<compile_context>
chip_gen: v7x
topology: tpu7x:2x2x1
jax: 0.10.0
libtpu: 0.0.40
codegen_flags: <defaults>
</compile_context>

<pallas_src>
import functools

import jax
import jax.numpy as jnp
from jax.experimental import pallas as pl
from jax.experimental.pallas import tpu as pltpu

ACT_DT = jnp.bfloat16          # activation / weight storage dtype fed to the MXU
LEAD = 8                       # canvas lead rows (>= max dilation)
TAIL = 8                       # canvas tail rows (>= max dilation)
DILATIONS = (2, 1, 2)          # conv stage dilations (pad = dilation, kernel 3x3)
VMEM_LIMIT = 48 * 1024 * 1024  # safe on v5e/v6e/v7x


# ----------------------------------------------------------------------------
# Kernel B: fused conv branch (3 stages) + trans->cnn fuse + residual + IN
# ----------------------------------------------------------------------------

def _conv_t2c_kernel(x_ref, tr_ref, wconv_ref, wc_ref, wt_ref, vec_ref,
                     o_ref, cb_ref, *, H, W, eps):
    """One image per grid step.

    x_ref  : (1, LEAD + Hp*Wp + TAIL, C)  f32 flattened replication-padded image
    tr_ref : (1, H*Wp, E)                 bf16 transformer slab on padded-width rows
    wconv  : (27, Cin, Cout)              bf16 per-tap weights, 9 taps per stage
    wc/wt  : (C, C) / (E, C)              bf16 fuse_trans2cnn split weights
    vec    : (4, C)                       f32  [conv0_b, conv1_b, conv2_b, t2c_b]
    o_ref  : (1, H*Wp, C)                 f32 output (valid columns X in [2, 2+W))
    cb_ref : (LEAD + Hp*Wp + TAIL, C)     f32 VMEM scratch canvas
    """
    Wp = W + 4
    Hp = H + 4
    R = H * Wp
    C = o_ref.shape[-1]

    # Validity mask over the padded-width row domain (computed once, reused by
    # all four InstanceNorms of this invocation).
    colX = jax.lax.broadcasted_iota(jnp.int32, (R, C), 0) % Wp
    valid = jnp.logical_and(colX >= 2, colX < 2 + W)
    cnt = float(H * W)

    def masked_instance_norm(y):
        y0 = jnp.where(valid, y, 0.0)
        mean = jnp.sum(y0, axis=0, keepdims=True) / cnt
        diff = jnp.where(valid, y - mean, 0.0)
        var = jnp.sum(diff * diff, axis=0, keepdims=True) / cnt
        return (y - mean) * jax.lax.rsqrt(var + eps)

    vp = vec_ref[...]                                        # (4, C) f32

    # Zero-init lead/tail so garbage-column taps never read uninitialized VMEM.
    cb_ref[0:LEAD, :] = jnp.zeros((LEAD, C), cb_ref.dtype)
    cb_ref[LEAD + Hp * Wp:LEAD + Hp * Wp + TAIL, :] = jnp.zeros((TAIL, C), cb_ref.dtype)

    def conv_stage(load, stage):
        d = DILATIONS[stage]
        acc = jnp.zeros((R, C), jnp.float32)
        for ky in range(3):
            for kx in range(3):
                off = LEAD + (2 + (ky - 1) * d) * Wp + (kx - 1) * d
                win = load(off).astype(jnp.bfloat16)          # (R, Cin)
                acc = acc + jnp.dot(win, wconv_ref[stage * 9 + ky * 3 + kx],
                                    preferred_element_type=jnp.float32)
        y = jnp.maximum(acc + vp[stage:stage + 1, :], 0.0)    # bias + ReLU
        return masked_instance_norm(y)

    def build_canvas(yn):
        """Write yn's valid data into the scratch canvas and rebuild the
        2-wide replication ring (valid for both dilation-1 and -2 stages)."""
        # Bulk copy: canvas rows [2, 2+H), all Wp columns (pad cols fixed below).
        cb_ref[LEAD + 2 * Wp:LEAD + 2 * Wp + R, :] = yn
        # Left / right replication columns for the interior rows.
        for yy in range(H):
            src = yy * Wp
            dst = LEAD + (yy + 2) * Wp
            vl = yn[src + 2:src + 3, :]                       # edge column x = 0
            vr = yn[src + W + 1:src + W + 2, :]               # edge column x = W-1
            cb_ref[dst:dst + 2, :] = jnp.concatenate([vl, vl], axis=0)
            cb_ref[dst + W + 2:dst + W + 4, :] = jnp.concatenate([vr, vr], axis=0)
        # Top / bottom replication rows (copies of the already-fixed edge rows).
        top = cb_ref[LEAD + 2 * Wp:LEAD + 3 * Wp, :]
        cb_ref[LEAD:LEAD + Wp, :] = top
        cb_ref[LEAD + Wp:LEAD + 2 * Wp, :] = top
        bot = cb_ref[LEAD + (H + 1) * Wp:LEAD + (H + 2) * Wp, :]
        cb_ref[LEAD + (H + 2) * Wp:LEAD + (H + 3) * Wp, :] = bot
        cb_ref[LEAD + (H + 3) * Wp:LEAD + (H + 4) * Wp, :] = bot

    load_x = lambda off: x_ref[0, off:off + R, :]
    load_cb = lambda off: cb_ref[off:off + R, :]

    y1 = conv_stage(load_x, 0)      # RepPad2 + Conv(dil=2) + ReLU + IN
    build_canvas(y1)
    y2 = conv_stage(load_cb, 1)     # RepPad1 + Conv(dil=1) + ReLU + IN
    build_canvas(y2)
    y3 = conv_stage(load_cb, 2)     # RepPad2 + Conv(dil=2) + ReLU + IN

    # fuse_trans2cnn (1x1 conv over channel concat, split matmul) + residual + IN
    resid = x_ref[0, LEAD + 2 * Wp:LEAD + 2 * Wp + R, :].astype(jnp.float32)
    tr = tr_ref[0]                                            # (R, E) bf16
    y = (jnp.dot(y3.astype(jnp.bfloat16), wc_ref[...], preferred_element_type=jnp.float32)
         + jnp.dot(tr, wt_ref[...], preferred_element_type=jnp.float32)
         + vp[3:4, :] + resid)
    o_ref[0] = masked_instance_norm(y).astype(o_ref.dtype)


def conv_t2c_fused_pallas(params, x_can, tr_slab, *, H, W, eps=1e-5):
    """x_can: (B, LEAD + (H+4)*(W+4) + TAIL, C) f32, tr_slab: (B, H*(W+4), E) bf16."""
    B, FLAT, C = x_can.shape
    E = tr_slab.shape[-1]
    Wp = W + 4
    R = H * Wp

    bf = lambda a: jnp.asarray(a, ACT_DT)

    taps = []
    for name in ("conv0_w", "conv1_w", "conv2_w"):
        wgt = params[name]                                    # (Cout, Cin, 3, 3)
        taps.append(jnp.transpose(wgt, (2, 3, 1, 0)).reshape(9, C, C))
    wconv = bf(jnp.concatenate(taps, axis=0))                 # (27, Cin, Cout)

    vec = jnp.stack([params["conv0_b"], params["conv1_b"], params["conv2_b"],
                     params["fuse_t2c_b"]], axis=0).astype(jnp.float32)  # (4, C)
    wc = bf(params["fuse_t2c_wc"])                            # (C, C)
    wt = bf(params["fuse_t2c_wt"])                            # (E, C)

    def wspec(a):
        nd = a.ndim
        return pl.BlockSpec(a.shape, lambda i, _nd=nd: (0,) * _nd)

    return pl.pallas_call(
        functools.partial(_conv_t2c_kernel, H=H, W=W, eps=eps),
        out_shape=jax.ShapeDtypeStruct((B, R, C), jnp.float32),
        grid=(B,),
        in_specs=[
            pl.BlockSpec((1, FLAT, C), lambda i: (i, 0, 0)),
            pl.BlockSpec((1, R, E), lambda i: (i, 0, 0)),
            wspec(wconv), wspec(wc), wspec(wt), wspec(vec),
        ],
        out_specs=pl.BlockSpec((1, R, C), lambda i: (i, 0, 0)),
        scratch_shapes=[pltpu.VMEM((LEAD + (H + 4) * Wp + TAIL, C), jnp.float32)],
        compiler_params=pltpu.CompilerParams(
            dimension_semantics=("parallel",),
            vmem_limit_bytes=VMEM_LIMIT),
    )(x_can.astype(jnp.float32), tr_slab.astype(ACT_DT), wconv, wc, wt, vec)


# ----------------------------------------------------------------------------
# Kernel A: fully fused transformer branch
#   fuse_cnn2trans -> LN1 -> (+pos) -> MHA -> +res -> LN2 -> FFN -> +res
# ----------------------------------------------------------------------------

def _transformer_kernel(*refs, nhead, temperature, eps, has_pos):
    if has_pos:
        (st_ref, sc_ref, pos_ref, fwt_ref, fwc_ref, wqk_ref, wv_ref,
         wo_ref, w1_ref, w2_ref, vec_ref, o_ref) = refs
    else:
        (st_ref, sc_ref, fwt_ref, fwc_ref, wqk_ref, wv_ref,
         wo_ref, w1_ref, w2_ref, vec_ref, o_ref) = refs
        pos_ref = None

    st = st_ref[0]                      # (L, E) bf16
    sc = sc_ref[0]                      # (L, C) bf16
    L, E = st.shape
    Dh = E // nhead
    F = w1_ref.shape[-1]

    vp = vec_ref[...]                   # (10, Vmax) f32 packed 1-D params
    fb = vp[0:1, :E]
    g1, b1 = vp[1:2, :E], vp[2:3, :E]
    bqk = vp[3:4, :2 * E]
    bv, bo = vp[4:5, :E], vp[5:6, :E]
    g2, b2 = vp[6:7, :E], vp[7:8, :E]
    fb1, fb2 = vp[8:9, :F], vp[9:10, :E]

    # fuse_cnn2trans: Linear(cat([src_trans, src_cnn2trans])) as a split matmul
    x = (jnp.dot(st, fwt_ref[...], preferred_element_type=jnp.float32)
         + jnp.dot(sc, fwc_ref[...], preferred_element_type=jnp.float32) + fb)

    # LayerNorm 1 (f32 statistics)
    mu = jnp.mean(x, axis=-1, keepdims=True)
    var = jnp.mean(jnp.square(x - mu), axis=-1, keepdims=True)
    xn = (x - mu) * jax.lax.rsqrt(var + eps) * g1 + b1
    qk_in = xn if pos_ref is None else xn + pos_ref[0].astype(jnp.float32)

    xn16 = xn.astype(jnp.bfloat16)
    qk_in16 = qk_in.astype(jnp.bfloat16)

    # Fused Q|K projection + V projection (single wide matmuls, bf16 MXU).
    qk = jnp.dot(qk_in16, wqk_ref[...], preferred_element_type=jnp.float32) + bqk
    v = jnp.dot(xn16, wv_ref[...], preferred_element_type=jnp.float32) + bv

    scale = 1.0 / (float(Dh) ** 0.5 * temperature)
    q = qk[:, :E] * scale
    k = qk[:, E:]

    heads = []
    for hd in range(nhead):
        s0, s1 = hd * Dh, (hd + 1) * Dh
        qh = q[:, s0:s1].astype(jnp.bfloat16)
        kh = k[:, s0:s1].astype(jnp.bfloat16)
        vh = v[:, s0:s1].astype(jnp.bfloat16)
        s = jax.lax.dot_general(qh, kh, (((1,), (1,)), ((), ())),
                                preferred_element_type=jnp.float32)   # (L, L)
        s = s - jnp.max(s, axis=-1, keepdims=True)
        p = jnp.exp(s)
        p = p / jnp.sum(p, axis=-1, keepdims=True)                    # exact softmax
        heads.append(jnp.dot(p.astype(jnp.bfloat16), vh,
                             preferred_element_type=jnp.float32))     # (L, Dh)
    attn = jnp.concatenate(heads, axis=-1)                            # (L, E)
    attn = jnp.dot(attn.astype(jnp.bfloat16), wo_ref[...],
                   preferred_element_type=jnp.float32) + bo

    # residual 1 (dropout1 = identity in eval)
    x = x + attn

    # LayerNorm 2 + FFN + residual 2 (dropout / dropout2 = identity)
    mu2 = jnp.mean(x, axis=-1, keepdims=True)
    var2 = jnp.mean(jnp.square(x - mu2), axis=-1, keepdims=True)
    xn2 = ((x - mu2) * jax.lax.rsqrt(var2 + eps) * g2 + b2).astype(jnp.bfloat16)
    h1 = jnp.maximum(jnp.dot(xn2, w1_ref[...], preferred_element_type=jnp.float32)
                     + fb1, 0.0)
    h2 = jnp.dot(h1.astype(jnp.bfloat16), w2_ref[...],
                 preferred_element_type=jnp.float32) + fb2
    o_ref[0] = (x + h2).astype(o_ref.dtype)


def transformer_fused_pallas(params, st_ble, sc_blc, pos_ble, *, nhead,
                             temperature, eps=1e-5):
    """st_ble: (b, L, E), sc_blc: (b, L, C), pos_ble: (b, L, E) or None -> (b, L, E)."""
    b, L, E = st_ble.shape
    C = sc_blc.shape[-1]
    F = params["lin1_w"].shape[-1]
    Vmax = max(2 * E, F)
    has_pos = pos_ble is not None

    bf = lambda a: jnp.asarray(a, ACT_DT)

    def vrow(v):
        v = jnp.asarray(v, jnp.float32).reshape(1, -1)
        return jnp.pad(v, ((0, 0), (0, Vmax - v.shape[1])))

    vec = jnp.concatenate([
        vrow(params["fuse_c2t_b"]),
        vrow(params["ln1_g"]), vrow(params["ln1_b"]),
        vrow(jnp.concatenate([params["bq"], params["bk"]])),
        vrow(params["bv"]), vrow(params["bo"]),
        vrow(params["ln2_g"]), vrow(params["ln2_b"]),
        vrow(params["lin1_b"]), vrow(params["lin2_b"]),
    ], axis=0)                                                        # (10, Vmax)

    wqk = jnp.concatenate([params["wq"], params["wk"]], axis=1)       # (E, 2E)
    weights = [bf(params["fuse_c2t_wt"]), bf(params["fuse_c2t_wc"]),
               bf(wqk), bf(params["wv"]), bf(params["wo"]),
               bf(params["lin1_w"]), bf(params["lin2_w"]), vec]

    def wspec(a):
        nd = a.ndim
        return pl.BlockSpec(a.shape, lambda i, _nd=nd: (0,) * _nd)

    spec_e = pl.BlockSpec((1, L, E), lambda i: (i, 0, 0))
    spec_c = pl.BlockSpec((1, L, C), lambda i: (i, 0, 0))

    acts = [st_ble.astype(ACT_DT), sc_blc.astype(ACT_DT)]
    act_specs = [spec_e, spec_c]
    if has_pos:
        acts.append(pos_ble.astype(ACT_DT))
        act_specs.append(spec_e)

    return pl.pallas_call(
        functools.partial(_transformer_kernel, nhead=nhead,
                          temperature=float(temperature), eps=eps,
                          has_pos=has_pos),
        out_shape=jax.ShapeDtypeStruct((b, L, E), jnp.float32),
        grid=(b,),
        in_specs=act_specs + [wspec(a) for a in weights],
        out_specs=spec_e,
        compiler_params=pltpu.CompilerParams(
            dimension_semantics=("parallel",),
            vmem_limit_bytes=VMEM_LIMIT),
    )(*acts, *weights)


# ----------------------------------------------------------------------------
# vc_layer forward
# ----------------------------------------------------------------------------

def vc_layer_forward(params, src_cnn, src_trans, shape, nhead,
                     pos=None, temperature=1.0):
    b, n, h, w = shape                                  # static Python ints
    Bn, C, hh, ww = src_cnn.shape
    L, b2, E = src_trans.shape
    assert (Bn, hh, ww) == (b * n, h, w) and (L, b2) == (n * h * w, b)

    # channels-last internally (lane-contiguous channels; free reshapes)
    x_nhwc = jnp.transpose(src_cnn, (0, 2, 3, 1)).astype(jnp.float32)  # (Bn, h, w, C)

    # ---- transformer branch: one fused kernel ----
    sc_blc = x_nhwc.reshape(b, L, C)
    st_ble = jnp.transpose(src_trans, (1, 0, 2))
    pos_ble = None if pos is None else jnp.transpose(pos, (1, 0, 2))
    out_trans_ble = transformer_fused_pallas(params, st_ble, sc_blc, pos_ble,
                                             nhead=nhead, temperature=temperature)

    # ---- conv branch (3 fused stages) + t2c fuse + residual + IN: one kernel ----
    Wp = w + 4
    x_pad = jnp.pad(x_nhwc, ((0, 0), (2, 2), (2, 2), (0, 0)), mode="edge")
    x_can = x_pad.reshape(Bn, (h + 4) * Wp, C)
    x_can = jnp.pad(x_can, ((0, 0), (LEAD, TAIL), (0, 0)))             # zero lead/tail

    tr_slab = jnp.pad(out_trans_ble.reshape(Bn, h, w, E),
                      ((0, 0), (0, 0), (2, 2), (0, 0)))
    tr_slab = tr_slab.reshape(Bn, h * Wp, E)

    out_flat = conv_t2c_fused_pallas(params, x_can, tr_slab, H=h, W=w)

    out_cnn = out_flat.reshape(Bn, h, Wp, C)[:, :, 2:2 + w, :]
    src_cnn_out = jnp.transpose(out_cnn, (0, 3, 1, 2))
    src_trans_out = jnp.transpose(out_trans_ble, (1, 0, 2))
    return src_cnn_out, src_trans_out


# ----------------------------------------------------------------------------
# Deterministic parameter construction
# ----------------------------------------------------------------------------

def make_params(key, d_model_cnn, d_model_trans, nhead, dim_feedforward):
    C, E, F = d_model_cnn, d_model_trans, dim_feedforward
    keys = jax.random.split(key, 13)
    s = 0.05

    def nrm(k, shape):
        return (s * jax.random.normal(k, shape)).astype(jnp.float32)

    zeros = lambda shape: jnp.zeros(shape, jnp.float32)
    ones = lambda shape: jnp.ones(shape, jnp.float32)

    return {
        # conv block: 3 convs (Cout, Cin, 3, 3) in PyTorch layout
        "conv0_w": nrm(keys[0], (C, C, 3, 3)), "conv0_b": zeros((C,)),
        "conv1_w": nrm(keys[1], (C, C, 3, 3)), "conv1_b": zeros((C,)),
        "conv2_w": nrm(keys[2], (C, C, 3, 3)), "conv2_b": zeros((C,)),
        # fuse_cnn2trans: Linear(E+C -> E), stored pre-split as (in, out)
        "fuse_c2t_wt": nrm(keys[3], (E, E)),
        "fuse_c2t_wc": nrm(keys[4], (C, E)),
        "fuse_c2t_b": zeros((E,)),
        # layernorms
        "ln1_g": ones((E,)), "ln1_b": zeros((E,)),
        "ln2_g": ones((E,)), "ln2_b": zeros((E,)),
        # MHA projections, stored as (in, out)
        "wq": nrm(keys[5], (E, E)), "bq": zeros((E,)),
        "wk": nrm(keys[6], (E, E)), "bk": zeros((E,)),
        "wv": nrm(keys[7], (E, E)), "bv": zeros((E,)),
        "wo": nrm(keys[8], (E, E)), "bo": zeros((E,)),
        # FFN
        "lin1_w": nrm(keys[9], (E, F)), "lin1_b": zeros((F,)),
        "lin2_w": nrm(keys[10], (F, E)), "lin2_b": zeros((E,)),
        # fuse_trans2cnn: 1x1 Conv(C+E -> C), stored pre-split as (in, out)
        "fuse_t2c_wc": nrm(keys[11], (C, C)),
        "fuse_t2c_wt": nrm(keys[12], (E, C)),
        "fuse_t2c_b": zeros((C,)),
    }


# ----------------------------------------------------------------------------
# main
# ----------------------------------------------------------------------------

if __name__ == "__main__":
    d_model_cnn = 16
    d_model_trans = 32
    nhead = 4
    dim_feedforward = 64
    b, n, h, w = 2, 2, 8, 8

    key = jax.random.PRNGKey(0)
    k_params, k_cnn, k_trans = jax.random.split(key, 3)

    params = make_params(k_params, d_model_cnn, d_model_trans, nhead, dim_feedforward)

    # src_cnn: (b*n, C, h, w) NCHW, src_trans: (n*h*w, b, E) (seq, batch, embed)
    src_cnn = jax.random.normal(k_cnn, (b * n, d_model_cnn, h, w), jnp.float32)
    src_trans = jax.random.normal(k_trans, (n * h * w, b, d_model_trans), jnp.float32)

    fwd = jax.jit(vc_layer_forward,
                  static_argnames=("shape", "nhead", "temperature"))
    out_cnn, out_trans = fwd(params, src_cnn, src_trans,
                             shape=(b, n, h, w), nhead=nhead, temperature=1.0)
    jax.block_until_ready((out_cnn, out_trans))

    assert out_cnn.shape == (b * n, d_model_cnn, h, w)
    assert out_trans.shape == (n * h * w, b, d_model_trans)
    assert bool(jnp.all(jnp.isfinite(out_cnn))) and bool(jnp.all(jnp.isfinite(out_trans)))
    print("KERNEL_OK")
</pallas_src>

<mosaic_0001>
module attributes {stable_mosaic.version = 11 : i64} {
  func.func @_transformer_kernel(%arg0: i32, %arg1: memref<1x128x32xbf16, #tpu.memory_space<vmem>>, %arg2: memref<1x128x16xbf16, #tpu.memory_space<vmem>>, %arg3: memref<32x32xbf16, #tpu.memory_space<vmem>>, %arg4: memref<16x32xbf16, #tpu.memory_space<vmem>>, %arg5: memref<32x64xbf16, #tpu.memory_space<vmem>>, %arg6: memref<32x32xbf16, #tpu.memory_space<vmem>>, %arg7: memref<32x32xbf16, #tpu.memory_space<vmem>>, %arg8: memref<32x64xbf16, #tpu.memory_space<vmem>>, %arg9: memref<64x32xbf16, #tpu.memory_space<vmem>>, %arg10: memref<10x64xf32, #tpu.memory_space<vmem>>, %arg11: memref<1x128x32xf32, #tpu.memory_space<vmem>>) attributes {dimension_semantics = [#tpu.dimension_semantics<parallel>], iteration_bounds = array<i64: 2>, scalar_prefetch = 0 : i64, scratch_operands = 0 : i64, tpu.core_type = #tpu.core_type<tc>, window_params = [{transform_indices = @transform_0, window_bounds = array<i64: 1, 128, 32>}, {transform_indices = @transform_1, window_bounds = array<i64: 1, 128, 16>}, {pipeline_mode = #tpu.pipeline_mode<synchronous>, transform_indices = @transform_2, window_bounds = array<i64: 32, 32>}, {pipeline_mode = #tpu.pipeline_mode<synchronous>, transform_indices = @transform_3, window_bounds = array<i64: 16, 32>}, {pipeline_mode = #tpu.pipeline_mode<synchronous>, transform_indices = @transform_4, window_bounds = array<i64: 32, 64>}, {pipeline_mode = #tpu.pipeline_mode<synchronous>, transform_indices = @transform_5, window_bounds = array<i64: 32, 32>}, {pipeline_mode = #tpu.pipeline_mode<synchronous>, transform_indices = @transform_6, window_bounds = array<i64: 32, 32>}, {pipeline_mode = #tpu.pipeline_mode<synchronous>, transform_indices = @transform_7, window_bounds = array<i64: 32, 64>}, {pipeline_mode = #tpu.pipeline_mode<synchronous>, transform_indices = @transform_8, window_bounds = array<i64: 64, 32>}, {pipeline_mode = #tpu.pipeline_mode<synchronous>, transform_indices = @transform_9, window_bounds = array<i64: 10, 64>}, {transform_indices = @transform_10, window_bounds = array<i64: 1, 128, 32>}]} {
    %c0 = arith.constant 0 : index
    %c0_0 = arith.constant 0 : index
    %c0_1 = arith.constant 0 : index
    %0 = vector.load %arg1[%c0, %c0_0, %c0_1] : memref<1x128x32xbf16, #tpu.memory_space<vmem>>, vector<1x128x32xbf16>
    %1 = vector.shape_cast %0 : vector<1x128x32xbf16> to vector<128x32xbf16>
    %c0_2 = arith.constant 0 : index
    %c0_3 = arith.constant 0 : index
    %c0_4 = arith.constant 0 : index
    %2 = vector.load %arg2[%c0_2, %c0_3, %c0_4] : memref<1x128x16xbf16, #tpu.memory_space<vmem>>, vector<1x128x16xbf16>
    %3 = vector.shape_cast %2 : vector<1x128x16xbf16> to vector<128x16xbf16>
    %c0_5 = arith.constant 0 : index
    %c0_6 = arith.constant 0 : index
    %4 = vector.load %arg10[%c0_5, %c0_6] : memref<10x64xf32, #tpu.memory_space<vmem>>, vector<10x64xf32>
    %5 = vector.extract_strided_slice %4 {offsets = [0, 0], sizes = [1, 32], strides = [1, 1]} : vector<10x64xf32> to vector<1x32xf32>
    %6 = vector.extract_strided_slice %4 {offsets = [1, 0], sizes = [1, 32], strides = [1, 1]} : vector<10x64xf32> to vector<1x32xf32>
    %7 = vector.extract_strided_slice %4 {offsets = [2, 0], sizes = [1, 32], strides = [1, 1]} : vector<10x64xf32> to vector<1x32xf32>
    %8 = vector.extract_strided_slice %4 {offsets = [3, 0], sizes = [1, 64], strides = [1, 1]} : vector<10x64xf32> to vector<1x64xf32>
    %9 = vector.extract_strided_slice %4 {offsets = [4, 0], sizes = [1, 32], strides = [1, 1]} : vector<10x64xf32> to vector<1x32xf32>
    %10 = vector.extract_strided_slice %4 {offsets = [5, 0], sizes = [1, 32], strides = [1, 1]} : vector<10x64xf32> to vector<1x32xf32>
    %11 = vector.extract_strided_slice %4 {offsets = [6, 0], sizes = [1, 32], strides = [1, 1]} : vector<10x64xf32> to vector<1x32xf32>
    %12 = vector.extract_strided_slice %4 {offsets = [7, 0], sizes = [1, 32], strides = [1, 1]} : vector<10x64xf32> to vector<1x32xf32>
    %13 = vector.extract_strided_slice %4 {offsets = [8, 0], sizes = [1, 64], strides = [1, 1]} : vector<10x64xf32> to vector<1x64xf32>
    %14 = vector.extract_strided_slice %4 {offsets = [9, 0], sizes = [1, 32], strides = [1, 1]} : vector<10x64xf32> to vector<1x32xf32>
    %c0_7 = arith.constant 0 : index
    %c0_8 = arith.constant 0 : index
    %15 = vector.load %arg3[%c0_7, %c0_8] : memref<32x32xbf16, #tpu.memory_space<vmem>>, vector<32x32xbf16>
    %cst = arith.constant dense<0.000000e+00> : vector<128x32xf32>
    %16 = tpu.matmul %1, %15, %cst {dimension_numbers = #tpu.dot_dimension_numbers<[1], [0], [0], [1], [0, 0, 1, 1], [], []>} : vector<128x32xbf16>, vector<32x32xbf16>, vector<128x32xf32> -> vector<128x32xf32>
    %c0_9 = arith.constant 0 : index
    %c0_10 = arith.constant 0 : index
    %17 = vector.load %arg4[%c0_9, %c0_10] : memref<16x32xbf16, #tpu.memory_space<vmem>>, vector<16x32xbf16>
    %cst_11 = arith.constant dense<0.000000e+00> : vector<128x32xf32>
    %18 = tpu.matmul %3, %17, %cst_11 {dimension_numbers = #tpu.dot_dimension_numbers<[1], [0], [0], [1], [0, 0, 1, 1], [], []>} : vector<128x16xbf16>, vector<16x32xbf16>, vector<128x32xf32> -> vector<128x32xf32>
    %19 = arith.addf %16, %18 : vector<128x32xf32>
    %20 = vector.broadcast %5 : vector<1x32xf32> to vector<128x32xf32>
    %21 = arith.addf %19, %20 : vector<128x32xf32>
    %cst_12 = arith.constant dense<0.000000e+00> : vector<128xf32>
    %22 = vector.multi_reduction <add>, %21, %cst_12 [1] : vector<128x32xf32> to vector<128xf32>
    %23 = vector.shape_cast %22 : vector<128xf32> to vector<128x1xf32>
    %cst_13 = arith.constant 3.200000e+01 : f32
    %24 = vector.broadcast %cst_13 : f32 to vector<128x1xf32>
    %25 = arith.divf %23, %24 : vector<128x1xf32>
    %26 = vector.broadcast %25 : vector<128x1xf32> to vector<128x32xf32>
    %27 = arith.subf %21, %26 : vector<128x32xf32>
    %28 = arith.mulf %27, %27 : vector<128x32xf32>
    %cst_14 = arith.constant dense<0.000000e+00> : vector<128xf32>
    %29 = vector.multi_reduction <add>, %28, %cst_14 [1] : vector<128x32xf32> to vector<128xf32>
    %30 = vector.shape_cast %29 : vector<128xf32> to vector<128x1xf32>
    %cst_15 = arith.constant 3.200000e+01 : f32
    %31 = vector.broadcast %cst_15 : f32 to vector<128x1xf32>
    %32 = arith.divf %30, %31 : vector<128x1xf32>
    %33 = vector.broadcast %25 : vector<128x1xf32> to vector<128x32xf32>
    %34 = arith.subf %21, %33 : vector<128x32xf32>
    %cst_16 = arith.constant 9.99999974E-6 : f32
    %35 = vector.broadcast %cst_16 : f32 to vector<128x1xf32>
    %36 = arith.addf %32, %35 : vector<128x1xf32>
    %37 = math.rsqrt %36 : vector<128x1xf32>
    %38 = vector.broadcast %37 : vector<128x1xf32> to vector<128x32xf32>
    %39 = arith.mulf %34, %38 : vector<128x32xf32>
    %40 = vector.broadcast %6 : vector<1x32xf32> to vector<128x32xf32>
    %41 = arith.mulf %39, %40 : vector<128x32xf32>
    %42 = vector.broadcast %7 : vector<1x32xf32> to vector<128x32xf32>
    %43 = arith.addf %41, %42 : vector<128x32xf32>
    %44 = arith.truncf %43 : vector<128x32xf32> to vector<128x32xbf16>
    %45 = arith.truncf %43 : vector<128x32xf32> to vector<128x32xbf16>
    %c0_17 = arith.constant 0 : index
    %c0_18 = arith.constant 0 : index
    %46 = vector.load %arg5[%c0_17, %c0_18] : memref<32x64xbf16, #tpu.memory_space<vmem>>, vector<32x64xbf16>
    %cst_19 = arith.constant dense<0.000000e+00> : vector<128x64xf32>
    %47 = tpu.matmul %45, %46, %cst_19 {dimension_numbers = #tpu.dot_dimension_numbers<[1], [0], [0], [1], [0, 0, 1, 1], [], []>} : vector<128x32xbf16>, vector<32x64xbf16>, vector<128x64xf32> -> vector<128x64xf32>
    %48 = vector.broadcast %8 : vector<1x64xf32> to vector<128x64xf32>
    %49 = arith.addf %47, %48 : vector<128x64xf32>
    %c0_20 = arith.constant 0 : index
    %c0_21 = arith.constant 0 : index
    %50 = vector.load %arg6[%c0_20, %c0_21] : memref<32x32xbf16, #tpu.memory_space<vmem>>, vector<32x32xbf16>
    %cst_22 = arith.constant dense<0.000000e+00> : vector<128x32xf32>
    %51 = tpu.matmul %44, %50, %cst_22 {dimension_numbers = #tpu.dot_dimension_numbers<[1], [0], [0], [1], [0, 0, 1, 1], [], []>} : vector<128x32xbf16>, vector<32x32xbf16>, vector<128x32xf32> -> vector<128x32xf32>
    %52 = vector.broadcast %9 : vector<1x32xf32> to vector<128x32xf32>
    %53 = arith.addf %51, %52 : vector<128x32xf32>
    %54 = vector.extract_strided_slice %49 {offsets = [0, 0], sizes = [128, 32], strides = [1, 1]} : vector<128x64xf32> to vector<128x32xf32>
    %cst_23 = arith.constant 0.353553385 : f32
    %55 = vector.broadcast %cst_23 : f32 to vector<128x32xf32>
    %56 = arith.mulf %54, %55 : vector<128x32xf32>
    %57 = vector.extract_strided_slice %49 {offsets = [0, 32], sizes = [128, 32], strides = [1, 1]} : vector<128x64xf32> to vector<128x32xf32>
    %58 = vector.extract_strided_slice %56 {offsets = [0, 0], sizes = [128, 8], strides = [1, 1]} : vector<128x32xf32> to vector<128x8xf32>
    %59 = arith.truncf %58 : vector<128x8xf32> to vector<128x8xbf16>
    %60 = vector.extract_strided_slice %57 {offsets = [0, 0], sizes = [128, 8], strides = [1, 1]} : vector<128x32xf32> to vector<128x8xf32>
    %61 = arith.truncf %60 : vector<128x8xf32> to vector<128x8xbf16>
    %62 = vector.extract_strided_slice %53 {offsets = [0, 0], sizes = [128, 8], strides = [1, 1]} : vector<128x32xf32> to vector<128x8xf32>
    %63 = arith.truncf %62 : vector<128x8xf32> to vector<128x8xbf16>
    %cst_24 = arith.constant dense<0.000000e+00> : vector<128x128xf32>
    %64 = tpu.matmul %59, %61, %cst_24 {dimension_numbers = #tpu.dot_dimension_numbers<[1], [1], [0], [0], [0, 0, 1, 0], [], []>} : vector<128x8xbf16>, vector<128x8xbf16>, vector<128x128xf32> -> vector<128x128xf32>
    %cst_25 = arith.constant dense<0xFF800000> : vector<128xf32>
    %65 = vector.multi_reduction <maximumf>, %64, %cst_25 [1] : vector<128x128xf32> to vector<128xf32>
    %66 = vector.shape_cast %65 : vector<128xf32> to vector<128x1xf32>
    %67 = vector.broadcast %66 : vector<128x1xf32> to vector<128x128xf32>
    %68 = arith.subf %64, %67 : vector<128x128xf32>
    %69 = math.exp %68 : vector<128x128xf32>
    %cst_26 = arith.constant dense<0.000000e+00> : vector<128xf32>
    %70 = vector.multi_reduction <add>, %69, %cst_26 [1] : vector<128x128xf32> to vector<128xf32>
    %71 = vector.shape_cast %70 : vector<128xf32> to vector<128x1xf32>
    %72 = vector.broadcast %71 : vector<128x1xf32> to vector<128x128xf32>
    %73 = arith.divf %69, %72 : vector<128x128xf32>
    %74 = arith.truncf %73 : vector<128x128xf32> to vector<128x128xbf16>
    %cst_27 = arith.constant dense<0.000000e+00> : vector<128x8xf32>
    %75 = tpu.matmul %74, %63, %cst_27 {dimension_numbers = #tpu.dot_dimension_numbers<[1], [0], [0], [1], [0, 0, 1, 1], [], []>} : vector<128x128xbf16>, vector<128x8xbf16>, vector<128x8xf32> -> vector<128x8xf32>
    %76 = vector.extract_strided_slice %56 {offsets = [0, 8], sizes = [128, 8], strides = [1, 1]} : vector<128x32xf32> to vector<128x8xf32>
    %77 = arith.truncf %76 : vector<128x8xf32> to vector<128x8xbf16>
    %78 = vector.extract_strided_slice %57 {offsets = [0, 8], sizes = [128, 8], strides = [1, 1]} : vector<128x32xf32> to vector<128x8xf32>
    %79 = arith.truncf %78 : vector<128x8xf32> to vector<128x8xbf16>
    %80 = vector.extract_strided_slice %53 {offsets = [0, 8], sizes = [128, 8], strides = [1, 1]} : vector<128x32xf32> to vector<128x8xf32>
    %81 = arith.truncf %80 : vector<128x8xf32> to vector<128x8xbf16>
    %cst_28 = arith.constant dense<0.000000e+00> : vector<128x128xf32>
    %82 = tpu.matmul %77, %79, %cst_28 {dimension_numbers = #tpu.dot_dimension_numbers<[1], [1], [0], [0], [0, 0, 1, 0], [], []>} : vector<128x8xbf16>, vector<128x8xbf16>, vector<128x128xf32> -> vector<128x128xf32>
    %cst_29 = arith.constant dense<0xFF800000> : vector<128xf32>
    %83 = vector.multi_reduction <maximumf>, %82, %cst_29 [1] : vector<128x128xf32> to vector<128xf32>
    %84 = vector.shape_cast %83 : vector<128xf32> to vector<128x1xf32>
    %85 = vector.broadcast %84 : vector<128x1xf32> to vector<128x128xf32>
    %86 = arith.subf %82, %85 : vector<128x128xf32>
    %87 = math.exp %86 : vector<128x128xf32>
    %cst_30 = arith.constant dense<0.000000e+00> : vector<128xf32>
    %88 = vector.multi_reduction <add>, %87, %cst_30 [1] : vector<128x128xf32> to vector<128xf32>
    %89 = vector.shape_cast %88 : vector<128xf32> to vector<128x1xf32>
    %90 = vector.broadcast %89 : vector<128x1xf32> to vector<128x128xf32>
    %91 = arith.divf %87, %90 : vector<128x128xf32>
    %92 = arith.truncf %91 : vector<128x128xf32> to vector<128x128xbf16>
    %cst_31 = arith.constant dense<0.000000e+00> : vector<128x8xf32>
    %93 = tpu.matmul %92, %81, %cst_31 {dimension_numbers = #tpu.dot_dimension_numbers<[1], [0], [0], [1], [0, 0, 1, 1], [], []>} : vector<128x128xbf16>, vector<128x8xbf16>, vector<128x8xf32> -> vector<128x8xf32>
    %94 = vector.extract_strided_slice %56 {offsets = [0, 16], sizes = [128, 8], strides = [1, 1]} : vector<128x32xf32> to vector<128x8xf32>
    %95 = arith.truncf %94 : vector<128x8xf32> to vector<128x8xbf16>
    %96 = vector.extract_strided_slice %57 {offsets = [0, 16], sizes = [128, 8], strides = [1, 1]} : vector<128x32xf32> to vector<128x8xf32>
    %97 = arith.truncf %96 : vector<128x8xf32> to vector<128x8xbf16>
    %98 = vector.extract_strided_slice %53 {offsets = [0, 16], sizes = [128, 8], strides = [1, 1]} : vector<128x32xf32> to vector<128x8xf32>
    %99 = arith.truncf %98 : vector<128x8xf32> to vector<128x8xbf16>
    %cst_32 = arith.constant dense<0.000000e+00> : vector<128x128xf32>
    %100 = tpu.matmul %95, %97, %cst_32 {dimension_numbers = #tpu.dot_dimension_numbers<[1], [1], [0], [0], [0, 0, 1, 0], [], []>} : vector<128x8xbf16>, vector<128x8xbf16>, vector<128x128xf32> -> vector<128x128xf32>
    %cst_33 = arith.constant dense<0xFF800000> : vector<128xf32>
    %101 = vector.multi_reduction <maximumf>, %100, %cst_33 [1] : vector<128x128xf32> to vector<128xf32>
    %102 = vector.shape_cast %101 : vector<128xf32> to vector<128x1xf32>
    %103 = vector.broadcast %102 : vector<128x1xf32> to vector<128x128xf32>
    %104 = arith.subf %100, %103 : vector<128x128xf32>
    %105 = math.exp %104 : vector<128x128xf32>
    %cst_34 = arith.constant dense<0.000000e+00> : vector<128xf32>
    %106 = vector.multi_reduction <add>, %105, %cst_34 [1] : vector<128x128xf32> to vector<128xf32>
    %107 = vector.shape_cast %106 : vector<128xf32> to vector<128x1xf32>
    %108 = vector.broadcast %107 : vector<128x1xf32> to vector<128x128xf32>
    %109 = arith.divf %105, %108 : vector<128x128xf32>
    %110 = arith.truncf %109 : vector<128x128xf32> to vector<128x128xbf16>
    %cst_35 = arith.constant dense<0.000000e+00> : vector<128x8xf32>
    %111 = tpu.matmul %110, %99, %cst_35 {dimension_numbers = #tpu.dot_dimension_numbers<[1], [0], [0], [1], [0, 0, 1, 1], [], []>} : vector<128x128xbf16>, vector<128x8xbf16>, vector<128x8xf32> -> vector<128x8xf32>
    %112 = vector.extract_strided_slice %56 {offsets = [0, 24], sizes = [128, 8], strides = [1, 1]} : vector<128x32xf32> to vector<128x8xf32>
    %113 = arith.truncf %112 : vector<128x8xf32> to vector<128x8xbf16>
    %114 = vector.extract_strided_slice %57 {offsets = [0, 24], sizes = [128, 8], strides = [1, 1]} : vector<128x32xf32> to vector<128x8xf32>
    %115 = arith.truncf %114 : vector<128x8xf32> to vector<128x8xbf16>
    %116 = vector.extract_strided_slice %53 {offsets = [0, 24], sizes = [128, 8], strides = [1, 1]} : vector<128x32xf32> to vector<128x8xf32>
    %117 = arith.truncf %116 : vector<128x8xf32> to vector<128x8xbf16>
    %cst_36 = arith.constant dense<0.000000e+00> : vector<128x128xf32>
    %118 = tpu.matmul %113, %115, %cst_36 {dimension_numbers = #tpu.dot_dimension_numbers<[1], [1], [0], [0], [0, 0, 1, 0], [], []>} : vector<128x8xbf16>, vector<128x8xbf16>, vector<128x128xf32> -> vector<128x128xf32>
    %cst_37 = arith.constant dense<0xFF800000> : vector<128xf32>
    %119 = vector.multi_reduction <maximumf>, %118, %cst_37 [1] : vector<128x128xf32> to vector<128xf32>
    %120 = vector.shape_cast %119 : vector<128xf32> to vector<128x1xf32>
    %121 = vector.broadcast %120 : vector<128x1xf32> to vector<128x128xf32>
    %122 = arith.subf %118, %121 : vector<128x128xf32>
    %123 = math.exp %122 : vector<128x128xf32>
    %cst_38 = arith.constant dense<0.000000e+00> : vector<128xf32>
    %124 = vector.multi_reduction <add>, %123, %cst_38 [1] : vector<128x128xf32> to vector<128xf32>
    %125 = vector.shape_cast %124 : vector<128xf32> to vector<128x1xf32>
    %126 = vector.broadcast %125 : vector<128x1xf32> to vector<128x128xf32>
    %127 = arith.divf %123, %126 : vector<128x128xf32>
    %128 = arith.truncf %127 : vector<128x128xf32> to vector<128x128xbf16>
    %cst_39 = arith.constant dense<0.000000e+00> : vector<128x8xf32>
    %129 = tpu.matmul %128, %117, %cst_39 {dimension_numbers = #tpu.dot_dimension_numbers<[1], [0], [0], [1], [0, 0, 1, 1], [], []>} : vector<128x128xbf16>, vector<128x8xbf16>, vector<128x8xf32> -> vector<128x8xf32>
    %130 = tpu.concatenate %75, %93, %111, %129 in 1 : vector<128x8xf32>, vector<128x8xf32>, vector<128x8xf32>, vector<128x8xf32> -> vector<128x32xf32>
    %131 = arith.truncf %130 : vector<128x32xf32> to vector<128x32xbf16>
    %c0_40 = arith.constant 0 : index
    %c0_41 = arith.constant 0 : index
    %132 = vector.load %arg7[%c0_40, %c0_41] : memref<32x32xbf16, #tpu.memory_space<vmem>>, vector<32x32xbf16>
    %cst_42 = arith.constant dense<0.000000e+00> : vector<128x32xf32>
    %133 = tpu.matmul %131, %132, %cst_42 {dimension_numbers = #tpu.dot_dimension_numbers<[1], [0], [0], [1], [0, 0, 1, 1], [], []>} : vector<128x32xbf16>, vector<32x32xbf16>, vector<128x32xf32> -> vector<128x32xf32>
    %134 = vector.broadcast %10 : vector<1x32xf32> to vector<128x32xf32>
    %135 = arith.addf %133, %134 : vector<128x32xf32>
    %136 = arith.addf %21, %135 : vector<128x32xf32>
    %cst_43 = arith.constant dense<0.000000e+00> : vector<128xf32>
    %137 = vector.multi_reduction <add>, %136, %cst_43 [1] : vector<128x32xf32> to vector<128xf32>
    %138 = vector.shape_cast %137 : vector<128xf32> to vector<128x1xf32>
    %cst_44 = arith.constant 3.200000e+01 : f32
    %139 = vector.broadcast %cst_44 : f32 to vector<128x1xf32>
    %140 = arith.divf %138, %139 : vector<128x1xf32>
    %141 = vector.broadcast %140 : vector<128x1xf32> to vector<128x32xf32>
    %142 = arith.subf %136, %141 : vector<128x32xf32>
    %143 = arith.mulf %142, %142 : vector<128x32xf32>
    %cst_45 = arith.constant dense<0.000000e+00> : vector<128xf32>
    %144 = vector.multi_reduction <add>, %143, %cst_45 [1] : vector<128x32xf32> to vector<128xf32>
    %145 = vector.shape_cast %144 : vector<128xf32> to vector<128x1xf32>
    %cst_46 = arith.constant 3.200000e+01 : f32
    %146 = vector.broadcast %cst_46 : f32 to vector<128x1xf32>
    %147 = arith.divf %145, %146 : vector<128x1xf32>
    %148 = vector.broadcast %140 : vector<128x1xf32> to vector<128x32xf32>
    %149 = arith.subf %136, %148 : vector<128x32xf32>
    %cst_47 = arith.constant 9.99999974E-6 : f32
    %150 = vector.broadcast %cst_47 : f32 to vector<128x1xf32>
    %151 = arith.addf %147, %150 : vector<128x1xf32>
    %152 = math.rsqrt %151 : vector<128x1xf32>
    %153 = vector.broadcast %152 : vector<128x1xf32> to vector<128x32xf32>
    %154 = arith.mulf %149, %153 : vector<128x32xf32>
    %155 = vector.broadcast %11 : vector<1x32xf32> to vector<128x32xf32>
    %156 = arith.mulf %154, %155 : vector<128x32xf32>
    %157 = vector.broadcast %12 : vector<1x32xf32> to vector<128x32xf32>
    %158 = arith.addf %156, %157 : vector<128x32xf32>
    %159 = arith.truncf %158 : vector<128x32xf32> to vector<128x32xbf16>
    %c0_48 = arith.constant 0 : index
    %c0_49 = arith.constant 0 : index
    %160 = vector.load %arg8[%c0_48, %c0_49] : memref<32x64xbf16, #tpu.memory_space<vmem>>, vector<32x64xbf16>
    %cst_50 = arith.constant dense<0.000000e+00> : vector<128x64xf32>
    %161 = tpu.matmul %159, %160, %cst_50 {dimension_numbers = #tpu.dot_dimension_numbers<[1], [0], [0], [1], [0, 0, 1, 1], [], []>} : vector<128x32xbf16>, vector<32x64xbf16>, vector<128x64xf32> -> vector<128x64xf32>
    %162 = vector.broadcast %13 : vector<1x64xf32> to vector<128x64xf32>
    %163 = arith.addf %161, %162 : vector<128x64xf32>
    %cst_51 = arith.constant 0.000000e+00 : f32
    %164 = vector.broadcast %cst_51 : f32 to vector<128x64xf32>
    %165 = arith.maximumf %163, %164 : vector<128x64xf32>
    %166 = arith.truncf %165 : vector<128x64xf32> to vector<128x64xbf16>
    %c0_52 = arith.constant 0 : index
    %c0_53 = arith.constant 0 : index
    %167 = vector.load %arg9[%c0_52, %c0_53] : memref<64x32xbf16, #tpu.memory_space<vmem>>, vector<64x32xbf16>
    %cst_54 = arith.constant dense<0.000000e+00> : vector<128x32xf32>
    %168 = tpu.matmul %166, %167, %cst_54 {dimension_numbers = #tpu.dot_dimension_numbers<[1], [0], [0], [1], [0, 0, 1, 1], [], []>} : vector<128x64xbf16>, vector<64x32xbf16>, vector<128x32xf32> -> vector<128x32xf32>
    %169 = vector.broadcast %14 : vector<1x32xf32> to vector<128x32xf32>
    %170 = arith.addf %168, %169 : vector<128x32xf32>
    %171 = arith.addf %136, %170 : vector<128x32xf32>
    %c0_55 = arith.constant 0 : index
    %c0_56 = arith.constant 0 : index
    %c0_57 = arith.constant 0 : index
    %172 = vector.load %arg11[%c0_55, %c0_56, %c0_57] : memref<1x128x32xf32, #tpu.memory_space<vmem>>, vector<1x128x32xf32>
    %173 = vector.shape_cast %172 : vector<1x128x32xf32> to vector<128x32xf32>
    %174 = vector.shape_cast %171 : vector<128x32xf32> to vector<1x128x32xf32>
    tpu.vector_store %arg11[%c0_55, %c0_56, %c0_57], %174 {strides = array<i32>} : memref<1x128x32xf32, #tpu.memory_space<vmem>>, vector<1x128x32xf32>,
    return
  }
  func.func @transform_0(%arg0: i32) -> (i32, i32, i32) {
    %c0_i32 = arith.constant 0 : i32
    %c0_i32_0 = arith.constant 0 : i32
    %c0_i32_1 = arith.constant 0 : i32
    return %arg0, %c0_i32, %c0_i32_0 : i32, i32, i32
  }
  func.func @transform_1(%arg0: i32) -> (i32, i32, i32) {
    %c0_i32 = arith.constant 0 : i32
    %c0_i32_0 = arith.constant 0 : i32
    %c0_i32_1 = arith.constant 0 : i32
    return %arg0, %c0_i32, %c0_i32_0 : i32, i32, i32
  }
  func.func @transform_2(%arg0: i32) -> (i32, i32) {
    %c0_i32 = arith.constant 0 : i32
    %c0_i32_0 = arith.constant 0 : i32
    %c0_i32_1 = arith.constant 0 : i32
    return %c0_i32, %c0_i32_0 : i32, i32
  }
  func.func @transform_3(%arg0: i32) -> (i32, i32) {
    %c0_i32 = arith.constant 0 : i32
    %c0_i32_0 = arith.constant 0 : i32
    %c0_i32_1 = arith.constant 0 : i32
    return %c0_i32, %c0_i32_0 : i32, i32
  }
  func.func @transform_4(%arg0: i32) -> (i32, i32) {
    %c0_i32 = arith.constant 0 : i32
    %c0_i32_0 = arith.constant 0 : i32
    %c0_i32_1 = arith.constant 0 : i32
    return %c0_i32, %c0_i32_0 : i32, i32
  }
  func.func @transform_5(%arg0: i32) -> (i32, i32) {
    %c0_i32 = arith.constant 0 : i32
    %c0_i32_0 = arith.constant 0 : i32
    %c0_i32_1 = arith.constant 0 : i32
    return %c0_i32, %c0_i32_0 : i32, i32
  }
  func.func @transform_6(%arg0: i32) -> (i32, i32) {
    %c0_i32 = arith.constant 0 : i32
    %c0_i32_0 = arith.constant 0 : i32
    %c0_i32_1 = arith.constant 0 : i32
    return %c0_i32, %c0_i32_0 : i32, i32
  }
  func.func @transform_7(%arg0: i32) -> (i32, i32) {
    %c0_i32 = arith.constant 0 : i32
    %c0_i32_0 = arith.constant 0 : i32
    %c0_i32_1 = arith.constant 0 : i32
    return %c0_i32, %c0_i32_0 : i32, i32
  }
  func.func @transform_8(%arg0: i32) -> (i32, i32) {
    %c0_i32 = arith.constant 0 : i32
    %c0_i32_0 = arith.constant 0 : i32
    %c0_i32_1 = arith.constant 0 : i32
    return %c0_i32, %c0_i32_0 : i32, i32
  }
  func.func @transform_9(%arg0: i32) -> (i32, i32) {
    %c0_i32 = arith.constant 0 : i32
    %c0_i32_0 = arith.constant 0 : i32
    %c0_i32_1 = arith.constant 0 : i32
    return %c0_i32, %c0_i32_0 : i32, i32
  }
  func.func @transform_10(%arg0: i32) -> (i32, i32, i32) {
    %c0_i32 = arith.constant 0 : i32
    %c0_i32_0 = arith.constant 0 : i32
    %c0_i32_1 = arith.constant 0 : i32
    return %arg0, %c0_i32, %c0_i32_0 : i32, i32, i32
  }
}

module attributes {stable_mosaic.version = 11 : i64} {
  func.func @_conv_t2c_kernel(%arg0: i32, %arg1: memref<1x160x16xf32, #tpu.memory_space<vmem>>, %arg2: memref<1x96x32xbf16, #tpu.memory_space<vmem>>, %arg3: memref<27x16x16xbf16, #tpu.memory_space<vmem>>, %arg4: memref<16x16xbf16, #tpu.memory_space<vmem>>, %arg5: memref<32x16xbf16, #tpu.memory_space<vmem>>, %arg6: memref<4x16xf32, #tpu.memory_space<vmem>>, %arg7: memref<1x96x16xf32, #tpu.memory_space<vmem>>, %arg8: memref<160x16xf32, #tpu.memory_space<vmem>>) attributes {dimension_semantics = [#tpu.dimension_semantics<parallel>], iteration_bounds = array<i64: 4>, scalar_prefetch = 0 : i64, scratch_operands = 1 : i64, tpu.core_type = #tpu.core_type<tc>, window_params = [{transform_indices = @transform_0, window_bounds = array<i64: 1, 160, 16>}, {transform_indices = @transform_1, window_bounds = array<i64: 1, 96, 32>}, {pipeline_mode = #tpu.pipeline_mode<synchronous>, transform_indices = @transform_2, window_bounds = array<i64: 27, 16, 16>}, {pipeline_mode = #tpu.pipeline_mode<synchronous>, transform_indices = @transform_3, window_bounds = array<i64: 16, 16>}, {pipeline_mode = #tpu.pipeline_mode<synchronous>, transform_indices = @transform_4, window_bounds = array<i64: 32, 16>}, {pipeline_mode = #tpu.pipeline_mode<synchronous>, transform_indices = @transform_5, window_bounds = array<i64: 4, 16>}, {transform_indices = @transform_6, window_bounds = array<i64: 1, 96, 16>}]} {
    %0 = tpu.iota {dimensions = array<i32: 0>} : vector<96x16xi32>
    %c12_i32 = arith.constant 12 : i32
    %c0_i32 = arith.constant 0 : i32
    %1 = arith.cmpi eq, %c12_i32, %c0_i32 : i32
    %c1_i32 = arith.constant 1 : i32
    %2 = arith.select %1, %c1_i32, %c12_i32 : i32
    %3 = vector.broadcast %2 : i32 to vector<96x16xi32>
    %4 = arith.remsi %0, %3 : vector<96x16xi32>
    %c0_i32_0 = arith.constant 0 : i32
    %5 = vector.broadcast %c0_i32_0 : i32 to vector<96x16xi32>
    %6 = arith.cmpi ne, %4, %5 : vector<96x16xi32>
    %c0_i32_1 = arith.constant 0 : i32
    %7 = vector.broadcast %c0_i32_1 : i32 to vector<96x16xi32>
    %8 = arith.cmpi slt, %4, %7 : vector<96x16xi32>
    %c0_i32_2 = arith.constant 0 : i32
    %9 = arith.cmpi slt, %2, %c0_i32_2 : i32
    %10 = vector.broadcast %9 : i1 to vector<96x16xi1>
    %11 = vector.broadcast %10 : vector<96x16xi1> to vector<96x16xi1>
    %12 = arith.xori %8, %11 : vector<96x16xi1>
    %13 = arith.andi %12, %6 : vector<96x16xi1>
    %14 = vector.broadcast %2 : i32 to vector<96x16xi32>
    %15 = arith.addi %4, %14 : vector<96x16xi32>
    %16 = arith.select %13, %15, %4 : vector<96x16xi1>, vector<96x16xi32>
    %c2_i32 = arith.constant 2 : i32
    %17 = vector.broadcast %c2_i32 : i32 to vector<96x16xi32>
    %18 = arith.cmpi sge, %16, %17 : vector<96x16xi32>
    %c10_i32 = arith.constant 10 : i32
    %19 = vector.broadcast %c10_i32 : i32 to vector<96x16xi32>
    %20 = arith.cmpi slt, %16, %19 : vector<96x16xi32>
    %21 = arith.andi %18, %20 : vector<96x16xi1>
    %c0 = arith.constant 0 : index
    %c0_3 = arith.constant 0 : index
    %22 = vector.load %arg6[%c0, %c0_3] : memref<4x16xf32, #tpu.memory_space<vmem>>, vector<4x16xf32>
    %cst = arith.constant 0.000000e+00 : f32
    %23 = vector.broadcast %cst : f32 to vector<8x16xf32>
    %c0_4 = arith.constant 0 : index
    %c0_5 = arith.constant 0 : index
    %24 = vector.load %arg8[%c0_4, %c0_5] : memref<160x16xf32, #tpu.memory_space<vmem>>, vector<8x16xf32>
    tpu.vector_store %arg8[%c0_4, %c0_5], %23 {strides = array<i32>} : memref<160x16xf32, #tpu.memory_space<vmem>>, vector<8x16xf32>,
    %cst_6 = arith.constant 0.000000e+00 : f32
    %25 = vector.broadcast %cst_6 : f32 to vector<8x16xf32>
    %c152 = arith.constant 152 : index
    %c0_7 = arith.constant 0 : index
    %26 = vector.load %arg8[%c152, %c0_7] : memref<160x16xf32, #tpu.memory_space<vmem>>, vector<8x16xf32>
    tpu.vector_store %arg8[%c152, %c0_7], %25 {strides = array<i32>} : memref<160x16xf32, #tpu.memory_space<vmem>>, vector<8x16xf32>,
    %cst_8 = arith.constant 0.000000e+00 : f32
    %27 = vector.broadcast %cst_8 : f32 to vector<96x16xf32>
    %c0_9 = arith.constant 0 : index
    %c6 = arith.constant 6 : index
    %c0_10 = arith.constant 0 : index
    %28 = vector.load %arg1[%c0_9, %c6, %c0_10] : memref<1x160x16xf32, #tpu.memory_space<vmem>>, vector<1x96x16xf32>
    %29 = vector.shape_cast %28 : vector<1x96x16xf32> to vector<96x16xf32>
    %30 = arith.truncf %29 : vector<96x16xf32> to vector<96x16xbf16>
    %c0_11 = arith.constant 0 : index
    %c0_12 = arith.constant 0 : index
    %c0_13 = arith.constant 0 : index
    %31 = vector.load %arg3[%c0_11, %c0_12, %c0_13] : memref<27x16x16xbf16, #tpu.memory_space<vmem>>, vector<1x16x16xbf16>
    %32 = vector.shape_cast %31 : vector<1x16x16xbf16> to vector<16x16xbf16>
    %cst_14 = arith.constant dense<0.000000e+00> : vector<96x16xf32>
    %33 = tpu.matmul %30, %32, %cst_14 {dimension_numbers = #tpu.dot_dimension_numbers<[1], [0], [0], [1], [0, 0, 1, 1], [], []>} : vector<96x16xbf16>, vector<16x16xbf16>, vector<96x16xf32> -> vector<96x16xf32>
    %34 = arith.addf %27, %33 : vector<96x16xf32>
    %c0_15 = arith.constant 0 : index
    %c8 = arith.constant 8 : index
    %c0_16 = arith.constant 0 : index
    %35 = vector.load %arg1[%c0_15, %c8, %c0_16] : memref<1x160x16xf32, #tpu.memory_space<vmem>>, vector<1x96x16xf32>
    %36 = vector.shape_cast %35 : vector<1x96x16xf32> to vector<96x16xf32>
    %37 = arith.truncf %36 : vector<96x16xf32> to vector<96x16xbf16>
    %c1 = arith.constant 1 : index
    %c0_17 = arith.constant 0 : index
    %c0_18 = arith.constant 0 : index
    %38 = vector.load %arg3[%c1, %c0_17, %c0_18] : memref<27x16x16xbf16, #tpu.memory_space<vmem>>, vector<1x16x16xbf16>
    %39 = vector.shape_cast %38 : vector<1x16x16xbf16> to vector<16x16xbf16>
    %cst_19 = arith.constant dense<0.000000e+00> : vector<96x16xf32>
    %40 = tpu.matmul %37, %39, %cst_19 {dimension_numbers = #tpu.dot_dimension_numbers<[1], [0], [0], [1], [0, 0, 1, 1], [], []>} : vector<96x16xbf16>, vector<16x16xbf16>, vector<96x16xf32> -> vector<96x16xf32>
    %41 = arith.addf %34, %40 : vector<96x16xf32>
    %c0_20 = arith.constant 0 : index
    %c10 = arith.constant 10 : index
    %c0_21 = arith.constant 0 : index
    %42 = vector.load %arg1[%c0_20, %c10, %c0_21] : memref<1x160x16xf32, #tpu.memory_space<vmem>>, vector<1x96x16xf32>
    %43 = vector.shape_cast %42 : vector<1x96x16xf32> to vector<96x16xf32>
    %44 = arith.truncf %43 : vector<96x16xf32> to vector<96x16xbf16>
    %c2 = arith.constant 2 : index
    %c0_22 = arith.constant 0 : index
    %c0_23 = arith.constant 0 : index
    %45 = vector.load %arg3[%c2, %c0_22, %c0_23] : memref<27x16x16xbf16, #tpu.memory_space<vmem>>, vector<1x16x16xbf16>
    %46 = vector.shape_cast %45 : vector<1x16x16xbf16> to vector<16x16xbf16>
    %cst_24 = arith.constant dense<0.000000e+00> : vector<96x16xf32>
    %47 = tpu.matmul %44, %46, %cst_24 {dimension_numbers = #tpu.dot_dimension_numbers<[1], [0], [0], [1], [0, 0, 1, 1], [], []>} : vector<96x16xbf16>, vector<16x16xbf16>, vector<96x16xf32> -> vector<96x16xf32>
    %48 = arith.addf %41, %47 : vector<96x16xf32>
    %c0_25 = arith.constant 0 : index
    %c30 = arith.constant 30 : index
    %c0_26 = arith.constant 0 : index
    %49 = vector.load %arg1[%c0_25, %c30, %c0_26] : memref<1x160x16xf32, #tpu.memory_space<vmem>>, vector<1x96x16xf32>
    %50 = vector.shape_cast %49 : vector<1x96x16xf32> to vector<96x16xf32>
    %51 = arith.truncf %50 : vector<96x16xf32> to vector<96x16xbf16>
    %c3 = arith.constant 3 : index
    %c0_27 = arith.constant 0 : index
    %c0_28 = arith.constant 0 : index
    %52 = vector.load %arg3[%c3, %c0_27, %c0_28] : memref<27x16x16xbf16, #tpu.memory_space<vmem>>, vector<1x16x16xbf16>
    %53 = vector.shape_cast %52 : vector<1x16x16xbf16> to vector<16x16xbf16>
    %cst_29 = arith.constant dense<0.000000e+00> : vector<96x16xf32>
    %54 = tpu.matmul %51, %53, %cst_29 {dimension_numbers = #tpu.dot_dimension_numbers<[1], [0], [0], [1], [0, 0, 1, 1], [], []>} : vector<96x16xbf16>, vector<16x16xbf16>, vector<96x16xf32> -> vector<96x16xf32>
    %55 = arith.addf %48, %54 : vector<96x16xf32>
    %c0_30 = arith.constant 0 : index
    %c32 = arith.constant 32 : index
    %c0_31 = arith.constant 0 : index
    %56 = vector.load %arg1[%c0_30, %c32, %c0_31] : memref<1x160x16xf32, #tpu.memory_space<vmem>>, vector<1x96x16xf32>
    %57 = vector.shape_cast %56 : vector<1x96x16xf32> to vector<96x16xf32>
    %58 = arith.truncf %57 : vector<96x16xf32> to vector<96x16xbf16>
    %c4 = arith.constant 4 : index
    %c0_32 = arith.constant 0 : index
    %c0_33 = arith.constant 0 : index
    %59 = vector.load %arg3[%c4, %c0_32, %c0_33] : memref<27x16x16xbf16, #tpu.memory_space<vmem>>, vector<1x16x16xbf16>
    %60 = vector.shape_cast %59 : vector<1x16x16xbf16> to vector<16x16xbf16>
    %cst_34 = arith.constant dense<0.000000e+00> : vector<96x16xf32>
    %61 = tpu.matmul %58, %60, %cst_34 {dimension_numbers = #tpu.dot_dimension_numbers<[1], [0], [0], [1], [0, 0, 1, 1], [], []>} : vector<96x16xbf16>, vector<16x16xbf16>, vector<96x16xf32> -> vector<96x16xf32>
    %62 = arith.addf %55, %61 : vector<96x16xf32>
    %c0_35 = arith.constant 0 : index
    %c34 = arith.constant 34 : index
    %c0_36 = arith.constant 0 : index
    %63 = vector.load %arg1[%c0_35, %c34, %c0_36] : memref<1x160x16xf32, #tpu.memory_space<vmem>>, vector<1x96x16xf32>
    %64 = vector.shape_cast %63 : vector<1x96x16xf32> to vector<96x16xf32>
    %65 = arith.truncf %64 : vector<96x16xf32> to vector<96x16xbf16>
    %c5 = arith.constant 5 : index
    %c0_37 = arith.constant 0 : index
    %c0_38 = arith.constant 0 : index
    %66 = vector.load %arg3[%c5, %c0_37, %c0_38] : memref<27x16x16xbf16, #tpu.memory_space<vmem>>, vector<1x16x16xbf16>
    %67 = vector.shape_cast %66 : vector<1x16x16xbf16> to vector<16x16xbf16>
    %cst_39 = arith.constant dense<0.000000e+00> : vector<96x16xf32>
    %68 = tpu.matmul %65, %67, %cst_39 {dimension_numbers = #tpu.dot_dimension_numbers<[1], [0], [0], [1], [0, 0, 1, 1], [], []>} : vector<96x16xbf16>, vector<16x16xbf16>, vector<96x16xf32> -> vector<96x16xf32>
    %69 = arith.addf %62, %68 : vector<96x16xf32>
    %c0_40 = arith.constant 0 : index
    %c54 = arith.constant 54 : index
    %c0_41 = arith.constant 0 : index
    %70 = vector.load %arg1[%c0_40, %c54, %c0_41] : memref<1x160x16xf32, #tpu.memory_space<vmem>>, vector<1x96x16xf32>
    %71 = vector.shape_cast %70 : vector<1x96x16xf32> to vector<96x16xf32>
    %72 = arith.truncf %71 : vector<96x16xf32> to vector<96x16xbf16>
    %c6_42 = arith.constant 6 : index
    %c0_43 = arith.constant 0 : index
    %c0_44 = arith.constant 0 : index
    %73 = vector.load %arg3[%c6_42, %c0_43, %c0_44] : memref<27x16x16xbf16, #tpu.memory_space<vmem>>, vector<1x16x16xbf16>
    %74 = vector.shape_cast %73 : vector<1x16x16xbf16> to vector<16x16xbf16>
    %cst_45 = arith.constant dense<0.000000e+00> : vector<96x16xf32>
    %75 = tpu.matmul %72, %74, %cst_45 {dimension_numbers = #tpu.dot_dimension_numbers<[1], [0], [0], [1], [0, 0, 1, 1], [], []>} : vector<96x16xbf16>, vector<16x16xbf16>, vector<96x16xf32> -> vector<96x16xf32>
    %76 = arith.addf %69, %75 : vector<96x16xf32>
    %c0_46 = arith.constant 0 : index
    %c56 = arith.constant 56 : index
    %c0_47 = arith.constant 0 : index
    %77 = vector.load %arg1[%c0_46, %c56, %c0_47] : memref<1x160x16xf32, #tpu.memory_space<vmem>>, vector<1x96x16xf32>
    %78 = vector.shape_cast %77 : vector<1x96x16xf32> to vector<96x16xf32>
    %79 = arith.truncf %78 : vector<96x16xf32> to vector<96x16xbf16>
    %c7 = arith.constant 7 : index
    %c0_48 = arith.constant 0 : index
    %c0_49 = arith.constant 0 : index
    %80 = vector.load %arg3[%c7, %c0_48, %c0_49] : memref<27x16x16xbf16, #tpu.memory_space<vmem>>, vector<1x16x16xbf16>
    %81 = vector.shape_cast %80 : vector<1x16x16xbf16> to vector<16x16xbf16>
    %cst_50 = arith.constant dense<0.000000e+00> : vector<96x16xf32>
    %82 = tpu.matmul %79, %81, %cst_50 {dimension_numbers = #tpu.dot_dimension_numbers<[1], [0], [0], [1], [0, 0, 1, 1], [], []>} : vector<96x16xbf16>, vector<16x16xbf16>, vector<96x16xf32> -> vector<96x16xf32>
    %83 = arith.addf %76, %82 : vector<96x16xf32>
    %c0_51 = arith.constant 0 : index
    %c58 = arith.constant 58 : index
    %c0_52 = arith.constant 0 : index
    %84 = vector.load %arg1[%c0_51, %c58, %c0_52] : memref<1x160x16xf32, #tpu.memory_space<vmem>>, vector<1x96x16xf32>
    %85 = vector.shape_cast %84 : vector<1x96x16xf32> to vector<96x16xf32>
    %86 = arith.truncf %85 : vector<96x16xf32> to vector<96x16xbf16>
    %c8_53 = arith.constant 8 : index
    %c0_54 = arith.constant 0 : index
    %c0_55 = arith.constant 0 : index
    %87 = vector.load %arg3[%c8_53, %c0_54, %c0_55] : memref<27x16x16xbf16, #tpu.memory_space<vmem>>, vector<1x16x16xbf16>
    %88 = vector.shape_cast %87 : vector<1x16x16xbf16> to vector<16x16xbf16>
    %cst_56 = arith.constant dense<0.000000e+00> : vector<96x16xf32>
    %89 = tpu.matmul %86, %88, %cst_56 {dimension_numbers = #tpu.dot_dimension_numbers<[1], [0], [0], [1], [0, 0, 1, 1], [], []>} : vector<96x16xbf16>, vector<16x16xbf16>, vector<96x16xf32> -> vector<96x16xf32>
    %90 = arith.addf %83, %89 : vector<96x16xf32>
    %91 = vector.extract_strided_slice %22 {offsets = [0, 0], sizes = [1, 16], strides = [1, 1]} : vector<4x16xf32> to vector<1x16xf32>
    %92 = vector.broadcast %91 : vector<1x16xf32> to vector<96x16xf32>
    %93 = arith.addf %90, %92 : vector<96x16xf32>
    %cst_57 = arith.constant 0.000000e+00 : f32
    %94 = vector.broadcast %cst_57 : f32 to vector<96x16xf32>
    %95 = arith.maximumf %93, %94 : vector<96x16xf32>
    %cst_58 = arith.constant 0.000000e+00 : f32
    %96 = vector.broadcast %cst_58 : f32 to vector<96x16xf32>
    %97 = arith.select %21, %95, %96 : vector<96x16xi1>, vector<96x16xf32>
    %cst_59 = arith.constant dense<0.000000e+00> : vector<16xf32>
    %98 = vector.multi_reduction <add>, %97, %cst_59 [0] : vector<96x16xf32> to vector<16xf32>
    %99 = vector.shape_cast %98 : vector<16xf32> to vector<1x16xf32>
    %cst_60 = arith.constant 6.400000e+01 : f32
    %100 = vector.broadcast %cst_60 : f32 to vector<1x16xf32>
    %101 = arith.divf %99, %100 : vector<1x16xf32>
    %102 = vector.broadcast %101 : vector<1x16xf32> to vector<96x16xf32>
    %103 = arith.subf %95, %102 : vector<96x16xf32>
    %cst_61 = arith.constant 0.000000e+00 : f32
    %104 = vector.broadcast %cst_61 : f32 to vector<96x16xf32>
    %105 = arith.select %21, %103, %104 : vector<96x16xi1>, vector<96x16xf32>
    %106 = arith.mulf %105, %105 : vector<96x16xf32>
    %cst_62 = arith.constant dense<0.000000e+00> : vector<16xf32>
    %107 = vector.multi_reduction <add>, %106, %cst_62 [0] : vector<96x16xf32> to vector<16xf32>
    %108 = vector.shape_cast %107 : vector<16xf32> to vector<1x16xf32>
    %cst_63 = arith.constant 6.400000e+01 : f32
    %109 = vector.broadcast %cst_63 : f32 to vector<1x16xf32>
    %110 = arith.divf %108, %109 : vector<1x16xf32>
    %111 = vector.broadcast %101 : vector<1x16xf32> to vector<96x16xf32>
    %112 = arith.subf %95, %111 : vector<96x16xf32>
    %cst_64 = arith.constant 9.99999974E-6 : f32
    %113 = vector.broadcast %cst_64 : f32 to vector<1x16xf32>
    %114 = arith.addf %110, %113 : vector<1x16xf32>
    %115 = math.rsqrt %114 : vector<1x16xf32>
    %116 = vector.broadcast %115 : vector<1x16xf32> to vector<96x16xf32>
    %117 = arith.mulf %112, %116 : vector<96x16xf32>
    %c32_65 = arith.constant 32 : index
    %c0_66 = arith.constant 0 : index
    %118 = vector.load %arg8[%c32_65, %c0_66] : memref<160x16xf32, #tpu.memory_space<vmem>>, vector<96x16xf32>
    tpu.vector_store %arg8[%c32_65, %c0_66], %117 {strides = array<i32>} : memref<160x16xf32, #tpu.memory_space<vmem>>, vector<96x16xf32>,
    %119 = vector.extract_strided_slice %117 {offsets = [2, 0], sizes = [1, 16], strides = [1, 1]} : vector<96x16xf32> to vector<1x16xf32>
    %120 = vector.extract_strided_slice %117 {offsets = [9, 0], sizes = [1, 16], strides = [1, 1]} : vector<96x16xf32> to vector<1x16xf32>
    %121 = tpu.concatenate %119, %119 in 0 : vector<1x16xf32>, vector<1x16xf32> -> vector<2x16xf32>
    %c32_67 = arith.constant 32 : index
    %c0_68 = arith.constant 0 : index
    %122 = vector.load %arg8[%c32_67, %c0_68] : memref<160x16xf32, #tpu.memory_space<vmem>>, vector<2x16xf32>
    tpu.vector_store %arg8[%c32_67, %c0_68], %121 {strides = array<i32>} : memref<160x16xf32, #tpu.memory_space<vmem>>, vector<2x16xf32>,
    %123 = tpu.concatenate %120, %120 in 0 : vector<1x16xf32>, vector<1x16xf32> -> vector<2x16xf32>
    %c42 = arith.constant 42 : index
    %c0_69 = arith.constant 0 : index
    %124 = vector.load %arg8[%c42, %c0_69] : memref<160x16xf32, #tpu.memory_space<vmem>>, vector<2x16xf32>
    tpu.vector_store %arg8[%c42, %c0_69], %123 {strides = array<i32>} : memref<160x16xf32, #tpu.memory_space<vmem>>, vector<2x16xf32>,
    %125 = vector.extract_strided_slice %117 {offsets = [14, 0], sizes = [1, 16], strides = [1, 1]} : vector<96x16xf32> to vector<1x16xf32>
    %126 = vector.extract_strided_slice %117 {offsets = [21, 0], sizes = [1, 16], strides = [1, 1]} : vector<96x16xf32> to vector<1x16xf32>
    %127 = tpu.concatenate %125, %125 in 0 : vector<1x16xf32>, vector<1x16xf32> -> vector<2x16xf32>
    %c44 = arith.constant 44 : index
    %c0_70 = arith.constant 0 : index
    %128 = vector.load %arg8[%c44, %c0_70] : memref<160x16xf32, #tpu.memory_space<vmem>>, vector<2x16xf32>
    tpu.vector_store %arg8[%c44, %c0_70], %127 {strides = array<i32>} : memref<160x16xf32, #tpu.memory_space<vmem>>, vector<2x16xf32>,
    %129 = tpu.concatenate %126, %126 in 0 : vector<1x16xf32>, vector<1x16xf32> -> vector<2x16xf32>
    %c54_71 = arith.constant 54 : index
    %c0_72 = arith.constant 0 : index
    %130 = vector.load %arg8[%c54_71, %c0_72] : memref<160x16xf32, #tpu.memory_space<vmem>>, vector<2x16xf32>
    tpu.vector_store %arg8[%c54_71, %c0_72], %129 {strides = array<i32>} : memref<160x16xf32, #tpu.memory_space<vmem>>, vector<2x16xf32>,
    %131 = vector.extract_strided_slice %117 {offsets = [26, 0], sizes = [1, 16], strides = [1, 1]} : vector<96x16xf32> to vector<1x16xf32>
    %132 = vector.extract_strided_slice %117 {offsets = [33, 0], sizes = [1, 16], strides = [1, 1]} : vector<96x16xf32> to vector<1x16xf32>
    %133 = tpu.concatenate %131, %131 in 0 : vector<1x16xf32>, vector<1x16xf32> -> vector<2x16xf32>
    %c56_73 = arith.constant 56 : index
    %c0_74 = arith.constant 0 : index
    %134 = vector.load %arg8[%c56_73, %c0_74] : memref<160x16xf32, #tpu.memory_space<vmem>>, vector<2x16xf32>
    tpu.vector_store %arg8[%c56_73, %c0_74], %133 {strides = array<i32>} : memref<160x16xf32, #tpu.memory_space<vmem>>, vector<2x16xf32>,
    %135 = tpu.concatenate %132, %132 in 0 : vector<1x16xf32>, vector<1x16xf32> -> vector<2x16xf32>
    %c66 = arith.constant 66 : index
    %c0_75 = arith.constant 0 : index
    %136 = vector.load %arg8[%c66, %c0_75] : memref<160x16xf32, #tpu.memory_space<vmem>>, vector<2x16xf32>
    tpu.vector_store %arg8[%c66, %c0_75], %135 {strides = array<i32>} : memref<160x16xf32, #tpu.memory_space<vmem>>, vector<2x16xf32>,
    %137 = vector.extract_strided_slice %117 {offsets = [38, 0], sizes = [1, 16], strides = [1, 1]} : vector<96x16xf32> to vector<1x16xf32>
    %138 = vector.extract_strided_slice %117 {offsets = [45, 0], sizes = [1, 16], strides = [1, 1]} : vector<96x16xf32> to vector<1x16xf32>
    %139 = tpu.concatenate %137, %137 in 0 : vector<1x16xf32>, vector<1x16xf32> -> vector<2x16xf32>
    %c68 = arith.constant 68 : index
    %c0_76 = arith.constant 0 : index
    %140 = vector.load %arg8[%c68, %c0_76] : memref<160x16xf32, #tpu.memory_space<vmem>>, vector<2x16xf32>
    tpu.vector_store %arg8[%c68, %c0_76], %139 {strides = array<i32>} : memref<160x16xf32, #tpu.memory_space<vmem>>, vector<2x16xf32>,
    %141 = tpu.concatenate %138, %138 in 0 : vector<1x16xf32>, vector<1x16xf32> -> vector<2x16xf32>
    %c78 = arith.constant 78 : index
    %c0_77 = arith.constant 0 : index
    %142 = vector.load %arg8[%c78, %c0_77] : memref<160x16xf32, #tpu.memory_space<vmem>>, vector<2x16xf32>
    tpu.vector_store %arg8[%c78, %c0_77], %141 {strides = array<i32>} : memref<160x16xf32, #tpu.memory_space<vmem>>, vector<2x16xf32>,
    %143 = vector.extract_strided_slice %117 {offsets = [50, 0], sizes = [1, 16], strides = [1, 1]} : vector<96x16xf32> to vector<1x16xf32>
    %144 = vector.extract_strided_slice %117 {offsets = [57, 0], sizes = [1, 16], strides = [1, 1]} : vector<96x16xf32> to vector<1x16xf32>
    %145 = tpu.concatenate %143, %143 in 0 : vector<1x16xf32>, vector<1x16xf32> -> vector<2x16xf32>
    %c80 = arith.constant 80 : index
    %c0_78 = arith.constant 0 : index
    %146 = vector.load %arg8[%c80, %c0_78] : memref<160x16xf32, #tpu.memory_space<vmem>>, vector<2x16xf32>
    tpu.vector_store %arg8[%c80, %c0_78], %145 {strides = array<i32>} : memref<160x16xf32, #tpu.memory_space<vmem>>, vector<2x16xf32>,
    %147 = tpu.concatenate %144, %144 in 0 : vector<1x16xf32>, vector<1x16xf32> -> vector<2x16xf32>
    %c90 = arith.constant 90 : index
    %c0_79 = arith.constant 0 : index
    %148 = vector.load %arg8[%c90, %c0_79] : memref<160x16xf32, #tpu.memory_space<vmem>>, vector<2x16xf32>
    tpu.vector_store %arg8[%c90, %c0_79], %147 {strides = array<i32>} : memref<160x16xf32, #tpu.memory_space<vmem>>, vector<2x16xf32>,
    %149 = vector.extract_strided_slice %117 {offsets = [62, 0], sizes = [1, 16], strides = [1, 1]} : vector<96x16xf32> to vector<1x16xf32>
    %150 = vector.extract_strided_slice %117 {offsets = [69, 0], sizes = [1, 16], strides = [1, 1]} : vector<96x16xf32> to vector<1x16xf32>
    %151 = tpu.concatenate %149, %149 in 0 : vector<1x16xf32>, vector<1x16xf32> -> vector<2x16xf32>
    %c92 = arith.constant 92 : index
    %c0_80 = arith.constant 0 : index
    %152 = vector.load %arg8[%c92, %c0_80] : memref<160x16xf32, #tpu.memory_space<vmem>>, vector<2x16xf32>
    tpu.vector_store %arg8[%c92, %c0_80], %151 {strides = array<i32>} : memref<160x16xf32, #tpu.memory_space<vmem>>, vector<2x16xf32>,
    %153 = tpu.concatenate %150, %150 in 0 : vector<1x16xf32>, vector<1x16xf32> -> vector<2x16xf32>
    %c102 = arith.constant 102 : index
    %c0_81 = arith.constant 0 : index
    %154 = vector.load %arg8[%c102, %c0_81] : memref<160x16xf32, #tpu.memory_space<vmem>>, vector<2x16xf32>
    tpu.vector_store %arg8[%c102, %c0_81], %153 {strides = array<i32>} : memref<160x16xf32, #tpu.memory_space<vmem>>, vector<2x16xf32>,
    %155 = vector.extract_strided_slice %117 {offsets = [74, 0], sizes = [1, 16], strides = [1, 1]} : vector<96x16xf32> to vector<1x16xf32>
    %156 = vector.extract_strided_slice %117 {offsets = [81, 0], sizes = [1, 16], strides = [1, 1]} : vector<96x16xf32> to vector<1x16xf32>
    %157 = tpu.concatenate %155, %155 in 0 : vector<1x16xf32>, vector<1x16xf32> -> vector<2x16xf32>
    %c104 = arith.constant 104 : index
    %c0_82 = arith.constant 0 : index
    %158 = vector.load %arg8[%c104, %c0_82] : memref<160x16xf32, #tpu.memory_space<vmem>>, vector<2x16xf32>
    tpu.vector_store %arg8[%c104, %c0_82], %157 {strides = array<i32>} : memref<160x16xf32, #tpu.memory_space<vmem>>, vector<2x16xf32>,
    %159 = tpu.concatenate %156, %156 in 0 : vector<1x16xf32>, vector<1x16xf32> -> vector<2x16xf32>
    %c114 = arith.constant 114 : index
    %c0_83 = arith.constant 0 : index
    %160 = vector.load %arg8[%c114, %c0_83] : memref<160x16xf32, #tpu.memory_space<vmem>>, vector<2x16xf32>
    tpu.vector_store %arg8[%c114, %c0_83], %159 {strides = array<i32>} : memref<160x16xf32, #tpu.memory_space<vmem>>, vector<2x16xf32>,
    %161 = vector.extract_strided_slice %117 {offsets = [86, 0], sizes = [1, 16], strides = [1, 1]} : vector<96x16xf32> to vector<1x16xf32>
    %162 = vector.extract_strided_slice %117 {offsets = [93, 0], sizes = [1, 16], strides = [1, 1]} : vector<96x16xf32> to vector<1x16xf32>
    %163 = tpu.concatenate %161, %161 in 0 : vector<1x16xf32>, vector<1x16xf32> -> vector<2x16xf32>
    %c116 = arith.constant 116 : index
    %c0_84 = arith.constant 0 : index
    %164 = vector.load %arg8[%c116, %c0_84] : memref<160x16xf32, #tpu.memory_space<vmem>>, vector<2x16xf32>
    tpu.vector_store %arg8[%c116, %c0_84], %163 {strides = array<i32>} : memref<160x16xf32, #tpu.memory_space<vmem>>, vector<2x16xf32>,
    %165 = tpu.concatenate %162, %162 in 0 : vector<1x16xf32>, vector<1x16xf32> -> vector<2x16xf32>
    %c126 = arith.constant 126 : index
    %c0_85 = arith.constant 0 : index
    %166 = vector.load %arg8[%c126, %c0_85] : memref<160x16xf32, #tpu.memory_space<vmem>>, vector<2x16xf32>
    tpu.vector_store %arg8[%c126, %c0_85], %165 {strides = array<i32>} : memref<160x16xf32, #tpu.memory_space<vmem>>, vector<2x16xf32>,
    %c32_86 = arith.constant 32 : index
    %c0_87 = arith.constant 0 : index
    %167 = vector.load %arg8[%c32_86, %c0_87] : memref<160x16xf32, #tpu.memory_space<vmem>>, vector<12x16xf32>
    %c8_88 = arith.constant 8 : index
    %c0_89 = arith.constant 0 : index
    %168 = vector.load %arg8[%c8_88, %c0_89] : memref<160x16xf32, #tpu.memory_space<vmem>>, vector<12x16xf32>
    tpu.vector_store %arg8[%c8_88, %c0_89], %167 {strides = array<i32>} : memref<160x16xf32, #tpu.memory_space<vmem>>, vector<12x16xf32>,
    %c20 = arith.constant 20 : index
    %c0_90 = arith.constant 0 : index
    %169 = vector.load %arg8[%c20, %c0_90] : memref<160x16xf32, #tpu.memory_space<vmem>>, vector<12x16xf32>
    tpu.vector_store %arg8[%c20, %c0_90], %167 {strides = array<i32>} : memref<160x16xf32, #tpu.memory_space<vmem>>, vector<12x16xf32>,
    %c116_91 = arith.constant 116 : index
    %c0_92 = arith.constant 0 : index
    %170 = vector.load %arg8[%c116_91, %c0_92] : memref<160x16xf32, #tpu.memory_space<vmem>>, vector<12x16xf32>
    %c128 = arith.constant 128 : index
    %c0_93 = arith.constant 0 : index
    %171 = vector.load %arg8[%c128, %c0_93] : memref<160x16xf32, #tpu.memory_space<vmem>>, vector<12x16xf32>
    tpu.vector_store %arg8[%c128, %c0_93], %170 {strides = array<i32>} : memref<160x16xf32, #tpu.memory_space<vmem>>, vector<12x16xf32>,
    %c140 = arith.constant 140 : index
    %c0_94 = arith.constant 0 : index
    %172 = vector.load %arg8[%c140, %c0_94] : memref<160x16xf32, #tpu.memory_space<vmem>>, vector<12x16xf32>
    tpu.vector_store %arg8[%c140, %c0_94], %170 {strides = array<i32>} : memref<160x16xf32, #tpu.memory_space<vmem>>, vector<12x16xf32>,
    %cst_95 = arith.constant 0.000000e+00 : f32
    %173 = vector.broadcast %cst_95 : f32 to vector<96x16xf32>
    %c19 = arith.constant 19 : index
    %c0_96 = arith.constant 0 : index
    %174 = vector.load %arg8[%c19, %c0_96] : memref<160x16xf32, #tpu.memory_space<vmem>>, vector<96x16xf32>
    %175 = arith.truncf %174 : vector<96x16xf32> to vector<96x16xbf16>
    %c9 = arith.constant 9 : index
    %c0_97 = arith.constant 0 : index
    %c0_98 = arith.constant 0 : index
    %176 = vector.load %arg3[%c9, %c0_97, %c0_98] : memref<27x16x16xbf16, #tpu.memory_space<vmem>>, vector<1x16x16xbf16>
    %177 = vector.shape_cast %176 : vector<1x16x16xbf16> to vector<16x16xbf16>
    %cst_99 = arith.constant dense<0.000000e+00> : vector<96x16xf32>
    %178 = tpu.matmul %175, %177, %cst_99 {dimension_numbers = #tpu.dot_dimension_numbers<[1], [0], [0], [1], [0, 0, 1, 1], [], []>} : vector<96x16xbf16>, vector<16x16xbf16>, vector<96x16xf32> -> vector<96x16xf32>
    %179 = arith.addf %173, %178 : vector<96x16xf32>
    %c20_100 = arith.constant 20 : index
    %c0_101 = arith.constant 0 : index
    %180 = vector.load %arg8[%c20_100, %c0_101] : memref<160x16xf32, #tpu.memory_space<vmem>>, vector<96x16xf32>
    %181 = arith.truncf %180 : vector<96x16xf32> to vector<96x16xbf16>
    %c10_102 = arith.constant 10 : index
    %c0_103 = arith.constant 0 : index
    %c0_104 = arith.constant 0 : index
    %182 = vector.load %arg3[%c10_102, %c0_103, %c0_104] : memref<27x16x16xbf16, #tpu.memory_space<vmem>>, vector<1x16x16xbf16>
    %183 = vector.shape_cast %182 : vector<1x16x16xbf16> to vector<16x16xbf16>
    %cst_105 = arith.constant dense<0.000000e+00> : vector<96x16xf32>
    %184 = tpu.matmul %181, %183, %cst_105 {dimension_numbers = #tpu.dot_dimension_numbers<[1], [0], [0], [1], [0, 0, 1, 1], [], []>} : vector<96x16xbf16>, vector<16x16xbf16>, vector<96x16xf32> -> vector<96x16xf32>
    %185 = arith.addf %179, %184 : vector<96x16xf32>
    %c21 = arith.constant 21 : index
    %c0_106 = arith.constant 0 : index
    %186 = vector.load %arg8[%c21, %c0_106] : memref<160x16xf32, #tpu.memory_space<vmem>>, vector<96x16xf32>
    %187 = arith.truncf %186 : vector<96x16xf32> to vector<96x16xbf16>
    %c11 = arith.constant 11 : index
    %c0_107 = arith.constant 0 : index
    %c0_108 = arith.constant 0 : index
    %188 = vector.load %arg3[%c11, %c0_107, %c0_108] : memref<27x16x16xbf16, #tpu.memory_space<vmem>>, vector<1x16x16xbf16>
    %189 = vector.shape_cast %188 : vector<1x16x16xbf16> to vector<16x16xbf16>
    %cst_109 = arith.constant dense<0.000000e+00> : vector<96x16xf32>
    %190 = tpu.matmul %187, %189, %cst_109 {dimension_numbers = #tpu.dot_dimension_numbers<[1], [0], [0], [1], [0, 0, 1, 1], [], []>} : vector<96x16xbf16>, vector<16x16xbf16>, vector<96x16xf32> -> vector<96x16xf32>
    %191 = arith.addf %185, %190 : vector<96x16xf32>
    %c31 = arith.constant 31 : index
    %c0_110 = arith.constant 0 : index
    %192 = vector.load %arg8[%c31, %c0_110] : memref<160x16xf32, #tpu.memory_space<vmem>>, vector<96x16xf32>
    %193 = arith.truncf %192 : vector<96x16xf32> to vector<96x16xbf16>
    %c12 = arith.constant 12 : index
    %c0_111 = arith.constant 0 : index
    %c0_112 = arith.constant 0 : index
    %194 = vector.load %arg3[%c12, %c0_111, %c0_112] : memref<27x16x16xbf16, #tpu.memory_space<vmem>>, vector<1x16x16xbf16>
    %195 = vector.shape_cast %194 : vector<1x16x16xbf16> to vector<16x16xbf16>
    %cst_113 = arith.constant dense<0.000000e+00> : vector<96x16xf32>
    %196 = tpu.matmul %193, %195, %cst_113 {dimension_numbers = #tpu.dot_dimension_numbers<[1], [0], [0], [1], [0, 0, 1, 1], [], []>} : vector<96x16xbf16>, vector<16x16xbf16>, vector<96x16xf32> -> vector<96x16xf32>
    %197 = arith.addf %191, %196 : vector<96x16xf32>
    %c32_114 = arith.constant 32 : index
    %c0_115 = arith.constant 0 : index
    %198 = vector.load %arg8[%c32_114, %c0_115] : memref<160x16xf32, #tpu.memory_space<vmem>>, vector<96x16xf32>
    %199 = arith.truncf %198 : vector<96x16xf32> to vector<96x16xbf16>
    %c13 = arith.constant 13 : index
    %c0_116 = arith.constant 0 : index
    %c0_117 = arith.constant 0 : index
    %200 = vector.load %arg3[%c13, %c0_116, %c0_117] : memref<27x16x16xbf16, #tpu.memory_space<vmem>>, vector<1x16x16xbf16>
    %201 = vector.shape_cast %200 : vector<1x16x16xbf16> to vector<16x16xbf16>
    %cst_118 = arith.constant dense<0.000000e+00> : vector<96x16xf32>
    %202 = tpu.matmul %199, %201, %cst_118 {dimension_numbers = #tpu.dot_dimension_numbers<[1], [0], [0], [1], [0, 0, 1, 1], [], []>} : vector<96x16xbf16>, vector<16x16xbf16>, vector<96x16xf32> -> vector<96x16xf32>
    %203 = arith.addf %197, %202 : vector<96x16xf32>
    %c33 = arith.constant 33 : index
    %c0_119 = arith.constant 0 : index
    %204 = vector.load %arg8[%c33, %c0_119] : memref<160x16xf32, #tpu.memory_space<vmem>>, vector<96x16xf32>
    %205 = arith.truncf %204 : vector<96x16xf32> to vector<96x16xbf16>
    %c14 = arith.constant 14 : index
    %c0_120 = arith.constant 0 : index
    %c0_121 = arith.constant 0 : index
    %206 = vector.load %arg3[%c14, %c0_120, %c0_121] : memref<27x16x16xbf16, #tpu.memory_space<vmem>>, vector<1x16x16xbf16>
    %207 = vector.shape_cast %206 : vector<1x16x16xbf16> to vector<16x16xbf16>
    %cst_122 = arith.constant dense<0.000000e+00> : vector<96x16xf32>
    %208 = tpu.matmul %205, %207, %cst_122 {dimension_numbers = #tpu.dot_dimension_numbers<[1], [0], [0], [1], [0, 0, 1, 1], [], []>} : vector<96x16xbf16>, vector<16x16xbf16>, vector<96x16xf32> -> vector<96x16xf32>
    %209 = arith.addf %203, %208 : vector<96x16xf32>
    %c43 = arith.constant 43 : index
    %c0_123 = arith.constant 0 : index
    %210 = vector.load %arg8[%c43, %c0_123] : memref<160x16xf32, #tpu.memory_space<vmem>>, vector<96x16xf32>
    %211 = arith.truncf %210 : vector<96x16xf32> to vector<96x16xbf16>
    %c15 = arith.constant 15 : index
    %c0_124 = arith.constant 0 : index
    %c0_125 = arith.constant 0 : index
    %212 = vector.load %arg3[%c15, %c0_124, %c0_125] : memref<27x16x16xbf16, #tpu.memory_space<vmem>>, vector<1x16x16xbf16>
    %213 = vector.shape_cast %212 : vector<1x16x16xbf16> to vector<16x16xbf16>
    %cst_126 = arith.constant dense<0.000000e+00> : vector<96x16xf32>
    %214 = tpu.matmul %211, %213, %cst_126 {dimension_numbers = #tpu.dot_dimension_numbers<[1], [0], [0], [1], [0, 0, 1, 1], [], []>} : vector<96x16xbf16>, vector<16x16xbf16>, vector<96x16xf32> -> vector<96x16xf32>
    %215 = arith.addf %209, %214 : vector<96x16xf32>
    %c44_127 = arith.constant 44 : index
    %c0_128 = arith.constant 0 : index
    %216 = vector.load %arg8[%c44_127, %c0_128] : memref<160x16xf32, #tpu.memory_space<vmem>>, vector<96x16xf32>
    %217 = arith.truncf %216 : vector<96x16xf32> to vector<96x16xbf16>
    %c16 = arith.constant 16 : index
    %c0_129 = arith.constant 0 : index
    %c0_130 = arith.constant 0 : index
    %218 = vector.load %arg3[%c16, %c0_129, %c0_130] : memref<27x16x16xbf16, #tpu.memory_space<vmem>>, vector<1x16x16xbf16>
    %219 = vector.shape_cast %218 : vector<1x16x16xbf16> to vector<16x16xbf16>
    %cst_131 = arith.constant dense<0.000000e+00> : vector<96x16xf32>
    %220 = tpu.matmul %217, %219, %cst_131 {dimension_numbers = #tpu.dot_dimension_numbers<[1], [0], [0], [1], [0, 0, 1, 1], [], []>} : vector<96x16xbf16>, vector<16x16xbf16>, vector<96x16xf32> -> vector<96x16xf32>
    %221 = arith.addf %215, %220 : vector<96x16xf32>
    %c45 = arith.constant 45 : index
    %c0_132 = arith.constant 0 : index
    %222 = vector.load %arg8[%c45, %c0_132] : memref<160x16xf32, #tpu.memory_space<vmem>>, vector<96x16xf32>
    %223 = arith.truncf %222 : vector<96x16xf32> to vector<96x16xbf16>
    %c17 = arith.constant 17 : index
    %c0_133 = arith.constant 0 : index
    %c0_134 = arith.constant 0 : index
    %224 = vector.load %arg3[%c17, %c0_133, %c0_134] : memref<27x16x16xbf16, #tpu.memory_space<vmem>>, vector<1x16x16xbf16>
    %225 = vector.shape_cast %224 : vector<1x16x16xbf16> to vector<16x16xbf16>
    %cst_135 = arith.constant dense<0.000000e+00> : vector<96x16xf32>
    %226 = tpu.matmul %223, %225, %cst_135 {dimension_numbers = #tpu.dot_dimension_numbers<[1], [0], [0], [1], [0, 0, 1, 1], [], []>} : vector<96x16xbf16>, vector<16x16xbf16>, vector<96x16xf32> -> vector<96x16xf32>
    %227 = arith.addf %221, %226 : vector<96x16xf32>
    %228 = vector.extract_strided_slice %22 {offsets = [1, 0], sizes = [1, 16], strides = [1, 1]} : vector<4x16xf32> to vector<1x16xf32>
    %229 = vector.broadcast %228 : vector<1x16xf32> to vector<96x16xf32>
    %230 = arith.addf %227, %229 : vector<96x16xf32>
    %cst_136 = arith.constant 0.000000e+00 : f32
    %231 = vector.broadcast %cst_136 : f32 to vector<96x16xf32>
    %232 = arith.maximumf %230, %231 : vector<96x16xf32>
    %cst_137 = arith.constant 0.000000e+00 : f32
    %233 = vector.broadcast %cst_137 : f32 to vector<96x16xf32>
    %234 = arith.select %21, %232, %233 : vector<96x16xi1>, vector<96x16xf32>
    %cst_138 = arith.constant dense<0.000000e+00> : vector<16xf32>
    %235 = vector.multi_reduction <add>, %234, %cst_138 [0] : vector<96x16xf32> to vector<16xf32>
    %236 = vector.shape_cast %235 : vector<16xf32> to vector<1x16xf32>
    %cst_139 = arith.constant 6.400000e+01 : f32
    %237 = vector.broadcast %cst_139 : f32 to vector<1x16xf32>
    %238 = arith.divf %236, %237 : vector<1x16xf32>
    %239 = vector.broadcast %238 : vector<1x16xf32> to vector<96x16xf32>
    %240 = arith.subf %232, %239 : vector<96x16xf32>
    %cst_140 = arith.constant 0.000000e+00 : f32
    %241 = vector.broadcast %cst_140 : f32 to vector<96x16xf32>
    %242 = arith.select %21, %240, %241 : vector<96x16xi1>, vector<96x16xf32>
    %243 = arith.mulf %242, %242 : vector<96x16xf32>
    %cst_141 = arith.constant dense<0.000000e+00> : vector<16xf32>
    %244 = vector.multi_reduction <add>, %243, %cst_141 [0] : vector<96x16xf32> to vector<16xf32>
    %245 = vector.shape_cast %244 : vector<16xf32> to vector<1x16xf32>
    %cst_142 = arith.constant 6.400000e+01 : f32
    %246 = vector.broadcast %cst_142 : f32 to vector<1x16xf32>
    %247 = arith.divf %245, %246 : vector<1x16xf32>
    %248 = vector.broadcast %238 : vector<1x16xf32> to vector<96x16xf32>
    %249 = arith.subf %232, %248 : vector<96x16xf32>
    %cst_143 = arith.constant 9.99999974E-6 : f32
    %250 = vector.broadcast %cst_143 : f32 to vector<1x16xf32>
    %251 = arith.addf %247, %250 : vector<1x16xf32>
    %252 = math.rsqrt %251 : vector<1x16xf32>
    %253 = vector.broadcast %252 : vector<1x16xf32> to vector<96x16xf32>
    %254 = arith.mulf %249, %253 : vector<96x16xf32>
    %c32_144 = arith.constant 32 : index
    %c0_145 = arith.constant 0 : index
    %255 = vector.load %arg8[%c32_144, %c0_145] : memref<160x16xf32, #tpu.memory_space<vmem>>, vector<96x16xf32>
    tpu.vector_store %arg8[%c32_144, %c0_145], %254 {strides = array<i32>} : memref<160x16xf32, #tpu.memory_space<vmem>>, vector<96x16xf32>,
    %256 = vector.extract_strided_slice %254 {offsets = [2, 0], sizes = [1, 16], strides = [1, 1]} : vector<96x16xf32> to vector<1x16xf32>
    %257 = vector.extract_strided_slice %254 {offsets = [9, 0], sizes = [1, 16], strides = [1, 1]} : vector<96x16xf32> to vector<1x16xf32>
    %258 = tpu.concatenate %256, %256 in 0 : vector<1x16xf32>, vector<1x16xf32> -> vector<2x16xf32>
    %c32_146 = arith.constant 32 : index
    %c0_147 = arith.constant 0 : index
    %259 = vector.load %arg8[%c32_146, %c0_147] : memref<160x16xf32, #tpu.memory_space<vmem>>, vector<2x16xf32>
    tpu.vector_store %arg8[%c32_146, %c0_147], %258 {strides = array<i32>} : memref<160x16xf32, #tpu.memory_space<vmem>>, vector<2x16xf32>,
    %260 = tpu.concatenate %257, %257 in 0 : vector<1x16xf32>, vector<1x16xf32> -> vector<2x16xf32>
    %c42_148 = arith.constant 42 : index
    %c0_149 = arith.constant 0 : index
    %261 = vector.load %arg8[%c42_148, %c0_149] : memref<160x16xf32, #tpu.memory_space<vmem>>, vector<2x16xf32>
    tpu.vector_store %arg8[%c42_148, %c0_149], %260 {strides = array<i32>} : memref<160x16xf32, #tpu.memory_space<vmem>>, vector<2x16xf32>,
    %262 = vector.extract_strided_slice %254 {offsets = [14, 0], sizes = [1, 16], strides = [1, 1]} : vector<96x16xf32> to vector<1x16xf32>
    %263 = vector.extract_strided_slice %254 {offsets = [21, 0], sizes = [1, 16], strides = [1, 1]} : vector<96x16xf32> to vector<1x16xf32>
    %264 = tpu.concatenate %262, %262 in 0 : vector<1x16xf32>, vector<1x16xf32> -> vector<2x16xf32>
    %c44_150 = arith.constant 44 : index
    %c0_151 = arith.constant 0 : index
    %265 = vector.load %arg8[%c44_150, %c0_151] : memref<160x16xf32, #tpu.memory_space<vmem>>, vector<2x16xf32>
    tpu.vector_store %arg8[%c44_150, %c0_151], %264 {strides = array<i32>} : memref<160x16xf32, #tpu.memory_space<vmem>>, vector<2x16xf32>,
    %266 = tpu.concatenate %263, %263 in 0 : vector<1x16xf32>, vector<1x16xf32> -> vector<2x16xf32>
    %c54_152 = arith.constant 54 : index
    %c0_153 = arith.constant 0 : index
    %267 = vector.load %arg8[%c54_152, %c0_153] : memref<160x16xf32, #tpu.memory_space<vmem>>, vector<2x16xf32>
    tpu.vector_store %arg8[%c54_152, %c0_153], %266 {strides = array<i32>} : memref<160x16xf32, #tpu.memory_space<vmem>>, vector<2x16xf32>,
    %268 = vector.extract_strided_slice %254 {offsets = [26, 0], sizes = [1, 16], strides = [1, 1]} : vector<96x16xf32> to vector<1x16xf32>
    %269 = vector.extract_strided_slice %254 {offsets = [33, 0], sizes = [1, 16], strides = [1, 1]} : vector<96x16xf32> to vector<1x16xf32>
    %270 = tpu.concatenate %268, %268 in 0 : vector<1x16xf32>, vector<1x16xf32> -> vector<2x16xf32>
    %c56_154 = arith.constant 56 : index
    %c0_155 = arith.constant 0 : index
    %271 = vector.load %arg8[%c56_154, %c0_155] : memref<160x16xf32, #tpu.memory_space<vmem>>, vector<2x16xf32>
    tpu.vector_store %arg8[%c56_154, %c0_155], %270 {strides = array<i32>} : memref<160x16xf32, #tpu.memory_space<vmem>>, vector<2x16xf32>,
    %272 = tpu.concatenate %269, %269 in 0 : vector<1x16xf32>, vector<1x16xf32> -> vector<2x16xf32>
    %c66_156 = arith.constant 66 : index
    %c0_157 = arith.constant 0 : index
    %273 = vector.load %arg8[%c66_156, %c0_157] : memref<160x16xf32, #tpu.memory_space<vmem>>, vector<2x16xf32>
    tpu.vector_store %arg8[%c66_156, %c0_157], %272 {strides = array<i32>} : memref<160x16xf32, #tpu.memory_space<vmem>>, vector<2x16xf32>,
    %274 = vector.extract_strided_slice %254 {offsets = [38, 0], sizes = [1, 16], strides = [1, 1]} : vector<96x16xf32> to vector<1x16xf32>
    %275 = vector.extract_strided_slice %254 {offsets = [45, 0], sizes = [1, 16], strides = [1, 1]} : vector<96x16xf32> to vector<1x16xf32>
    %276 = tpu.concatenate %274, %274 in 0 : vector<1x16xf32>, vector<1x16xf32> -> vector<2x16xf32>
    %c68_158 = arith.constant 68 : index
    %c0_159 = arith.constant 0 : index
    %277 = vector.load %arg8[%c68_158, %c0_159] : memref<160x16xf32, #tpu.memory_space<vmem>>, vector<2x16xf32>
    tpu.vector_store %arg8[%c68_158, %c0_159], %276 {strides = array<i32>} : memref<160x16xf32, #tpu.memory_space<vmem>>, vector<2x16xf32>,
    %278 = tpu.concatenate %275, %275 in 0 : vector<1x16xf32>, vector<1x16xf32> -> vector<2x16xf32>
    %c78_160 = arith.constant 78 : index
    %c0_161 = arith.constant 0 : index
    %279 = vector.load %arg8[%c78_160, %c0_161] : memref<160x16xf32, #tpu.memory_space<vmem>>, vector<2x16xf32>
    tpu.vector_store %arg8[%c78_160, %c0_161], %278 {strides = array<i32>} : memref<160x16xf32, #tpu.memory_space<vmem>>, vector<2x16xf32>,
    %280 = vector.extract_strided_slice %254 {offsets = [50, 0], sizes = [1, 16], strides = [1, 1]} : vector<96x16xf32> to vector<1x16xf32>
    %281 = vector.extract_strided_slice %254 {offsets = [57, 0], sizes = [1, 16], strides = [1, 1]} : vector<96x16xf32> to vector<1x16xf32>
    %282 = tpu.concatenate %280, %280 in 0 : vector<1x16xf32>, vector<1x16xf32> -> vector<2x16xf32>
    %c80_162 = arith.constant 80 : index
    %c0_163 = arith.constant 0 : index
    %283 = vector.load %arg8[%c80_162, %c0_163] : memref<160x16xf32, #tpu.memory_space<vmem>>, vector<2x16xf32>
    tpu.vector_store %arg8[%c80_162, %c0_163], %282 {strides = array<i32>} : memref<160x16xf32, #tpu.memory_space<vmem>>, vector<2x16xf32>,
    %284 = tpu.concatenate %281, %281 in 0 : vector<1x16xf32>, vector<1x16xf32> -> vector<2x16xf32>
    %c90_164 = arith.constant 90 : index
    %c0_165 = arith.constant 0 : index
    %285 = vector.load %arg8[%c90_164, %c0_165] : memref<160x16xf32, #tpu.memory_space<vmem>>, vector<2x16xf32>
    tpu.vector_store %arg8[%c90_164, %c0_165], %284 {strides = array<i32>} : memref<160x16xf32, #tpu.memory_space<vmem>>, vector<2x16xf32>,
    %286 = vector.extract_strided_slice %254 {offsets = [62, 0], sizes = [1, 16], strides = [1, 1]} : vector<96x16xf32> to vector<1x16xf32>
    %287 = vector.extract_strided_slice %254 {offsets = [69, 0], sizes = [1, 16], strides = [1, 1]} : vector<96x16xf32> to vector<1x16xf32>
    %288 = tpu.concatenate %286, %286 in 0 : vector<1x16xf32>, vector<1x16xf32> -> vector<2x16xf32>
    %c92_166 = arith.constant 92 : index
    %c0_167 = arith.constant 0 : index
    %289 = vector.load %arg8[%c92_166, %c0_167] : memref<160x16xf32, #tpu.memory_space<vmem>>, vector<2x16xf32>
    tpu.vector_store %arg8[%c92_166, %c0_167], %288 {strides = array<i32>} : memref<160x16xf32, #tpu.memory_space<vmem>>, vector<2x16xf32>,
    %290 = tpu.concatenate %287, %287 in 0 : vector<1x16xf32>, vector<1x16xf32> -> vector<2x16xf32>
    %c102_168 = arith.constant 102 : index
    %c0_169 = arith.constant 0 : index
    %291 = vector.load %arg8[%c102_168, %c0_169] : memref<160x16xf32, #tpu.memory_space<vmem>>, vector<2x16xf32>
    tpu.vector_store %arg8[%c102_168, %c0_169], %290 {strides = array<i32>} : memref<160x16xf32, #tpu.memory_space<vmem>>, vector<2x16xf32>,
    %292 = vector.extract_strided_slice %254 {offsets = [74, 0], sizes = [1, 16], strides = [1, 1]} : vector<96x16xf32> to vector<1x16xf32>
    %293 = vector.extract_strided_slice %254 {offsets = [81, 0], sizes = [1, 16], strides = [1, 1]} : vector<96x16xf32> to vector<1x16xf32>
    %294 = tpu.concatenate %292, %292 in 0 : vector<1x16xf32>, vector<1x16xf32> -> vector<2x16xf32>
    %c104_170 = arith.constant 104 : index
    %c0_171 = arith.constant 0 : index
    %295 = vector.load %arg8[%c104_170, %c0_171] : memref<160x16xf32, #tpu.memory_space<vmem>>, vector<2x16xf32>
    tpu.vector_store %arg8[%c104_170, %c0_171], %294 {strides = array<i32>} : memref<160x16xf32, #tpu.memory_space<vmem>>, vector<2x16xf32>,
    %296 = tpu.concatenate %293, %293 in 0 : vector<1x16xf32>, vector<1x16xf32> -> vector<2x16xf32>
    %c114_172 = arith.constant 114 : index
    %c0_173 = arith.constant 0 : index
    %297 = vector.load %arg8[%c114_172, %c0_173] : memref<160x16xf32, #tpu.memory_space<vmem>>, vector<2x16xf32>
    tpu.vector_store %arg8[%c114_172, %c0_173], %296 {strides = array<i32>} : memref<160x16xf32, #tpu.memory_space<vmem>>, vector<2x16xf32>,
    %298 = vector.extract_strided_slice %254 {offsets = [86, 0], sizes = [1, 16], strides = [1, 1]} : vector<96x16xf32> to vector<1x16xf32>
    %299 = vector.extract_strided_slice %254 {offsets = [93, 0], sizes = [1, 16], strides = [1, 1]} : vector<96x16xf32> to vector<1x16xf32>
    %300 = tpu.concatenate %298, %298 in 0 : vector<1x16xf32>, vector<1x16xf32> -> vector<2x16xf32>
    %c116_174 = arith.constant 116 : index
    %c0_175 = arith.constant 0 : index
    %301 = vector.load %arg8[%c116_174, %c0_175] : memref<160x16xf32, #tpu.memory_space<vmem>>, vector<2x16xf32>
    tpu.vector_store %arg8[%c116_174, %c0_175], %300 {strides = array<i32>} : memref<160x16xf32, #tpu.memory_space<vmem>>, vector<2x16xf32>,
    %302 = tpu.concatenate %299, %299 in 0 : vector<1x16xf32>, vector<1x16xf32> -> vector<2x16xf32>
    %c126_176 = arith.constant 126 : index
    %c0_177 = arith.constant 0 : index
    %303 = vector.load %arg8[%c126_176, %c0_177] : memref<160x16xf32, #tpu.memory_space<vmem>>, vector<2x16xf32>
    tpu.vector_store %arg8[%c126_176, %c0_177], %302 {strides = array<i32>} : memref<160x16xf32, #tpu.memory_space<vmem>>, vector<2x16xf32>,
    %c32_178 = arith.constant 32 : index
    %c0_179 = arith.constant 0 : index
    %304 = vector.load %arg8[%c32_178, %c0_179] : memref<160x16xf32, #tpu.memory_space<vmem>>, vector<12x16xf32>
    %c8_180 = arith.constant 8 : index
    %c0_181 = arith.constant 0 : index
    %305 = vector.load %arg8[%c8_180, %c0_181] : memref<160x16xf32, #tpu.memory_space<vmem>>, vector<12x16xf32>
    tpu.vector_store %arg8[%c8_180, %c0_181], %304 {strides = array<i32>} : memref<160x16xf32, #tpu.memory_space<vmem>>, vector<12x16xf32>,
    %c20_182 = arith.constant 20 : index
    %c0_183 = arith.constant 0 : index
    %306 = vector.load %arg8[%c20_182, %c0_183] : memref<160x16xf32, #tpu.memory_space<vmem>>, vector<12x16xf32>
    tpu.vector_store %arg8[%c20_182, %c0_183], %304 {strides = array<i32>} : memref<160x16xf32, #tpu.memory_space<vmem>>, vector<12x16xf32>,
    %c116_184 = arith.constant 116 : index
    %c0_185 = arith.constant 0 : index
    %307 = vector.load %arg8[%c116_184, %c0_185] : memref<160x16xf32, #tpu.memory_space<vmem>>, vector<12x16xf32>
    %c128_186 = arith.constant 128 : index
    %c0_187 = arith.constant 0 : index
    %308 = vector.load %arg8[%c128_186, %c0_187] : memref<160x16xf32, #tpu.memory_space<vmem>>, vector<12x16xf32>
    tpu.vector_store %arg8[%c128_186, %c0_187], %307 {strides = array<i32>} : memref<160x16xf32, #tpu.memory_space<vmem>>, vector<12x16xf32>,
    %c140_188 = arith.constant 140 : index
    %c0_189 = arith.constant 0 : index
    %309 = vector.load %arg8[%c140_188, %c0_189] : memref<160x16xf32, #tpu.memory_space<vmem>>, vector<12x16xf32>
    tpu.vector_store %arg8[%c140_188, %c0_189], %307 {strides = array<i32>} : memref<160x16xf32, #tpu.memory_space<vmem>>, vector<12x16xf32>,
    %cst_190 = arith.constant 0.000000e+00 : f32
    %310 = vector.broadcast %cst_190 : f32 to vector<96x16xf32>
    %c6_191 = arith.constant 6 : index
    %c0_192 = arith.constant 0 : index
    %311 = vector.load %arg8[%c6_191, %c0_192] : memref<160x16xf32, #tpu.memory_space<vmem>>, vector<96x16xf32>
    %312 = arith.truncf %311 : vector<96x16xf32> to vector<96x16xbf16>
    %c18 = arith.constant 18 : index
    %c0_193 = arith.constant 0 : index
    %c0_194 = arith.constant 0 : index
    %313 = vector.load %arg3[%c18, %c0_193, %c0_194] : memref<27x16x16xbf16, #tpu.memory_space<vmem>>, vector<1x16x16xbf16>
    %314 = vector.shape_cast %313 : vector<1x16x16xbf16> to vector<16x16xbf16>
    %cst_195 = arith.constant dense<0.000000e+00> : vector<96x16xf32>
    %315 = tpu.matmul %312, %314, %cst_195 {dimension_numbers = #tpu.dot_dimension_numbers<[1], [0], [0], [1], [0, 0, 1, 1], [], []>} : vector<96x16xbf16>, vector<16x16xbf16>, vector<96x16xf32> -> vector<96x16xf32>
    %316 = arith.addf %310, %315 : vector<96x16xf32>
    %c8_196 = arith.constant 8 : index
    %c0_197 = arith.constant 0 : index
    %317 = vector.load %arg8[%c8_196, %c0_197] : memref<160x16xf32, #tpu.memory_space<vmem>>, vector<96x16xf32>
    %318 = arith.truncf %317 : vector<96x16xf32> to vector<96x16xbf16>
    %c19_198 = arith.constant 19 : index
    %c0_199 = arith.constant 0 : index
    %c0_200 = arith.constant 0 : index
    %319 = vector.load %arg3[%c19_198, %c0_199, %c0_200] : memref<27x16x16xbf16, #tpu.memory_space<vmem>>, vector<1x16x16xbf16>
    %320 = vector.shape_cast %319 : vector<1x16x16xbf16> to vector<16x16xbf16>
    %cst_201 = arith.constant dense<0.000000e+00> : vector<96x16xf32>
    %321 = tpu.matmul %318, %320, %cst_201 {dimension_numbers = #tpu.dot_dimension_numbers<[1], [0], [0], [1], [0, 0, 1, 1], [], []>} : vector<96x16xbf16>, vector<16x16xbf16>, vector<96x16xf32> -> vector<96x16xf32>
    %322 = arith.addf %316, %321 : vector<96x16xf32>
    %c10_202 = arith.constant 10 : index
    %c0_203 = arith.constant 0 : index
    %323 = vector.load %arg8[%c10_202, %c0_203] : memref<160x16xf32, #tpu.memory_space<vmem>>, vector<96x16xf32>
    %324 = arith.truncf %323 : vector<96x16xf32> to vector<96x16xbf16>
    %c20_204 = arith.constant 20 : index
    %c0_205 = arith.constant 0 : index
    %c0_206 = arith.constant 0 : index
    %325 = vector.load %arg3[%c20_204, %c0_205, %c0_206] : memref<27x16x16xbf16, #tpu.memory_space<vmem>>, vector<1x16x16xbf16>
    %326 = vector.shape_cast %325 : vector<1x16x16xbf16> to vector<16x16xbf16>
    %cst_207 = arith.constant dense<0.000000e+00> : vector<96x16xf32>
    %327 = tpu.matmul %324, %326, %cst_207 {dimension_numbers = #tpu.dot_dimension_numbers<[1], [0], [0], [1], [0, 0, 1, 1], [], []>} : vector<96x16xbf16>, vector<16x16xbf16>, vector<96x16xf32> -> vector<96x16xf32>
    %328 = arith.addf %322, %327 : vector<96x16xf32>
    %c30_208 = arith.constant 30 : index
    %c0_209 = arith.constant 0 : index
    %329 = vector.load %arg8[%c30_208, %c0_209] : memref<160x16xf32, #tpu.memory_space<vmem>>, vector<96x16xf32>
    %330 = arith.truncf %329 : vector<96x16xf32> to vector<96x16xbf16>
    %c21_210 = arith.constant 21 : index
    %c0_211 = arith.constant 0 : index
    %c0_212 = arith.constant 0 : index
    %331 = vector.load %arg3[%c21_210, %c0_211, %c0_212] : memref<27x16x16xbf16, #tpu.memory_space<vmem>>, vector<1x16x16xbf16>
    %332 = vector.shape_cast %331 : vector<1x16x16xbf16> to vector<16x16xbf16>
    %cst_213 = arith.constant dense<0.000000e+00> : vector<96x16xf32>
    %333 = tpu.matmul %330, %332, %cst_213 {dimension_numbers = #tpu.dot_dimension_numbers<[1], [0], [0], [1], [0, 0, 1, 1], [], []>} : vector<96x16xbf16>, vector<16x16xbf16>, vector<96x16xf32> -> vector<96x16xf32>
    %334 = arith.addf %328, %333 : vector<96x16xf32>
    %c32_214 = arith.constant 32 : index
    %c0_215 = arith.constant 0 : index
    %335 = vector.load %arg8[%c32_214, %c0_215] : memref<160x16xf32, #tpu.memory_space<vmem>>, vector<96x16xf32>
    %336 = arith.truncf %335 : vector<96x16xf32> to vector<96x16xbf16>
    %c22 = arith.constant 22 : index
    %c0_216 = arith.constant 0 : index
    %c0_217 = arith.constant 0 : index
    %337 = vector.load %arg3[%c22, %c0_216, %c0_217] : memref<27x16x16xbf16, #tpu.memory_space<vmem>>, vector<1x16x16xbf16>
    %338 = vector.shape_cast %337 : vector<1x16x16xbf16> to vector<16x16xbf16>
    %cst_218 = arith.constant dense<0.000000e+00> : vector<96x16xf32>
    %339 = tpu.matmul %336, %338, %cst_218 {dimension_numbers = #tpu.dot_dimension_numbers<[1], [0], [0], [1], [0, 0, 1, 1], [], []>} : vector<96x16xbf16>, vector<16x16xbf16>, vector<96x16xf32> -> vector<96x16xf32>
    %340 = arith.addf %334, %339 : vector<96x16xf32>
    %c34_219 = arith.constant 34 : index
    %c0_220 = arith.constant 0 : index
    %341 = vector.load %arg8[%c34_219, %c0_220] : memref<160x16xf32, #tpu.memory_space<vmem>>, vector<96x16xf32>
    %342 = arith.truncf %341 : vector<96x16xf32> to vector<96x16xbf16>
    %c23 = arith.constant 23 : index
    %c0_221 = arith.constant 0 : index
    %c0_222 = arith.constant 0 : index
    %343 = vector.load %arg3[%c23, %c0_221, %c0_222] : memref<27x16x16xbf16, #tpu.memory_space<vmem>>, vector<1x16x16xbf16>
    %344 = vector.shape_cast %343 : vector<1x16x16xbf16> to vector<16x16xbf16>
    %cst_223 = arith.constant dense<0.000000e+00> : vector<96x16xf32>
    %345 = tpu.matmul %342, %344, %cst_223 {dimension_numbers = #tpu.dot_dimension_numbers<[1], [0], [0], [1], [0, 0, 1, 1], [], []>} : vector<96x16xbf16>, vector<16x16xbf16>, vector<96x16xf32> -> vector<96x16xf32>
    %346 = arith.addf %340, %345 : vector<96x16xf32>
    %c54_224 = arith.constant 54 : index
    %c0_225 = arith.constant 0 : index
    %347 = vector.load %arg8[%c54_224, %c0_225] : memref<160x16xf32, #tpu.memory_space<vmem>>, vector<96x16xf32>
    %348 = arith.truncf %347 : vector<96x16xf32> to vector<96x16xbf16>
    %c24 = arith.constant 24 : index
    %c0_226 = arith.constant 0 : index
    %c0_227 = arith.constant 0 : index
    %349 = vector.load %arg3[%c24, %c0_226, %c0_227] : memref<27x16x16xbf16, #tpu.memory_space<vmem>>, vector<1x16x16xbf16>
    %350 = vector.shape_cast %349 : vector<1x16x16xbf16> to vector<16x16xbf16>
    %cst_228 = arith.constant dense<0.000000e+00> : vector<96x16xf32>
    %351 = tpu.matmul %348, %350, %cst_228 {dimension_numbers = #tpu.dot_dimension_numbers<[1], [0], [0], [1], [0, 0, 1, 1], [], []>} : vector<96x16xbf16>, vector<16x16xbf16>, vector<96x16xf32> -> vector<96x16xf32>
    %352 = arith.addf %346, %351 : vector<96x16xf32>
    %c56_229 = arith.constant 56 : index
    %c0_230 = arith.constant 0 : index
    %353 = vector.load %arg8[%c56_229, %c0_230] : memref<160x16xf32, #tpu.memory_space<vmem>>, vector<96x16xf32>
    %354 = arith.truncf %353 : vector<96x16xf32> to vector<96x16xbf16>
    %c25 = arith.constant 25 : index
    %c0_231 = arith.constant 0 : index
    %c0_232 = arith.constant 0 : index
    %355 = vector.load %arg3[%c25, %c0_231, %c0_232] : memref<27x16x16xbf16, #tpu.memory_space<vmem>>, vector<1x16x16xbf16>
    %356 = vector.shape_cast %355 : vector<1x16x16xbf16> to vector<16x16xbf16>
    %cst_233 = arith.constant dense<0.000000e+00> : vector<96x16xf32>
    %357 = tpu.matmul %354, %356, %cst_233 {dimension_numbers = #tpu.dot_dimension_numbers<[1], [0], [0], [1], [0, 0, 1, 1], [], []>} : vector<96x16xbf16>, vector<16x16xbf16>, vector<96x16xf32> -> vector<96x16xf32>
    %358 = arith.addf %352, %357 : vector<96x16xf32>
    %c58_234 = arith.constant 58 : index
    %c0_235 = arith.constant 0 : index
    %359 = vector.load %arg8[%c58_234, %c0_235] : memref<160x16xf32, #tpu.memory_space<vmem>>, vector<96x16xf32>
    %360 = arith.truncf %359 : vector<96x16xf32> to vector<96x16xbf16>
    %c26 = arith.constant 26 : index
    %c0_236 = arith.constant 0 : index
    %c0_237 = arith.constant 0 : index
    %361 = vector.load %arg3[%c26, %c0_236, %c0_237] : memref<27x16x16xbf16, #tpu.memory_space<vmem>>, vector<1x16x16xbf16>
    %362 = vector.shape_cast %361 : vector<1x16x16xbf16> to vector<16x16xbf16>
    %cst_238 = arith.constant dense<0.000000e+00> : vector<96x16xf32>
    %363 = tpu.matmul %360, %362, %cst_238 {dimension_numbers = #tpu.dot_dimension_numbers<[1], [0], [0], [1], [0, 0, 1, 1], [], []>} : vector<96x16xbf16>, vector<16x16xbf16>, vector<96x16xf32> -> vector<96x16xf32>
    %364 = arith.addf %358, %363 : vector<96x16xf32>
    %365 = vector.extract_strided_slice %22 {offsets = [2, 0], sizes = [1, 16], strides = [1, 1]} : vector<4x16xf32> to vector<1x16xf32>
    %366 = vector.broadcast %365 : vector<1x16xf32> to vector<96x16xf32>
    %367 = arith.addf %364, %366 : vector<96x16xf32>
    %cst_239 = arith.constant 0.000000e+00 : f32
    %368 = vector.broadcast %cst_239 : f32 to vector<96x16xf32>
    %369 = arith.maximumf %367, %368 : vector<96x16xf32>
    %cst_240 = arith.constant 0.000000e+00 : f32
    %370 = vector.broadcast %cst_240 : f32 to vector<96x16xf32>
    %371 = arith.select %21, %369, %370 : vector<96x16xi1>, vector<96x16xf32>
    %cst_241 = arith.constant dense<0.000000e+00> : vector<16xf32>
    %372 = vector.multi_reduction <add>, %371, %cst_241 [0] : vector<96x16xf32> to vector<16xf32>
    %373 = vector.shape_cast %372 : vector<16xf32> to vector<1x16xf32>
    %cst_242 = arith.constant 6.400000e+01 : f32
    %374 = vector.broadcast %cst_242 : f32 to vector<1x16xf32>
    %375 = arith.divf %373, %374 : vector<1x16xf32>
    %376 = vector.broadcast %375 : vector<1x16xf32> to vector<96x16xf32>
    %377 = arith.subf %369, %376 : vector<96x16xf32>
    %cst_243 = arith.constant 0.000000e+00 : f32
    %378 = vector.broadcast %cst_243 : f32 to vector<96x16xf32>
    %379 = arith.select %21, %377, %378 : vector<96x16xi1>, vector<96x16xf32>
    %380 = arith.mulf %379, %379 : vector<96x16xf32>
    %cst_244 = arith.constant dense<0.000000e+00> : vector<16xf32>
    %381 = vector.multi_reduction <add>, %380, %cst_244 [0] : vector<96x16xf32> to vector<16xf32>
    %382 = vector.shape_cast %381 : vector<16xf32> to vector<1x16xf32>
    %cst_245 = arith.constant 6.400000e+01 : f32
    %383 = vector.broadcast %cst_245 : f32 to vector<1x16xf32>
    %384 = arith.divf %382, %383 : vector<1x16xf32>
    %385 = vector.broadcast %375 : vector<1x16xf32> to vector<96x16xf32>
    %386 = arith.subf %369, %385 : vector<96x16xf32>
    %cst_246 = arith.constant 9.99999974E-6 : f32
    %387 = vector.broadcast %cst_246 : f32 to vector<1x16xf32>
    %388 = arith.addf %384, %387 : vector<1x16xf32>
    %389 = math.rsqrt %388 : vector<1x16xf32>
    %390 = vector.broadcast %389 : vector<1x16xf32> to vector<96x16xf32>
    %391 = arith.mulf %386, %390 : vector<96x16xf32>
    %c0_247 = arith.constant 0 : index
    %c32_248 = arith.constant 32 : index
    %c0_249 = arith.constant 0 : index
    %392 = vector.load %arg1[%c0_247, %c32_248, %c0_249] : memref<1x160x16xf32, #tpu.memory_space<vmem>>, vector<1x96x16xf32>
    %393 = vector.shape_cast %392 : vector<1x96x16xf32> to vector<96x16xf32>
    %c0_250 = arith.constant 0 : index
    %c0_251 = arith.constant 0 : index
    %c0_252 = arith.constant 0 : index
    %394 = vector.load %arg2[%c0_250, %c0_251, %c0_252] : memref<1x96x32xbf16, #tpu.memory_space<vmem>>, vector<1x96x32xbf16>
    %395 = vector.shape_cast %394 : vector<1x96x32xbf16> to vector<96x32xbf16>
    %396 = arith.truncf %391 : vector<96x16xf32> to vector<96x16xbf16>
    %c0_253 = arith.constant 0 : index
    %c0_254 = arith.constant 0 : index
    %397 = vector.load %arg4[%c0_253, %c0_254] : memref<16x16xbf16, #tpu.memory_space<vmem>>, vector<16x16xbf16>
    %cst_255 = arith.constant dense<0.000000e+00> : vector<96x16xf32>
    %398 = tpu.matmul %396, %397, %cst_255 {dimension_numbers = #tpu.dot_dimension_numbers<[1], [0], [0], [1], [0, 0, 1, 1], [], []>} : vector<96x16xbf16>, vector<16x16xbf16>, vector<96x16xf32> -> vector<96x16xf32>
    %c0_256 = arith.constant 0 : index
    %c0_257 = arith.constant 0 : index
    %399 = vector.load %arg5[%c0_256, %c0_257] : memref<32x16xbf16, #tpu.memory_space<vmem>>, vector<32x16xbf16>
    %cst_258 = arith.constant dense<0.000000e+00> : vector<96x16xf32>
    %400 = tpu.matmul %395, %399, %cst_258 {dimension_numbers = #tpu.dot_dimension_numbers<[1], [0], [0], [1], [0, 0, 1, 1], [], []>} : vector<96x32xbf16>, vector<32x16xbf16>, vector<96x16xf32> -> vector<96x16xf32>
    %401 = arith.addf %398, %400 : vector<96x16xf32>
    %402 = vector.extract_strided_slice %22 {offsets = [3, 0], sizes = [1, 16], strides = [1, 1]} : vector<4x16xf32> to vector<1x16xf32>
    %403 = vector.broadcast %402 : vector<1x16xf32> to vector<96x16xf32>
    %404 = arith.addf %401, %403 : vector<96x16xf32>
    %405 = arith.addf %404, %393 : vector<96x16xf32>
    %cst_259 = arith.constant 0.000000e+00 : f32
    %406 = vector.broadcast %cst_259 : f32 to vector<96x16xf32>
    %407 = arith.select %21, %405, %406 : vector<96x16xi1>, vector<96x16xf32>
    %cst_260 = arith.constant dense<0.000000e+00> : vector<16xf32>
    %408 = vector.multi_reduction <add>, %407, %cst_260 [0] : vector<96x16xf32> to vector<16xf32>
    %409 = vector.shape_cast %408 : vector<16xf32> to vector<1x16xf32>
    %cst_261 = arith.constant 6.400000e+01 : f32
    %410 = vector.broadcast %cst_261 : f32 to vector<1x16xf32>
    %411 = arith.divf %409, %410 : vector<1x16xf32>
    %412 = vector.broadcast %411 : vector<1x16xf32> to vector<96x16xf32>
    %413 = arith.subf %405, %412 : vector<96x16xf32>
    %cst_262 = arith.constant 0.000000e+00 : f32
    %414 = vector.broadcast %cst_262 : f32 to vector<96x16xf32>
    %415 = arith.select %21, %413, %414 : vector<96x16xi1>, vector<96x16xf32>
    %416 = arith.mulf %415, %415 : vector<96x16xf32>
    %cst_263 = arith.constant dense<0.000000e+00> : vector<16xf32>
    %417 = vector.multi_reduction <add>, %416, %cst_263 [0] : vector<96x16xf32> to vector<16xf32>
    %418 = vector.shape_cast %417 : vector<16xf32> to vector<1x16xf32>
    %cst_264 = arith.constant 6.400000e+01 : f32
    %419 = vector.broadcast %cst_264 : f32 to vector<1x16xf32>
    %420 = arith.divf %418, %419 : vector<1x16xf32>
    %421 = vector.broadcast %411 : vector<1x16xf32> to vector<96x16xf32>
    %422 = arith.subf %405, %421 : vector<96x16xf32>
    %cst_265 = arith.constant 9.99999974E-6 : f32
    %423 = vector.broadcast %cst_265 : f32 to vector<1x16xf32>
    %424 = arith.addf %420, %423 : vector<1x16xf32>
    %425 = math.rsqrt %424 : vector<1x16xf32>
    %426 = vector.broadcast %425 : vector<1x16xf32> to vector<96x16xf32>
    %427 = arith.mulf %422, %426 : vector<96x16xf32>
    %c0_266 = arith.constant 0 : index
    %c0_267 = arith.constant 0 : index
    %c0_268 = arith.constant 0 : index
    %428 = vector.load %arg7[%c0_266, %c0_267, %c0_268] : memref<1x96x16xf32, #tpu.memory_space<vmem>>, vector<1x96x16xf32>
    %429 = vector.shape_cast %428 : vector<1x96x16xf32> to vector<96x16xf32>
    %430 = vector.shape_cast %427 : vector<96x16xf32> to vector<1x96x16xf32>
    tpu.vector_store %arg7[%c0_266, %c0_267, %c0_268], %430 {strides = array<i32>} : memref<1x96x16xf32, #tpu.memory_space<vmem>>, vector<1x96x16xf32>,
    return
  }
  func.func @transform_0(%arg0: i32) -> (i32, i32, i32) {
    %c0_i32 = arith.constant 0 : i32
    %c0_i32_0 = arith.constant 0 : i32
    %c0_i32_1 = arith.constant 0 : i32
    return %arg0, %c0_i32, %c0_i32_0 : i32, i32, i32
  }
  func.func @transform_1(%arg0: i32) -> (i32, i32, i32) {
    %c0_i32 = arith.constant 0 : i32
    %c0_i32_0 = arith.constant 0 : i32
    %c0_i32_1 = arith.constant 0 : i32
    return %arg0, %c0_i32, %c0_i32_0 : i32, i32, i32
  }
  func.func @transform_2(%arg0: i32) -> (i32, i32, i32) {
    %c0_i32 = arith.constant 0 : i32
    %c0_i32_0 = arith.constant 0 : i32
    %c0_i32_1 = arith.constant 0 : i32
    %c0_i32_2 = arith.constant 0 : i32
    return %c0_i32, %c0_i32_0, %c0_i32_1 : i32, i32, i32
  }
  func.func @transform_3(%arg0: i32) -> (i32, i32) {
    %c0_i32 = arith.constant 0 : i32
    %c0_i32_0 = arith.constant 0 : i32
    %c0_i32_1 = arith.constant 0 : i32
    return %c0_i32, %c0_i32_0 : i32, i32
  }
  func.func @transform_4(%arg0: i32) -> (i32, i32) {
    %c0_i32 = arith.constant 0 : i32
    %c0_i32_0 = arith.constant 0 : i32
    %c0_i32_1 = arith.constant 0 : i32
    return %c0_i32, %c0_i32_0 : i32, i32
  }
  func.func @transform_5(%arg0: i32) -> (i32, i32) {
    %c0_i32 = arith.constant 0 : i32
    %c0_i32_0 = arith.constant 0 : i32
    %c0_i32_1 = arith.constant 0 : i32
    return %c0_i32, %c0_i32_0 : i32, i32
  }
  func.func @transform_6(%arg0: i32) -> (i32, i32, i32) {
    %c0_i32 = arith.constant 0 : i32
    %c0_i32_0 = arith.constant 0 : i32
    %c0_i32_1 = arith.constant 0 : i32
    return %arg0, %c0_i32, %c0_i32_0 : i32, i32, i32
  }
}

</mosaic_0001>

<bundles_post_ra>
// kernel: vc_layer_forward.2
= control target key start
LH: loop header
LB: loop body
LE: loop exit
PB: predicated region body
PF: predicated region fallthrough
CT: control target
= control target key end

     0   :  { %s5552_s13 = smov 0   ;;  %s7294_s0 = inlined_call_operand.vmem [shape: bf16[2,128,32], index: 0, kind: input, shape index: {}]   ;;  %s7295_s1 = inlined_call_operand.vmem [shape: bf16[2,128,16], index: 1, kind: input, shape index: {}]   ;;  %s7296_s2 = inlined_call_operand.vmem [shape: bf16[32,32], index: 2, kind: input, shape index: {}]   ;;  %s7297_s3 = inlined_call_operand.vmem [shape: bf16[16,32], index: 3, kind: input, shape index: {}]   ;;  %s7298_s4 = inlined_call_operand.vmem [shape: bf16[32,64], index: 4, kind: input, shape index: {}]   ;;  %s7299_s5 = inlined_call_operand.vmem [shape: bf16[32,32], index: 5, kind: input, shape index: {}]   ;;  %s7300_s6 = inlined_call_operand.vmem [shape: bf16[32,32], index: 6, kind: input, shape index: {}]   ;;  %s7301_s7 = inlined_call_operand.vmem [shape: bf16[32,64], index: 7, kind: input, shape index: {}]   ;;  %s7302_s8 = inlined_call_operand.vmem [shape: bf16[64,32], index: 8, kind: input, shape index: {}]   ;;  %s7303_s9 = inlined_call_operand.vmem [shape: f32[10,64], index: 9, kind: input, shape index: {}]   ;;  %s7304_s10 = inlined_call_operand.vmem [shape: f32[2,128,32], index: 10, kind: output, shape index: {}]  }
   0x1 LB: > { %s4207_s14 = sadd.s32 4294967295, %s5485_s13   ;;  %p4211_p0 = scmp.ge.s32.totalorder %s5485_s13, 1  ;;  %s5485_s13 = sphi %s5552_s13, %s20_s13  }
   0x2   : > { %p322_p1 = scmp.lt.s32.totalorder %s5485_s13, 3 }
   0x4   : > { %p323_p2 = pnand %p4211_p0, %p322_p1 }
   0x6   : > { %326 = sbr.rel (%p323_p2) target bundleno = 4773 (0x12a5), region = 60 }
   0xd   : > { %v5127_v0 = vld [vmem:[%s7297_s3] sm:$0xff]   ;;  %p365_p3 = scmp.lt.s32.totalorder %s4207_s14, 1  ;;  %vm467_vm0 = vcmask 130048   ;;  %v5132_v2 = vld [vmem:[%s7296_s2 + $0x8] sm:$0xff]   ;;  %vm641_vm1 = vcmask 261120   ;;  %v763_v19 = vlaneseq  ;;  %s5487_s20 = smov 96  }
   0xe   : > { %v5129_v1 = vld [vmem:[%s7296_s2] sm:$0xff]   ;;  %4541 = vmatprep.subr.bf16.mxu0 %v5127_v0  ;;  %4939 = vmatprep.subr.bf16.mxu1 %v5127_v0  ;;  %vm1362_vm2 = vcmask 64512   ;;  %s5488_s21 = smov 88   ;;  %s5490_s23 = smov 80   ;;  %vm3347_vm3 = vcmask 195584   ;;  %vm3986_vm4 = vcmask 523264  }
   0xf   : > { %s7425_s14 = smov (!%p365_p3, %s4207_s14), 1  ;;  %4542 = vmatpush3.bf16.msra.mxu0 %v5127_v0  ;;  %4940 = vmatpush3.bf16.msra.mxu1 %v5127_v0  ;;  %v5604_v20 = vshrl.u32 %v763_v19, 7  ;;  %v5610_v23 = vld [vmem:[%s7303_s9] sm:$0xff]  ;;  %s5491_s24 = smov 112  }
  0x10   : > { %s4339_s19 = sshll.u32 %s7425_s14, 6  ;;  %4559 = vmatprep.subr.bf16.mxu0 %v5129_v1  ;;  %s5492_s25 = smov 72  }
  0x11   : > { %s374_s22 = scalar_lea.vmem %s7295_s1, %s4339_s19  ;;  %s5579_s27 = scalar_lea.vmem %s7294_s0, %s4339_s19  ;;  %7331 = vst [vmem:[#allocation2_spill] sm:$0xff] %v5604_v20  ;;  %v7306_v21 = vsub.s32 0, %v5604_v20 }
  0x12   : > { %v5128_v3 = vld [vmem:[%s374_s22] sm:$0xff]   ;;  %v5130_v4 = vld [vmem:[%s374_s22 + $0x8] sm:$0xff]   ;;  %v5131_v5 = vld [vmem:[%s374_s22 + $0x10] sm:$0xff]   ;;  %s5493_s26 = smov 104   ;;  %s5495_s28 = smov 16  }
  0x13   : > { %4543 = vmatprep.mubr.msk.bf16.mxu0 %vm467_vm0, %v5128_v3  ;;  %v5133_v6 = vld [vmem:[%s374_s22 + $0x18] sm:$0xff]   ;;  %v5134_v7 = vld [vmem:[%s5579_s27] sm:$0xff]   ;;  %v5140_v9 = vld [vmem:[%s374_s22 + $0x28] sm:$0xff]   ;;  %v5615_v27 = vrot.slane %v5610_v23, %v7306_v21  ;;  %s5496_s15 = smov 24   ;;  %s4341_s12 = sshll.u32 %s7425_s14, 7 }
  0x14   : > { %4544 = vmatmul.mubr.msk.bf16.vlgmr.msra.gmra.mrb[0].mxu0 %vm467_vm0, %v5130_v4  ;;  %v5138_v8 = vld [vmem:[%s374_s22 + $0x20] sm:$0xff]   ;;  %v5142_v10 = vld [vmem:[%s374_s22 + $0x30] sm:$0xff]   ;;  %v5135_v11 = vld [vmem:[%s5579_s27 + $0x8] sm:$0xff]   ;;  %s7241_s17 = scalar_lea.vmem %s7304_s10, %s4341_s12 }
  0x15   : > { %4560 = vmatpush3.bf16.msra.mxu0 %v5129_v1  ;;  %4547 = vmatprep.mubr.msk.bf16.mxu0 %vm467_vm0, %v5131_v5  ;;  %v5136_v12 = vld [vmem:[%s5579_s27 + $0x10] sm:$0xff]   ;;  %v5144_v13 = vld [vmem:[%s374_s22 + $0x38] sm:$0xff]   ;;  %v5139_v15 = vld [vmem:[%s5579_s27 + $0x20] sm:$0xff]   ;;  %s5489_s22 = smov 120  }
  0x16   : > { %4561 = vmatprep.subr.bf16.mxu0 %v5132_v2  ;;  %4551 = vmatprep.mubr.msk.bf16.mxu1 %vm467_vm0, %v5138_v8  ;;  %v5137_v14 = vld [vmem:[%s5579_s27 + $0x18] sm:$0xff]   ;;  %v5141_v16 = vld [vmem:[%s5579_s27 + $0x28] sm:$0xff]   ;;  %v5143_v17 = vld [vmem:[%s5579_s27 + $0x30] sm:$0xff]  }
  0x17   : > { %4552 = vmatmul.mubr.msk.bf16.vlgmr.msra.gmra.mrb[0].mxu1 %vm467_vm0, %v5140_v9  ;;  %v5145_v18 = vld [vmem:[%s5579_s27 + $0x38] sm:$0xff]   ;;  %s5494_s27 = smov 8  }
  0x18   : > { %4555 = vmatprep.mubr.msk.bf16.mxu1 %vm467_vm0, %v5142_v10 }
  0x19   : > { %4562 = vmatpush3.bf16.msra.mxu0 %v5132_v2 }
  0x1c   : > { %4548 = vmatmul.mubr.msk.bf16.gmra.mrb[4].mxu0 %vm467_vm0, %v5133_v6 }
  0x1d   : > { %4563 = vmatprep.mubr.msk.bf16.mxu0 %vm641_vm1, %v5134_v7 }
  0x1f   : > { %4556 = vmatmul.mubr.msk.bf16.gmra.mrb[4].mxu1 %vm467_vm0, %v5144_v13 }
  0x24   : > { %4564 = vmatmul.mubr.msk.bf16.vlgmr.msra.gmra.mrb[0].mxu0 %vm641_vm1, %v5135_v11 }
  0x25   : > { %4567 = vmatprep.mubr.msk.bf16.mxu0 %vm641_vm1, %v5136_v12 }
  0x2c   : > { %4568 = vmatmul.mubr.msk.bf16.gmra.mrb[4].mxu0 %vm641_vm1, %v5137_v14 }
  0x2d   : > { %4571 = vmatprep.mubr.msk.bf16.mxu0 %vm641_vm1, %v5139_v15 }
  0x34   : > { %4572 = vmatmul.mubr.msk.bf16.gmra.mrb[8].mxu0 %vm641_vm1, %v5141_v16 }
  0x35   : > { %4575 = vmatprep.mubr.msk.bf16.mxu0 %vm641_vm1, %v5143_v17 }
  0x3c   : > { %4576 = vmatmul.mubr.msk.bf16.gmra.mrb[12].mxu0 %vm641_vm1, %v5145_v18 }
  0xea   : > { %v4553_v22 = vpop.f32.mrb[0].mxu1 }
  0xeb   : > { %v558_v24 = vpop.f32.mrb[1].mxu1 }
  0xec   : > { %v4554_v25 = vpop.f32.mrb[2].mxu1 }
  0xed   : > { %v561_v26 = vpop.f32.mrb[3].mxu1 }
  0xf2   : > { %v4557_v31 = vpop.f32.mrb[4].mxu1 }
  0xf3   : > { %v574_v34 = vpop.f32.mrb[5].mxu1 }
  0xf4   : > { %v4558_v38 = vpop.f32.mrb[6].mxu1 }
  0xf5   : > { %v577_v41 = vpop.f32.mrb[7].mxu1 }
  0xf7   : > { %v4565_v28 = vpop.f32.mrb[0].mxu0 }
  0xf8   : > { %v5618_v29 = vadd.f32 %v4565_v28, %v5615_v27  ;;  %v700_v30 = vpop.f32.mrb[1].mxu0 }
  0xf9   : > { %v5621_v32 = vadd.f32 %v5615_v27, %v700_v30  ;;  %v4566_v33 = vpop.f32.mrb[2].mxu0 }
  0xfa   : > { %7332 = vst [vmem:[#allocation3_spill] sm:$0xff] %v5618_v29  ;;  %v5624_v35 = vadd.f32 %v4566_v33, %v5615_v27  ;;  %v703_v36 = vpop.f32.mrb[3].mxu0  ;;  %v789_v37 = vsel %vm641_vm1, %v5618_v29, 0.0 }
  0xfb   : > { %7333 = vst [vmem:[#allocation4_spill] sm:$0xff] %v5621_v32  ;;  %v5629_v39 = vadd.f32 %v5615_v27, %v703_v36  ;;  %790 = vadd.xlane.f32.xlu1 %v789_v37  ;;  %v783_v40 = vsel %vm641_vm1, %v5621_v32, 0.0 }
  0xfc   : > { %7334 = vst [vmem:[#allocation5_spill] sm:$0xff] %v5624_v35  ;;  %784 = vadd.xlane.f32.xlu0 %v783_v40  ;;  %v792_v42 = vsel %vm641_vm1, %v5624_v35, 0.0 }
  0xfd   : > { %7335 = vst [vmem:[#allocation6_spill] sm:$0xff] %v5629_v39  ;;  %v786_v44 = vsel %vm641_vm1, %v5629_v39, 0.0 }
  0xff   : > { %793 = vadd.xlane.f32.xlu1 %v792_v42  ;;  %v4569_v43 = vpop.f32.mrb[4].mxu0 }
 0x100   : > { %787 = vadd.xlane.f32.xlu0 %v786_v44  ;;  %v716_v45 = vpop.f32.mrb[5].mxu0  ;;  %v5641_v49 = vadd.f32 %v4569_v43, %v5615_v27 }
 0x101   : > { %v5638_v46 = vadd.f32 %v5615_v27, %v716_v45  ;;  %v4570_v47 = vpop.f32.mrb[6].mxu0 }
 0x102   : > { %v719_v48 = vpop.f32.mrb[7].mxu0  ;;  %7337 = vst [vmem:[#allocation8_spill] sm:$0xff] %v5641_v49  ;;  %v5649_v52 = vadd.f32 %v4570_v47, %v5615_v27  ;;  %v801_v55 = vsel %vm641_vm1, %v5641_v49, 0.0 }
 0x103   : > { %7336 = vst [vmem:[#allocation7_spill] sm:$0xff] %v5638_v46  ;;  %v5644_v50 = vadd.f32 %v5615_v27, %v719_v48  ;;  %v795_v51 = vsel %vm641_vm1, %v5638_v46, 0.0 }
 0x104   : > { %796 = vadd.xlane.f32.xlu0 %v795_v51  ;;  %7339 = vst [vmem:[#allocation10_spill] sm:$0xff] %v5649_v52  ;;  %v804_v60 = vsel %vm641_vm1, %v5649_v52, 0.0 }
 0x105   : > { %7338 = vst [vmem:[#allocation9_spill] sm:$0xff] %v5644_v50  ;;  %v798_v53 = vsel %vm641_vm1, %v5644_v50, 0.0 }
 0x106   : > { %799 = vadd.xlane.f32.xlu1 %v798_v53 }
 0x107   : > { %v4573_v54 = vpop.f32.mrb[8].mxu0 }
 0x108   : > { %v741_v56 = vadd.f32 %v4573_v54, %v4553_v22  ;;  %802 = vadd.xlane.f32.xlu0 %v801_v55  ;;  %v732_v57 = vpop.f32.mrb[9].mxu0 }
 0x109   : > { %v733_v58 = vadd.f32 %v732_v57, %v558_v24  ;;  %v4574_v59 = vpop.f32.mrb[10].mxu0 }
 0x10a   : > { %v744_v61 = vadd.f32 %v4574_v59, %v4554_v25  ;;  %805 = vadd.xlane.f32.xlu1 %v804_v60  ;;  %v735_v62 = vpop.f32.mrb[11].mxu0  ;;  %v5658_v63 = vadd.f32 %v5615_v27, %v741_v56 }
 0x10b   : > { %v5661_v0 = vadd.f32 %v5615_v27, %v733_v58  ;;  %v736_v1 = vadd.f32 %v735_v62, %v561_v26 }
 0x10c   : > { %7340 = vst [vmem:[#allocation11_spill] sm:$0xff] %v5658_v63  ;;  %v5664_v2 = vadd.f32 %v5615_v27, %v744_v61  ;;  %v813_v7 = vsel %vm641_vm1, %v5658_v63, 0.0 }
 0x10d   : > { %7341 = vst [vmem:[#allocation12_spill] sm:$0xff] %v5661_v0  ;;  %v5667_v3 = vadd.f32 %v5615_v27, %v736_v1  ;;  %v807_v4 = vsel %vm641_vm1, %v5661_v0, 0.0 }
 0x10e   : > { %7342 = vst [vmem:[#allocation13_spill] sm:$0xff] %v5664_v2  ;;  %808 = vadd.xlane.f32.xlu0 %v807_v4  ;;  %v816_v12 = vsel %vm641_vm1, %v5664_v2, 0.0 }
 0x10f   : > { %7343 = vst [vmem:[#allocation14_spill] sm:$0xff] %v5667_v3  ;;  %v4577_v5 = vpop.f32.mrb[12].mxu0  ;;  %v810_v6 = vsel %vm641_vm1, %v5667_v3, 0.0 }
 0x110   : > { %v757_v8 = vadd.f32 %v4577_v5, %v4557_v31  ;;  %v748_v9 = vpop.f32.mrb[13].mxu0  ;;  %811 = vadd.xlane.f32.xlu1 %v810_v6 }
 0x111   : > { %v749_v10 = vadd.f32 %v748_v9, %v574_v34  ;;  %v4578_v11 = vpop.f32.mrb[14].mxu0 }
 0x112   : > { %v760_v13 = vadd.f32 %v4578_v11, %v4558_v38  ;;  %v751_v14 = vpop.f32.mrb[15].mxu0  ;;  %814 = vadd.xlane.f32.xlu0 %v813_v7  ;;  %v5678_v15 = vadd.f32 %v5615_v27, %v757_v8 }
 0x113   : > { %v5681_v16 = vadd.f32 %v5615_v27, %v749_v10  ;;  %v752_v17 = vadd.f32 %v751_v14, %v577_v41 }
 0x114   : > { %7344 = vst [vmem:[#allocation15_spill] sm:$0xff] %v5678_v15  ;;  %817 = vadd.xlane.f32.xlu1 %v816_v12  ;;  %v5684_v18 = vadd.f32 %v5615_v27, %v760_v13  ;;  %v825_v25 = vsel %vm641_vm1, %v5678_v15, 0.0 }
 0x115   : > { %7345 = vst [vmem:[#allocation16_spill] sm:$0xff] %v5681_v16  ;;  %v5687_v19 = vadd.f32 %v5615_v27, %v752_v17  ;;  %v819_v22 = vsel %vm641_vm1, %v5681_v16, 0.0 }
 0x116   : > { %7346 = vst [vmem:[#allocation17_spill] sm:$0xff] %v5684_v18  ;;  %820 = vadd.xlane.f32.xlu0 %v819_v22  ;;  %v828_v26 = vsel %vm641_vm1, %v5684_v18, 0.0 }
 0x117   : > { %7347 = vst [vmem:[#allocation18_spill] sm:$0xff] %v5687_v19  ;;  %v822_v24 = vsel %vm641_vm1, %v5687_v19, 0.0 }
 0x118   : > { %823 = vadd.xlane.f32.xlu1 %v822_v24 }
 0x11a   : > { %826 = vadd.xlane.f32.xlu0 %v825_v25 }
 0x11c   : > { %829 = vadd.xlane.f32.xlu1 %v828_v26 }
 0x188   : > { %v791_v28 = vpop.xlane.xlu1 %790 }
 0x189   : > { %v834_v30 = vmul.f32 0.03125, %v791_v28  ;;  %v785_v27 = vpop.xlane.xlu0 %784 }
 0x18a   : > { %v832_v31 = vmul.f32 0.03125, %v785_v27 }
 0x18b   : > { %v5698_v33 = vsub.f32 %v5618_v29, %v834_v30 }
 0x18c   : > { %v5701_v34 = vsub.f32 %v5621_v32, %v832_v31  ;;  %v794_v36 = vpop.xlane.xlu1 %793 }
 0x18d   : > { %v835_v37 = vmul.f32 0.03125, %v794_v36  ;;  %v788_v38 = vpop.xlane.xlu0 %787  ;;  %v866_v45 = vmul.f32 %v5698_v33, %v5698_v33 }
 0x18e   : > { %v833_v40 = vmul.f32 0.03125, %v788_v38  ;;  %v864_v41 = vmul.f32 %v5701_v34, %v5701_v34 }
 0x18f   : > { %v5706_v42 = vsub.f32 %v5624_v35, %v835_v37  ;;  %v886_v58 = vsel %vm641_vm1, %v866_v45, 0.0 }
 0x190   : > { %v5709_v43 = vsub.f32 %v5629_v39, %v833_v40  ;;  %v880_v44 = vsel %vm641_vm1, %v864_v41, 0.0 }
 0x191   : > { %v797_v47 = vpop.xlane.xlu0 %796  ;;  %881 = vadd.xlane.f32.xlu0 %v880_v44  ;;  %v867_v54 = vmul.f32 %v5706_v42, %v5706_v42 }
 0x192   : > { %v836_v48 = vmul.f32 0.03125, %v797_v47  ;;  %v865_v51 = vmul.f32 %v5709_v43, %v5709_v43 }
 0x193   : > { %v800_v53 = vpop.xlane.xlu1 %799  ;;  %v889_v4 = vsel %vm641_vm1, %v867_v54, 0.0 }
 0x194   : > { %v5719_v55 = vsub.f32 %v5638_v46, %v836_v48  ;;  %v837_v56 = vmul.f32 0.03125, %v800_v53  ;;  %v883_v57 = vsel %vm641_vm1, %v865_v51, 0.0 }
 0x195   : > { %v803_v59 = vpop.xlane.xlu0 %802  ;;  %884 = vadd.xlane.f32.xlu1 %v883_v57  ;;  %887 = vadd.xlane.f32.xlu0 %v886_v58 }
 0x196   : > { %v5724_v60 = vsub.f32 %v5644_v50, %v837_v56  ;;  %v838_v61 = vmul.f32 0.03125, %v803_v59  ;;  %v868_v62 = vmul.f32 %v5719_v55, %v5719_v55 }
 0x197   : > { %v806_v1 = vpop.xlane.xlu1 %805 }
 0x198   : > { %v5730_v5 = vsub.f32 %v5641_v49, %v838_v61  ;;  %v839_v6 = vmul.f32 0.03125, %v806_v1  ;;  %v892_v7 = vsel %vm641_vm1, %v868_v62, 0.0  ;;  %v869_v8 = vmul.f32 %v5724_v60, %v5724_v60 }
 0x199   : > { %890 = vadd.xlane.f32.xlu1 %v889_v4  ;;  %893 = vadd.xlane.f32.xlu0 %v892_v7 }
 0x19a   : > { %v5736_v9 = vsub.f32 %v5649_v52, %v839_v6  ;;  %v870_v10 = vmul.f32 %v5730_v5, %v5730_v5  ;;  %v895_v13 = vsel %vm641_vm1, %v869_v8, 0.0 }
 0x19b   : > { %v809_v11 = vpop.xlane.xlu0 %808 }
 0x19c   : > { %v840_v12 = vmul.f32 0.03125, %v809_v11  ;;  %v898_v14 = vsel %vm641_vm1, %v870_v10, 0.0  ;;  %v871_v17 = vmul.f32 %v5736_v9, %v5736_v9 }
 0x19d   : > { %896 = vadd.xlane.f32.xlu1 %v895_v13  ;;  %v812_v22 = vpop.xlane.xlu1 %811  ;;  %899 = vadd.xlane.f32.xlu0 %v898_v14 }
 0x19e   : > { %v5745_v24 = vsub.f32 %v5661_v0, %v840_v12  ;;  %v841_v25 = vmul.f32 0.03125, %v812_v22  ;;  %v901_v27 = vsel %vm641_vm1, %v871_v17, 0.0 }
 0x19f   : > { %v815_v26 = vpop.xlane.xlu0 %814 }
 0x1a0   : > { %v5748_v28 = vsub.f32 %v5667_v3, %v841_v25  ;;  %v842_v30 = vmul.f32 0.03125, %v815_v26  ;;  %v872_v31 = vmul.f32 %v5745_v24, %v5745_v24  ;;  %v5146_v26 = vld [vmem:[%s7298_s4] sm:$0xff]  }
 0x1a1   : > { %902 = vadd.xlane.f32.xlu1 %v901_v27  ;;  %v818_v36 = vpop.xlane.xlu1 %817  ;;  %4579 = vmatprep.subr.bf16.mxu1 %v5146_v26  ;;  %v5802_v27 = vld [vmem:[%s7299_s5] sm:$0xff]  }
 0x1a2   : > { %v5754_v37 = vsub.f32 %v5658_v63, %v842_v30  ;;  %v843_v38 = vmul.f32 0.03125, %v818_v36  ;;  %v904_v40 = vsel %vm641_vm1, %v872_v31, 0.0  ;;  %v873_v41 = vmul.f32 %v5748_v28, %v5748_v28  ;;  %4580 = vmatpush3.bf16.msra.mxu1 %v5146_v26  ;;  %v5147_v30 = vld [vmem:[%s7298_s4 + $0x8] sm:$0xff]  }
 0x1a3   : > { %905 = vadd.xlane.f32.xlu0 %v904_v40  ;;  %v821_v44 = vpop.xlane.xlu0 %820  ;;  %4581 = vmatprep.subr.bf16.mxu1 %v5147_v30 }
 0x1a4   : > { %v5760_v45 = vsub.f32 %v5664_v2, %v843_v38  ;;  %v844_v47 = vmul.f32 0.03125, %v821_v44  ;;  %v907_v48 = vsel %vm641_vm1, %v873_v41, 0.0  ;;  %v874_v51 = vmul.f32 %v5754_v37, %v5754_v37 }
 0x1a5   : > { %908 = vadd.xlane.f32.xlu1 %v907_v48  ;;  %v824_v53 = vpop.xlane.xlu1 %823 }
 0x1a6   : > { %v5766_v54 = vsub.f32 %v5681_v16, %v844_v47  ;;  %v845_v56 = vmul.f32 0.03125, %v824_v53  ;;  %v910_v57 = vsel %vm641_vm1, %v874_v51, 0.0  ;;  %v875_v58 = vmul.f32 %v5760_v45, %v5760_v45  ;;  %4582 = vmatpush3.bf16.msra.mxu1 %v5147_v30 }
 0x1a7   : > { %911 = vadd.xlane.f32.xlu0 %v910_v57  ;;  %v827_v59 = vpop.xlane.xlu0 %826  ;;  %4599 = vmatprep.subr.bf16.mxu1 %v5802_v27 }
 0x1a8   : > { %v5772_v61 = vsub.f32 %v5687_v19, %v845_v56  ;;  %v846_v62 = vmul.f32 0.03125, %v827_v59  ;;  %v913_v1 = vsel %vm641_vm1, %v875_v58, 0.0  ;;  %v876_v4 = vmul.f32 %v5766_v54, %v5766_v54 }
 0x1a9   : > { %914 = vadd.xlane.f32.xlu1 %v913_v1  ;;  %v830_v6 = vpop.xlane.xlu1 %829  ;;  %v7305_v1 = vsub.s32 1, %v5604_v20 }
 0x1aa   : > { %v5778_v7 = vsub.f32 %v5678_v15, %v846_v62  ;;  %v847_v8 = vmul.f32 0.03125, %v830_v6  ;;  %v916_v10 = vsel %vm641_vm1, %v876_v4, 0.0  ;;  %v877_v11 = vmul.f32 %v5772_v61, %v5772_v61 }
 0x1ab   : > { %917 = vadd.xlane.f32.xlu0 %v916_v10 }
 0x1ac   : > { %v5784_v12 = vsub.f32 %v5684_v18, %v847_v8  ;;  %v919_v13 = vsel %vm641_vm1, %v877_v11, 0.0  ;;  %v878_v14 = vmul.f32 %v5778_v7, %v5778_v7 }
 0x1ad   : > { %920 = vadd.xlane.f32.xlu1 %v919_v13 }
 0x1ae   : > { %v922_v17 = vsel %vm641_vm1, %v878_v14, 0.0  ;;  %v879_v22 = vmul.f32 %v5784_v12, %v5784_v12 }
 0x1af   : > { %923 = vadd.xlane.f32.xlu0 %v922_v17  ;;  %v5809_v17 = vrot.slane %v5610_v23, %v7305_v1 }
 0x1b0   : > { %v925_v25 = vsel %vm641_vm1, %v879_v22, 0.0  ;;  %v1014_v22 = vsub.s32 2, %v5604_v20 }
 0x1b1   : > { %926 = vadd.xlane.f32.xlu1 %v925_v25 }
 0x21e   : > { %v882_v31 = vpop.xlane.xlu0 %881 }
 0x21f   : > { %v928_v36 = vmul.f32 0.03125, %v882_v31 }
 0x221   : > { %v944_v38 = vadd.f32 1e-05, %v928_v36 }
 0x222   : > { %v885_v40 = vpop.xlane.xlu1 %884  ;;  %v888_v41 = vpop.xlane.xlu0 %887 }
 0x223   : > { %5158 = vrsqrt.f32 %v944_v38  ;;  %v929_v44 = vmul.f32 0.03125, %v885_v40  ;;  %v930_v47 = vmul.f32 0.03125, %v888_v41 }
 0x225   : > { %v945_v48 = vadd.f32 1e-05, %v929_v44  ;;  %v946_v51 = vadd.f32 1e-05, %v930_v47  ;;  %v5814_v44 = vrot.slane %v5610_v23, %v1014_v22 }
 0x226   : > { %v891_v53 = vpop.xlane.xlu1 %890  ;;  %v894_v56 = vpop.xlane.xlu0 %893 }
 0x227   : > { %5160 = vrsqrt.f32 %v945_v48  ;;  %v931_v57 = vmul.f32 0.03125, %v891_v53  ;;  %v932_v58 = vmul.f32 0.03125, %v894_v56 }
 0x228   : > { %5162 = vrsqrt.f32 %v946_v51 }
 0x229   : > { %v947_v59 = vadd.f32 1e-05, %v931_v57  ;;  %v948_v62 = vadd.f32 1e-05, %v932_v58 }
 0x22a   : > { %v897_v4 = vpop.xlane.xlu1 %896  ;;  %v900_v6 = vpop.xlane.xlu0 %899 }
 0x22b   : > { %5164 = vrsqrt.f32 %v947_v59  ;;  %v933_v8 = vmul.f32 0.03125, %v897_v4  ;;  %v934_v10 = vmul.f32 0.03125, %v900_v6 }
 0x22c   : > { %5166 = vrsqrt.f32 %v948_v62 }
 0x22d   : > { %v5159_v11 = vpop.eup %5158  ;;  %v949_v13 = vadd.f32 1e-05, %v933_v8  ;;  %v950_v14 = vadd.f32 1e-05, %v934_v10 }
 0x22e   : > { %v903_v25 = vpop.xlane.xlu1 %902  ;;  %v976_v26 = vmul.f32 %v5159_v11, %v5701_v34 }
 0x22f   : > { %5168 = vrsqrt.f32 %v949_v13  ;;  %v935_v30 = vmul.f32 0.03125, %v903_v25 }
 0x230   : > { %5170 = vrsqrt.f32 %v950_v14  ;;  %v906_v31 = vpop.xlane.xlu0 %905  ;;  %v996_v51 = vmul.f32 %v5809_v17, %v976_v26 }
 0x231   : > { %v5161_v36 = vpop.eup %5160  ;;  %v951_v38 = vadd.f32 1e-05, %v935_v30  ;;  %v936_v40 = vmul.f32 0.03125, %v906_v31 }
 0x232   : > { %v5163_v41 = vpop.eup %5162  ;;  %v909_v47 = vpop.xlane.xlu1 %908  ;;  %v977_v48 = vmul.f32 %v5161_v36, %v5709_v43  ;;  %v1016_v11 = vadd.f32 %v5814_v44, %v996_v51 }
 0x233   : > { %v978_v53 = vmul.f32 %v5163_v41, %v5698_v33  ;;  %5172 = vrsqrt.f32 %v951_v38  ;;  %v952_v34 = vadd.f32 1e-05, %v936_v40  ;;  %v937_v56 = vmul.f32 0.03125, %v909_v47 }
 0x234   : > { %v912_v57 = vpop.xlane.xlu0 %911  ;;  %v997_v58 = vmul.f32 %v5809_v17, %v977_v48 }
 0x235   : > { %v5165_v59 = vpop.eup %5164  ;;  %5174 = vrsqrt.f32 %v952_v34  ;;  %v953_v62 = vadd.f32 1e-05, %v937_v56  ;;  %v938_v4 = vmul.f32 0.03125, %v912_v57  ;;  %v998_v8 = vmul.f32 %v5809_v17, %v978_v53 }
 0x236   : > { %v5167_v6 = vpop.eup %5166  ;;  %v979_v10 = vmul.f32 %v5165_v59, %v5706_v42  ;;  %v915_v43 = vpop.xlane.xlu1 %914  ;;  %v1017_v33 = vadd.f32 %v5814_v44, %v997_v58  ;;  %v5149_v59 = vld [vmem:[%s7299_s5 + $0x8] sm:$0xff]  }
 0x237   : > { %5176 = vrsqrt.f32 %v953_v62  ;;  %v954_v13 = vadd.f32 1e-05, %v938_v4  ;;  %v939_v14 = vmul.f32 0.03125, %v915_v43  ;;  %v980_v30 = vmul.f32 %v5167_v6, %v5719_v55 }
 0x238   : > { %v999_v22 = vmul.f32 %v5809_v17, %v979_v10  ;;  %v918_v25 = vpop.xlane.xlu0 %917  ;;  %v5825_v26 = vpack.c.bf16 %v1017_v33, %v1016_v11  ;;  %v1018_v40 = vadd.f32 %v5814_v44, %v998_v8 }
 0x239   : > { %v5169_v31 = vpop.eup %5168  ;;  %5178 = vrsqrt.f32 %v954_v13  ;;  %v955_v36 = vadd.f32 1e-05, %v939_v14  ;;  %v940_v38 = vmul.f32 0.03125, %v918_v25  ;;  %v1000_v51 = vmul.f32 %v5809_v17, %v980_v30 }
 0x23a   : > { %v5171_v42 = vpop.eup %5170  ;;  %v1019_v41 = vadd.f32 %v5814_v44, %v999_v22  ;;  %v921_v47 = vpop.xlane.xlu1 %920  ;;  %4583 = vmatprep.mubr.msk.bf16.mxu1 %vm641_vm1, %v5825_v26  ;;  %v981_v48 = vmul.f32 %v5169_v31, %v5724_v60 }
 0x23b   : > { %5180 = vrsqrt.f32 %v955_v36  ;;  %v956_v53 = vadd.f32 1e-05, %v940_v38  ;;  %v941_v55 = vmul.f32 0.03125, %v921_v47  ;;  %v982_v34 = vmul.f32 %v5171_v42, %v5730_v5 }
 0x23c   : > { %v924_v56 = vpop.xlane.xlu0 %923  ;;  %v5835_v57 = vpack.c.bf16 %v1019_v41, %v1018_v40  ;;  %v1001_v58 = vmul.f32 %v5809_v17, %v981_v48  ;;  %v1020_v8 = vadd.f32 %v5814_v44, %v1000_v51 }
 0x23d   : > { %v5173_v62 = vpop.eup %5172  ;;  %5182 = vrsqrt.f32 %v956_v53  ;;  %v957_v4 = vadd.f32 1e-05, %v941_v55  ;;  %v942_v60 = vmul.f32 0.03125, %v924_v56  ;;  %v1002_v43 = vmul.f32 %v5809_v17, %v982_v34 }
 0x23e   : > { %v927_v6 = vpop.xlane.xlu1 %926  ;;  %4584 = vmatmul.mubr.msk.bf16.vlgmr.msra.gmra.mrb[8].mxu1 %vm641_vm1, %v5835_v57  ;;  %v1021_v5 = vadd.f32 %v5814_v44, %v1001_v58  ;;  %v983_v10 = vmul.f32 %v5173_v62, %v5736_v9 }
 0x23f   : > { %v5175_v11 = vpop.eup %5174  ;;  %5184 = vrsqrt.f32 %v957_v4  ;;  %v958_v33 = vadd.f32 1e-05, %v942_v60  ;;  %v943_v13 = vmul.f32 0.03125, %v927_v6  ;;  %4600 = vmatpush3.bf16.msra.mxu1 %v5802_v27  ;;  %v1022_v9 = vadd.f32 %v5814_v44, %v1002_v43 }
 0x240   : > { %v1034_v14 = vpack.c.bf16 %v1021_v5, %v1020_v8  ;;  %v1003_v22 = vmul.f32 %v5809_v17, %v983_v10  ;;  %v984_v25 = vmul.f32 %v5175_v11, %v5745_v24  ;;  %4601 = vmatprep.subr.bf16.mxu1 %v5149_v59 }
 0x241   : > { %v5177_v30 = vpop.eup %5176  ;;  %5186 = vrsqrt.f32 %v958_v33  ;;  %v959_v31 = vadd.f32 1e-05, %v943_v13 }
 0x242   : > { %4587 = vmatprep.mubr.msk.bf16.mxu1 %vm641_vm1, %v1034_v14  ;;  %v1023_v36 = vadd.f32 %v5814_v44, %v1003_v22  ;;  %v985_v38 = vmul.f32 %v5177_v30, %v5748_v28  ;;  %v1004_v42 = vmul.f32 %v5809_v17, %v984_v25 }
 0x243   : > { %v5179_v27 = vpop.eup %5178  ;;  %5188 = vrsqrt.f32 %v959_v31  ;;  %4602 = vmatpush3.bf16.msra.mxu1 %v5149_v59 }
 0x244   : > { %v1035_v40 = vpack.c.bf16 %v1023_v36, %v1022_v9  ;;  %v1005_v24 = vmul.f32 %v5809_v17, %v985_v38  ;;  %v986_v41 = vmul.f32 %v5179_v27, %v5754_v37  ;;  %v1024_v48 = vadd.f32 %v5814_v44, %v1004_v42 }
 0x245   : > { %v5181_v47 = vpop.eup %5180 }
 0x246   : > { %4588 = vmatmul.mubr.msk.bf16.gmra.mrb[12].mxu1 %vm641_vm1, %v1035_v40  ;;  %v1025_v51 = vadd.f32 %v5814_v44, %v1005_v24  ;;  %v987_v53 = vmul.f32 %v5181_v47, %v5760_v45  ;;  %v1006_v28 = vmul.f32 %v5809_v17, %v986_v41 }
 0x247   : > { %v5183_v55 = vpop.eup %5182 }
 0x248   : > { %v1036_v34 = vpack.c.bf16 %v1025_v51, %v1024_v48  ;;  %v1007_v56 = vmul.f32 %v5809_v17, %v987_v53  ;;  %v988_v58 = vmul.f32 %v5183_v55, %v5766_v54  ;;  %v1026_v37 = vadd.f32 %v5814_v44, %v1006_v28 }
 0x249   : > { %v5185_v59 = vpop.eup %5184 }
 0x24a   : > { %4591 = vmatprep.mubr.msk.bf16.mxu1 %vm641_vm1, %v1036_v34  ;;  %v1027_v62 = vadd.f32 %v5814_v44, %v1007_v56  ;;  %v989_v4 = vmul.f32 %v5185_v59, %v5772_v61  ;;  %v1008_v60 = vmul.f32 %v5809_v17, %v988_v58 }
 0x24b   : > { %v5187_v45 = vpop.eup %5186 }
 0x24c   : > { %v1037_v6 = vpack.c.bf16 %v1027_v62, %v1026_v37  ;;  %v1009_v8 = vmul.f32 %v5809_v17, %v989_v4  ;;  %v990_v5 = vmul.f32 %v5187_v45, %v5778_v7  ;;  %v1028_v54 = vadd.f32 %v5814_v44, %v1008_v60 }
 0x24d   : > { %v5189_v10 = vpop.eup %5188 }
 0x24e   : > { %4592 = vmatmul.mubr.msk.bf16.gmra.mrb[16].mxu1 %vm641_vm1, %v1037_v6  ;;  %v1029_v43 = vadd.f32 %v5814_v44, %v1009_v8  ;;  %v991_v11 = vmul.f32 %v5189_v10, %v5784_v12  ;;  %v1010_v33 = vmul.f32 %v5809_v17, %v990_v5  ;;  %v1046_v12 = vsub.s32 3, %v5604_v20 }
 0x250   : > { %v1038_v61 = vpack.c.bf16 %v1029_v43, %v1028_v54  ;;  %v1011_v13 = vmul.f32 %v5809_v17, %v991_v11  ;;  %v1030_v22 = vadd.f32 %v5814_v44, %v1010_v33  ;;  %v5893_v17 = vrot.slane %v5610_v23, %v1046_v12 }
 0x252   : > { %4595 = vmatprep.mubr.msk.bf16.mxu1 %vm641_vm1, %v1038_v61  ;;  %v1031_v7 = vadd.f32 %v5814_v44, %v1011_v13 }
 0x254   : > { %v1039_v25 = vpack.c.bf16 %v1031_v7, %v1030_v22 }
 0x256   : > { %4596 = vmatmul.mubr.msk.bf16.gmra.mrb[20].mxu1 %vm641_vm1, %v1039_v25 }
 0x257   : > { %4603 = vmatprep.mubr.msk.bf16.mxu1 %vm641_vm1, %v5825_v26 }
 0x25e   : > { %4604 = vmatmul.mubr.msk.bf16.vlgmr.msra.gmra.mrb[24].mxu1 %vm641_vm1, %v5835_v57 }
 0x25f   : > { %4607 = vmatprep.mubr.msk.bf16.mxu1 %vm641_vm1, %v1034_v14 }
 0x266   : > { %4608 = vmatmul.mubr.msk.bf16.gmra.mrb[28].mxu1 %vm641_vm1, %v1035_v40 }
 0x267   : > { %4611 = vmatprep.mubr.msk.bf16.mxu1 %vm641_vm1, %v1036_v34 }
 0x26e   : > { %4612 = vmatmul.mubr.msk.bf16.gmra.mrb[32].mxu1 %vm641_vm1, %v1037_v6 }
 0x26f   : > { %4615 = vmatprep.mubr.msk.bf16.mxu1 %vm641_vm1, %v1038_v61 }
 0x276   : > { %4616 = vmatmul.mubr.msk.bf16.gmra.mrb[36].mxu1 %vm641_vm1, %v1039_v25 }
 0x311   : > { %v4585_v44 = vpop.f32.mrb[8].mxu1 }
 0x312   : > { %v1127_v26 = vadd.f32 %v4585_v44, %v5893_v17  ;;  %v1118_v57 = vpop.f32.mrb[9].mxu1 }
 0x313   : > { %v1119_v14 = vadd.f32 %v1118_v57, %v5893_v17  ;;  %v4586_v30 = vpop.f32.mrb[10].mxu1 }
 0x314   : > { %v1130_v31 = vadd.f32 %v4586_v30, %v5893_v17  ;;  %v1121_v9 = vpop.f32.mrb[11].mxu1  ;;  %v1300_v38 = vmul.f32 0.35355338, %v1127_v26 }
 0x315   : > { %v1122_v36 = vadd.f32 %v1121_v9, %v5893_v17  ;;  %v1298_v40 = vmul.f32 0.35355338, %v1119_v14 }
 0x316   : > { %v1301_v42 = vmul.f32 0.35355338, %v1130_v31  ;;  %v5899_v27 = vpack.c.bf16 %v1130_v31, %v1127_v26 }
 0x317   : > { %v1299_v24 = vmul.f32 0.35355338, %v1122_v36  ;;  %v5901_v41 = vpack.c.bf16 %v1122_v36, %v1119_v14 }
 0x318   : > { %v5903_v47 = vpack.c.bf16 %v1301_v42, %v1300_v38  ;;  %1348 = vrot.lane.b32.xlu1 %v5899_v27, %s5487_s20 }
 0x319   : > { %v5907_v48 = vpack.c.bf16 %v1299_v24, %v1298_v40  ;;  %1346 = vrot.lane.b32.xlu0 %v5901_v41, %s5487_s20  ;;  %v4589_v51 = vpop.f32.mrb[12].mxu1 }
 0x31a   : > { %v1143_v53 = vadd.f32 %v4589_v51, %v5893_v17  ;;  %v1134_v28 = vpop.f32.mrb[13].mxu1  ;;  %v1187_v51 = vsub.s32 4, %v5604_v20 }
 0x31b   : > { %v1135_v55 = vadd.f32 %v1134_v28, %v5893_v17  ;;  %v4590_v34 = vpop.f32.mrb[14].mxu1  ;;  %4635 = vmatprep.mubr.msk.bf16.mxu0 %vm1362_vm2, %v5907_v48 }
 0x31c   : > { %v1146_v56 = vadd.f32 %v4590_v34, %v5893_v17  ;;  %v1137_v58 = vpop.f32.mrb[15].mxu1  ;;  %v1304_v37 = vmul.f32 0.35355338, %v1143_v53 }
 0x31d   : > { %v1138_v59 = vadd.f32 %v1137_v58, %v5893_v17  ;;  %v1302_v60 = vmul.f32 0.35355338, %v1135_v55 }
 0x31e   : > { %v1305_v62 = vmul.f32 0.35355338, %v1146_v56  ;;  %v5917_v4 = vpack.c.bf16 %v1146_v56, %v1143_v53 }
 0x31f   : > { %v1303_v45 = vmul.f32 0.35355338, %v1138_v59  ;;  %v5919_v6 = vpack.c.bf16 %v1138_v59, %v1135_v55 }
 0x320   : > { %v5921_v8 = vpack.c.bf16 %v1305_v62, %v1304_v37  ;;  %v1188_v62 = vrot.slane %v5610_v23, %v1187_v51 }
 0x321   : > { %v5923_v5 = vpack.c.bf16 %v1303_v45, %v1302_v60  ;;  %1350 = vrot.lane.b32.xlu1 %v5919_v6, %s5487_s20  ;;  %v4593_v10 = vpop.f32.mrb[16].mxu1 }
 0x322   : > { %v1159_v54 = vadd.f32 %v4593_v10, %v5893_v17  ;;  %v1150_v43 = vpop.f32.mrb[17].mxu1 }
 0x323   : > { %v1151_v11 = vadd.f32 %v1150_v43, %v5893_v17  ;;  %v4594_v33 = vpop.f32.mrb[18].mxu1 }
 0x324   : > { %v1162_v61 = vadd.f32 %v4594_v33, %v5893_v17  ;;  %v1153_v13 = vpop.f32.mrb[19].mxu1  ;;  %v1308_v7 = vmul.f32 0.35355338, %v1159_v54 }
 0x325   : > { %v1154_v22 = vadd.f32 %v1153_v13, %v5893_v17  ;;  %1352 = vrot.lane.b32.xlu1 %v5917_v4, %s5487_s20  ;;  %v1306_v44 = vmul.f32 0.35355338, %v1151_v11 }
 0x326   : > { %v1309_v25 = vmul.f32 0.35355338, %v1162_v61  ;;  %v5933_v12 = vpack.c.bf16 %v1162_v61, %v1159_v54 }
 0x327   : > { %v1307_v26 = vmul.f32 0.35355338, %v1154_v22  ;;  %v5935_v57 = vpack.c.bf16 %v1154_v22, %v1151_v11 }
 0x328   : > { %v5937_v14 = vpack.c.bf16 %v1309_v25, %v1308_v7 }
 0x329   : > { %v5939_v30 = vpack.c.bf16 %v1307_v26, %v1306_v44  ;;  %1356 = vrot.lane.b32.xlu1 %v5933_v12, %s5487_s20  ;;  %1354 = vrot.lane.b32.xlu0 %v5935_v57, %s5487_s20  ;;  %v4597_v31 = vpop.f32.mrb[20].mxu1 }
 0x32a   : > { %v1175_v9 = vadd.f32 %v4597_v31, %v5893_v17  ;;  %v1166_v36 = vpop.f32.mrb[21].mxu1 }
 0x32b   : > { %v1167_v38 = vadd.f32 %v1166_v36, %v5893_v17  ;;  %v4598_v42 = vpop.f32.mrb[22].mxu1 }
 0x32c   : > { %v1178_v40 = vadd.f32 %v4598_v42, %v5893_v17  ;;  %v1169_v24 = vpop.f32.mrb[23].mxu1  ;;  %v1312_v28 = vmul.f32 0.35355338, %v1175_v9 }
 0x32d   : > { %v1170_v53 = vadd.f32 %v1169_v24, %v5893_v17  ;;  %v1310_v56 = vmul.f32 0.35355338, %v1167_v38 }
 0x32e   : > { %v1313_v55 = vmul.f32 0.35355338, %v1178_v40  ;;  %v5950_v34 = vpack.c.bf16 %v1178_v40, %v1175_v9 }
 0x32f   : > { %v1311_v58 = vmul.f32 0.35355338, %v1170_v53  ;;  %v5952_v59 = vpack.c.bf16 %v1170_v53, %v1167_v38 }
 0x330   : > { %v5954_v37 = vpack.c.bf16 %v1313_v55, %v1312_v28  ;;  %1360 = vrot.lane.b32.xlu1 %v5950_v34, %s5487_s20 }
 0x331   : > { %v5959_v60 = vpack.c.bf16 %v1311_v58, %v1310_v56  ;;  %v4605_v45 = vpop.f32.mrb[24].mxu1  ;;  %1358 = vrot.lane.b32.xlu0 %v5952_v59, %s5487_s20 }
 0x332   : > { %v1235_v17 = vpop.f32.mrb[25].mxu1  ;;  %v1244_v54 = vadd.f32 %v4605_v45, %v1188_v62 }
 0x333   : > { %v4606_v10 = vpop.f32.mrb[26].mxu1  ;;  %v1236_v33 = vadd.f32 %v1235_v17, %v1188_v62 }
 0x334   : > { %v1247_v43 = vadd.f32 %v4606_v10, %v1188_v62  ;;  %1783 = vrot.lane.b32.xlu1 %v5899_v27, %s5488_s21  ;;  %v1238_v11 = vpop.f32.mrb[27].mxu1 }
 0x335   : > { %v1239_v61 = vadd.f32 %v1238_v11, %v1188_v62  ;;  %1781 = vrot.lane.b32.xlu0 %v5901_v41, %s5488_s21 }
 0x336   : > { %v5967_v23 = vpack.c.bf16 %v1247_v43, %v1244_v54 }
 0x337   : > { %v5969_v13 = vpack.c.bf16 %v1239_v61, %v1236_v33 }
 0x339   : > { %v4609_v22 = vpop.f32.mrb[28].mxu1  ;;  %4651 = vmatprep.subr.bf16.mxu1 %v5969_v13 }
 0x33a   : > { %v1251_v7 = vpop.f32.mrb[29].mxu1  ;;  %4652 = vmatpush3.bf16.msra.mxu1 %v5969_v13  ;;  %v1260_v44 = vadd.f32 %v4609_v22, %v1188_v62 }
 0x33b   : > { %v4610_v25 = vpop.f32.mrb[30].mxu1  ;;  %4653 = vmatprep.subr.bf16.mxu1 %v5967_v23  ;;  %v1252_v9 = vadd.f32 %v1251_v7, %v1188_v62 }
 0x33c   : > { %v1263_v26 = vadd.f32 %v4610_v25, %v1188_v62  ;;  %v1254_v31 = vpop.f32.mrb[31].mxu1 }
 0x33d   : > { %v1255_v36 = vadd.f32 %v1254_v31, %v1188_v62 }
 0x33e   : > { %v5974_v38 = vpack.c.bf16 %v1263_v26, %v1260_v44  ;;  %4654 = vmatpush3.bf16.msra.mxu1 %v5967_v23 }
 0x33f   : > { %v5977_v42 = vpack.c.bf16 %v1255_v36, %v1252_v9 }
 0x341   : > { %v4613_v40 = vpop.f32.mrb[32].mxu1  ;;  %4655 = vmatprep.subr.bf16.mxu1 %v5977_v42 }
 0x342   : > { %v1267_v24 = vpop.f32.mrb[33].mxu1  ;;  %4656 = vmatpush3.bf16.msra.mxu1 %v5977_v42  ;;  %v1276_v53 = vadd.f32 %v4613_v40, %v1188_v62 }
 0x343   : > { %v4614_v51 = vpop.f32.mrb[34].mxu1  ;;  %4657 = vmatprep.subr.bf16.mxu1 %v5974_v38  ;;  %v1268_v56 = vadd.f32 %v1267_v24, %v1188_v62 }
 0x344   : > { %v1279_v28 = vadd.f32 %v4614_v51, %v1188_v62  ;;  %v1270_v55 = vpop.f32.mrb[35].mxu1 }
 0x345   : > { %v1271_v58 = vadd.f32 %v1270_v55, %v1188_v62 }
 0x346   : > { %v5982_v45 = vpack.c.bf16 %v1279_v28, %v1276_v53  ;;  %4658 = vmatpush3.bf16.msra.mxu1 %v5974_v38 }
 0x347   : > { %v5985_v17 = vpack.c.bf16 %v1271_v58, %v1268_v56 }
 0x349   : > { %v4617_v10 = vpop.f32.mrb[36].mxu1  ;;  %4659 = vmatprep.subr.bf16.mxu1 %v5985_v17 }
 0x34a   : > { %v1283_v54 = vpop.f32.mrb[37].mxu1  ;;  %4660 = vmatpush3.bf16.msra.mxu1 %v5985_v17  ;;  %v1292_v11 = vadd.f32 %v4617_v10, %v1188_v62 }
 0x34b   : > { %v4618_v43 = vpop.f32.mrb[38].mxu1  ;;  %4661 = vmatprep.subr.bf16.mxu1 %v5982_v45  ;;  %v1284_v22 = vadd.f32 %v1283_v54, %v1188_v62 }
 0x34c   : > { %v1295_v33 = vadd.f32 %v4618_v43, %v1188_v62  ;;  %v1286_v61 = vpop.f32.mrb[39].mxu1 }
 0x34d   : > { %v1287_v7 = vadd.f32 %v1286_v61, %v1188_v62 }
 0x34e   : > { %v5990_v25 = vpack.c.bf16 %v1295_v33, %v1292_v11  ;;  %4662 = vmatpush3.bf16.msra.mxu1 %v5982_v45 }
 0x34f   : > { %v5993_v44 = vpack.c.bf16 %v1287_v7, %v1284_v22 }
 0x351   : > { %4663 = vmatprep.subr.bf16.mxu1 %v5993_v44 }
 0x352   : > { %4664 = vmatpush3.bf16.msra.mxu1 %v5993_v44 }
 0x353   : > { %4665 = vmatprep.subr.bf16.mxu1 %v5990_v25 }
 0x356   : > { %4666 = vmatpush3.bf16.msra.mxu1 %v5990_v25 }
 0x38a   : > { %v1349_v62 = vpop.permute.xlu1 %1348 }
 0x38b   : > { %v1347_v26 = vpop.permute.xlu0 %1346  ;;  %v1391_v9 = vsel %vm1362_vm2, %v1349_v62, 0 }
 0x38c   : > { %4957 = vmatprep.subr.msk.bf16.mxu0 %vm1362_vm2, %v1347_v26  ;;  %v1388_v31 = vsel %vm1362_vm2, %v1347_v26, 0 }
 0x38d   : > { %4620 = vmatpush3.bf16.xpose.msra.mxu0 %v1388_v31 }
 0x38e   : > { %4958 = vmatprep.subr.msk.bf16.mxu0 %vm1362_vm2, %v1349_v62 }
 0x393   : > { %v1351_v36 = vpop.permute.xlu1 %1350 }
 0x394   : > { %v1394_v40 = vsel %vm1362_vm2, %v1351_v36, 0 }
 0x395   : > { %4622 = vmatpush3.bf16.xpose.msra.mxu0 %v1391_v9 }
 0x396   : > { %4959 = vmatprep.subr.msk.bf16.mxu0 %vm1362_vm2, %v1351_v36 }
 0x397   : > { %v1353_v24 = vpop.permute.xlu1 %1352 }
 0x398   : > { %v1397_v28 = vsel %vm1362_vm2, %v1353_v24, 0 }
 0x39b   : > { %v1355_v51 = vpop.permute.xlu0 %1354  ;;  %v1357_v58 = vpop.permute.xlu1 %1356 }
 0x39c   : > { %v1400_v56 = vsel %vm1362_vm2, %v1355_v51, 0  ;;  %v1403_v10 = vsel %vm1362_vm2, %v1357_v58, 0 }
 0x39d   : > { %4624 = vmatpush3.bf16.xpose.msra.mxu0 %v1394_v40 }
 0x39e   : > { %4960 = vmatprep.subr.msk.bf16.mxu0 %vm1362_vm2, %v1353_v24 }
 0x3a2   : > { %v1361_v43 = vpop.permute.xlu1 %1360 }
 0x3a3   : > { %v1359_v53 = vpop.permute.xlu0 %1358  ;;  %v1409_v11 = vsel %vm1362_vm2, %v1361_v43, 0 }
 0x3a4   : > { %v1406_v54 = vsel %vm1362_vm2, %v1359_v53, 0 }
 0x3a5   : > { %4626 = vmatpush3.bf16.xpose.msra.mxu0 %v1397_v28 }
 0x3a6   : > { %4961 = vmatprep.subr.msk.bf16.mxu0 %vm1362_vm2, %v1355_v51 }
 0x3a7   : > { %v6008_v55 = vpop.permute.xlu0 %1781 }
 0x3a8   : > { %4965 = vmatprep.subr.msk.bf16.mxu1 %vm1362_vm2, %v6008_v55 }
 0x3ad   : > { %4628 = vmatpush3.bf16.xpose.msra.mxu0 %v1400_v56 }
 0x3ae   : > { %4962 = vmatprep.subr.msk.bf16.mxu0 %vm1362_vm2, %v1357_v58 }
 0x3b5   : > { %4630 = vmatpush3.bf16.xpose.msra.mxu0 %v1403_v10 }
 0x3b6   : > { %4963 = vmatprep.subr.msk.bf16.mxu0 %vm1362_vm2, %v1359_v53 }
 0x3bd   : > { %4632 = vmatpush3.bf16.xpose.msra.mxu0 %v1406_v54 }
 0x3be   : > { %4964 = vmatprep.subr.msk.bf16.mxu0 %vm1362_vm2, %v1361_v43  ;;  %v6061_v43 = vpop.permute.xlu1 %1783 }
 0x3c5   : > { %4634 = vmatpush3.bf16.xpose.msra.mxu0 %v1409_v11 }
 0x3cc   : > { %4636 = vmatmul.mubr.msk.bf16.vlgmr.msra.gmra.mrb[16].mxu0 %vm1362_vm2, %v5903_v47 }
 0x3cd   : > { %4639 = vmatprep.mubr.msk.bf16.mxu0 %vm1362_vm2, %v5923_v5 }
 0x3d4   : > { %4640 = vmatmul.mubr.msk.bf16.gmra.mrb[20].mxu0 %vm1362_vm2, %v5921_v8 }
 0x3d5   : > { %4643 = vmatprep.mubr.msk.bf16.mxu0 %vm1362_vm2, %v5939_v30 }
 0x3dc   : > { %4644 = vmatmul.mubr.msk.bf16.gmra.mrb[24].mxu0 %vm1362_vm2, %v5937_v14 }
 0x3dd   : > { %4647 = vmatprep.mubr.msk.bf16.mxu0 %vm1362_vm2, %v5959_v60 }
 0x3e4   : > { %4648 = vmatmul.mubr.msk.bf16.gmra.mrb[28].mxu0 %vm1362_vm2, %v5954_v37 }
 0x49f   : > { %v4637_v33 = vpop.f32.mrb[16].mxu0 }
 0x4a0   : > { %1512 = vmax.xlane.f32.xlu0 %v4637_v33  ;;  %v1445_v61 = vpop.f32.mrb[17].mxu0 }
 0x4a1   : > { %v4638_v22 = vpop.f32.mrb[18].mxu0 }
 0x4a2   : > { %v1448_v7 = vpop.f32.mrb[19].mxu0 }
 0x4a3   : > { %1510 = vmax.xlane.f32.xlu1 %v1448_v7 }
 0x4a4   : > { %1508 = vmax.xlane.f32.xlu0 %v1445_v61 }
 0x4a7   : > { %v4641_v26 = vpop.f32.mrb[20].mxu0 }
 0x4a8   : > { %1514 = vmax.xlane.f32.xlu0 %v4638_v22  ;;  %v6033_v31 = vpop.f32.mrb[21].mxu0 }
 0x4a9   : > { %v6035_v62 = vpop.f32.mrb[22].mxu0 }
 0x4aa   : > { %1522 = vmax.xlane.f32.xlu1 %v6035_v62  ;;  %v1464_v9 = vpop.f32.mrb[23].mxu0 }
 0x4ac   : > { %1520 = vmax.xlane.f32.xlu0 %v4641_v26 }
 0x4ae   : > { %1518 = vmax.xlane.f32.xlu1 %v1464_v9 }
 0x4af   : > { %v6038_v36 = vpop.f32.mrb[24].mxu0 }
 0x4b0   : > { %1516 = vmax.xlane.f32.xlu0 %v6033_v31  ;;  %v6041_v40 = vpop.f32.mrb[25].mxu0 }
 0x4b1   : > { %v6043_v24 = vpop.f32.mrb[26].mxu0 }
 0x4b2   : > { %1530 = vmax.xlane.f32.xlu1 %v6043_v24  ;;  %v6046_v51 = vpop.f32.mrb[27].mxu0 }
 0x4b4   : > { %1528 = vmax.xlane.f32.xlu0 %v6038_v36 }
 0x4b6   : > { %1526 = vmax.xlane.f32.xlu1 %v6046_v51 }
 0x4b7   : > { %v4649_v53 = vpop.f32.mrb[28].mxu0 }
 0x4b8   : > { %1524 = vmax.xlane.f32.xlu0 %v6041_v40  ;;  %v1493_v28 = vpop.f32.mrb[29].mxu0 }
 0x4b9   : > { %v6051_v56 = vpop.f32.mrb[30].mxu0 }
 0x4ba   : > { %v6053_v58 = vpop.f32.mrb[31].mxu0 }
 0x4bc   : > { %1536 = vmax.xlane.f32.xlu0 %v4649_v53 }
 0x4c0   : > { %1532 = vmax.xlane.f32.xlu0 %v1493_v28 }
 0x4c7   : > { %1787 = vrot.lane.b32.xlu1 %v5917_v4, %s5488_s21 }
 0x4d6   : > { %1785 = vrot.lane.b32.xlu0 %v5919_v6, %s5488_s21 }
 0x4eb   : > { %1538 = vmax.xlane.f32.xlu1 %v6051_v56 }
 0x4ef   : > { %1534 = vmax.xlane.f32.xlu1 %v6053_v58 }
 0x52d   : > { %v1513_v10 = vpop.xlane.xlu0 %1512 }
 0x52e   : > { %v1542_v54 = vsub.f32 %v4637_v33, %v1513_v10 }
 0x530   : > { %v1560_v11 = vmul.f32 1.442695, %v1542_v54  ;;  %v1511_v18 = vpop.xlane.xlu1 %1510 }
 0x531   : > { %v1509_v1 = vpop.xlane.xlu0 %1508  ;;  %v1541_v16 = vsub.f32 %v1448_v7, %v1511_v18 }
 0x532   : > { %5190 = vpow2.f32 %v1560_v11  ;;  %v1540_v21 = vsub.f32 %v1445_v61, %v1509_v1 }
 0x533   : > { %v1558_v3 = vmul.f32 1.442695, %v1541_v16 }
 0x534   : > { %v1556_v19 = vmul.f32 1.442695, %v1540_v21 }
 0x535   : > { %v1515_v15 = vpop.xlane.xlu0 %1514 }
 0x536   : > { %5192 = vpow2.f32 %v1556_v19  ;;  %v1543_v63 = vsub.f32 %v4638_v22, %v1515_v15 }
 0x538   : > { %v1562_v2 = vmul.f32 1.442695, %v1543_v63 }
 0x539   : > { %v1521_v63 = vpop.xlane.xlu0 %1520 }
 0x53a   : > { %5194 = vpow2.f32 %v1562_v2  ;;  %v1546_v19 = vsub.f32 %v4641_v26, %v1521_v63 }
 0x53b   : > { %5196 = vpow2.f32 %v1558_v3  ;;  %v1523_v3 = vpop.xlane.xlu1 %1522 }
 0x53c   : > { %v6063_v0 = vpop.eup %5190  ;;  %v1568_v61 = vmul.f32 1.442695, %v1546_v19  ;;  %v1547_v50 = vsub.f32 %v6035_v62, %v1523_v3 }
 0x53d   : > { %1592 = vadd.xlane.f32.xlu0 %v6063_v0  ;;  %v1517_v15 = vpop.xlane.xlu0 %1516 }
 0x53e   : > { %v1544_v54 = vsub.f32 %v6033_v31, %v1517_v15  ;;  %5198 = vpow2.f32 %v1568_v61  ;;  %v1570_v32 = vmul.f32 1.442695, %v1547_v50 }
 0x53f   : > { %v1519_v18 = vpop.xlane.xlu1 %1518 }
 0x540   : > { %v6066_v33 = vpop.eup %5192  ;;  %v1545_v22 = vsub.f32 %v1464_v9, %v1519_v18  ;;  %v1564_v46 = vmul.f32 1.442695, %v1544_v54 }
 0x541   : > { %1588 = vadd.xlane.f32.xlu0 %v6066_v33  ;;  %v1529_v2 = vpop.xlane.xlu0 %1528 }
 0x542   : > { %v1566_v11 = vmul.f32 1.442695, %v1545_v22  ;;  %v1550_v26 = vsub.f32 %v6038_v36, %v1529_v2 }
 0x543   : > { %v1531_v7 = vpop.xlane.xlu1 %1530 }
 0x544   : > { %v6069_v10 = vpop.eup %5194  ;;  %5200 = vpow2.f32 %v1566_v11 }
 0x545   : > { %1594 = vadd.xlane.f32.xlu1 %v6069_v10  ;;  %v6072_v21 = vpop.eup %5196  ;;  %v1525_v16 = vpop.xlane.xlu0 %1524  ;;  %5202 = vpow2.f32 %v1564_v46 }
 0x546   : > { %v1548_v62 = vsub.f32 %v6041_v40, %v1525_v16 }
 0x547   : > { %v1527_v35 = vpop.xlane.xlu1 %1526 }
 0x548   : > { %v6084_v31 = vpop.eup %5198  ;;  %v1549_v40 = vsub.f32 %v6046_v51, %v1527_v35 }
 0x549   : > { %1590 = vadd.xlane.f32.xlu1 %v6072_v21  ;;  %v1537_v1 = vpop.xlane.xlu0 %1536 }
 0x54a   : > { %v1554_v49 = vsub.f32 %v4649_v53, %v1537_v1  ;;  %v1576_v53 = vmul.f32 1.442695, %v1550_v26  ;;  %v1574_v2 = vmul.f32 1.442695, %v1549_v40  ;;  %v1822_v40 = vsel %vm1362_vm2, %v6008_v55, 0 }
 0x54b   : > { %v6082_v63 = vpop.permute.xlu1 %1787 }
 0x54c   : > { %v1584_v39 = vmul.f32 1.442695, %v1554_v49  ;;  %v1831_v55 = vsel %vm1362_vm2, %v6082_v63, 0 }
 0x54d   : > { %v1533_v52 = vpop.xlane.xlu0 %1532 }
 0x54e   : > { %v1552_v29 = vsub.f32 %v1493_v28, %v1533_v52  ;;  %5204 = vpow2.f32 %v1584_v39  ;;  %v6088_v49 = vpop.eup %5200  ;;  %v1572_v39 = vmul.f32 1.442695, %v1548_v62 }
 0x54f   : > { %5206 = vpow2.f32 %v1570_v32  ;;  %v6093_v52 = vpop.eup %5202 }
 0x550   : > { %v1580_v9 = vmul.f32 1.442695, %v1552_v29  ;;  %v1551_v29 = vsub.f32 %v6043_v24, %v1531_v7 }
 0x551   : > { %v1786_v61 = vpop.permute.xlu0 %1785 }
 0x552   : > { %5208 = vpow2.f32 %v1580_v9  ;;  %v1578_v36 = vmul.f32 1.442695, %v1551_v29 }
 0x553   : > { %5210 = vpow2.f32 %v1576_v53 }
 0x557   : > { %1789 = vrot.lane.b32.xlu0 %v5935_v57, %s5488_s21 }
 0x558   : > { %v6095_v32 = vpop.eup %5204 }
 0x559   : > { %v6100_v28 = vpop.eup %5206 }
 0x55a   : > { %1791 = vrot.lane.b32.xlu1 %v5933_v12, %s5488_s21 }
 0x55c   : > { %v6102_v24 = vpop.eup %5208 }
 0x55d   : > { %v6107_v16 = vpop.eup %5210 }
 0x576   : > { %1600 = vadd.xlane.f32.xlu0 %v6084_v31 }
 0x578   : > { %v1539_v15 = vpop.xlane.xlu1 %1538 }
 0x579   : > { %v1555_v46 = vsub.f32 %v6051_v56, %v1539_v15 }
 0x57a   : > { %1598 = vadd.xlane.f32.xlu0 %v6088_v49 }
 0x57b   : > { %v1586_v50 = vmul.f32 1.442695, %v1555_v46 }
 0x57c   : > { %v1535_v56 = vpop.xlane.xlu1 %1534 }
 0x57d   : > { %5212 = vpow2.f32 %v1586_v50  ;;  %v1553_v3 = vsub.f32 %v6053_v58, %v1535_v56 }
 0x57e   : > { %1596 = vadd.xlane.f32.xlu1 %v6093_v52  ;;  %1616 = vadd.xlane.f32.xlu0 %v6095_v32  ;;  %5214 = vpow2.f32 %v1572_v39 }
 0x57f   : > { %5216 = vpow2.f32 %v1578_v36  ;;  %v1582_v35 = vmul.f32 1.442695, %v1553_v3 }
 0x580   : > { %5218 = vpow2.f32 %v1574_v2 }
 0x581   : > { %5220 = vpow2.f32 %v1582_v35 }
 0x582   : > { %1602 = vadd.xlane.f32.xlu1 %v6100_v28  ;;  %1612 = vadd.xlane.f32.xlu0 %v6102_v24 }
 0x586   : > { %1608 = vadd.xlane.f32.xlu1 %v6107_v16 }
 0x587   : > { %v6110_v18 = vpop.eup %5212 }
 0x588   : > { %1618 = vadd.xlane.f32.xlu0 %v6110_v18  ;;  %v6113_v51 = vpop.eup %5214 }
 0x589   : > { %v6116_v19 = vpop.eup %5216 }
 0x58a   : > { %1604 = vadd.xlane.f32.xlu1 %v6113_v51  ;;  %v6119_v58 = vpop.eup %5218 }
 0x58b   : > { %v6122_v1 = vpop.eup %5220 }
 0x58e   : > { %1610 = vadd.xlane.f32.xlu1 %v6116_v19 }
 0x592   : > { %1606 = vadd.xlane.f32.xlu1 %v6119_v58 }
 0x596   : > { %1614 = vadd.xlane.f32.xlu1 %v6122_v1 }
 0x59e   : > { %1793 = vrot.lane.b32.xlu0 %v5952_v59, %s5488_s21 }
 0x5a2   : > { %1765 = vrot.lane.b32.xlu0 %v5907_v48, %s5489_s22 }
 0x5a6   : > { %1769 = vrot.lane.b32.xlu0 %v5923_v5, %s5489_s22 }
 0x5a7   : > { %1795 = vrot.lane.b32.xlu1 %v5950_v34, %s5488_s21 }
 0x5aa   : > { %1773 = vrot.lane.b32.xlu0 %v5939_v30, %s5489_s22 }
 0x5ab   : > { %1767 = vrot.lane.b32.xlu1 %v5903_v47, %s5489_s22 }
 0x5ae   : > { %1777 = vrot.lane.b32.xlu0 %v5959_v60, %s5489_s22 }
 0x5af   : > { %1771 = vrot.lane.b32.xlu1 %v5921_v8, %s5489_s22 }
 0x5b2   : > { %2102 = vrot.lane.b32.xlu0 %v5969_v13, %s5489_s22 }
 0x5b3   : > { %1775 = vrot.lane.b32.xlu1 %v5937_v14, %s5489_s22 }
 0x5b6   : > { %2106 = vrot.lane.b32.xlu0 %v5977_v42, %s5489_s22 }
 0x5b7   : > { %1779 = vrot.lane.b32.xlu1 %v5954_v37, %s5489_s22 }
 0x5ba   : > { %2110 = vrot.lane.b32.xlu0 %v5985_v17, %s5489_s22 }
 0x5bb   : > { %2104 = vrot.lane.b32.xlu1 %v5967_v23, %s5489_s22 }
 0x5be   : > { %2114 = vrot.lane.b32.xlu0 %v5993_v44, %s5489_s22 }
 0x5bf   : > { %2108 = vrot.lane.b32.xlu1 %v5974_v38, %s5489_s22 }
 0x5c2   : > { %2239 = vrot.lane.b32.xlu0 %v5901_v41, %s5490_s23 }
 0x5c3   : > { %2112 = vrot.lane.b32.xlu1 %v5982_v45, %s5489_s22 }
 0x5c7   : > { %2116 = vrot.lane.b32.xlu1 %v5990_v25, %s5489_s22 }
 0x5ca   : > { %v1593_v22 = vpop.xlane.xlu0 %1592 }
 0x5cb   : > { %2241 = vrot.lane.b32.xlu1 %v5899_v27, %s5490_s23 }
 0x5ce   : > { %v1589_v7 = vpop.xlane.xlu0 %1588 }
 0x5d2   : > { %v1595_v54 = vpop.xlane.xlu1 %1594 }
 0x5d3   : > { %5222 = vrcp.f32 %v1595_v54 }
 0x5d4   : > { %5224 = vrcp.f32 %v1589_v7 }
 0x5d5   : > { %5226 = vrcp.f32 %v1593_v22 }
 0x5d6   : > { %v1591_v11 = vpop.xlane.xlu1 %1590 }
 0x5d7   : > { %5228 = vrcp.f32 %v1591_v11 }
 0x5da   : > { %v1792_v56 = vpop.permute.xlu1 %1791 }
 0x5db   : > { %v1837_v22 = vsel %vm1362_vm2, %v1792_v56, 0 }
 0x5dd   : > { %v5223_v26 = vpop.eup %5222 }
 0x5de   : > { %v5225_v9 = vpop.eup %5224  ;;  %v1627_v15 = vmul.f32 %v5223_v26, %v6069_v10  ;;  %v1825_v10 = vsel %vm1362_vm2, %v6061_v43, 0 }
 0x5df   : > { %v5227_v53 = vpop.eup %5226  ;;  %v1621_v46 = vmul.f32 %v5225_v9, %v6066_v33  ;;  %v1828_v33 = vsel %vm1362_vm2, %v1786_v61, 0 }
 0x5e0   : > { %v1625_v39 = vmul.f32 %v5227_v53, %v6063_v0  ;;  %v1790_v0 = vpop.permute.xlu0 %1789 }
 0x5e1   : > { %v5229_v62 = vpop.eup %5228 }
 0x5e2   : > { %v1623_v29 = vmul.f32 %v5229_v62, %v6072_v21  ;;  %v1653_v36 = vpack.c.bf16 %v1627_v15, %v1625_v39 }
 0x5e4   : > { %v1652_v50 = vpack.c.bf16 %v1623_v29, %v1621_v46 }
 0x5e6   : > { %4667 = vmatprep.mubr.bf16.mxu1 %v1652_v50 }
 0x5e7   : > { %4668 = vmatmul.mubr.bf16.vlgmr.msra.gmra.mrb[40].mxu1 %v1653_v36 }
 0x5e8   : > { %4684 = vmatpush3.bf16.xpose.msra.mxu1 %v1822_v40 }
 0x5e9   : > { %4966 = vmatprep.subr.msk.bf16.mxu1 %vm1362_vm2, %v6061_v43  ;;  %v1834_v43 = vsel %vm1362_vm2, %v1790_v0, 0 }
 0x5f0   : > { %4686 = vmatpush3.bf16.xpose.msra.mxu1 %v1825_v10 }
 0x5f1   : > { %4967 = vmatprep.subr.msk.bf16.mxu1 %vm1362_vm2, %v1786_v61 }
 0x5f8   : > { %4688 = vmatpush3.bf16.xpose.msra.mxu1 %v1828_v33 }
 0x5f9   : > { %4968 = vmatprep.subr.msk.bf16.mxu1 %vm1362_vm2, %v6082_v63 }
 0x600   : > { %4690 = vmatpush3.bf16.xpose.msra.mxu1 %v1831_v55 }
 0x601   : > { %4969 = vmatprep.subr.msk.bf16.mxu1 %vm1362_vm2, %v1790_v0 }
 0x603   : > { %v1601_v21 = vpop.xlane.xlu0 %1600 }
 0x607   : > { %v1599_v2 = vpop.xlane.xlu0 %1598 }
 0x608   : > { %4692 = vmatpush3.bf16.xpose.msra.mxu1 %v1834_v43  ;;  %5230 = vrcp.f32 %v1599_v2 }
 0x609   : > { %4970 = vmatprep.subr.msk.bf16.mxu1 %vm1362_vm2, %v1792_v56 }
 0x60b   : > { %v1597_v3 = vpop.xlane.xlu1 %1596  ;;  %v1617_v35 = vpop.xlane.xlu0 %1616 }
 0x60c   : > { %5232 = vrcp.f32 %v1597_v3 }
 0x60d   : > { %5234 = vrcp.f32 %v1601_v21 }
 0x60f   : > { %v1603_v61 = vpop.xlane.xlu1 %1602  ;;  %v1613_v63 = vpop.xlane.xlu0 %1612 }
 0x610   : > { %5236 = vrcp.f32 %v1603_v61  ;;  %4694 = vmatpush3.bf16.xpose.msra.mxu1 %v1837_v22 }
 0x612   : > { %v5231_v54 = vpop.eup %5230 }
 0x613   : > { %v1609_v7 = vpop.xlane.xlu1 %1608  ;;  %v1631_v62 = vmul.f32 %v5231_v54, %v6088_v49 }
 0x615   : > { %v1619_v11 = vpop.xlane.xlu0 %1618 }
 0x616   : > { %v5233_v26 = vpop.eup %5232 }
 0x617   : > { %v1605_v9 = vpop.xlane.xlu1 %1604  ;;  %v1629_v53 = vmul.f32 %v5233_v26, %v6093_v52  ;;  %v5235_v15 = vpop.eup %5234 }
 0x618   : > { %v1633_v40 = vmul.f32 %v5235_v15, %v6084_v31 }
 0x619   : > { %v1794_v46 = vpop.permute.xlu0 %1793  ;;  %v1654_v29 = vpack.c.bf16 %v1631_v62, %v1629_v53 }
 0x61a   : > { %v5237_v39 = vpop.eup %5236  ;;  %4971 = vmatprep.subr.msk.bf16.mxu1 %vm1362_vm2, %v1794_v46  ;;  %v1840_v50 = vsel %vm1362_vm2, %v1794_v46, 0 }
 0x61b   : > { %v1611_v36 = vpop.xlane.xlu1 %1610  ;;  %4671 = vmatprep.mubr.bf16.mxu1 %v1654_v29  ;;  %4696 = vmatpush3.bf16.xpose.msra.mxu1 %v1840_v50  ;;  %v1635_v10 = vmul.f32 %v5237_v39, %v6100_v28 }
 0x61c   : > { %5238 = vrcp.f32 %v1611_v36 }
 0x61d   : > { %v1766_v33 = vpop.permute.xlu0 %1765  ;;  %v1655_v52 = vpack.c.bf16 %v1635_v10, %v1633_v40  ;;  %5240 = vrcp.f32 %v1605_v9 }
 0x61e   : > { %5242 = vrcp.f32 %v1609_v7 }
 0x61f   : > { %v1607_v49 = vpop.xlane.xlu1 %1606  ;;  %4672 = vmatmul.mubr.bf16.gmra.mrb[44].mxu1 %v1655_v52 }
 0x620   : > { %5244 = vrcp.f32 %v1607_v49 }
 0x621   : > { %v1770_v0 = vpop.permute.xlu0 %1769  ;;  %5246 = vrcp.f32 %v1613_v63 }
 0x623   : > { %v1615_v55 = vpop.xlane.xlu1 %1614 }
 0x624   : > { %5248 = vrcp.f32 %v1615_v55 }
 0x625   : > { %5250 = vrcp.f32 %v1619_v11  ;;  %v1774_v21 = vpop.permute.xlu0 %1773 }
 0x626   : > { %v5239_v56 = vpop.eup %5238  ;;  %5252 = vrcp.f32 %v1617_v35 }
 0x627   : > { %v1796_v43 = vpop.permute.xlu1 %1795  ;;  %v5241_v31 = vpop.eup %5240  ;;  %v1643_v22 = vmul.f32 %v5239_v56, %v6116_v19 }
 0x628   : > { %4972 = vmatprep.subr.msk.bf16.mxu1 %vm1362_vm2, %v1796_v43  ;;  %v1843_v28 = vsel %vm1362_vm2, %v1796_v43, 0  ;;  %v5243_v2 = vpop.eup %5242  ;;  %v1637_v63 = vmul.f32 %v5241_v31, %v6113_v51 }
 0x629   : > { %4698 = vmatpush3.bf16.xpose.msra.mxu1 %v1843_v28  ;;  %v1778_v3 = vpop.permute.xlu0 %1777  ;;  %v1641_v35 = vmul.f32 %v5243_v2, %v6107_v16 }
 0x62a   : > { %v5245_v61 = vpop.eup %5244 }
 0x62b   : > { %v1768_v7 = vpop.permute.xlu1 %1767  ;;  %v1639_v54 = vmul.f32 %v5245_v61, %v6119_v58  ;;  %v5247_v11 = vpop.eup %5246  ;;  %v1657_v62 = vpack.c.bf16 %v1643_v22, %v1641_v35 }
 0x62c   : > { %v1645_v29 = vmul.f32 %v5247_v11, %v6102_v24 }
 0x62d   : > { %v2103_v26 = vpop.permute.xlu0 %2102  ;;  %v1656_v9 = vpack.c.bf16 %v1639_v54, %v1637_v63 }
 0x62e   : > { %v5249_v53 = vpop.eup %5248  ;;  %4715 = vmatprep.subr.bf16.mxu0 %v2103_v26 }
 0x62f   : > { %v5251_v15 = vpop.eup %5250  ;;  %v1772_v46 = vpop.permute.xlu1 %1771  ;;  %4675 = vmatprep.mubr.bf16.mxu1 %v1656_v9  ;;  %4716 = vmatpush3.bf16.msra.mxu0 %v2103_v26  ;;  %v1647_v19 = vmul.f32 %v5249_v53, %v6122_v1 }
 0x630   : > { %4676 = vmatmul.mubr.bf16.gmra.mrb[48].mxu1 %v1657_v62  ;;  %v5253_v51 = vpop.eup %5252  ;;  %v1651_v58 = vmul.f32 %v5251_v15, %v6110_v18 }
 0x631   : > { %v1658_v39 = vpack.c.bf16 %v1647_v19, %v1645_v29  ;;  %v1649_v16 = vmul.f32 %v5253_v51, %v6095_v32  ;;  %v2107_v52 = vpop.permute.xlu0 %2106 }
 0x633   : > { %v1776_v50 = vpop.permute.xlu1 %1775  ;;  %4679 = vmatprep.mubr.bf16.mxu1 %v1658_v39  ;;  %v1659_v36 = vpack.c.bf16 %v1651_v58, %v1649_v16 }
 0x635   : > { %v2111_v18 = vpop.permute.xlu0 %2110 }
 0x637   : > { %v1780_v40 = vpop.permute.xlu1 %1779 }
 0x638   : > { %4680 = vmatmul.mubr.bf16.gmra.mrb[52].mxu1 %v1659_v36 }
 0x639   : > { %4699 = vmatprep.mubr.msk.bf16.mxu1 %vm1362_vm2, %v1766_v33  ;;  %v2115_v1 = vpop.permute.xlu0 %2114 }
 0x63b   : > { %v2105_v10 = vpop.permute.xlu1 %2104 }
 0x63c   : > { %4717 = vmatprep.subr.bf16.mxu0 %v2105_v10 }
 0x63d   : > { %4718 = vmatpush3.bf16.msra.mxu0 %v2105_v10  ;;  %v6192_v49 = vpop.permute.xlu0 %2239 }
 0x63e   : > { %4719 = vmatprep.subr.bf16.mxu0 %v2107_v52 }
 0x63f   : > { %v2109_v24 = vpop.permute.xlu1 %2108 }
 0x640   : > { %4700 = vmatmul.mubr.msk.bf16.vlgmr.msra.gmra.mrb[56].mxu1 %vm1362_vm2, %v1768_v7 }
 0x641   : > { %4703 = vmatprep.mubr.msk.bf16.mxu1 %vm1362_vm2, %v1770_v0  ;;  %4720 = vmatpush3.bf16.msra.mxu0 %v2107_v52 }
 0x642   : > { %4721 = vmatprep.subr.bf16.mxu0 %v2109_v24 }
 0x643   : > { %v2113_v32 = vpop.permute.xlu1 %2112 }
 0x645   : > { %4722 = vmatpush3.bf16.msra.mxu0 %v2109_v24 }
 0x646   : > { %4723 = vmatprep.subr.bf16.mxu0 %v2111_v18 }
 0x647   : > { %v2117_v33 = vpop.permute.xlu1 %2116 }
 0x648   : > { %4704 = vmatmul.mubr.msk.bf16.gmra.mrb[60].mxu1 %vm1362_vm2, %v1772_v46 }
 0x649   : > { %4707 = vmatprep.mubr.msk.bf16.mxu1 %vm1362_vm2, %v1774_v21  ;;  %4724 = vmatpush3.bf16.msra.mxu0 %v2111_v18 }
 0x64a   : > { %4725 = vmatprep.subr.bf16.mxu0 %v2113_v32 }
 0x64b   : > { %v6266_v52 = vpop.permute.xlu1 %2241 }
 0x64d   : > { %4726 = vmatpush3.bf16.msra.mxu0 %v2113_v32 }
 0x64e   : > { %4727 = vmatprep.subr.bf16.mxu0 %v2115_v1 }
 0x650   : > { %4708 = vmatmul.mubr.msk.bf16.gmra.mrb[64].mxu1 %vm1362_vm2, %v1776_v50 }
 0x651   : > { %4711 = vmatprep.mubr.msk.bf16.mxu1 %vm1362_vm2, %v1778_v3  ;;  %4728 = vmatpush3.bf16.msra.mxu0 %v2115_v1 }
 0x652   : > { %4729 = vmatprep.subr.bf16.mxu0 %v2117_v33 }
 0x655   : > { %4730 = vmatpush3.bf16.msra.mxu0 %v2117_v33 }
 0x656   : > { %4973 = vmatprep.subr.msk.bf16.mxu0 %vm1362_vm2, %v6192_v49 }
 0x658   : > { %4712 = vmatmul.mubr.msk.bf16.gmra.mrb[68].mxu1 %vm1362_vm2, %v1780_v40 }
 0x6ba   : > { %v6197_v0 = vpop.f32.mrb[40].mxu1 }
 0x6bb   : > { %7348 = vst [vmem:[#allocation19_spill] sm:$0xff] %v6197_v0  ;;  %v6199_v55 = vpop.f32.mrb[41].mxu1 }
 0x6bc   : > { %7349 = vst [vmem:[#allocation20_spill] sm:$0xff] %v6199_v55  ;;  %v6201_v21 = vpop.f32.mrb[42].mxu1 }
 0x6bd   : > { %7350 = vst [vmem:[#allocation21_spill] sm:$0xff] %v6201_v21  ;;  %v6203_v56 = vpop.f32.mrb[43].mxu1 }
 0x6be   : > { %7351 = vst [vmem:[#allocation22_spill] sm:$0xff] %v6203_v56 }
 0x6f2   : > { %v6205_v43 = vpop.f32.mrb[44].mxu1 }
 0x6f3   : > { %7352 = vst [vmem:[#allocation23_spill] sm:$0xff] %v6205_v43  ;;  %v6207_v31 = vpop.f32.mrb[45].mxu1 }
 0x6f4   : > { %7353 = vst [vmem:[#allocation24_spill] sm:$0xff] %v6207_v31  ;;  %v6209_v28 = vpop.f32.mrb[46].mxu1 }
 0x6f5   : > { %7354 = vst [vmem:[#allocation25_spill] sm:$0xff] %v6209_v28  ;;  %v6211_v2 = vpop.f32.mrb[47].mxu1 }
 0x6f6   : > { %7355 = vst [vmem:[#allocation26_spill] sm:$0xff] %v6211_v2 }
 0x703   : > { %v6213_v3 = vpop.f32.mrb[48].mxu1 }
 0x704   : > { %7356 = vst [vmem:[#allocation27_spill] sm:$0xff] %v6213_v3  ;;  %v6215_v61 = vpop.f32.mrb[49].mxu1 }
 0x705   : > { %7357 = vst [vmem:[#allocation28_spill] sm:$0xff] %v6215_v61  ;;  %v6217_v22 = vpop.f32.mrb[50].mxu1 }
 0x706   : > { %7358 = vst [vmem:[#allocation29_spill] sm:$0xff] %v6217_v22  ;;  %v6219_v7 = vpop.f32.mrb[51].mxu1 }
 0x707   : > { %7359 = vst [vmem:[#allocation30_spill] sm:$0xff] %v6219_v7 }
 0x70b   : > { %v6221_v63 = vpop.f32.mrb[52].mxu1 }
 0x70c   : > { %7360 = vst [vmem:[#allocation31_spill] sm:$0xff] %v6221_v63  ;;  %v6223_v54 = vpop.f32.mrb[53].mxu1 }
 0x70d   : > { %7361 = vst [vmem:[#allocation32_spill] sm:$0xff] %v6223_v54  ;;  %v6225_v11 = vpop.f32.mrb[54].mxu1 }
 0x70e   : > { %7362 = vst [vmem:[#allocation33_spill] sm:$0xff] %v6225_v11  ;;  %v6227_v35 = vpop.f32.mrb[55].mxu1 }
 0x70f   : > { %7363 = vst [vmem:[#allocation34_spill] sm:$0xff] %v6227_v35 }
 0x713   : > { %v4701_v26 = vpop.f32.mrb[56].mxu1 }
 0x714   : > { %1946 = vmax.xlane.f32.xlu0 %v4701_v26  ;;  %v1879_v9 = vpop.f32.mrb[57].mxu1 }
 0x715   : > { %v4702_v53 = vpop.f32.mrb[58].mxu1 }
 0x716   : > { %v1882_v62 = vpop.f32.mrb[59].mxu1 }
 0x717   : > { %1944 = vmax.xlane.f32.xlu1 %v1882_v62 }
 0x718   : > { %1942 = vmax.xlane.f32.xlu0 %v1879_v9 }
 0x71b   : > { %v4705_v15 = vpop.f32.mrb[60].mxu1 }
 0x71c   : > { %1948 = vmax.xlane.f32.xlu0 %v4702_v53  ;;  %v6229_v46 = vpop.f32.mrb[61].mxu1 }
 0x71d   : > { %v6231_v29 = vpop.f32.mrb[62].mxu1 }
 0x71e   : > { %1956 = vmax.xlane.f32.xlu1 %v6231_v29  ;;  %v6234_v19 = vpop.f32.mrb[63].mxu1 }
 0x720   : > { %1954 = vmax.xlane.f32.xlu0 %v4705_v15 }
 0x722   : > { %1952 = vmax.xlane.f32.xlu1 %v6234_v19 }
 0x723   : > { %v6237_v51 = vpop.f32.mrb[64].mxu1 }
 0x724   : > { %1950 = vmax.xlane.f32.xlu0 %v6229_v46  ;;  %v6240_v39 = vpop.f32.mrb[65].mxu1 }
 0x725   : > { %v6242_v58 = vpop.f32.mrb[66].mxu1 }
 0x726   : > { %1964 = vmax.xlane.f32.xlu1 %v6242_v58  ;;  %v6245_v50 = vpop.f32.mrb[67].mxu1 }
 0x728   : > { %1962 = vmax.xlane.f32.xlu0 %v6237_v51 }
 0x72a   : > { %1960 = vmax.xlane.f32.xlu1 %v6245_v50 }
 0x72b   : > { %v6249_v16 = vpop.f32.mrb[68].mxu1 }
 0x72c   : > { %1958 = vmax.xlane.f32.xlu0 %v6240_v39  ;;  %v6252_v36 = vpop.f32.mrb[69].mxu1 }
 0x72d   : > { %v6254_v40 = vpop.f32.mrb[70].mxu1 }
 0x72e   : > { %v6256_v10 = vpop.f32.mrb[71].mxu1 }
 0x730   : > { %1970 = vmax.xlane.f32.xlu0 %v6249_v16 }
 0x734   : > { %1966 = vmax.xlane.f32.xlu0 %v6252_v36 }
 0x73b   : > { %2245 = vrot.lane.b32.xlu1 %v5917_v4, %s5490_s23 }
 0x74a   : > { %2243 = vrot.lane.b32.xlu0 %v5919_v6, %s5490_s23 }
 0x75f   : > { %1972 = vmax.xlane.f32.xlu1 %v6254_v40 }
 0x763   : > { %1968 = vmax.xlane.f32.xlu1 %v6256_v10 }
 0x7a1   : > { %v1947_v24 = vpop.xlane.xlu0 %1946 }
 0x7a2   : > { %v1976_v18 = vsub.f32 %v4701_v26, %v1947_v24 }
 0x7a4   : > { %v1994_v32 = vmul.f32 1.442695, %v1976_v18  ;;  %v1945_v1 = vpop.xlane.xlu1 %1944 }
 0x7a5   : > { %v1975_v33 = vsub.f32 %v1882_v62, %v1945_v1  ;;  %v1943_v20 = vpop.xlane.xlu0 %1942 }
 0x7a6   : > { %5254 = vpow2.f32 %v1994_v32  ;;  %v1974_v54 = vsub.f32 %v1879_v9, %v1943_v20 }
 0x7a7   : > { %v1992_v35 = vmul.f32 1.442695, %v1975_v33 }
 0x7a8   : > { %v1990_v63 = vmul.f32 1.442695, %v1974_v54 }
 0x7a9   : > { %5256 = vpow2.f32 %v1992_v35  ;;  %v1949_v11 = vpop.xlane.xlu0 %1948 }
 0x7aa   : > { %5258 = vpow2.f32 %v1990_v63  ;;  %v1977_v61 = vsub.f32 %v4702_v53, %v1949_v11 }
 0x7ac   : > { %v1996_v7 = vmul.f32 1.442695, %v1977_v61 }
 0x7ad   : > { %v1955_v63 = vpop.xlane.xlu0 %1954 }
 0x7ae   : > { %5260 = vpow2.f32 %v1996_v7  ;;  %v1957_v7 = vpop.xlane.xlu1 %1956  ;;  %v1980_v11 = vsub.f32 %v4705_v15, %v1955_v63 }
 0x7af   : > { %v1981_v1 = vsub.f32 %v6231_v29, %v1957_v7 }
 0x7b0   : > { %v6268_v3 = vpop.eup %5254  ;;  %v2002_v53 = vmul.f32 1.442695, %v1980_v11 }
 0x7b1   : > { %2026 = vadd.xlane.f32.xlu1 %v6268_v3  ;;  %v1951_v61 = vpop.xlane.xlu0 %1950  ;;  %v2004_v28 = vmul.f32 1.442695, %v1981_v1 }
 0x7b2   : > { %v1953_v35 = vpop.xlane.xlu1 %1952  ;;  %v1978_v62 = vsub.f32 %v6229_v46, %v1951_v61  ;;  %5262 = vpow2.f32 %v2002_v53 }
 0x7b3   : > { %v6271_v22 = vpop.eup %5256  ;;  %v1979_v24 = vsub.f32 %v6234_v19, %v1953_v35 }
 0x7b4   : > { %v6273_v26 = vpop.eup %5258  ;;  %2024 = vadd.xlane.f32.xlu0 %v6271_v22  ;;  %v1998_v33 = vmul.f32 1.442695, %v1978_v62 }
 0x7b5   : > { %2022 = vadd.xlane.f32.xlu1 %v6273_v26  ;;  %v1963_v54 = vpop.xlane.xlu0 %1962  ;;  %v2000_v31 = vmul.f32 1.442695, %v1979_v24 }
 0x7b6   : > { %v1965_v18 = vpop.xlane.xlu1 %1964  ;;  %v1984_v2 = vsub.f32 %v6237_v51, %v1963_v54  ;;  %5264 = vpow2.f32 %v1998_v33 }
 0x7b7   : > { %5266 = vpow2.f32 %v2000_v31  ;;  %v1985_v29 = vsub.f32 %v6242_v58, %v1965_v18 }
 0x7b8   : > { %v6277_v20 = vpop.eup %5260  ;;  %v2010_v63 = vmul.f32 1.442695, %v1984_v2  ;;  %5268 = vpow2.f32 %v2004_v28 }
 0x7b9   : > { %2028 = vadd.xlane.f32.xlu1 %v6277_v20  ;;  %v1959_v9 = vpop.xlane.xlu0 %1958  ;;  %v2012_v2 = vmul.f32 1.442695, %v1985_v29 }
 0x7ba   : > { %v1961_v43 = vpop.xlane.xlu1 %1960  ;;  %v1982_v46 = vsub.f32 %v6240_v39, %v1959_v9  ;;  %5270 = vpow2.f32 %v2010_v63 }
 0x7bb   : > { %v1983_v39 = vsub.f32 %v6245_v50, %v1961_v43 }
 0x7bc   : > { %v2006_v7 = vmul.f32 1.442695, %v1982_v46  ;;  %v6292_v35 = vpop.eup %5262 }
 0x7bd   : > { %v1971_v32 = vpop.xlane.xlu0 %1970  ;;  %v2008_v54 = vmul.f32 1.442695, %v1983_v39 }
 0x7be   : > { %v1988_v15 = vsub.f32 %v6249_v16, %v1971_v32  ;;  %v6294_v51 = vpop.permute.xlu1 %2245 }
 0x7c0   : > { %v2018_v19 = vmul.f32 1.442695, %v1988_v15  ;;  %v6298_v28 = vpop.eup %5264 }
 0x7c1   : > { %v1967_v61 = vpop.xlane.xlu0 %1966 }
 0x7c2   : > { %v1986_v11 = vsub.f32 %v6252_v36, %v1967_v61  ;;  %5272 = vpow2.f32 %v2018_v19  ;;  %v6300_v36 = vpop.eup %5266 }
 0x7c3   : > { %5274 = vpow2.f32 %v2006_v7  ;;  %v6305_v53 = vpop.eup %5268 }
 0x7c4   : > { %v2014_v31 = vmul.f32 1.442695, %v1986_v11  ;;  %v6307_v43 = vpop.eup %5270 }
 0x7c5   : > { %v2244_v63 = vpop.permute.xlu0 %2243 }
 0x7c6   : > { %5276 = vpow2.f32 %v2014_v31 }
 0x7c7   : > { %5278 = vpow2.f32 %v2012_v2 }
 0x7ca   : > { %2247 = vrot.lane.b32.xlu0 %v5935_v57, %s5490_s23  ;;  %2249 = vrot.lane.b32.xlu1 %v5933_v12, %s5490_s23 }
 0x7cc   : > { %v6312_v24 = vpop.eup %5272 }
 0x7cd   : > { %v6314_v18 = vpop.eup %5274 }
 0x7d0   : > { %v6318_v32 = vpop.eup %5276 }
 0x7d1   : > { %v6320_v1 = vpop.eup %5278 }
 0x7e9   : > { %2034 = vadd.xlane.f32.xlu0 %v6292_v35 }
 0x7ec   : > { %v1973_v16 = vpop.xlane.xlu1 %1972 }
 0x7ed   : > { %v1989_v58 = vsub.f32 %v6254_v40, %v1973_v16  ;;  %2030 = vadd.xlane.f32.xlu0 %v6298_v28 }
 0x7ee   : > { %2032 = vadd.xlane.f32.xlu1 %v6300_v36 }
 0x7ef   : > { %v2020_v9 = vmul.f32 1.442695, %v1989_v58 }
 0x7f0   : > { %v1969_v62 = vpop.xlane.xlu1 %1968 }
 0x7f1   : > { %5280 = vpow2.f32 %v2020_v9  ;;  %v1987_v50 = vsub.f32 %v6256_v10, %v1969_v62  ;;  %2036 = vadd.xlane.f32.xlu0 %v6305_v53  ;;  %v2280_v9 = vsel %vm1362_vm2, %v6192_v49, 0 }
 0x7f2   : > { %2042 = vadd.xlane.f32.xlu1 %v6307_v43  ;;  %5282 = vpow2.f32 %v2008_v54 }
 0x7f3   : > { %v2016_v40 = vmul.f32 1.442695, %v1987_v50 }
 0x7f5   : > { %2050 = vadd.xlane.f32.xlu0 %v6312_v24  ;;  %5284 = vpow2.f32 %v2016_v40 }
 0x7f6   : > { %2038 = vadd.xlane.f32.xlu1 %v6314_v18 }
 0x7f9   : > { %2046 = vadd.xlane.f32.xlu0 %v6318_v32 }
 0x7fa   : > { %2044 = vadd.xlane.f32.xlu1 %v6320_v1 }
 0x7fb   : > { %v6324_v10 = vpop.eup %5280 }
 0x7fc   : > { %v6326_v33 = vpop.eup %5282 }
 0x7fd   : > { %2052 = vadd.xlane.f32.xlu0 %v6324_v10 }
 0x7fe   : > { %2040 = vadd.xlane.f32.xlu1 %v6326_v33 }
 0x7ff   : > { %v6330_v15 = vpop.eup %5284 }
 0x802   : > { %2048 = vadd.xlane.f32.xlu1 %v6330_v15 }
 0x813   : > { %2253 = vrot.lane.b32.xlu1 %v5950_v34, %s5490_s23  ;;  %2251 = vrot.lane.b32.xlu0 %v5952_v59, %s5490_s23 }
 0x817   : > { %2225 = vrot.lane.b32.xlu1 %v5903_v47, %s5491_s24  ;;  %2223 = vrot.lane.b32.xlu0 %v5907_v48, %s5491_s24 }
 0x81b   : > { %2229 = vrot.lane.b32.xlu1 %v5921_v8, %s5491_s24  ;;  %2227 = vrot.lane.b32.xlu0 %v5923_v5, %s5491_s24 }
 0x81f   : > { %2233 = vrot.lane.b32.xlu1 %v5937_v14, %s5491_s24  ;;  %2231 = vrot.lane.b32.xlu0 %v5939_v30, %s5491_s24 }
 0x823   : > { %2237 = vrot.lane.b32.xlu1 %v5954_v37, %s5491_s24  ;;  %2235 = vrot.lane.b32.xlu0 %v5959_v60, %s5491_s24 }
 0x827   : > { %2554 = vrot.lane.b32.xlu1 %v5967_v23, %s5491_s24  ;;  %2552 = vrot.lane.b32.xlu0 %v5969_v13, %s5491_s24 }
 0x82b   : > { %2558 = vrot.lane.b32.xlu1 %v5974_v38, %s5491_s24  ;;  %2556 = vrot.lane.b32.xlu0 %v5977_v42, %s5491_s24 }
 0x82f   : > { %2562 = vrot.lane.b32.xlu1 %v5982_v45, %s5491_s24  ;;  %2560 = vrot.lane.b32.xlu0 %v5985_v17, %s5491_s24 }
 0x833   : > { %2566 = vrot.lane.b32.xlu1 %v5990_v25, %s5491_s24  ;;  %2564 = vrot.lane.b32.xlu0 %v5993_v44, %s5491_s24 }
 0x837   : > { %2691 = vrot.lane.b32.xlu1 %v5899_v27, %s5492_s25  ;;  %2689 = vrot.lane.b32.xlu0 %v5901_v41, %s5492_s25 }
 0x83e   : > { %v2027_v46 = vpop.xlane.xlu1 %2026 }
 0x841   : > { %v2025_v61 = vpop.xlane.xlu0 %2024 }
 0x842   : > { %5286 = vrcp.f32 %v2025_v61  ;;  %v2023_v19 = vpop.xlane.xlu1 %2022 }
 0x843   : > { %5288 = vrcp.f32 %v2023_v19 }
 0x844   : > { %5290 = vrcp.f32 %v2027_v46 }
 0x845   : > { %v2248_v49 = vpop.permute.xlu0 %2247 }
 0x846   : > { %v2029_v11 = vpop.xlane.xlu1 %2028 }
 0x847   : > { %5292 = vrcp.f32 %v2029_v11 }
 0x84c   : > { %v5287_v29 = vpop.eup %5286 }
 0x84d   : > { %v5289_v7 = vpop.eup %5288  ;;  %v2057_v31 = vmul.f32 %v5287_v29, %v6271_v22  ;;  %v2283_v22 = vsel %vm1362_vm2, %v6266_v52, 0 }
 0x84e   : > { %v2055_v2 = vmul.f32 %v5289_v7, %v6273_v26  ;;  %v5291_v39 = vpop.eup %5290  ;;  %v2289_v26 = vsel %vm1362_vm2, %v6294_v51, 0 }
 0x84f   : > { %v2059_v41 = vmul.f32 %v5291_v39, %v6268_v3  ;;  %v2286_v3 = vsel %vm1362_vm2, %v2244_v63, 0 }
 0x850   : > { %v2086_v27 = vpack.c.bf16 %v2057_v31, %v2055_v2 }
 0x851   : > { %v5293_v16 = vpop.eup %5292 }
 0x852   : > { %v2061_v58 = vmul.f32 %v5293_v16, %v6277_v20  ;;  %4731 = vmatprep.mubr.bf16.mxu0 %v2086_v27  ;;  %v2292_v20 = vsel %vm1362_vm2, %v2248_v49, 0 }
 0x854   : > { %v2087_v54 = vpack.c.bf16 %v2061_v58, %v2059_v41 }
 0x856   : > { %4732 = vmatmul.mubr.bf16.vlgmr.msra.gmra.mrb[32].mxu0 %v2087_v54 }
 0x857   : > { %4748 = vmatpush3.bf16.xpose.msra.mxu0 %v2280_v9 }
 0x858   : > { %4974 = vmatprep.subr.msk.bf16.mxu0 %vm1362_vm2, %v6266_v52  ;;  %v2250_v52 = vpop.permute.xlu1 %2249 }
 0x85f   : > { %4750 = vmatpush3.bf16.xpose.msra.mxu0 %v2283_v22 }
 0x860   : > { %4975 = vmatprep.subr.msk.bf16.mxu0 %vm1362_vm2, %v2244_v63  ;;  %v2295_v63 = vsel %vm1362_vm2, %v2250_v52, 0 }
 0x867   : > { %4752 = vmatpush3.bf16.xpose.msra.mxu0 %v2286_v3 }
 0x868   : > { %4976 = vmatprep.subr.msk.bf16.mxu0 %vm1362_vm2, %v6294_v51 }
 0x86f   : > { %4754 = vmatpush3.bf16.xpose.msra.mxu0 %v2289_v26 }
 0x870   : > { %4977 = vmatprep.subr.msk.bf16.mxu0 %vm1362_vm2, %v2248_v49 }
 0x876   : > { %v2035_v62 = vpop.xlane.xlu0 %2034 }
 0x877   : > { %4756 = vmatpush3.bf16.xpose.msra.mxu0 %v2292_v20 }
 0x878   : > { %4978 = vmatprep.subr.msk.bf16.mxu0 %vm1362_vm2, %v2250_v52 }
 0x87a   : > { %v2031_v50 = vpop.xlane.xlu0 %2030 }
 0x87b   : > { %5294 = vrcp.f32 %v2031_v50  ;;  %v2033_v40 = vpop.xlane.xlu1 %2032 }
 0x87c   : > { %5296 = vrcp.f32 %v2033_v40 }
 0x87d   : > { %5298 = vrcp.f32 %v2035_v62 }
 0x87e   : > { %v2037_v46 = vpop.xlane.xlu0 %2036 }
 0x87f   : > { %4758 = vmatpush3.bf16.xpose.msra.mxu0 %v2295_v63  ;;  %5300 = vrcp.f32 %v2037_v46  ;;  %v2043_v51 = vpop.xlane.xlu1 %2042 }
 0x882   : > { %v2051_v61 = vpop.xlane.xlu0 %2050 }
 0x883   : > { %v2039_v19 = vpop.xlane.xlu1 %2038 }
 0x885   : > { %v5295_v11 = vpop.eup %5294 }
 0x886   : > { %v5297_v29 = vpop.eup %5296  ;;  %v2047_v7 = vpop.xlane.xlu0 %2046  ;;  %v2063_v31 = vmul.f32 %v5295_v11, %v6298_v28 }
 0x887   : > { %v5299_v2 = vpop.eup %5298  ;;  %v2045_v39 = vpop.xlane.xlu1 %2044  ;;  %v2065_v27 = vmul.f32 %v5297_v29, %v6300_v36 }
 0x888   : > { %5302 = vrcp.f32 %v2045_v39  ;;  %v2067_v54 = vmul.f32 %v5299_v2, %v6292_v35 }
 0x889   : > { %v5301_v16 = vpop.eup %5300  ;;  %v2088_v41 = vpack.c.bf16 %v2065_v27, %v2063_v31  ;;  %5304 = vrcp.f32 %v2039_v19 }
 0x88a   : > { %v2053_v58 = vpop.xlane.xlu0 %2052  ;;  %v2069_v9 = vmul.f32 %v5301_v16, %v6305_v53  ;;  %5306 = vrcp.f32 %v2043_v51 }
 0x88b   : > { %v2041_v22 = vpop.xlane.xlu1 %2040  ;;  %4735 = vmatprep.mubr.bf16.mxu0 %v2088_v41 }
 0x88c   : > { %5308 = vrcp.f32 %v2041_v22  ;;  %v2089_v3 = vpack.c.bf16 %v2069_v9, %v2067_v54 }
 0x88d   : > { %5310 = vrcp.f32 %v2047_v7 }
 0x88e   : > { %4736 = vmatmul.mubr.bf16.gmra.mrb[36].mxu0 %v2089_v3  ;;  %v2252_v28 = vpop.permute.xlu0 %2251 }
 0x88f   : > { %v2049_v26 = vpop.xlane.xlu1 %2048  ;;  %4979 = vmatprep.subr.msk.bf16.mxu0 %vm1362_vm2, %v2252_v28  ;;  %v2298_v36 = vsel %vm1362_vm2, %v2252_v28, 0 }
 0x890   : > { %5312 = vrcp.f32 %v2049_v26  ;;  %4760 = vmatpush3.bf16.xpose.msra.mxu0 %v2298_v36 }
 0x891   : > { %5314 = vrcp.f32 %v2053_v58 }
 0x892   : > { %v2224_v49 = vpop.permute.xlu0 %2223  ;;  %v5303_v35 = vpop.eup %5302  ;;  %5316 = vrcp.f32 %v2051_v61 }
 0x893   : > { %v2254_v53 = vpop.permute.xlu1 %2253  ;;  %v5305_v20 = vpop.eup %5304  ;;  %v2077_v40 = vmul.f32 %v5303_v35, %v6320_v1 }
 0x894   : > { %4980 = vmatprep.subr.msk.bf16.mxu0 %vm1362_vm2, %v2254_v53  ;;  %v5307_v62 = vpop.eup %5306  ;;  %v2301_v46 = vsel %vm1362_vm2, %v2254_v53, 0  ;;  %v2071_v51 = vmul.f32 %v5305_v20, %v6314_v18 }
 0x895   : > { %v2075_v61 = vmul.f32 %v5307_v62, %v6307_v43 }
 0x896   : > { %v5309_v52 = vpop.eup %5308  ;;  %v2228_v50 = vpop.permute.xlu0 %2227 }
 0x897   : > { %v2226_v63 = vpop.permute.xlu1 %2225  ;;  %v2073_v19 = vmul.f32 %v5309_v52, %v6326_v33  ;;  %v5311_v11 = vpop.eup %5310  ;;  %v2091_v2 = vpack.c.bf16 %v2077_v40, %v2075_v61 }
 0x898   : > { %4762 = vmatpush3.bf16.xpose.msra.mxu0 %v2301_v46  ;;  %v2079_v1 = vmul.f32 %v5311_v11, %v6318_v32 }
 0x899   : > { %v2090_v29 = vpack.c.bf16 %v2073_v19, %v2071_v51 }
 0x89a   : > { %v5313_v7 = vpop.eup %5312  ;;  %v2232_v31 = vpop.permute.xlu0 %2231 }
 0x89b   : > { %v5315_v39 = vpop.eup %5314  ;;  %v2230_v27 = vpop.permute.xlu1 %2229  ;;  %4739 = vmatprep.mubr.bf16.mxu0 %v2090_v29  ;;  %v2081_v16 = vmul.f32 %v5313_v7, %v6330_v15 }
 0x89c   : > { %4740 = vmatmul.mubr.bf16.gmra.mrb[40].mxu0 %v2091_v2  ;;  %v5317_v41 = vpop.eup %5316  ;;  %v2085_v33 = vmul.f32 %v5315_v39, %v6324_v10 }
 0x89d   : > { %v2092_v18 = vpack.c.bf16 %v2081_v16, %v2079_v1  ;;  %v2083_v43 = vmul.f32 %v5317_v41, %v6312_v24 }
 0x89e   : > { %v2236_v58 = vpop.permute.xlu0 %2235 }
 0x89f   : > { %v2234_v54 = vpop.permute.xlu1 %2233  ;;  %4743 = vmatprep.mubr.bf16.mxu0 %v2092_v18  ;;  %v2093_v22 = vpack.c.bf16 %v2085_v33, %v2083_v43 }
 0x8a2   : > { %v2553_v9 = vpop.permute.xlu0 %2552 }
 0x8a3   : > { %v2238_v3 = vpop.permute.xlu1 %2237  ;;  %4779 = vmatprep.subr.bf16.mxu1 %v2553_v9 }
 0x8a4   : > { %4744 = vmatmul.mubr.bf16.gmra.mrb[44].mxu0 %v2093_v22  ;;  %4780 = vmatpush3.bf16.msra.mxu1 %v2553_v9 }
 0x8a5   : > { %4763 = vmatprep.mubr.msk.bf16.mxu0 %vm1362_vm2, %v2224_v49 }
 0x8a6   : > { %v2557_v15 = vpop.permute.xlu0 %2556 }
 0x8a7   : > { %v2555_v32 = vpop.permute.xlu1 %2554 }
 0x8a8   : > { %4781 = vmatprep.subr.bf16.mxu1 %v2555_v32 }
 0x8a9   : > { %4782 = vmatpush3.bf16.msra.mxu1 %v2555_v32 }
 0x8aa   : > { %4783 = vmatprep.subr.bf16.mxu1 %v2557_v15  ;;  %v2561_v24 = vpop.permute.xlu0 %2560 }
 0x8ab   : > { %v2559_v10 = vpop.permute.xlu1 %2558 }
 0x8ac   : > { %4764 = vmatmul.mubr.msk.bf16.vlgmr.msra.gmra.mrb[48].mxu0 %vm1362_vm2, %v2226_v63 }
 0x8ad   : > { %4767 = vmatprep.mubr.msk.bf16.mxu0 %vm1362_vm2, %v2228_v50  ;;  %4784 = vmatpush3.bf16.msra.mxu1 %v2557_v15 }
 0x8ae   : > { %4785 = vmatprep.subr.bf16.mxu1 %v2559_v10  ;;  %v2565_v26 = vpop.permute.xlu0 %2564 }
 0x8af   : > { %v2563_v28 = vpop.permute.xlu1 %2562 }
 0x8b1   : > { %4786 = vmatpush3.bf16.msra.mxu1 %v2559_v10 }
 0x8b2   : > { %4787 = vmatprep.subr.bf16.mxu1 %v2561_v24  ;;  %v6400_v49 = vpop.permute.xlu0 %2689 }
 0x8b3   : > { %v2567_v36 = vpop.permute.xlu1 %2566 }
 0x8b4   : > { %4768 = vmatmul.mubr.msk.bf16.gmra.mrb[52].mxu0 %vm1362_vm2, %v2230_v27 }
 0x8b5   : > { %4771 = vmatprep.mubr.msk.bf16.mxu0 %vm1362_vm2, %v2232_v31  ;;  %4788 = vmatpush3.bf16.msra.mxu1 %v2561_v24 }
 0x8b6   : > { %4789 = vmatprep.subr.bf16.mxu1 %v2563_v28 }
 0x8b7   : > { %v6490_v11 = vpop.permute.xlu1 %2691 }
 0x8b9   : > { %4790 = vmatpush3.bf16.msra.mxu1 %v2563_v28 }
 0x8ba   : > { %4791 = vmatprep.subr.bf16.mxu1 %v2565_v26 }
 0x8bc   : > { %4772 = vmatmul.mubr.msk.bf16.gmra.mrb[56].mxu0 %vm1362_vm2, %v2234_v54 }
 0x8bd   : > { %4775 = vmatprep.mubr.msk.bf16.mxu0 %vm1362_vm2, %v2236_v58  ;;  %4792 = vmatpush3.bf16.msra.mxu1 %v2565_v26 }
 0x8be   : > { %4793 = vmatprep.subr.bf16.mxu1 %v2567_v36 }
 0x8c1   : > { %4794 = vmatpush3.bf16.msra.mxu1 %v2567_v36 }
 0x8c2   : > { %4981 = vmatprep.subr.msk.bf16.mxu1 %vm1362_vm2, %v6400_v49 }
 0x8c4   : > { %4776 = vmatmul.mubr.msk.bf16.gmra.mrb[60].mxu0 %vm1362_vm2, %v2238_v3 }
 0x929   : > { %v6405_v35 = vpop.f32.mrb[32].mxu0 }
 0x92a   : > { %v6407_v53 = vpop.f32.mrb[33].mxu0 }
 0x92b   : > { %v6409_v20 = vpop.f32.mrb[34].mxu0 }
 0x92c   : > { %v6413_v52 = vpop.f32.mrb[35].mxu0 }
 0x961   : > { %v6417_v40 = vpop.f32.mrb[36].mxu0 }
 0x962   : > { %v6419_v63 = vpop.f32.mrb[37].mxu0 }
 0x963   : > { %v6421_v46 = vpop.f32.mrb[38].mxu0 }
 0x964   : > { %v6425_v19 = vpop.f32.mrb[39].mxu0 }
 0x96f   : > { %v6429_v61 = vpop.f32.mrb[40].mxu0 }
 0x970   : > { %v6431_v29 = vpop.f32.mrb[41].mxu0 }
 0x971   : > { %7364 = vst [vmem:[#allocation35_spill] sm:$0xff] %v6431_v29  ;;  %v6433_v7 = vpop.f32.mrb[42].mxu0 }
 0x972   : > { %v6437_v2 = vpop.f32.mrb[43].mxu0 }
 0x973   : > { %7365 = vst [vmem:[#allocation36_spill] sm:$0xff] %v6437_v2 }
 0x977   : > { %v6441_v27 = vpop.f32.mrb[44].mxu0 }
 0x978   : > { %7366 = vst [vmem:[#allocation37_spill] sm:$0xff] %v6441_v27  ;;  %v6443_v1 = vpop.f32.mrb[45].mxu0 }
 0x979   : > { %7367 = vst [vmem:[#allocation38_spill] sm:$0xff] %v6443_v1  ;;  %v6445_v16 = vpop.f32.mrb[46].mxu0 }
 0x97a   : > { %7368 = vst [vmem:[#allocation39_spill] sm:$0xff] %v6445_v16  ;;  %v6449_v18 = vpop.f32.mrb[47].mxu0 }
 0x97b   : > { %7369 = vst [vmem:[#allocation40_spill] sm:$0xff] %v6449_v18 }
 0x97f   : > { %v4765_v33 = vpop.f32.mrb[48].mxu0 }
 0x980   : > { %2404 = vmax.xlane.f32.xlu0 %v4765_v33  ;;  %v2337_v54 = vpop.f32.mrb[49].mxu0 }
 0x981   : > { %v4766_v43 = vpop.f32.mrb[50].mxu0 }
 0x982   : > { %v2340_v9 = vpop.f32.mrb[51].mxu0 }
 0x983   : > { %2402 = vmax.xlane.f32.xlu1 %v2340_v9 }
 0x984   : > { %2400 = vmax.xlane.f32.xlu0 %v2337_v54 }
 0x987   : > { %v4769_v22 = vpop.f32.mrb[52].mxu0 }
 0x988   : > { %2406 = vmax.xlane.f32.xlu0 %v4766_v43  ;;  %v6453_v3 = vpop.f32.mrb[53].mxu0 }
 0x989   : > { %v6455_v32 = vpop.f32.mrb[54].mxu0 }
 0x98a   : > { %2414 = vmax.xlane.f32.xlu1 %v6455_v32  ;;  %v6458_v15 = vpop.f32.mrb[55].mxu0 }
 0x98c   : > { %2412 = vmax.xlane.f32.xlu0 %v4769_v22 }
 0x98e   : > { %2410 = vmax.xlane.f32.xlu1 %v6458_v15 }
 0x98f   : > { %v6461_v10 = vpop.f32.mrb[56].mxu0 }
 0x990   : > { %2408 = vmax.xlane.f32.xlu0 %v6453_v3  ;;  %v6464_v24 = vpop.f32.mrb[57].mxu0 }
 0x991   : > { %v6466_v28 = vpop.f32.mrb[58].mxu0 }
 0x992   : > { %2422 = vmax.xlane.f32.xlu1 %v6466_v28  ;;  %v6469_v26 = vpop.f32.mrb[59].mxu0 }
 0x994   : > { %2420 = vmax.xlane.f32.xlu0 %v6461_v10 }
 0x996   : > { %2418 = vmax.xlane.f32.xlu1 %v6469_v26 }
 0x997   : > { %v6473_v36 = vpop.f32.mrb[60].mxu0 }
 0x998   : > { %2416 = vmax.xlane.f32.xlu0 %v6464_v24  ;;  %v6476_v58 = vpop.f32.mrb[61].mxu0 }
 0x999   : > { %v6478_v41 = vpop.f32.mrb[62].mxu0 }
 0x99a   : > { %v6480_v39 = vpop.f32.mrb[63].mxu0 }
 0x99c   : > { %2428 = vmax.xlane.f32.xlu0 %v6473_v36 }
 0x9a0   : > { %2424 = vmax.xlane.f32.xlu0 %v6476_v58 }
 0x9a7   : > { %2695 = vrot.lane.b32.xlu1 %v5917_v4, %s5492_s25 }
 0x9b6   : > { %2693 = vrot.lane.b32.xlu0 %v5919_v6, %s5492_s25 }
 0x9cb   : > { %2430 = vmax.xlane.f32.xlu1 %v6478_v41 }
 0x9cf   : > { %2426 = vmax.xlane.f32.xlu1 %v6480_v39 }
 0xa0d   : > { %v2405_v50 = vpop.xlane.xlu0 %2404 }
 0xa0e   : > { %v2434_v31 = vsub.f32 %v4765_v33, %v2405_v50 }
 0xa10   : > { %v2452_v51 = vmul.f32 1.442695, %v2434_v31  ;;  %v2403_v62 = vpop.xlane.xlu1 %2402 }
 0xa11   : > { %v2433_v55 = vsub.f32 %v2340_v9, %v2403_v62  ;;  %v2401_v56 = vpop.xlane.xlu0 %2400 }
 0xa12   : > { %5318 = vpow2.f32 %v2452_v51  ;;  %v2432_v0 = vsub.f32 %v2337_v54, %v2401_v56 }
 0xa13   : > { %v2450_v21 = vmul.f32 1.442695, %v2433_v55 }
 0xa14   : > { %v2448_v1 = vmul.f32 1.442695, %v2432_v0 }
 0xa15   : > { %5320 = vpow2.f32 %v2450_v21  ;;  %v2407_v4 = vpop.xlane.xlu0 %2406 }
 0xa16   : > { %5322 = vpow2.f32 %v2448_v1  ;;  %v2435_v6 = vsub.f32 %v4766_v43, %v2407_v4 }
 0xa17   : > { %v2415_v56 = vpop.xlane.xlu1 %2414 }
 0xa18   : > { %v2454_v18 = vmul.f32 1.442695, %v2435_v6  ;;  %v2439_v4 = vsub.f32 %v6455_v32, %v2415_v56 }
 0xa19   : > { %v2413_v0 = vpop.xlane.xlu0 %2412 }
 0xa1a   : > { %5324 = vpow2.f32 %v2454_v18  ;;  %v2438_v51 = vsub.f32 %v4769_v22, %v2413_v0  ;;  %v2462_v29 = vmul.f32 1.442695, %v2439_v4 }
 0xa1b   : > { %v2411_v31 = vpop.xlane.xlu1 %2410 }
 0xa1c   : > { %v6492_v27 = vpop.eup %5318  ;;  %v2460_v18 = vmul.f32 1.442695, %v2438_v51  ;;  %v2437_v54 = vsub.f32 %v6458_v15, %v2411_v31 }
 0xa1d   : > { %2484 = vadd.xlane.f32.xlu1 %v6492_v27  ;;  %v2409_v21 = vpop.xlane.xlu0 %2408 }
 0xa1e   : > { %v2436_v33 = vsub.f32 %v6453_v3, %v2409_v21  ;;  %5326 = vpow2.f32 %v2460_v18  ;;  %v2458_v6 = vmul.f32 1.442695, %v2437_v54 }
 0xa1f   : > { %v6495_v16 = vpop.eup %5320  ;;  %v2423_v43 = vpop.xlane.xlu1 %2422 }
 0xa20   : > { %v6497_v50 = vpop.eup %5322  ;;  %2482 = vadd.xlane.f32.xlu0 %v6495_v16  ;;  %v2443_v32 = vsub.f32 %v6466_v28, %v2423_v43 }
 0xa21   : > { %2480 = vadd.xlane.f32.xlu1 %v6497_v50  ;;  %v2421_v62 = vpop.xlane.xlu0 %2420 }
 0xa23   : > { %v2419_v2 = vpop.xlane.xlu1 %2418 }
 0xa24   : > { %v6501_v55 = vpop.eup %5324 }
 0xa25   : > { %2486 = vadd.xlane.f32.xlu1 %v6501_v55  ;;  %v2417_v1 = vpop.xlane.xlu0 %2416 }
 0xa26   : > { %v2440_v3 = vsub.f32 %v6464_v24, %v2417_v1  ;;  %v2441_v24 = vsub.f32 %v6469_v26, %v2419_v2 }
 0xa28   : > { %v2464_v56 = vmul.f32 1.442695, %v2440_v3  ;;  %v6516_v31 = vpop.eup %5326  ;;  %v2466_v18 = vmul.f32 1.442695, %v2441_v24 }
 0xa29   : > { %v2429_v9 = vpop.xlane.xlu0 %2428 }
 0xa2a   : > { %v2446_v22 = vsub.f32 %v6473_v36, %v2429_v9 }
 0xa2c   : > { %v2476_v15 = vmul.f32 1.442695, %v2446_v22 }
 0xa2d   : > { %v2425_v21 = vpop.xlane.xlu0 %2424 }
 0xa2e   : > { %v2444_v51 = vsub.f32 %v6476_v58, %v2425_v21  ;;  %v2730_v21 = vsel %vm1362_vm2, %v6400_v49, 0 }
 0xa30   : > { %v2472_v36 = vmul.f32 1.442695, %v2444_v51 }
 0xa36   : > { %2697 = vrot.lane.b32.xlu0 %v5935_v57, %s5492_s25  ;;  %2699 = vrot.lane.b32.xlu1 %v5933_v12, %s5492_s25  ;;  %v2456_v57 = vmul.f32 1.442695, %v2436_v33  ;;  %v2442_v12 = vsub.f32 %v6461_v10, %v2421_v62  ;;  %v6518_v10 = vpop.permute.xlu1 %2695  ;;  %v2470_v62 = vmul.f32 1.442695, %v2443_v32 }
 0xa38   : > { %5328 = vpow2.f32 %v2456_v57  ;;  %v2468_v0 = vmul.f32 1.442695, %v2442_v12 }
 0xa39   : > { %5330 = vpow2.f32 %v2458_v6 }
 0xa3a   : > { %5332 = vpow2.f32 %v2462_v29 }
 0xa3b   : > { %5334 = vpow2.f32 %v2468_v0 }
 0xa3c   : > { %5336 = vpow2.f32 %v2476_v15 }
 0xa3d   : > { %5338 = vpow2.f32 %v2464_v56 }
 0xa3e   : > { %5340 = vpow2.f32 %v2472_v36 }
 0xa3f   : > { %5342 = vpow2.f32 %v2470_v62 }
 0xa42   : > { %v6522_v29 = vpop.eup %5328 }
 0xa43   : > { %v6524_v58 = vpop.eup %5330 }
 0xa44   : > { %v6529_v54 = vpop.eup %5332 }
 0xa45   : > { %v6531_v2 = vpop.eup %5334 }
 0xa46   : > { %v6536_v9 = vpop.eup %5336 }
 0xa47   : > { %v6538_v4 = vpop.eup %5338 }
 0xa48   : > { %v6542_v57 = vpop.eup %5340 }
 0xa49   : > { %v6544_v6 = vpop.eup %5342 }
 0xa55   : > { %2492 = vadd.xlane.f32.xlu0 %v6516_v31 }
 0xa58   : > { %v2431_v1 = vpop.xlane.xlu1 %2430 }
 0xa59   : > { %v2447_v28 = vsub.f32 %v6478_v41, %v2431_v1  ;;  %2488 = vadd.xlane.f32.xlu0 %v6522_v29 }
 0xa5a   : > { %2490 = vadd.xlane.f32.xlu1 %v6524_v58 }
 0xa5b   : > { %v2478_v33 = vmul.f32 1.442695, %v2447_v28 }
 0xa5c   : > { %v2427_v43 = vpop.xlane.xlu1 %2426 }
 0xa5d   : > { %5344 = vpow2.f32 %v2478_v33  ;;  %v2445_v26 = vsub.f32 %v6480_v39, %v2427_v43  ;;  %2494 = vadd.xlane.f32.xlu0 %v6529_v54 }
 0xa5e   : > { %2500 = vadd.xlane.f32.xlu1 %v6531_v2  ;;  %5346 = vpow2.f32 %v2466_v18 }
 0xa5f   : > { %v2474_v41 = vmul.f32 1.442695, %v2445_v26 }
 0xa61   : > { %2508 = vadd.xlane.f32.xlu0 %v6536_v9  ;;  %5348 = vpow2.f32 %v2474_v41 }
 0xa62   : > { %2496 = vadd.xlane.f32.xlu1 %v6538_v4 }
 0xa65   : > { %2504 = vadd.xlane.f32.xlu0 %v6542_v57 }
 0xa66   : > { %2502 = vadd.xlane.f32.xlu1 %v6544_v6 }
 0xa67   : > { %v6548_v39 = vpop.eup %5344 }
 0xa68   : > { %v6550_v12 = vpop.eup %5346 }
 0xa69   : > { %2510 = vadd.xlane.f32.xlu0 %v6548_v39 }
 0xa6a   : > { %2498 = vadd.xlane.f32.xlu1 %v6550_v12 }
 0xa6b   : > { %v6554_v22 = vpop.eup %5348 }
 0xa6e   : > { %2506 = vadd.xlane.f32.xlu1 %v6554_v22 }
 0xa7f   : > { %2703 = vrot.lane.b32.xlu1 %v5950_v34, %s5492_s25  ;;  %2701 = vrot.lane.b32.xlu0 %v5952_v59, %s5492_s25 }
 0xa83   : > { %2675 = vrot.lane.b32.xlu1 %v5903_v47, %s5493_s26  ;;  %2673 = vrot.lane.b32.xlu0 %v5907_v48, %s5493_s26  ;;  %v2694_v47 = vpop.permute.xlu0 %2693 }
 0xa87   : > { %2679 = vrot.lane.b32.xlu1 %v5921_v8, %s5493_s26  ;;  %2677 = vrot.lane.b32.xlu0 %v5923_v5, %s5493_s26 }
 0xa8b   : > { %2683 = vrot.lane.b32.xlu1 %v5937_v14, %s5493_s26  ;;  %2681 = vrot.lane.b32.xlu0 %v5939_v30, %s5493_s26 }
 0xa8f   : > { %2687 = vrot.lane.b32.xlu1 %v5954_v37, %s5493_s26  ;;  %2685 = vrot.lane.b32.xlu0 %v5959_v60, %s5493_s26 }
 0xa93   : > { %3004 = vrot.lane.b32.xlu1 %v5967_v23, %s5493_s26  ;;  %3002 = vrot.lane.b32.xlu0 %v5969_v13, %s5493_s26 }
 0xa97   : > { %3006 = vrot.lane.b32.xlu0 %v5977_v42, %s5493_s26 }
 0xaaa   : > { %v2485_v48 = vpop.xlane.xlu1 %2484 }
 0xaad   : > { %v2483_v8 = vpop.xlane.xlu0 %2482 }
 0xaae   : > { %5350 = vrcp.f32 %v2483_v8  ;;  %v2481_v5 = vpop.xlane.xlu1 %2480 }
 0xaaf   : > { %5352 = vrcp.f32 %v2481_v5 }
 0xab0   : > { %5354 = vrcp.f32 %v2485_v48 }
 0xab1   : > { %v2698_v49 = vpop.permute.xlu0 %2697 }
 0xab2   : > { %v2487_v14 = vpop.xlane.xlu1 %2486 }
 0xab3   : > { %5356 = vrcp.f32 %v2487_v14 }
 0xab8   : > { %v5351_v30 = vpop.eup %5350 }
 0xab9   : > { %v5353_v34 = vpop.eup %5352  ;;  %v2515_v59 = vmul.f32 %v5351_v30, %v6495_v16  ;;  %v2733_v16 = vsel %vm1362_vm2, %v6490_v11, 0 }
 0xaba   : > { %v2513_v37 = vmul.f32 %v5353_v34, %v6497_v50  ;;  %v5355_v60 = vpop.eup %5354  ;;  %v2739_v50 = vsel %vm1362_vm2, %v6518_v10, 0 }
 0xabb   : > { %v2517_v42 = vmul.f32 %v5355_v60, %v6492_v27  ;;  %v2736_v27 = vsel %vm1362_vm2, %v2694_v47, 0 }
 0xabc   : > { %v2544_v23 = vpack.c.bf16 %v2515_v59, %v2513_v37 }
 0xabd   : > { %v5357_v13 = vpop.eup %5356 }
 0xabe   : > { %v2519_v0 = vmul.f32 %v5357_v13, %v6501_v55  ;;  %4795 = vmatprep.mubr.bf16.mxu1 %v2544_v23  ;;  %v2742_v55 = vsel %vm1362_vm2, %v2698_v49, 0 }
 0xac0   : > { %v2545_v3 = vpack.c.bf16 %v2519_v0, %v2517_v42 }
 0xac2   : > { %4796 = vmatmul.mubr.bf16.vlgmr.msra.gmra.mrb[72].mxu1 %v2545_v3 }
 0xac3   : > { %4812 = vmatpush3.bf16.xpose.msra.mxu1 %v2730_v21 }
 0xac4   : > { %4982 = vmatprep.subr.msk.bf16.mxu1 %vm1362_vm2, %v6490_v11  ;;  %v2700_v11 = vpop.permute.xlu1 %2699 }
 0xac5   : > { %v2745_v56 = vsel %vm1362_vm2, %v2700_v11, 0 }
 0xacb   : > { %4814 = vmatpush3.bf16.xpose.msra.mxu1 %v2733_v16 }
 0xacc   : > { %4983 = vmatprep.subr.msk.bf16.mxu1 %vm1362_vm2, %v2694_v47 }
 0xad3   : > { %4816 = vmatpush3.bf16.xpose.msra.mxu1 %v2736_v27 }
 0xad4   : > { %4984 = vmatprep.subr.msk.bf16.mxu1 %vm1362_vm2, %v6518_v10 }
 0xadb   : > { %4818 = vmatpush3.bf16.xpose.msra.mxu1 %v2739_v50 }
 0xadc   : > { %4985 = vmatprep.subr.msk.bf16.mxu1 %vm1362_vm2, %v2698_v49 }
 0xae2   : > { %v2493_v15 = vpop.xlane.xlu0 %2492 }
 0xae3   : > { %4820 = vmatpush3.bf16.xpose.msra.mxu1 %v2742_v55 }
 0xae4   : > { %4986 = vmatprep.subr.msk.bf16.mxu1 %vm1362_vm2, %v2700_v11 }
 0xae6   : > { %v2489_v51 = vpop.xlane.xlu0 %2488 }
 0xae7   : > { %5358 = vrcp.f32 %v2489_v51  ;;  %v2491_v32 = vpop.xlane.xlu1 %2490 }
 0xae8   : > { %5360 = vrcp.f32 %v2491_v32 }
 0xae9   : > { %5362 = vrcp.f32 %v2493_v15 }
 0xaea   : > { %v2495_v36 = vpop.xlane.xlu0 %2494 }
 0xaeb   : > { %4822 = vmatpush3.bf16.xpose.msra.mxu1 %v2745_v56  ;;  %5364 = vrcp.f32 %v2495_v36  ;;  %v2501_v10 = vpop.xlane.xlu1 %2500 }
 0xaee   : > { %v2509_v62 = vpop.xlane.xlu0 %2508 }
 0xaef   : > { %v2497_v24 = vpop.xlane.xlu1 %2496 }
 0xaf1   : > { %v5359_v1 = vpop.eup %5358 }
 0xaf2   : > { %v5361_v28 = vpop.eup %5360  ;;  %v2505_v18 = vpop.xlane.xlu0 %2504  ;;  %v2521_v33 = vmul.f32 %v5359_v1, %v6522_v29 }
 0xaf3   : > { %v5363_v43 = vpop.eup %5362  ;;  %v2503_v26 = vpop.xlane.xlu1 %2502  ;;  %v2523_v41 = vmul.f32 %v5361_v28, %v6524_v58 }
 0xaf4   : > { %5366 = vrcp.f32 %v2503_v26  ;;  %v2525_v5 = vmul.f32 %v5363_v43, %v6516_v31 }
 0xaf5   : > { %v5365_v47 = vpop.eup %5364  ;;  %v2546_v48 = vpack.c.bf16 %v2523_v41, %v2521_v33  ;;  %5368 = vrcp.f32 %v2497_v24 }
 0xaf6   : > { %v2511_v8 = vpop.xlane.xlu0 %2510  ;;  %v2527_v14 = vmul.f32 %v5365_v47, %v6529_v54  ;;  %5370 = vrcp.f32 %v2501_v10 }
 0xaf7   : > { %v2499_v30 = vpop.xlane.xlu1 %2498  ;;  %4799 = vmatprep.mubr.bf16.mxu1 %v2546_v48 }
 0xaf8   : > { %5372 = vrcp.f32 %v2499_v30  ;;  %v2547_v34 = vpack.c.bf16 %v2527_v14, %v2525_v5 }
 0xaf9   : > { %5374 = vrcp.f32 %v2505_v18 }
 0xafa   : > { %4800 = vmatmul.mubr.bf16.gmra.mrb[76].mxu1 %v2547_v34  ;;  %v2702_v29 = vpop.permute.xlu0 %2701 }
 0xafb   : > { %v2507_v59 = vpop.xlane.xlu1 %2506  ;;  %4987 = vmatprep.subr.msk.bf16.mxu1 %vm1362_vm2, %v2702_v29  ;;  %v2748_v58 = vsel %vm1362_vm2, %v2702_v29, 0 }
 0xafc   : > { %5376 = vrcp.f32 %v2507_v59  ;;  %4824 = vmatpush3.bf16.xpose.msra.mxu1 %v2748_v58 }
 0xafd   : > { %5378 = vrcp.f32 %v2511_v8 }
 0xafe   : > { %v2674_v37 = vpop.permute.xlu0 %2673  ;;  %v5367_v31 = vpop.eup %5366  ;;  %5380 = vrcp.f32 %v2509_v62 }
 0xaff   : > { %v2704_v54 = vpop.permute.xlu1 %2703  ;;  %v5369_v60 = vpop.eup %5368  ;;  %v2535_v0 = vmul.f32 %v5367_v31, %v6544_v6 }
 0xb00   : > { %4988 = vmatprep.subr.msk.bf16.mxu1 %vm1362_vm2, %v2704_v54  ;;  %v5371_v23 = vpop.eup %5370  ;;  %v2751_v21 = vsel %vm1362_vm2, %v2704_v54, 0  ;;  %v2529_v16 = vmul.f32 %v5369_v60, %v6538_v4 }
 0xb01   : > { %v2533_v49 = vmul.f32 %v5371_v23, %v6531_v2 }
 0xb02   : > { %v5373_v13 = vpop.eup %5372  ;;  %v2678_v42 = vpop.permute.xlu0 %2677 }
 0xb03   : > { %v2676_v3 = vpop.permute.xlu1 %2675  ;;  %v2531_v27 = vmul.f32 %v5373_v13, %v6550_v12  ;;  %v5375_v50 = vpop.eup %5374  ;;  %v2549_v51 = vpack.c.bf16 %v2535_v0, %v2533_v49 }
 0xb04   : > { %4826 = vmatpush3.bf16.xpose.msra.mxu1 %v2751_v21  ;;  %v2537_v6 = vmul.f32 %v5375_v50, %v6542_v57 }
 0xb05   : > { %v2548_v55 = vpack.c.bf16 %v2531_v27, %v2529_v16 }
 0xb06   : > { %v5377_v15 = vpop.eup %5376  ;;  %v2682_v11 = vpop.permute.xlu0 %2681 }
 0xb07   : > { %v5379_v32 = vpop.eup %5378  ;;  %v2680_v56 = vpop.permute.xlu1 %2679  ;;  %4803 = vmatprep.mubr.bf16.mxu1 %v2548_v55  ;;  %v2539_v36 = vmul.f32 %v5377_v15, %v6554_v22 }
 0xb08   : > { %4804 = vmatmul.mubr.bf16.gmra.mrb[80].mxu1 %v2549_v51  ;;  %v5381_v10 = vpop.eup %5380  ;;  %v2543_v12 = vmul.f32 %v5379_v32, %v6548_v39 }
 0xb09   : > { %v2550_v4 = vpack.c.bf16 %v2539_v36, %v2537_v6  ;;  %v2541_v2 = vmul.f32 %v5381_v10, %v6536_v9 }
 0xb0a   : > { %v2686_v62 = vpop.permute.xlu0 %2685 }
 0xb0b   : > { %v2684_v24 = vpop.permute.xlu1 %2683  ;;  %4807 = vmatprep.mubr.bf16.mxu1 %v2550_v4  ;;  %v2551_v28 = vpack.c.bf16 %v2543_v12, %v2541_v2 }
 0xb0e   : > { %v3003_v1 = vpop.permute.xlu0 %3002 }
 0xb0f   : > { %v2688_v18 = vpop.permute.xlu1 %2687  ;;  %4843 = vmatprep.subr.bf16.mxu0 %v3003_v1 }
 0xb10   : > { %4808 = vmatmul.mubr.bf16.gmra.mrb[84].mxu1 %v2551_v28  ;;  %4844 = vmatpush3.bf16.msra.mxu0 %v3003_v1 }
 0xb11   : > { %4827 = vmatprep.mubr.msk.bf16.mxu1 %vm1362_vm2, %v2674_v37 }
 0xb12   : > { %v3007_v22 = vpop.permute.xlu0 %3006 }
 0xb13   : > { %v3005_v57 = vpop.permute.xlu1 %3004 }
 0xb14   : > { %4845 = vmatprep.subr.bf16.mxu0 %v3005_v57 }
 0xb15   : > { %4846 = vmatpush3.bf16.msra.mxu0 %v3005_v57 }
 0xb16   : > { %4847 = vmatprep.subr.bf16.mxu0 %v3007_v22 }
 0xb18   : > { %4828 = vmatmul.mubr.msk.bf16.vlgmr.msra.gmra.mrb[88].mxu1 %vm1362_vm2, %v2676_v3 }
 0xb19   : > { %4831 = vmatprep.mubr.msk.bf16.mxu1 %vm1362_vm2, %v2678_v42  ;;  %4848 = vmatpush3.bf16.msra.mxu0 %v3007_v22 }
 0xb20   : > { %4832 = vmatmul.mubr.msk.bf16.gmra.mrb[92].mxu1 %vm1362_vm2, %v2680_v56 }
 0xb21   : > { %4835 = vmatprep.mubr.msk.bf16.mxu1 %vm1362_vm2, %v2682_v11 }
 0xb28   : > { %4836 = vmatmul.mubr.msk.bf16.gmra.mrb[96].mxu1 %vm1362_vm2, %v2684_v24 }
 0xb29   : > { %4839 = vmatprep.mubr.msk.bf16.mxu1 %vm1362_vm2, %v2686_v62 }
 0xb30   : > { %4840 = vmatmul.mubr.msk.bf16.gmra.mrb[100].mxu1 %vm1362_vm2, %v2688_v18 }
 0xb95   : > { %v6627_v9 = vpop.f32.mrb[72].mxu1 }
 0xb96   : > { %v6629_v39 = vpop.f32.mrb[73].mxu1 }
 0xb97   : > { %v6631_v33 = vpop.f32.mrb[74].mxu1 }
 0xb98   : > { %v5022_v43 = vpack.i.bf16 %v6631_v33, %v6627_v9  ;;  %v6635_v26 = vpop.f32.mrb[75].mxu1  ;;  %v7372_v33 = vpack.i.bf16 %v6433_v7, %v6429_v61  ;;  %v7374_v61 = vpack.i.bf16 %v6425_v19, %v6419_v63 }
 0xb99   : > { %v5017_v41 = vpack.i.bf16 %v6635_v26, %v6629_v39  ;;  %v7373_v26 = vpack.i.bf16 %v6413_v52, %v6407_v53 }
 0xbcd   : > { %v6639_v47 = vpop.f32.mrb[76].mxu1 }
 0xbce   : > { %v6641_v48 = vpop.f32.mrb[77].mxu1 }
 0xbcf   : > { %v6643_v8 = vpop.f32.mrb[78].mxu1 }
 0xbd0   : > { %v5042_v5 = vpack.i.bf16 %v6643_v8, %v6639_v47  ;;  %v6647_v14 = vpop.f32.mrb[79].mxu1  ;;  %v7377_v47 = vld [vmem:[#allocation35_spill] sm:$0xff] }
 0xbd1   : > { %v7375_v7 = vpack.i.bf16 %v6647_v14, %v6641_v48 }
 0xbdb   : > { %v6651_v34 = vpop.f32.mrb[80].mxu1 }
 0xbdc   : > { %v6653_v29 = vpop.f32.mrb[81].mxu1 }
 0xbdd   : > { %v6655_v59 = vpop.f32.mrb[82].mxu1 }
 0xbde   : > { %v6659_v37 = vpop.f32.mrb[83].mxu1 }
 0xbe3   : > { %v6663_v54 = vpop.f32.mrb[84].mxu1 }
 0xbe4   : > { %v6665_v60 = vpop.f32.mrb[85].mxu1 }
 0xbe5   : > { %v6667_v23 = vpop.f32.mrb[86].mxu1 }
 0xbe6   : > { %v6671_v42 = vpop.f32.mrb[87].mxu1 }
 0xbeb   : > { %v4829_v3 = vpop.f32.mrb[88].mxu1 }
 0xbec   : > { %2854 = vmax.xlane.f32.xlu0 %v4829_v3  ;;  %v2787_v21 = vpop.f32.mrb[89].mxu1 }
 0xbed   : > { %v4830_v16 = vpop.f32.mrb[90].mxu1 }
 0xbee   : > { %v2790_v27 = vpop.f32.mrb[91].mxu1 }
 0xbef   : > { %2852 = vmax.xlane.f32.xlu1 %v2790_v27 }
 0xbf0   : > { %2850 = vmax.xlane.f32.xlu0 %v2787_v21 }
 0xbf3   : > { %v4833_v50 = vpop.f32.mrb[92].mxu1 }
 0xbf4   : > { %2856 = vmax.xlane.f32.xlu0 %v4830_v16  ;;  %v2803_v49 = vpop.f32.mrb[93].mxu1 }
 0xbf5   : > { %v4834_v55 = vpop.f32.mrb[94].mxu1 }
 0xbf6   : > { %2864 = vmax.xlane.f32.xlu1 %v4834_v55  ;;  %v2806_v15 = vpop.f32.mrb[95].mxu1 }
 0xbf8   : > { %2862 = vmax.xlane.f32.xlu0 %v4833_v50 }
 0xbfa   : > { %2860 = vmax.xlane.f32.xlu1 %v2806_v15 }
 0xbfb   : > { %v4837_v11 = vpop.f32.mrb[96].mxu1 }
 0xbfc   : > { %2858 = vmax.xlane.f32.xlu0 %v2803_v49  ;;  %v6675_v51 = vpop.f32.mrb[97].mxu1 }
 0xbfd   : > { %v6677_v32 = vpop.f32.mrb[98].mxu1 }
 0xbfe   : > { %2872 = vmax.xlane.f32.xlu1 %v6677_v32  ;;  %v6680_v56 = vpop.f32.mrb[99].mxu1 }
 0xc00   : > { %2870 = vmax.xlane.f32.xlu0 %v4837_v11 }
 0xc02   : > { %2868 = vmax.xlane.f32.xlu1 %v6680_v56 }
 0xc03   : > { %v6683_v6 = vpop.f32.mrb[100].mxu1 }
 0xc04   : > { %2866 = vmax.xlane.f32.xlu0 %v6675_v51  ;;  %v6686_v36 = vpop.f32.mrb[101].mxu1 }
 0xc05   : > { %v6688_v10 = vpop.f32.mrb[102].mxu1 }
 0xc06   : > { %v6690_v4 = vpop.f32.mrb[103].mxu1 }
 0xc08   : > { %2878 = vmax.xlane.f32.xlu0 %v6683_v6 }
 0xc0c   : > { %2874 = vmax.xlane.f32.xlu0 %v6686_v36 }
 0xc13   : > { %3010 = vrot.lane.b32.xlu1 %v5985_v17, %s5493_s26 }
 0xc22   : > { %3008 = vrot.lane.b32.xlu0 %v5974_v38, %s5493_s26 }
 0xc37   : > { %2880 = vmax.xlane.f32.xlu1 %v6688_v10 }
 0xc3b   : > { %2876 = vmax.xlane.f32.xlu1 %v6690_v4 }
 0xc4c   : > { %3012 = vrot.lane.b32.xlu1 %v5982_v45, %s5493_s26 }
 0xc79   : > { %v2855_v62 = vpop.xlane.xlu0 %2854 }
 0xc7a   : > { %v2884_v12 = vsub.f32 %v4829_v3, %v2855_v62 }
 0xc7c   : > { %v2902_v24 = vmul.f32 1.442695, %v2884_v12  ;;  %v2853_v1 = vpop.xlane.xlu1 %2852 }
 0xc7d   : > { %v2851_v2 = vpop.xlane.xlu0 %2850  ;;  %v2883_v57 = vsub.f32 %v2790_v27, %v2853_v1 }
 0xc7e   : > { %5382 = vpow2.f32 %v2902_v24  ;;  %v2882_v28 = vsub.f32 %v2787_v21, %v2851_v2 }
 0xc7f   : > { %v2900_v13 = vmul.f32 1.442695, %v2883_v57 }
 0xc80   : > { %v2898_v18 = vmul.f32 1.442695, %v2882_v28 }
 0xc81   : > { %v2857_v17 = vpop.xlane.xlu0 %2856 }
 0xc82   : > { %5384 = vpow2.f32 %v2898_v18  ;;  %v2885_v22 = vsub.f32 %v4830_v16, %v2857_v17 }
 0xc83   : > { %v2865_v38 = vpop.xlane.xlu1 %2864 }
 0xc84   : > { %v2904_v0 = vmul.f32 1.442695, %v2885_v22  ;;  %v2889_v12 = vsub.f32 %v4834_v55, %v2865_v38 }
 0xc85   : > { %v2863_v31 = vpop.xlane.xlu0 %2862 }
 0xc86   : > { %5386 = vpow2.f32 %v2904_v0  ;;  %v2888_v58 = vsub.f32 %v4833_v50, %v2863_v31  ;;  %v2912_v0 = vmul.f32 1.442695, %v2889_v12 }
 0xc87   : > { %v2861_v30 = vpop.xlane.xlu1 %2860  ;;  %5388 = vpow2.f32 %v2900_v13 }
 0xc88   : > { %v6702_v45 = vpop.eup %5382  ;;  %v2910_v3 = vmul.f32 1.442695, %v2888_v58  ;;  %v2887_v62 = vsub.f32 %v2806_v15, %v2861_v30 }
 0xc89   : > { %2934 = vadd.xlane.f32.xlu1 %v6702_v45  ;;  %v2859_v21 = vpop.xlane.xlu0 %2858 }
 0xc8a   : > { %5390 = vpow2.f32 %v2910_v3  ;;  %v2908_v27 = vmul.f32 1.442695, %v2887_v62  ;;  %v2886_v24 = vsub.f32 %v2803_v49, %v2859_v21 }
 0xc8b   : > { %v2873_v1 = vpop.xlane.xlu1 %2872 }
 0xc8c   : > { %v6705_v16 = vpop.eup %5384  ;;  %v2906_v2 = vmul.f32 1.442695, %v2886_v24  ;;  %5392 = vpow2.f32 %v2908_v27  ;;  %v2893_v13 = vsub.f32 %v6677_v32, %v2873_v1 }
 0xc8d   : > { %2930 = vadd.xlane.f32.xlu1 %v6705_v16  ;;  %v2871_v31 = vpop.xlane.xlu0 %2870 }
 0xc8e   : > { %5394 = vpow2.f32 %v2906_v2  ;;  %v2892_v58 = vsub.f32 %v4837_v11, %v2871_v31  ;;  %v2920_v17 = vmul.f32 1.442695, %v2893_v13  ;;  %v7370_v13 = vpack.i.bf16 %v6409_v20, %v6405_v35 }
 0xc8f   : > { %5396 = vpow2.f32 %v2912_v0  ;;  %v2869_v49 = vpop.xlane.xlu1 %2868  ;;  %v7371_v35 = vpack.i.bf16 %v6421_v46, %v6417_v40 }
 0xc90   : > { %v6708_v30 = vpop.eup %5386  ;;  %v2918_v50 = vmul.f32 1.442695, %v2892_v58  ;;  %v2891_v11 = vsub.f32 %v6680_v56, %v2869_v49 }
 0xc91   : > { %2936 = vadd.xlane.f32.xlu1 %v6708_v30  ;;  %v2867_v55 = vpop.xlane.xlu0 %2866  ;;  %v6713_v28 = vpop.eup %5388 }
 0xc92   : > { %v2890_v15 = vsub.f32 %v6675_v51, %v2867_v55  ;;  %5398 = vpow2.f32 %v2918_v50  ;;  %v2916_v62 = vmul.f32 1.442695, %v2891_v11 }
 0xc93   : > { %v3011_v2 = vpop.permute.xlu1 %3010 }
 0xc94   : > { %v6715_v18 = vpop.eup %5390  ;;  %v2914_v57 = vmul.f32 1.442695, %v2890_v15 }
 0xc95   : > { %2932 = vadd.xlane.f32.xlu1 %v6713_v28  ;;  %2942 = vadd.xlane.f32.xlu0 %v6715_v18  ;;  %v2879_v32 = vpop.xlane.xlu0 %2878 }
 0xc96   : > { %5400 = vpow2.f32 %v2914_v57  ;;  %v2896_v22 = vsub.f32 %v6683_v6, %v2879_v32  ;;  %v6721_v38 = vpop.eup %5392 }
 0xc97   : > { %5402 = vpow2.f32 %v2920_v17 }
 0xc98   : > { %v6723_v51 = vpop.eup %5394  ;;  %v2926_v3 = vmul.f32 1.442695, %v2896_v22 }
 0xc99   : > { %2940 = vadd.xlane.f32.xlu1 %v6721_v38  ;;  %2938 = vadd.xlane.f32.xlu0 %v6723_v51  ;;  %v2875_v56 = vpop.xlane.xlu0 %2874  ;;  %v6728_v12 = vpop.eup %5396 }
 0xc9a   : > { %5404 = vpow2.f32 %v2926_v3  ;;  %v2894_v21 = vsub.f32 %v6686_v36, %v2875_v56 }
 0xc9b   : > { %5406 = vpow2.f32 %v2916_v62 }
 0xc9c   : > { %v2922_v27 = vmul.f32 1.442695, %v2894_v21  ;;  %v6731_v24 = vpop.eup %5398 }
 0xc9d   : > { %2944 = vadd.xlane.f32.xlu0 %v6728_v12  ;;  %v3009_v6 = vpop.permute.xlu0 %3008 }
 0xc9e   : > { %5408 = vpow2.f32 %v2922_v27  ;;  %4849 = vmatprep.subr.bf16.mxu0 %v3009_v6 }
 0xc9f   : > { %4850 = vmatpush3.bf16.msra.mxu0 %v3009_v6 }
 0xca0   : > { %v6733_v1 = vpop.eup %5400  ;;  %4851 = vmatprep.subr.bf16.mxu0 %v3011_v2 }
 0xca1   : > { %2950 = vadd.xlane.f32.xlu0 %v6731_v24  ;;  %2946 = vadd.xlane.f32.xlu1 %v6733_v1  ;;  %v6737_v36 = vpop.eup %5402 }
 0xca3   : > { %4852 = vmatpush3.bf16.msra.mxu0 %v3011_v2 }
 0xca4   : > { %v6739_v31 = vpop.eup %5404 }
 0xca5   : > { %2952 = vadd.xlane.f32.xlu0 %v6737_v36  ;;  %2958 = vadd.xlane.f32.xlu1 %v6739_v31  ;;  %v6743_v0 = vpop.eup %5406 }
 0xca8   : > { %v6745_v58 = vpop.eup %5408 }
 0xca9   : > { %2948 = vadd.xlane.f32.xlu0 %v6743_v0  ;;  %2954 = vadd.xlane.f32.xlu1 %v6745_v58 }
 0xcba   : > { %3016 = vrot.lane.b32.xlu1 %v5990_v25, %s5493_s26 }
 0xcbe   : > { %5013 = vrot.lane.b32.xlu1 %v7370_v13, %s5494_s27 }
 0xcbf   : > { %3014 = vrot.lane.b32.xlu0 %v5993_v44, %s5493_s26 }
 0xcc2   : > { %5018 = vrot.lane.b32.xlu1 %v5017_v41, %s5495_s28  ;;  %v7376_v41 = vld [vmem:[#allocation36_spill] sm:$0xff] }
 0xcc3   : > { %v7378_v8 = vpack.i.bf16 %v7376_v41, %v7377_v47 }
 0xcc4   : > { %v2881_v50 = vpop.xlane.xlu1 %2880 }
 0xcc5   : > { %v2897_v39 = vsub.f32 %v6688_v10, %v2881_v50 }
 0xcc6   : > { %5023 = vrot.lane.b32.xlu1 %v5022_v43, %s5495_s28 }
 0xcc7   : > { %v2928_v40 = vmul.f32 1.442695, %v2897_v39 }
 0xcc8   : > { %v2877_v25 = vpop.xlane.xlu1 %2876 }
 0xcc9   : > { %v2895_v44 = vsub.f32 %v6690_v4, %v2877_v25 }
 0xcca   : > { %5033 = vrot.lane.b32.xlu1 %v7371_v35, %s5494_s27 }
 0xccb   : > { %v2924_v9 = vmul.f32 1.442695, %v2895_v44 }
 0xccc   : > { %v3013_v20 = vpop.permute.xlu1 %3012 }
 0xccd   : > { %4853 = vmatprep.subr.bf16.mxu0 %v3013_v20  ;;  %5410 = vpow2.f32 %v2924_v9 }
 0xcce   : > { %5043 = vrot.lane.b32.xlu1 %v5042_v5, %s5495_s28  ;;  %4854 = vmatpush3.bf16.msra.mxu0 %v3013_v20  ;;  %5412 = vpow2.f32 %v2928_v40 }
 0xcd2   : > { %5053 = vrot.lane.b32.xlu1 %v7372_v33, %s5494_s27 }
 0xcd7   : > { %v6779_v46 = vpop.eup %5410 }
 0xcd8   : > { %v6782_v43 = vpop.eup %5412 }
 0xcde   : > { %2956 = vadd.xlane.f32.xlu0 %v6779_v46 }
 0xce2   : > { %2960 = vadd.xlane.f32.xlu0 %v6782_v43 }
 0xcf8   : > { %5008 = vrot.lane.b32.xlu0 %v7373_v26, %s5494_s27 }
 0xcfc   : > { %5028 = vrot.lane.b32.xlu0 %v7374_v61, %s5494_s27 }
 0xd00   : > { %5038 = vrot.lane.b32.xlu0 %v7375_v7, %s5495_s28 }
 0xd04   : > { %5048 = vrot.lane.b32.xlu0 %v7378_v8, %s5494_s27 }
 0xd16   : > { %v2935_v5 = vpop.xlane.xlu1 %2934 }
 0xd1a   : > { %v2931_v10 = vpop.xlane.xlu1 %2930 }
 0xd1b   : > { %5414 = vrcp.f32 %v2931_v10 }
 0xd1e   : > { %v2937_v4 = vpop.xlane.xlu1 %2936 }
 0xd22   : > { %v2933_v53 = vpop.xlane.xlu1 %2932  ;;  %v2943_v52 = vpop.xlane.xlu0 %2942 }
 0xd23   : > { %5416 = vrcp.f32 %v2933_v53 }
 0xd24   : > { %5418 = vrcp.f32 %v2937_v4 }
 0xd25   : > { %v5415_v49 = vpop.eup %5414 }
 0xd26   : > { %v2939_v55 = vpop.xlane.xlu0 %2938  ;;  %v2941_v63 = vpop.xlane.xlu1 %2940  ;;  %v2963_v14 = vmul.f32 %v5415_v49, %v6705_v16 }
 0xd27   : > { %5420 = vrcp.f32 %v2941_v63  ;;  %v5150_v63 = vld [vmem:[%s7300_s6] sm:$0xff]  }
 0xd28   : > { %5422 = vrcp.f32 %v2939_v55 }
 0xd29   : > { %5424 = vrcp.f32 %v2935_v5 }
 0xd2a   : > { %v2945_v19 = vpop.xlane.xlu0 %2944 }
 0xd2b   : > { %5426 = vrcp.f32 %v2945_v19 }
 0xd2d   : > { %v5417_v15 = vpop.eup %5416 }
 0xd2e   : > { %v2947_v57 = vpop.xlane.xlu1 %2946  ;;  %v2951_v48 = vpop.xlane.xlu0 %2950  ;;  %v2965_v17 = vmul.f32 %v5417_v15, %v6713_v28 }
 0xd2f   : > { %v5419_v56 = vpop.eup %5418 }
 0xd30   : > { %v2994_v11 = vpack.c.bf16 %v2965_v17, %v2963_v14  ;;  %v2969_v2 = vmul.f32 %v5419_v56, %v6708_v30  ;;  %v7380_v17 = vpack.i.bf16 %v6659_v37, %v6653_v29  ;;  %v7381_v56 = vld [vmem:[#allocation39_spill] sm:$0xff] }
 0xd31   : > { %v5421_v21 = vpop.eup %5420 }
 0xd32   : > { %4859 = vmatprep.mubr.bf16.mxu0 %v2994_v11  ;;  %v2959_v32 = vpop.xlane.xlu1 %2958  ;;  %v2953_v22 = vpop.xlane.xlu0 %2952  ;;  %v2973_v50 = vmul.f32 %v5421_v21, %v6721_v38  ;;  %v7382_v21 = vld [vmem:[#allocation37_spill] sm:$0xff] }
 0xd33   : > { %v5423_v6 = vpop.eup %5422 }
 0xd34   : > { %v5425_v16 = vpop.eup %5424  ;;  %v2971_v13 = vmul.f32 %v5423_v6, %v6723_v51  ;;  %v7385_v6 = vld [vmem:[#allocation38_spill] sm:$0xff] }
 0xd35   : > { %v2967_v25 = vmul.f32 %v5425_v16, %v6702_v45  ;;  %v5427_v44 = vpop.eup %5426 }
 0xd36   : > { %v2955_v3 = vpop.xlane.xlu1 %2954  ;;  %v2949_v62 = vpop.xlane.xlu0 %2948  ;;  %v2996_v20 = vpack.c.bf16 %v2973_v50, %v2971_v13  ;;  %v2977_v30 = vmul.f32 %v5427_v44, %v6728_v12  ;;  %v7387_v13 = vpack.i.bf16 %v6667_v23, %v6663_v54  ;;  %v7388_v50 = vpack.i.bf16 %v6671_v42, %v6665_v60 }
 0xd37   : > { %5428 = vrcp.f32 %v2949_v62  ;;  %v2995_v35 = vpack.c.bf16 %v2969_v2, %v2967_v25 }
 0xd38   : > { %5430 = vrcp.f32 %v2943_v52 }
 0xd39   : > { %5432 = vrcp.f32 %v2947_v57 }
 0xd3a   : > { %v3015_v27 = vpop.permute.xlu0 %3014  ;;  %v3017_v28 = vpop.permute.xlu1 %3016  ;;  %5434 = vrcp.f32 %v2953_v22 }
 0xd3b   : > { %4855 = vmatprep.subr.bf16.mxu0 %v3015_v27  ;;  %5436 = vrcp.f32 %v2951_v48  ;;  %v7379_v48 = vpack.i.bf16 %v6655_v59, %v6651_v34  ;;  %v7383_v34 = vpack.i.bf16 %v7381_v56, %v7382_v21 }
 0xd3c   : > { %4856 = vmatpush3.bf16.msra.mxu0 %v3015_v27  ;;  %5438 = vrcp.f32 %v2955_v3  ;;  %v7384_v27 = vld [vmem:[#allocation40_spill] sm:$0xff] }
 0xd3d   : > { %4857 = vmatprep.subr.bf16.mxu0 %v3017_v28  ;;  %v7386_v29 = vpack.i.bf16 %v7384_v27, %v7385_v6  ;;  %v7393_v6 = vld [vmem:[#allocation23_spill] sm:$0xff] }
 0xd40   : > { %4858 = vmatpush3.bf16.msra.mxu0 %v3017_v28 }
 0xd41   : > { %v5429_v39 = vpop.eup %5428  ;;  %4875 = vmatprep.subr.bf16.mxu0 %v5150_v63 }
 0xd42   : > { %v5431_v9 = vpop.eup %5430  ;;  %v2981_v40 = vmul.f32 %v5429_v39, %v6743_v0 }
 0xd43   : > { %4860 = vmatmul.mubr.bf16.vlgmr.msra.gmra.mrb[64].mxu0 %v2995_v35  ;;  %v5433_v33 = vpop.eup %5432  ;;  %v2975_v51 = vmul.f32 %v5431_v9, %v6715_v18 }
 0xd44   : > { %4863 = vmatprep.mubr.bf16.mxu0 %v2996_v20  ;;  %v2979_v38 = vmul.f32 %v5433_v33, %v6733_v1  ;;  %v5435_v26 = vpop.eup %5434  ;;  %4876 = vmatpush3.bf16.msra.mxu0 %v5150_v63  ;;  %v5014_v33 = vpop.permute.xlu1 %5013 }
 0xd45   : > { %v2997_v45 = vpack.c.bf16 %v2977_v30, %v2975_v51  ;;  %v5437_v7 = vpop.eup %5436  ;;  %v2985_v41 = vmul.f32 %v5435_v26, %v6737_v36  ;;  %v5016_v60 = vunpack.i.h.bf16 %v5014_v33  ;;  %v5015_v42 = vunpack.i.l.bf16 %v5014_v33 }
 0xd46   : > { %v2998_v61 = vpack.c.bf16 %v2981_v40, %v2979_v38  ;;  %v2983_v47 = vmul.f32 %v5437_v7, %v6731_v24  ;;  %v5439_v18 = vpop.eup %5438 }
 0xd47   : > { %v2987_v5 = vmul.f32 %v5439_v18, %v6745_v58  ;;  %v5151_v58 = vld [vmem:[%s7300_s6 + $0x8] sm:$0xff]  }
 0xd48   : > { %v2999_v8 = vpack.c.bf16 %v2985_v41, %v2983_v47  ;;  %4877 = vmatprep.subr.bf16.mxu0 %v5151_v58  ;;  %v5019_v30 = vpop.permute.xlu1 %5018  ;;  %v7390_v18 = vld [vmem:[#allocation19_spill] sm:$0xff] }
 0xd49   : > { %4878 = vmatpush3.bf16.msra.mxu0 %v5151_v58 }
 0xd4b   : > { %4864 = vmatmul.mubr.bf16.gmra.mrb[68].mxu0 %v2997_v45 }
 0xd4c   : > { %4867 = vmatprep.mubr.bf16.mxu0 %v2998_v61  ;;  %v5024_v40 = vpop.permute.xlu1 %5023 }
 0xd4d   : > { %v5026_v41 = vunpack.i.h.bf16 %v5024_v40  ;;  %v5025_v47 = vunpack.i.l.bf16 %v5024_v40 }
 0xd50   : > { %v5034_v23 = vpop.permute.xlu1 %5033 }
 0xd53   : > { %4868 = vmatmul.mubr.bf16.gmra.mrb[72].mxu0 %v2999_v8 }
 0xd54   : > { %v5044_v38 = vpop.permute.xlu1 %5043 }
 0xd55   : > { %v5046_v56 = vunpack.i.h.bf16 %v5044_v38 }
 0xd58   : > { %v6855_v26 = vpop.permute.xlu1 %5053 }
 0xd6b   : > { %v2957_v12 = vpop.xlane.xlu0 %2956 }
 0xd6c   : > { %5440 = vrcp.f32 %v2957_v12  ;;  %v7389_v12 = vld [vmem:[#allocation21_spill] sm:$0xff] }
 0xd6d   : > { %5442 = vrcp.f32 %v2959_v32 }
 0xd6f   : > { %v2961_v0 = vpop.xlane.xlu0 %2960 }
 0xd70   : > { %5444 = vrcp.f32 %v2961_v0  ;;  %v3318_v0 = vsel %vm1362_vm2, %v7389_v12, %v5016_v60 }
 0xd71   : > { %v3334_v63 = vsel %vm467_vm0, %v3318_v0, %v5026_v41 }
 0xd73   : > { %v5009_v54 = vpop.permute.xlu0 %5008 }
 0xd74   : > { %v5011_v61 = vunpack.i.h.bf16 %v5009_v54  ;;  %v5010_v7 = vunpack.i.l.bf16 %v5009_v54 }
 0xd76   : > { %v5441_v1 = vpop.eup %5440 }
 0xd77   : > { %v2989_v10 = vmul.f32 %v5441_v1, %v6779_v46  ;;  %v5443_v4 = vpop.eup %5442  ;;  %v5029_v51 = vpop.permute.xlu0 %5028  ;;  %v3317_v1 = vsel %vm1362_vm2, %v7390_v18, %v5015_v42  ;;  %v5055_v42 = vunpack.i.l.bf16 %v6855_v26 }
 0xd78   : > { %v2991_v24 = vmul.f32 %v5443_v4, %v6739_v31  ;;  %v7391_v4 = vld [vmem:[#allocation22_spill] sm:$0xff]  ;;  %v5030_v27 = vunpack.i.l.bf16 %v5029_v51 }
 0xd79   : > { %v3000_v53 = vpack.c.bf16 %v2989_v10, %v2987_v5  ;;  %v5021_v5 = vunpack.i.h.bf16 %v5019_v30  ;;  %v5020_v10 = vunpack.i.l.bf16 %v5019_v30  ;;  %v7396_v30 = vld [vmem:[#allocation24_spill] sm:$0xff] }
 0xd7a   : > { %v5445_v52 = vpop.eup %5444  ;;  %v3319_v40 = vsel %vm1362_vm2, %v7396_v30, %v5030_v27 }
 0xd7b   : > { %4871 = vmatprep.mubr.bf16.mxu0 %v3000_v53  ;;  %v2993_v36 = vmul.f32 %v5445_v52, %v6782_v43  ;;  %v5039_v45 = vpop.permute.xlu0 %5038  ;;  %v3316_v53 = vsel %vm1362_vm2, %v7391_v4, %v5011_v61  ;;  %v7392_v52 = vld [vmem:[#allocation20_spill] sm:$0xff] }
 0xd7d   : > { %v3001_v55 = vpack.c.bf16 %v2993_v36, %v2991_v24  ;;  %v3315_v24 = vsel %vm1362_vm2, %v7392_v52, %v5010_v7  ;;  %v7397_v52 = vld [vmem:[#allocation29_spill] sm:$0xff] }
 0xd7f   : > { %4872 = vmatmul.mubr.bf16.gmra.mrb[76].mxu0 %v3001_v55  ;;  %v6857_v8 = vpop.permute.xlu0 %5048  ;;  %v3333_v55 = vsel %vm467_vm0, %v3317_v1, %v5025_v47 }
 0xd80   : > { %v5051_v12 = vunpack.i.h.bf16 %v6857_v8  ;;  %v5050_v0 = vunpack.i.l.bf16 %v6857_v8 }
 0xe16   : > { %v4861_v46 = vpop.f32.mrb[64].mxu0 }
 0xe17   : > { %v3060_v19 = vpop.f32.mrb[65].mxu0 }
 0xe18   : > { %v4862_v49 = vpop.f32.mrb[66].mxu0 }
 0xe19   : > { %v5057_v31 = vpack.i.bf16 %v4862_v49, %v4861_v46  ;;  %v3063_v15 = vpop.f32.mrb[67].mxu0  ;;  %v5036_v49 = vunpack.i.h.bf16 %v5034_v23 }
 0xe1a   : > { %v5062_v43 = vpack.i.bf16 %v3063_v15, %v3060_v19 }
 0xe1b   : > { %5058 = vrot.lane.b32.xlu1 %v5057_v31, %s5496_s15  ;;  %v5035_v31 = vunpack.i.l.bf16 %v5034_v23 }
 0xe1c   : > { %5063 = vrot.lane.b32.xlu0 %v5062_v43, %s5496_s15 }
 0xe1e   : > { %v4865_v57 = vpop.f32.mrb[68].mxu0 }
 0xe1f   : > { %5073 = vrot.lane.b32.xlu1 %v7379_v48, %s5495_s28  ;;  %v3076_v14 = vpop.f32.mrb[69].mxu0 }
 0xe20   : > { %5068 = vrot.lane.b32.xlu0 %v7380_v17, %s5495_s28  ;;  %v4866_v11 = vpop.f32.mrb[70].mxu0  ;;  %v3332_v17 = vsel %vm467_vm0, %v3316_v53, %v5021_v5 }
 0xe21   : > { %v5077_v32 = vpack.i.bf16 %v4866_v11, %v4865_v57  ;;  %v3079_v22 = vpop.f32.mrb[71].mxu0  ;;  %v5045_v11 = vunpack.i.l.bf16 %v5044_v38 }
 0xe22   : > { %v5082_v3 = vpack.i.bf16 %v3079_v22, %v3076_v14  ;;  %v3331_v14 = vsel %vm467_vm0, %v3315_v24, %v5020_v10  ;;  %v7398_v24 = vld [vmem:[#allocation27_spill] sm:$0xff] }
 0xe23   : > { %5078 = vrot.lane.b32.xlu1 %v5077_v32, %s5496_s15 }
 0xe24   : > { %5083 = vrot.lane.b32.xlu0 %v5082_v3, %s5496_s15 }
 0xe26   : > { %v4869_v62 = vpop.f32.mrb[72].mxu0 }
 0xe27   : > { %5093 = vrot.lane.b32.xlu1 %v7383_v34, %s5494_s27  ;;  %v3092_v59 = vpop.f32.mrb[73].mxu0 }
 0xe28   : > { %5088 = vrot.lane.b32.xlu0 %v7386_v29, %s5494_s27  ;;  %v4870_v37 = vpop.f32.mrb[74].mxu0  ;;  %v3321_v29 = vsel %vm1362_vm2, %v7393_v6, %v5035_v31 }
 0xe29   : > { %v5097_v16 = vpack.i.bf16 %v4870_v37, %v4869_v62  ;;  %v3095_v28 = vpop.f32.mrb[75].mxu0  ;;  %v5041_v37 = vunpack.i.h.bf16 %v5039_v45 }
 0xe2a   : > { %v5102_v2 = vpack.i.bf16 %v3095_v28, %v3092_v59  ;;  %v5031_v59 = vunpack.i.h.bf16 %v5029_v51  ;;  %v7394_v28 = vld [vmem:[#allocation25_spill] sm:$0xff] }
 0xe2b   : > { %5098 = vrot.lane.b32.xlu1 %v5097_v16, %s5496_s15  ;;  %v5040_v16 = vunpack.i.l.bf16 %v5039_v45 }
 0xe2c   : > { %5103 = vrot.lane.b32.xlu0 %v5102_v2, %s5496_s15  ;;  %v3322_v2 = vsel %vm1362_vm2, %v7394_v28, %v5036_v49 }
 0xe2d   : > { %v3335_v51 = vsel %vm467_vm0, %v3319_v40, %v5040_v16 }
 0xe2f   : > { %5113 = vrot.lane.b32.xlu1 %v7387_v13, %s5495_s28  ;;  %v3337_v13 = vsel %vm467_vm0, %v3321_v29, %v5045_v11 }
 0xe30   : > { %5108 = vrot.lane.b32.xlu0 %v7388_v50, %s5495_s28 }
 0xe52   : > { %v4873_v25 = vpop.f32.mrb[76].mxu0 }
 0xe53   : > { %v3108_v35 = vpop.f32.mrb[77].mxu0 }
 0xe54   : > { %v4874_v44 = vpop.f32.mrb[78].mxu0 }
 0xe55   : > { %v5122_v20 = vpack.i.bf16 %v4874_v44, %v4873_v25  ;;  %v3111_v39 = vpop.f32.mrb[79].mxu0  ;;  %v3338_v25 = vsel %vm467_vm0, %v3322_v2, %v5046_v56 }
 0xe56   : > { %v5117_v9 = vpack.i.bf16 %v3111_v39, %v3108_v35  ;;  %v5056_v35 = vunpack.i.h.bf16 %v6855_v26 }
 0xe57   : > { %5123 = vrot.lane.b32.xlu1 %v5122_v20, %s5496_s15 }
 0xe58   : > { %5118 = vrot.lane.b32.xlu0 %v5117_v9, %s5496_s15  ;;  %v7395_v9 = vld [vmem:[#allocation26_spill] sm:$0xff]  ;;  %v3326_v26 = vsel %vm1362_vm2, %v7397_v52, %v5056_v35 }
 0xe59   : > { %v3320_v33 = vsel %vm1362_vm2, %v7395_v9, %v5031_v59  ;;  %v7404_v9 = vld [vmem:[#allocation32_spill] sm:$0xff] }
 0xe5a   : > { %v3336_v38 = vsel %vm467_vm0, %v3320_v33, %v5041_v37 }
 0xe8d   : > { %v5059_v36 = vpop.permute.xlu1 %5058 }
 0xe8e   : > { %v5061_v58 = vunpack.i.h.bf16 %v5059_v36  ;;  %v5060_v46 = vunpack.i.l.bf16 %v5059_v36  ;;  %v5064_v19 = vpop.permute.xlu0 %5063  ;;  %v3325_v36 = vsel %vm1362_vm2, %v7398_v24, %v5055_v42 }
 0xe8f   : > { %v5066_v15 = vunpack.i.h.bf16 %v5064_v19  ;;  %v5065_v43 = vunpack.i.l.bf16 %v5064_v19 }
 0xe90   : > { %v3351_v57 = vsel %vm3347_vm3, %v3334_v63, %v5061_v58  ;;  %v3350_v48 = vsel %vm3347_vm3, %v3333_v55, %v5060_v46  ;;  %v7399_v63 = vld [vmem:[#allocation30_spill] sm:$0xff]  ;;  %v7400_v58 = vld [vmem:[#allocation28_spill] sm:$0xff] }
 0xe91   : > { %v3365_v32 = vpack.c.bf16 %v3351_v57, %v3350_v48  ;;  %v3348_v22 = vsel %vm3347_vm3, %v3331_v14, %v5065_v43  ;;  %v3349_v3 = vsel %vm3347_vm3, %v3332_v17, %v5066_v15  ;;  %v5074_v62 = vpop.permute.xlu1 %5073  ;;  %v3324_v8 = vsel %vm1362_vm2, %v7399_v63, %v5051_v12 }
 0xe92   : > { %v3364_v21 = vpack.c.bf16 %v3349_v3, %v3348_v22  ;;  %v5069_v34 = vpop.permute.xlu0 %5068  ;;  %v5076_v5 = vunpack.i.h.bf16 %v5074_v62  ;;  %v5075_v10 = vunpack.i.l.bf16 %v5074_v62  ;;  %v3323_v46 = vsel %vm1362_vm2, %v7400_v58, %v5050_v0  ;;  %v7407_v58 = vld [vmem:[#allocation3_spill] sm:$0xff] }
 0xe93   : > { %v5071_v4 = vunpack.i.h.bf16 %v5069_v34  ;;  %v5070_v53 = vunpack.i.l.bf16 %v5069_v34 }
 0xe94   : > { %4879 = vmatprep.mubr.msk.bf16.mxu0 %vm641_vm1, %v3364_v21  ;;  %v3342_v15 = vsel %vm467_vm0, %v3326_v26, %v5076_v5  ;;  %v3341_v43 = vsel %vm467_vm0, %v3325_v36, %v5075_v10  ;;  %v6939_v5 = vld [vmem:[%s7303_s9] sm:$0xff] }
 0xe95   : > { %v5079_v50 = vpop.permute.xlu1 %5078  ;;  %4880 = vmatmul.mubr.msk.bf16.vlgmr.msra.gmra.mrb[80].mxu0 %vm641_vm1, %v3365_v32  ;;  %v3339_v14 = vsel %vm467_vm0, %v3323_v46, %v5070_v53  ;;  %v3340_v17 = vsel %vm467_vm0, %v3324_v8, %v5071_v4 }
 0xe96   : > { %v5081_v44 = vunpack.i.h.bf16 %v5079_v50  ;;  %v5080_v20 = vunpack.i.l.bf16 %v5079_v50  ;;  %v5084_v39 = vpop.permute.xlu0 %5083 }
 0xe97   : > { %v5086_v54 = vunpack.i.h.bf16 %v5084_v39  ;;  %v5085_v23 = vunpack.i.l.bf16 %v5084_v39 }
 0xe98   : > { %v3355_v45 = vsel %vm3347_vm3, %v3338_v25, %v5081_v44  ;;  %v3354_v60 = vsel %vm3347_vm3, %v3337_v13, %v5080_v20  ;;  %v7401_v13 = vld [vmem:[#allocation33_spill] sm:$0xff]  ;;  %v7402_v25 = vld [vmem:[#allocation31_spill] sm:$0xff]  ;;  %v7403_v20 = vld [vmem:[#allocation34_spill] sm:$0xff] }
 0xe99   : > { %v3367_v61 = vpack.c.bf16 %v3355_v45, %v3354_v60  ;;  %v3352_v7 = vsel %vm3347_vm3, %v3335_v51, %v5085_v23  ;;  %v3353_v41 = vsel %vm3347_vm3, %v3336_v38, %v5086_v54  ;;  %v5094_v47 = vpop.permute.xlu1 %5093 }
 0xe9a   : > { %v3366_v18 = vpack.c.bf16 %v3353_v41, %v3352_v7  ;;  %v5089_v1 = vpop.permute.xlu0 %5088  ;;  %v5096_v34 = vunpack.i.h.bf16 %v5094_v47  ;;  %v5095_v59 = vunpack.i.l.bf16 %v5094_v47 }
 0xe9b   : > { %v5091_v6 = vunpack.i.h.bf16 %v5089_v1  ;;  %v5090_v29 = vunpack.i.l.bf16 %v5089_v1 }
 0xe9c   : > { %4883 = vmatprep.mubr.msk.bf16.mxu0 %vm641_vm1, %v3366_v18  ;;  %v3330_v50 = vsel %vm1362_vm2, %v7401_v13, %v5096_v34  ;;  %v3329_v35 = vsel %vm1362_vm2, %v7402_v25, %v5095_v59  ;;  %v7405_v18 = vld [vmem:[#allocation2_spill] sm:$0xff]  ;;  %v7410_v34 = vld [vmem:[#allocation7_spill] sm:$0xff] }
 0xe9d   : > { %v5099_v55 = vpop.permute.xlu1 %5098  ;;  %4884 = vmatmul.mubr.msk.bf16.gmra.mrb[84].mxu0 %vm641_vm1, %v3367_v61  ;;  %v3328_v39 = vsel %vm1362_vm2, %v7403_v20, %v5091_v6  ;;  %v3327_v33 = vsel %vm1362_vm2, %v7404_v9, %v5090_v29  ;;  %v3378_v1 = vsub.s32 5, %v7405_v18 }
 0xe9e   : > { %v5101_v19 = vunpack.i.h.bf16 %v5099_v55  ;;  %v5100_v49 = vunpack.i.l.bf16 %v5099_v55  ;;  %v5104_v31 = vpop.permute.xlu0 %5103  ;;  %v7406_v55 = vld [vmem:[#allocation4_spill] sm:$0xff] }
 0xe9f   : > { %v5106_v57 = vunpack.i.h.bf16 %v5104_v31  ;;  %v5105_v48 = vunpack.i.l.bf16 %v5104_v31  ;;  %v6942_v10 = vrot.slane %v6939_v5, %v3378_v1 }
 0xea0   : > { %v3359_v11 = vsel %vm3347_vm3, %v3342_v15, %v5101_v19  ;;  %v3358_v32 = vsel %vm3347_vm3, %v3341_v43, %v5100_v49  ;;  %v7408_v49 = vld [vmem:[#allocation6_spill] sm:$0xff] }
 0xea1   : > { %v3369_v22 = vpack.c.bf16 %v3359_v11, %v3358_v32  ;;  %v3356_v3 = vsel %vm3347_vm3, %v3339_v14, %v5105_v48  ;;  %v3357_v62 = vsel %vm3347_vm3, %v3340_v17, %v5106_v57  ;;  %v5114_v21 = vpop.permute.xlu1 %5113  ;;  %v7409_v14 = vld [vmem:[#allocation5_spill] sm:$0xff] }
 0xea2   : > { %v3368_v56 = vpack.c.bf16 %v3357_v62, %v3356_v3  ;;  %v5109_v27 = vpop.permute.xlu0 %5108  ;;  %v5116_v37 = vunpack.i.h.bf16 %v5114_v21  ;;  %v5115_v16 = vunpack.i.l.bf16 %v5114_v21 }
 0xea3   : > { %v5111_v28 = vunpack.i.h.bf16 %v5109_v27  ;;  %v5110_v2 = vunpack.i.l.bf16 %v5109_v27  ;;  %v7411_v27 = vld [vmem:[#allocation9_spill] sm:$0xff] }
 0xea4   : > { %4887 = vmatprep.mubr.msk.bf16.mxu0 %vm641_vm1, %v3368_v56  ;;  %v3346_v23 = vsel %vm467_vm0, %v3330_v50, %v5116_v37  ;;  %v3345_v51 = vsel %vm467_vm0, %v3329_v35, %v5115_v16  ;;  %v7412_v37 = vld [vmem:[#allocation10_spill] sm:$0xff]  ;;  %v7413_v50 = vld [vmem:[#allocation8_spill] sm:$0xff] }
 0xea5   : > { %4888 = vmatmul.mubr.msk.bf16.gmra.mrb[88].mxu0 %vm641_vm1, %v3369_v22  ;;  %v3343_v60 = vsel %vm467_vm0, %v3327_v33, %v5110_v2  ;;  %v3344_v42 = vsel %vm467_vm0, %v3328_v39, %v5111_v28 }
 0xec9   : > { %v5124_v44 = vpop.permute.xlu1 %5123 }
 0xeca   : > { %v5126_v30 = vunpack.i.h.bf16 %v5124_v44  ;;  %v5125_v40 = vunpack.i.l.bf16 %v5124_v44  ;;  %v5119_v54 = vpop.permute.xlu0 %5118 }
 0xecb   : > { %v5121_v38 = vunpack.i.h.bf16 %v5119_v54  ;;  %v5120_v45 = vunpack.i.l.bf16 %v5119_v54  ;;  %v7414_v54 = vld [vmem:[#allocation12_spill] sm:$0xff] }
 0xecc   : > { %v3363_v61 = vsel %vm3347_vm3, %v3346_v23, %v5126_v30  ;;  %v3362_v7 = vsel %vm3347_vm3, %v3345_v51, %v5125_v40  ;;  %v7415_v51 = vld [vmem:[#allocation14_spill] sm:$0xff] }
 0xecd   : > { %v3371_v41 = vpack.c.bf16 %v3363_v61, %v3362_v7  ;;  %v3360_v47 = vsel %vm3347_vm3, %v3343_v60, %v5120_v45  ;;  %v3361_v12 = vsel %vm3347_vm3, %v3344_v42, %v5121_v38  ;;  %v7416_v60 = vld [vmem:[#allocation13_spill] sm:$0xff]  ;;  %v7417_v7 = vld [vmem:[#allocation11_spill] sm:$0xff] }
 0xece   : > { %v3370_v0 = vpack.c.bf16 %v3361_v12, %v3360_v47 }
 0xed0   : > { %4891 = vmatprep.mubr.msk.bf16.mxu0 %vm641_vm1, %v3370_v0 }
 0xed1   : > { %4892 = vmatmul.mubr.msk.bf16.gmra.mrb[92].mxu0 %vm641_vm1, %v3371_v41 }
 0xf68   : > { %v4881_v4 = vpop.f32.mrb[80].mxu0 }
 0xf69   : > { %v3450_v53 = vpop.f32.mrb[81].mxu0  ;;  %v3459_v52 = vadd.f32 %v4881_v4, %v6942_v10 }
 0xf6a   : > { %v3451_v26 = vadd.f32 %v3450_v53, %v6942_v10  ;;  %v4882_v24 = vpop.f32.mrb[82].mxu0 }
 0xf6b   : > { %v3453_v36 = vpop.f32.mrb[83].mxu0  ;;  %v6951_v46 = vadd.f32 %v3459_v52, %v7407_v58  ;;  %v3462_v19 = vadd.f32 %v4882_v24, %v6942_v10 }
 0xf6c   : > { %v6947_v63 = vadd.f32 %v3451_v26, %v7406_v55  ;;  %v3454_v8 = vadd.f32 %v3453_v36, %v6942_v10  ;;  %v7418_v55 = vld [vmem:[#allocation16_spill] sm:$0xff] }
 0xf6d   : > { %v6962_v17 = vadd.f32 %v3462_v19, %v7409_v14  ;;  %v3535_v22 = vsel %vm641_vm1, %v6951_v46, 0.0  ;;  %v7419_v19 = vld [vmem:[#allocation15_spill] sm:$0xff] }
 0xf6e   : > { %v6955_v31 = vadd.f32 %v3454_v8, %v7408_v49  ;;  %v3529_v15 = vsel %vm641_vm1, %v6947_v63, 0.0 }
 0xf6f   : > { %3530 = vadd.xlane.f32.xlu0 %v3529_v15  ;;  %v3538_v29 = vsel %vm641_vm1, %v6962_v17, 0.0  ;;  %v7420_v15 = vld [vmem:[#allocation18_spill] sm:$0xff] }
 0xf70   : > { %v4885_v43 = vpop.f32.mrb[84].mxu0  ;;  %v3532_v57 = vsel %vm641_vm1, %v6955_v31, 0.0 }
 0xf71   : > { %v3466_v48 = vpop.f32.mrb[85].mxu0  ;;  %3533 = vadd.xlane.f32.xlu1 %v3532_v57  ;;  %v3475_v21 = vadd.f32 %v4885_v43, %v6942_v10 }
 0xf72   : > { %v3467_v11 = vadd.f32 %v3466_v48, %v6942_v10  ;;  %v4886_v32 = vpop.f32.mrb[86].mxu0  ;;  %v7421_v48 = vld [vmem:[#allocation17_spill] sm:$0xff] }
 0xf73   : > { %v3469_v3 = vpop.f32.mrb[87].mxu0  ;;  %3536 = vadd.xlane.f32.xlu0 %v3535_v22  ;;  %v3478_v62 = vadd.f32 %v4886_v32, %v6942_v10  ;;  %v6984_v25 = vadd.f32 %v3475_v21, %v7413_v50 }
 0xf74   : > { %v3470_v56 = vadd.f32 %v3469_v3, %v6942_v10  ;;  %v6971_v59 = vadd.f32 %v3467_v11, %v7410_v34 }
 0xf75   : > { %v6979_v16 = vadd.f32 %v3478_v62, %v7412_v37  ;;  %v3547_v45 = vsel %vm641_vm1, %v6984_v25, 0.0 }
 0xf76   : > { %v6974_v6 = vadd.f32 %v3470_v56, %v7411_v27  ;;  %v3541_v20 = vsel %vm641_vm1, %v6971_v59, 0.0 }
 0xf77   : > { %3539 = vadd.xlane.f32.xlu0 %v3538_v29  ;;  %v3550_v30 = vsel %vm641_vm1, %v6979_v16, 0.0 }
 0xf78   : > { %v4889_v28 = vpop.f32.mrb[88].mxu0  ;;  %v3544_v2 = vsel %vm641_vm1, %v6974_v6, 0.0 }
 0xf79   : > { %v3482_v13 = vpop.f32.mrb[89].mxu0  ;;  %3545 = vadd.xlane.f32.xlu1 %v3544_v2  ;;  %v3491_v40 = vadd.f32 %v4889_v28, %v6942_v10 }
 0xf7a   : > { %v3483_v35 = vadd.f32 %v3482_v13, %v6942_v10  ;;  %v4890_v44 = vpop.f32.mrb[90].mxu0 }
 0xf7b   : > { %v3485_v39 = vpop.f32.mrb[91].mxu0  ;;  %3542 = vadd.xlane.f32.xlu0 %v3541_v20  ;;  %v3494_v9 = vadd.f32 %v4890_v44, %v6942_v10  ;;  %v7008_v41 = vadd.f32 %v3491_v40, %v7417_v7 }
 0xf7c   : > { %v3486_v33 = vadd.f32 %v3485_v39, %v6942_v10  ;;  %v6995_v23 = vadd.f32 %v3483_v35, %v7414_v54 }
 0xf7d   : > { %3551 = vadd.xlane.f32.xlu1 %v3550_v30  ;;  %v7003_v42 = vadd.f32 %v3494_v9, %v7416_v60  ;;  %v3559_v0 = vsel %vm641_vm1, %v7008_v41, 0.0 }
 0xf7e   : > { %v6998_v38 = vadd.f32 %v3486_v33, %v7415_v51  ;;  %v3553_v47 = vsel %vm641_vm1, %v6995_v23, 0.0 }
 0xf7f   : > { %3548 = vadd.xlane.f32.xlu0 %v3547_v45  ;;  %v3562_v12 = vsel %vm641_vm1, %v7003_v42, 0.0 }
 0xf80   : > { %v3556_v61 = vsel %vm641_vm1, %v6998_v38, 0.0 }
 0xf81   : > { %3557 = vadd.xlane.f32.xlu1 %v3556_v61 }
 0xf83   : > { %3554 = vadd.xlane.f32.xlu0 %v3553_v47 }
 0xf85   : > { %3563 = vadd.xlane.f32.xlu1 %v3562_v12 }
 0xf87   : > { %3560 = vadd.xlane.f32.xlu0 %v3559_v0 }
 0xfa4   : > { %v4893_v1 = vpop.f32.mrb[92].mxu0 }
 0xfa5   : > { %v3507_v4 = vadd.f32 %v4893_v1, %v6942_v10  ;;  %v3498_v53 = vpop.f32.mrb[93].mxu0 }
 0xfa6   : > { %v3499_v52 = vadd.f32 %v3498_v53, %v6942_v10  ;;  %v4894_v26 = vpop.f32.mrb[94].mxu0 }
 0xfa7   : > { %v3510_v24 = vadd.f32 %v4894_v26, %v6942_v10  ;;  %v3501_v36 = vpop.f32.mrb[95].mxu0  ;;  %v7024_v49 = vadd.f32 %v3507_v4, %v7419_v19 }
 0xfa8   : > { %v7020_v8 = vadd.f32 %v3499_v52, %v7418_v55  ;;  %v3502_v58 = vadd.f32 %v3501_v36, %v6942_v10 }
 0xfa9   : > { %v7032_v14 = vadd.f32 %v3510_v24, %v7421_v48  ;;  %v3571_v10 = vsel %vm641_vm1, %v7024_v49, 0.0 }
 0xfaa   : > { %v7027_v43 = vadd.f32 %v3502_v58, %v7420_v15  ;;  %v3565_v57 = vsel %vm641_vm1, %v7020_v8, 0.0 }
 0xfab   : > { %3566 = vadd.xlane.f32.xlu0 %v3565_v57  ;;  %v3574_v32 = vsel %vm641_vm1, %v7032_v14, 0.0 }
 0xfac   : > { %v3568_v11 = vsel %vm641_vm1, %v7027_v43, 0.0 }
 0xfad   : > { %3569 = vadd.xlane.f32.xlu1 %v3568_v11 }
 0xfaf   : > { %3572 = vadd.xlane.f32.xlu0 %v3571_v10 }
 0xfb1   : > { %3575 = vadd.xlane.f32.xlu1 %v3574_v32 }
 0xffc   : > { %v3531_v22 = vpop.xlane.xlu0 %3530 }
 0xffd   : > { %v3577_v3 = vmul.f32 0.03125, %v3531_v22 }
 0xffe   : > { %v3534_v62 = vpop.xlane.xlu1 %3533 }
 0xfff   : > { %v7041_v56 = vsub.f32 %v6947_v63, %v3577_v3  ;;  %v3578_v21 = vmul.f32 0.03125, %v3534_v62 }
0x1000   : > { %v3537_v34 = vpop.xlane.xlu0 %3536 }
0x1001   : > { %v7044_v27 = vsub.f32 %v6955_v31, %v3578_v21  ;;  %v3579_v29 = vmul.f32 0.03125, %v3537_v34  ;;  %v3609_v37 = vmul.f32 %v7041_v56, %v7041_v56 }
0x1003   : > { %v7049_v28 = vsub.f32 %v6951_v46, %v3579_v29  ;;  %v3625_v2 = vsel %vm641_vm1, %v3609_v37, 0.0  ;;  %v3610_v13 = vmul.f32 %v7044_v27, %v7044_v27 }
0x1004   : > { %3626 = vadd.xlane.f32.xlu0 %v3625_v2  ;;  %v3540_v50 = vpop.xlane.xlu0 %3539 }
0x1005   : > { %v3580_v35 = vmul.f32 0.03125, %v3540_v50  ;;  %v3628_v44 = vsel %vm641_vm1, %v3610_v13, 0.0  ;;  %v3611_v20 = vmul.f32 %v7049_v28, %v7049_v28 }
0x1006   : > { %3629 = vadd.xlane.f32.xlu1 %v3628_v44  ;;  %v3546_v39 = vpop.xlane.xlu1 %3545 }
0x1007   : > { %v7058_v9 = vsub.f32 %v6962_v17, %v3580_v35  ;;  %v3582_v33 = vmul.f32 0.03125, %v3546_v39  ;;  %v3631_v30 = vsel %vm641_vm1, %v3611_v20, 0.0 }
0x1008   : > { %3632 = vadd.xlane.f32.xlu0 %v3631_v30  ;;  %v3543_v40 = vpop.xlane.xlu0 %3542  ;;  %v5153_v30 = vld [vmem:[%s7301_s7 + $0x8] sm:$0xff]  }
0x1009   : > { %v7062_v54 = vsub.f32 %v6974_v6, %v3582_v33  ;;  %v3581_v51 = vmul.f32 0.03125, %v3543_v40  ;;  %v3612_v45 = vmul.f32 %v7058_v9, %v7058_v9  ;;  %v5152_v33 = vld [vmem:[%s7301_s7] sm:$0xff]  }
0x100a   : > { %v3552_v60 = vpop.xlane.xlu1 %3551  ;;  %4895 = vmatprep.subr.bf16.mxu1 %v5152_v33 }
0x100b   : > { %v7067_v61 = vsub.f32 %v6971_v59, %v3581_v51  ;;  %v3584_v7 = vmul.f32 0.03125, %v3552_v60  ;;  %v3634_v47 = vsel %vm641_vm1, %v3612_v45, 0.0  ;;  %v3614_v12 = vmul.f32 %v7062_v54, %v7062_v54  ;;  %4896 = vmatpush3.bf16.msra.mxu1 %v5152_v33 }
0x100c   : > { %3635 = vadd.xlane.f32.xlu1 %v3634_v47  ;;  %v3549_v0 = vpop.xlane.xlu0 %3548  ;;  %4897 = vmatprep.subr.bf16.mxu1 %v5153_v30 }
0x100d   : > { %v7073_v1 = vsub.f32 %v6979_v16, %v3584_v7  ;;  %v3583_v4 = vmul.f32 0.03125, %v3549_v0  ;;  %v3613_v53 = vmul.f32 %v7067_v61, %v7067_v61  ;;  %v3640_v26 = vsel %vm641_vm1, %v3614_v12, 0.0 }
0x100e   : > { %v3558_v52 = vpop.xlane.xlu1 %3557 }
0x100f   : > { %v7079_v24 = vsub.f32 %v6984_v25, %v3583_v4  ;;  %v3586_v36 = vmul.f32 0.03125, %v3558_v52  ;;  %v3637_v55 = vsel %vm641_vm1, %v3613_v53, 0.0  ;;  %v3616_v58 = vmul.f32 %v7073_v1, %v7073_v1  ;;  %4898 = vmatpush3.bf16.msra.mxu1 %v5153_v30 }
0x1010   : > { %3641 = vadd.xlane.f32.xlu1 %v3640_v26  ;;  %3638 = vadd.xlane.f32.xlu0 %v3637_v55  ;;  %v3555_v19 = vpop.xlane.xlu0 %3554  ;;  %v3739_v30 = vsub.s32 6, %v7405_v18 }
0x1011   : > { %v7085_v15 = vsub.f32 %v6998_v38, %v3586_v36  ;;  %v3585_v57 = vmul.f32 0.03125, %v3555_v19  ;;  %v3615_v48 = vmul.f32 %v7079_v24, %v7079_v24  ;;  %v3646_v10 = vsel %vm641_vm1, %v3616_v58, 0.0 }
0x1012   : > { %v3564_v11 = vpop.xlane.xlu1 %3563 }
0x1013   : > { %v7091_v32 = vsub.f32 %v6995_v23, %v3585_v57  ;;  %v3588_v22 = vmul.f32 0.03125, %v3564_v11  ;;  %v3643_v3 = vsel %vm641_vm1, %v3615_v48, 0.0  ;;  %v3618_v62 = vmul.f32 %v7085_v15, %v7085_v15 }
0x1014   : > { %3647 = vadd.xlane.f32.xlu1 %v3646_v10  ;;  %3644 = vadd.xlane.f32.xlu0 %v3643_v3  ;;  %v3561_v21 = vpop.xlane.xlu0 %3560  ;;  %v5155_v3 = vld [vmem:[%s7302_s8 + $0x8] sm:$0xff]  }
0x1015   : > { %v7097_v34 = vsub.f32 %v7003_v42, %v3588_v22  ;;  %v3587_v29 = vmul.f32 0.03125, %v3561_v21  ;;  %v3617_v37 = vmul.f32 %v7091_v32, %v7091_v32  ;;  %v3652_v13 = vsel %vm641_vm1, %v3618_v62, 0.0  ;;  %v5154_v22 = vld [vmem:[%s7302_s8] sm:$0xff]  }
0x1016   : > { %4915 = vmatprep.subr.bf16.mxu0 %v5154_v22 }
0x1017   : > { %v7102_v2 = vsub.f32 %v7008_v41, %v3587_v29  ;;  %v3649_v50 = vsel %vm641_vm1, %v3617_v37, 0.0  ;;  %v3620_v35 = vmul.f32 %v7097_v34, %v7097_v34  ;;  %4916 = vmatpush3.bf16.msra.mxu0 %v5154_v22 }
0x1018   : > { %3653 = vadd.xlane.f32.xlu1 %v3652_v13  ;;  %3650 = vadd.xlane.f32.xlu0 %v3649_v50 }
0x1019   : > { %v3619_v44 = vmul.f32 %v7102_v2, %v7102_v2  ;;  %v3658_v20 = vsel %vm641_vm1, %v3620_v35, 0.0  ;;  %4917 = vmatprep.subr.bf16.mxu0 %v5155_v3 }
0x101b   : > { %v3655_v39 = vsel %vm641_vm1, %v3619_v44, 0.0  ;;  %4918 = vmatpush3.bf16.msra.mxu0 %v5155_v3 }
0x101c   : > { %3659 = vadd.xlane.f32.xlu1 %v3658_v20  ;;  %3656 = vadd.xlane.f32.xlu0 %v3655_v39 }
0x1038   : > { %v3567_v40 = vpop.xlane.xlu0 %3566 }
0x1039   : > { %v3589_v51 = vmul.f32 0.03125, %v3567_v40 }
0x103a   : > { %v3570_v45 = vpop.xlane.xlu1 %3569 }
0x103b   : > { %v7119_v60 = vsub.f32 %v7020_v8, %v3589_v51  ;;  %v3590_v7 = vmul.f32 0.03125, %v3570_v45 }
0x103c   : > { %v3573_v47 = vpop.xlane.xlu0 %3572 }
0x103d   : > { %v7122_v12 = vsub.f32 %v7027_v43, %v3590_v7  ;;  %v3591_v0 = vmul.f32 0.03125, %v3573_v47  ;;  %v3621_v4 = vmul.f32 %v7119_v60, %v7119_v60 }
0x103e   : > { %v3576_v53 = vpop.xlane.xlu1 %3575 }
0x103f   : > { %v7127_v52 = vsub.f32 %v7024_v49, %v3591_v0  ;;  %v3592_v26 = vmul.f32 0.03125, %v3576_v53  ;;  %v3661_v36 = vsel %vm641_vm1, %v3621_v4, 0.0  ;;  %v3622_v55 = vmul.f32 %v7122_v12, %v7122_v12 }
0x1040   : > { %3662 = vadd.xlane.f32.xlu0 %v3661_v36  ;;  %v7150_v0 = vrot.slane %v6939_v5, %v3739_v30  ;;  %v3759_v4 = vsub.s32 7, %v7405_v18 }
0x1041   : > { %v7133_v58 = vsub.f32 %v7032_v14, %v3592_v26  ;;  %v3664_v19 = vsel %vm641_vm1, %v3622_v55, 0.0  ;;  %v3623_v57 = vmul.f32 %v7127_v52, %v7127_v52 }
0x1042   : > { %3665 = vadd.xlane.f32.xlu1 %v3664_v19  ;;  %v7156_v3 = vrot.slane %v6939_v5, %v3759_v4 }
0x1043   : > { %v3667_v48 = vsel %vm641_vm1, %v3623_v57, 0.0  ;;  %v3624_v11 = vmul.f32 %v7133_v58, %v7133_v58 }
0x1044   : > { %3668 = vadd.xlane.f32.xlu0 %v3667_v48 }
0x1045   : > { %v3670_v10 = vsel %vm641_vm1, %v3624_v11, 0.0 }
0x1046   : > { %3671 = vadd.xlane.f32.xlu1 %v3670_v10 }
0x1091   : > { %v3627_v62 = vpop.xlane.xlu0 %3626 }
0x1092   : > { %v3673_v21 = vmul.f32 0.03125, %v3627_v62 }
0x1093   : > { %v3630_v29 = vpop.xlane.xlu1 %3629 }
0x1094   : > { %v3689_v37 = vadd.f32 1e-05, %v3673_v21  ;;  %v3674_v13 = vmul.f32 0.03125, %v3630_v29 }
0x1095   : > { %v3633_v50 = vpop.xlane.xlu0 %3632 }
0x1096   : > { %5446 = vrsqrt.f32 %v3689_v37  ;;  %v3690_v35 = vadd.f32 1e-05, %v3674_v13  ;;  %v3675_v44 = vmul.f32 0.03125, %v3633_v50 }
0x1098   : > { %5448 = vrsqrt.f32 %v3690_v35  ;;  %v3691_v20 = vadd.f32 1e-05, %v3675_v44 }
0x1099   : > { %v3636_v39 = vpop.xlane.xlu1 %3635 }
0x109a   : > { %5450 = vrsqrt.f32 %v3691_v20  ;;  %v3676_v33 = vmul.f32 0.03125, %v3636_v39 }
0x109c   : > { %v3692_v40 = vadd.f32 1e-05, %v3676_v33 }
0x109d   : > { %v3642_v51 = vpop.xlane.xlu1 %3641  ;;  %v3639_v45 = vpop.xlane.xlu0 %3638 }
0x109e   : > { %5452 = vrsqrt.f32 %v3692_v40  ;;  %v3678_v7 = vmul.f32 0.03125, %v3642_v51  ;;  %v3677_v47 = vmul.f32 0.03125, %v3639_v45 }
0x10a0   : > { %v5447_v53 = vpop.eup %5446  ;;  %v3694_v26 = vadd.f32 1e-05, %v3678_v7  ;;  %v3693_v36 = vadd.f32 1e-05, %v3677_v47 }
0x10a1   : > { %v3721_v55 = vmul.f32 %v5447_v53, %v7041_v56  ;;  %v3648_v19 = vpop.xlane.xlu1 %3647  ;;  %v3645_v57 = vpop.xlane.xlu0 %3644 }
0x10a2   : > { %v5449_v48 = vpop.eup %5448  ;;  %5454 = vrsqrt.f32 %v3694_v26  ;;  %v3680_v11 = vmul.f32 0.03125, %v3648_v19  ;;  %v3679_v10 = vmul.f32 0.03125, %v3645_v57 }
0x10a3   : > { %v3722_v22 = vmul.f32 %v5449_v48, %v7044_v27  ;;  %5456 = vrsqrt.f32 %v3693_v36  ;;  %v3741_v62 = vmul.f32 %v7150_v0, %v3721_v55 }
0x10a4   : > { %v5451_v21 = vpop.eup %5450  ;;  %v3696_v29 = vadd.f32 1e-05, %v3680_v11  ;;  %v3695_v37 = vadd.f32 1e-05, %v3679_v10 }
0x10a5   : > { %v3723_v13 = vmul.f32 %v5451_v21, %v7049_v28  ;;  %v3654_v56 = vpop.xlane.xlu1 %3653  ;;  %v3651_v50 = vpop.xlane.xlu0 %3650  ;;  %v3742_v35 = vmul.f32 %v7150_v0, %v3722_v22  ;;  %v3761_v27 = vadd.f32 %v7156_v3, %v3741_v62 }
0x10a6   : > { %5458 = vrsqrt.f32 %v3696_v29  ;;  %v3682_v44 = vmul.f32 0.03125, %v3654_v56  ;;  %v3681_v20 = vmul.f32 0.03125, %v3651_v50 }
0x10a7   : > { %5460 = vrsqrt.f32 %v3695_v37  ;;  %v3762_v5 = vadd.f32 %v7156_v3, %v3742_v35  ;;  %v3743_v40 = vmul.f32 %v7150_v0, %v3723_v13 }
0x10a8   : > { %v5453_v39 = vpop.eup %5452  ;;  %v3698_v33 = vadd.f32 1e-05, %v3682_v44  ;;  %v3697_v30 = vadd.f32 1e-05, %v3681_v20 }
0x10a9   : > { %v3724_v51 = vmul.f32 %v5453_v39, %v7058_v9  ;;  %v3660_v28 = vpop.xlane.xlu1 %3659  ;;  %v3657_v45 = vpop.xlane.xlu0 %3656  ;;  %v3777_v7 = vpack.c.bf16 %v3762_v5, %v3761_v27  ;;  %v3763_v57 = vadd.f32 %v7156_v3, %v3743_v40 }
0x10aa   : > { %5462 = vrsqrt.f32 %v3698_v33  ;;  %v3684_v47 = vmul.f32 0.03125, %v3660_v28  ;;  %v3683_v4 = vmul.f32 0.03125, %v3657_v45 }
0x10ab   : > { %v3744_v53 = vmul.f32 %v7150_v0, %v3724_v51  ;;  %5464 = vrsqrt.f32 %v3697_v30  ;;  %4899 = vmatprep.mubr.msk.bf16.mxu1 %vm641_vm1, %v3777_v7 }
0x10ac   : > { %v5455_v26 = vpop.eup %5454  ;;  %v3700_v36 = vadd.f32 1e-05, %v3684_v47  ;;  %v3699_v55 = vadd.f32 1e-05, %v3683_v4 }
0x10ad   : > { %v5457_v19 = vpop.eup %5456  ;;  %v3764_v48 = vadd.f32 %v7156_v3, %v3744_v53  ;;  %v3726_v9 = vmul.f32 %v5455_v26, %v7062_v54 }
0x10ae   : > { %v3725_v11 = vmul.f32 %v5457_v19, %v7067_v61  ;;  %5466 = vrsqrt.f32 %v3700_v36 }
0x10af   : > { %5468 = vrsqrt.f32 %v3699_v55  ;;  %v3778_v10 = vpack.c.bf16 %v3764_v48, %v3763_v57  ;;  %v3746_v22 = vmul.f32 %v7150_v0, %v3726_v9 }
0x10b0   : > { %v5459_v62 = vpop.eup %5458  ;;  %v3745_v21 = vmul.f32 %v7150_v0, %v3725_v11 }
0x10b1   : > { %v5461_v29 = vpop.eup %5460  ;;  %v3728_v37 = vmul.f32 %v5459_v62, %v7073_v1  ;;  %4900 = vmatmul.mubr.msk.bf16.vlgmr.msra.gmra.mrb[104].mxu1 %vm641_vm1, %v3778_v10  ;;  %v3766_v13 = vadd.f32 %v7156_v3, %v3746_v22 }
0x10b2   : > { %v3727_v56 = vmul.f32 %v5461_v29, %v7079_v24  ;;  %v3765_v54 = vadd.f32 %v7156_v3, %v3745_v21 }
0x10b3   : > { %v3748_v61 = vmul.f32 %v7150_v0, %v3728_v37 }
0x10b4   : > { %v5463_v50 = vpop.eup %5462  ;;  %v3779_v35 = vpack.c.bf16 %v3766_v13, %v3765_v54  ;;  %v3747_v44 = vmul.f32 %v7150_v0, %v3727_v56 }
0x10b5   : > { %v5465_v20 = vpop.eup %5464  ;;  %v3730_v27 = vmul.f32 %v5463_v50, %v7085_v15  ;;  %v3768_v5 = vadd.f32 %v7156_v3, %v3748_v61 }
0x10b6   : > { %v3729_v1 = vmul.f32 %v5465_v20, %v7091_v32  ;;  %4903 = vmatprep.mubr.msk.bf16.mxu1 %vm641_vm1, %v3779_v35  ;;  %v3767_v39 = vadd.f32 %v7156_v3, %v3747_v44 }
0x10b7   : > { %v3750_v24 = vmul.f32 %v7150_v0, %v3730_v27 }
0x10b8   : > { %v5467_v33 = vpop.eup %5466  ;;  %v3780_v30 = vpack.c.bf16 %v3768_v5, %v3767_v39  ;;  %v3749_v40 = vmul.f32 %v7150_v0, %v3729_v1 }
0x10b9   : > { %v5469_v51 = vpop.eup %5468  ;;  %v3732_v28 = vmul.f32 %v5467_v33, %v7097_v34  ;;  %v3770_v45 = vadd.f32 %v7156_v3, %v3750_v24  ;;  %v5157_v33 = vld [vmem:[%s7302_s8 + $0x18] sm:$0xff]  }
0x10ba   : > { %v3731_v15 = vmul.f32 %v5469_v51, %v7102_v2  ;;  %4904 = vmatmul.mubr.msk.bf16.gmra.mrb[108].mxu1 %vm641_vm1, %v3780_v30  ;;  %v3769_v32 = vadd.f32 %v7156_v3, %v3749_v40 }
0x10bb   : > { %v3752_v7 = vmul.f32 %v7150_v0, %v3732_v28 }
0x10bc   : > { %v3781_v47 = vpack.c.bf16 %v3770_v45, %v3769_v32  ;;  %v3751_v4 = vmul.f32 %v7150_v0, %v3731_v15 }
0x10bd   : > { %v3772_v53 = vadd.f32 %v7156_v3, %v3752_v7 }
0x10be   : > { %4907 = vmatprep.mubr.msk.bf16.mxu1 %vm641_vm1, %v3781_v47  ;;  %v3771_v26 = vadd.f32 %v7156_v3, %v3751_v4 }
0x10c0   : > { %v3782_v34 = vpack.c.bf16 %v3772_v53, %v3771_v26 }
0x10c2   : > { %4908 = vmatmul.mubr.msk.bf16.gmra.mrb[112].mxu1 %vm641_vm1, %v3782_v34 }
0x10cd   : > { %v3663_v36 = vpop.xlane.xlu0 %3662 }
0x10ce   : > { %v3685_v2 = vmul.f32 0.03125, %v3663_v36 }
0x10cf   : > { %v3666_v55 = vpop.xlane.xlu1 %3665 }
0x10d0   : > { %v3701_v19 = vadd.f32 1e-05, %v3685_v2  ;;  %v3686_v57 = vmul.f32 0.03125, %v3666_v55 }
0x10d1   : > { %v3669_v48 = vpop.xlane.xlu0 %3668 }
0x10d2   : > { %5470 = vrsqrt.f32 %v3701_v19  ;;  %v3702_v9 = vadd.f32 1e-05, %v3686_v57  ;;  %v3687_v11 = vmul.f32 0.03125, %v3669_v48 }
0x10d3   : > { %v3672_v10 = vpop.xlane.xlu1 %3671 }
0x10d4   : > { %5472 = vrsqrt.f32 %v3702_v9  ;;  %v3703_v22 = vadd.f32 1e-05, %v3687_v11  ;;  %v3688_v62 = vmul.f32 0.03125, %v3672_v10 }
0x10d6   : > { %5474 = vrsqrt.f32 %v3703_v22  ;;  %v3704_v21 = vadd.f32 1e-05, %v3688_v62 }
0x10d8   : > { %5476 = vrsqrt.f32 %v3704_v21 }
0x10dc   : > { %v5471_v29 = vpop.eup %5470 }
0x10dd   : > { %v3733_v37 = vmul.f32 %v5471_v29, %v7119_v60 }
0x10de   : > { %v5473_v13 = vpop.eup %5472 }
0x10df   : > { %v3734_v56 = vmul.f32 %v5473_v13, %v7122_v12  ;;  %v3753_v54 = vmul.f32 %v7150_v0, %v3733_v37 }
0x10e0   : > { %v5475_v61 = vpop.eup %5474 }
0x10e1   : > { %v3735_v50 = vmul.f32 %v5475_v61, %v7127_v52  ;;  %v3754_v35 = vmul.f32 %v7150_v0, %v3734_v56  ;;  %v3773_v27 = vadd.f32 %v7156_v3, %v3753_v54 }
0x10e2   : > { %v5477_v44 = vpop.eup %5476 }
0x10e3   : > { %v3736_v20 = vmul.f32 %v5477_v44, %v7133_v58  ;;  %v3774_v5 = vadd.f32 %v7156_v3, %v3754_v35  ;;  %v3755_v1 = vmul.f32 %v7150_v0, %v3735_v50  ;;  %v5156_v58 = vld [vmem:[%s7302_s8 + $0x10] sm:$0xff]  }
0x10e4   : > { %4919 = vmatprep.subr.bf16.mxu0 %v5156_v58 }
0x10e5   : > { %v3783_v60 = vpack.c.bf16 %v3774_v5, %v3773_v27  ;;  %v3756_v39 = vmul.f32 %v7150_v0, %v3736_v20  ;;  %v3775_v12 = vadd.f32 %v7156_v3, %v3755_v1  ;;  %4920 = vmatpush3.bf16.msra.mxu0 %v5156_v58  ;;  %v7221_v0 = vld [vmem:[%s7303_s9 + $0x8] sm:$0x3] }
0x10e6   : > { %4921 = vmatprep.subr.bf16.mxu0 %v5157_v33 }
0x10e7   : > { %4911 = vmatprep.mubr.msk.bf16.mxu1 %vm641_vm1, %v3783_v60  ;;  %v3776_v52 = vadd.f32 %v7156_v3, %v3756_v39  ;;  %v7422_v3 = vsub.s32 0, %v7405_v18 }
0x10e9   : > { %v3784_v24 = vpack.c.bf16 %v3776_v52, %v3775_v12  ;;  %4922 = vmatpush3.bf16.msra.mxu0 %v5157_v33  ;;  %v3792_v30 = vrot.slane %v7221_v0, %v7422_v3 }
0x10eb   : > { %4912 = vmatmul.mubr.msk.bf16.gmra.mrb[116].mxu1 %vm641_vm1, %v3784_v24 }
0x1184   : > { %v4901_v40 = vpop.f32.mrb[104].mxu1 }
0x1185   : > { %v3872_v51 = vadd.f32 %v4901_v40, %v3792_v30  ;;  %v3863_v28 = vpop.f32.mrb[105].mxu1 }
0x1186   : > { %v3864_v45 = vadd.f32 %v3863_v28, %v3792_v30  ;;  %v4902_v15 = vpop.f32.mrb[106].mxu1 }
0x1187   : > { %v3875_v32 = vadd.f32 %v4902_v15, %v3792_v30  ;;  %v3866_v7 = vpop.f32.mrb[107].mxu1  ;;  %v3928_v4 = vmax.f32 %v3872_v51, 0.0 }
0x1188   : > { %v3867_v47 = vadd.f32 %v3866_v7, %v3792_v30  ;;  %v3926_v26 = vmax.f32 %v3864_v45, 0.0 }
0x1189   : > { %v3929_v53 = vmax.f32 %v3875_v32, 0.0 }
0x118a   : > { %v3927_v34 = vmax.f32 %v3867_v47, 0.0 }
0x118b   : > { %v3943_v36 = vpack.c.bf16 %v3929_v53, %v3928_v4 }
0x118c   : > { %v3942_v2 = vpack.c.bf16 %v3927_v34, %v3926_v26  ;;  %v7423_v34 = vsub.s32 1, %v7405_v18 }
0x118d   : > { %v4905_v55 = vpop.f32.mrb[108].mxu1 }
0x118e   : > { %v3888_v19 = vadd.f32 %v4905_v55, %v3792_v30  ;;  %v3879_v57 = vpop.f32.mrb[109].mxu1  ;;  %4923 = vmatprep.mubr.msk.bf16.mxu0 %vm3986_vm4, %v3942_v2 }
0x118f   : > { %v3880_v48 = vadd.f32 %v3879_v57, %v3792_v30  ;;  %v4906_v9 = vpop.f32.mrb[110].mxu1  ;;  %4924 = vmatmul.mubr.msk.bf16.vlgmr.msra.gmra.mrb[96].mxu0 %vm3986_vm4, %v3943_v36  ;;  %v3961_v36 = vrot.slane %v7221_v0, %v7423_v34 }
0x1190   : > { %v3891_v11 = vadd.f32 %v4906_v9, %v3792_v30  ;;  %v3882_v10 = vpop.f32.mrb[111].mxu1  ;;  %v3932_v62 = vmax.f32 %v3888_v19, 0.0 }
0x1191   : > { %v3883_v22 = vadd.f32 %v3882_v10, %v3792_v30  ;;  %v3930_v29 = vmax.f32 %v3880_v48, 0.0 }
0x1192   : > { %v3933_v21 = vmax.f32 %v3891_v11, 0.0 }
0x1193   : > { %v3931_v37 = vmax.f32 %v3883_v22, 0.0 }
0x1194   : > { %v3945_v13 = vpack.c.bf16 %v3933_v21, %v3932_v62 }
0x1195   : > { %v3944_v56 = vpack.c.bf16 %v3931_v37, %v3930_v29  ;;  %v4909_v54 = vpop.f32.mrb[112].mxu1 }
0x1196   : > { %v3904_v61 = vadd.f32 %v4909_v54, %v3792_v30  ;;  %v3895_v50 = vpop.f32.mrb[113].mxu1 }
0x1197   : > { %v3896_v35 = vadd.f32 %v3895_v50, %v3792_v30  ;;  %v4910_v44 = vpop.f32.mrb[114].mxu1  ;;  %4927 = vmatprep.mubr.msk.bf16.mxu0 %vm3986_vm4, %v3944_v56 }
0x1198   : > { %v3907_v20 = vadd.f32 %v4910_v44, %v3792_v30  ;;  %v3898_v27 = vpop.f32.mrb[115].mxu1  ;;  %4928 = vmatmul.mubr.msk.bf16.gmra.mrb[100].mxu0 %vm3986_vm4, %v3945_v13  ;;  %v3936_v1 = vmax.f32 %v3904_v61, 0.0 }
0x1199   : > { %v3899_v5 = vadd.f32 %v3898_v27, %v3792_v30  ;;  %v3934_v39 = vmax.f32 %v3896_v35, 0.0 }
0x119a   : > { %v3937_v60 = vmax.f32 %v3907_v20, 0.0 }
0x119b   : > { %v3935_v12 = vmax.f32 %v3899_v5, 0.0 }
0x119c   : > { %v3947_v52 = vpack.c.bf16 %v3937_v60, %v3936_v1 }
0x119d   : > { %v3946_v24 = vpack.c.bf16 %v3935_v12, %v3934_v39 }
0x119f   : > { %4931 = vmatprep.mubr.msk.bf16.mxu0 %vm3986_vm4, %v3946_v24 }
0x11a0   : > { %4932 = vmatmul.mubr.msk.bf16.gmra.mrb[104].mxu0 %vm3986_vm4, %v3947_v52 }
0x11be   : > { %v4913_v58 = vpop.f32.mrb[116].mxu1 }
0x11bf   : > { %v3920_v33 = vadd.f32 %v4913_v58, %v3792_v30  ;;  %v3911_v3 = vpop.f32.mrb[117].mxu1 }
0x11c0   : > { %v3912_v40 = vadd.f32 %v3911_v3, %v3792_v30  ;;  %v4914_v51 = vpop.f32.mrb[118].mxu1 }
0x11c1   : > { %v3923_v28 = vadd.f32 %v4914_v51, %v3792_v30  ;;  %v3914_v45 = vpop.f32.mrb[119].mxu1  ;;  %v3940_v32 = vmax.f32 %v3920_v33, 0.0 }
0x11c2   : > { %v3915_v15 = vadd.f32 %v3914_v45, %v3792_v30  ;;  %v3938_v47 = vmax.f32 %v3912_v40, 0.0 }
0x11c3   : > { %v3941_v7 = vmax.f32 %v3923_v28, 0.0 }
0x11c4   : > { %v3939_v4 = vmax.f32 %v3915_v15, 0.0 }
0x11c5   : > { %v3949_v53 = vpack.c.bf16 %v3941_v7, %v3940_v32 }
0x11c6   : > { %v3948_v26 = vpack.c.bf16 %v3939_v4, %v3938_v47 }
0x11c8   : > { %4935 = vmatprep.mubr.msk.bf16.mxu0 %vm3986_vm4, %v3948_v26 }
0x11c9   : > { %4936 = vmatmul.mubr.msk.bf16.gmra.mrb[108].mxu0 %vm3986_vm4, %v3949_v53 }
0x1262   : > { %v4925_v2 = vpop.f32.mrb[96].mxu0 }
0x1263   : > { %v4054_v55 = vadd.f32 %v4925_v2, %v3961_v36  ;;  %v4045_v19 = vpop.f32.mrb[97].mxu0 }
0x1264   : > { %v4046_v30 = vadd.f32 %v4045_v19, %v3961_v36  ;;  %v4926_v57 = vpop.f32.mrb[98].mxu0 }
0x1265   : > { %v4110_v48 = vadd.f32 %v4054_v55, %v6951_v46  ;;  %v4057_v18 = vadd.f32 %v4926_v57, %v3961_v36  ;;  %v4048_v9 = vpop.f32.mrb[99].mxu0 }
0x1266   : > { %v4108_v0 = vadd.f32 %v4046_v30, %v6947_v63  ;;  %v4049_v11 = vadd.f32 %v4048_v9, %v3961_v36 }
0x1267   : > { %4126 = vst.msk [vmem:[%s7241_s17 + $0x10] sm:$0xff] %vm641_vm1, %v4110_v48  ;;  %v4111_v10 = vadd.f32 %v4057_v18, %v6962_v17 }
0x1268   : > { %4124 = vst.msk [vmem:[%s7241_s17] sm:$0xff] %vm641_vm1, %v4108_v0  ;;  %v4109_v22 = vadd.f32 %v4049_v11, %v6955_v31 }
0x1269   : > { %4127 = vst.msk [vmem:[%s7241_s17 + $0x18] sm:$0xff] %vm641_vm1, %v4111_v10 }
0x126a   : > { %4125 = vst.msk [vmem:[%s7241_s17 + $0x8] sm:$0xff] %vm641_vm1, %v4109_v22 }
0x126b   : > { %v4929_v46 = vpop.f32.mrb[100].mxu0 }
0x126c   : > { %v4070_v62 = vadd.f32 %v4929_v46, %v3961_v36  ;;  %v4061_v63 = vpop.f32.mrb[101].mxu0 }
0x126d   : > { %v4062_v21 = vadd.f32 %v4061_v63, %v3961_v36  ;;  %v4930_v29 = vpop.f32.mrb[102].mxu0 }
0x126e   : > { %v4114_v37 = vadd.f32 %v4070_v62, %v6984_v25  ;;  %v4073_v13 = vadd.f32 %v4930_v29, %v3961_v36  ;;  %v4064_v17 = vpop.f32.mrb[103].mxu0 }
0x126f   : > { %v4112_v56 = vadd.f32 %v4062_v21, %v6971_v59  ;;  %v4065_v54 = vadd.f32 %v4064_v17, %v3961_v36 }
0x1270   : > { %4130 = vst.msk [vmem:[%s7241_s17 + $0x30] sm:$0xff] %vm641_vm1, %v4114_v37  ;;  %v4115_v31 = vadd.f32 %v4073_v13, %v6979_v16 }
0x1271   : > { %4128 = vst.msk [vmem:[%s7241_s17 + $0x20] sm:$0xff] %vm641_vm1, %v4112_v56  ;;  %v4113_v61 = vadd.f32 %v4065_v54, %v6974_v6 }
0x1272   : > { %4131 = vst.msk [vmem:[%s7241_s17 + $0x38] sm:$0xff] %vm641_vm1, %v4115_v31 }
0x1273   : > { %4129 = vst.msk [vmem:[%s7241_s17 + $0x28] sm:$0xff] %vm641_vm1, %v4113_v61  ;;  %v4933_v25 = vpop.f32.mrb[104].mxu0 }
0x1274   : > { %v4086_v50 = vadd.f32 %v4933_v25, %v3961_v36  ;;  %v4077_v59 = vpop.f32.mrb[105].mxu0 }
0x1275   : > { %v4078_v35 = vadd.f32 %v4077_v59, %v3961_v36  ;;  %v4934_v44 = vpop.f32.mrb[106].mxu0 }
0x1276   : > { %v4118_v20 = vadd.f32 %v4086_v50, %v7008_v41  ;;  %v4089_v27 = vadd.f32 %v4934_v44, %v3961_v36  ;;  %v4080_v16 = vpop.f32.mrb[107].mxu0 }
0x1277   : > { %v4116_v5 = vadd.f32 %v4078_v35, %v6995_v23  ;;  %v4081_v1 = vadd.f32 %v4080_v16, %v3961_v36 }
0x1278   : > { %4134 = vst.msk [vmem:[%s7241_s17 + $0x50] sm:$0xff] %vm641_vm1, %v4118_v20  ;;  %v4119_v6 = vadd.f32 %v4089_v27, %v7003_v42 }
0x1279   : > { %4132 = vst.msk [vmem:[%s7241_s17 + $0x40] sm:$0xff] %vm641_vm1, %v4116_v5  ;;  %v4117_v60 = vadd.f32 %v4081_v1, %v6998_v38 }
0x127a   : > { %4135 = vst.msk [vmem:[%s7241_s17 + $0x58] sm:$0xff] %vm641_vm1, %v4119_v6 }
0x127b   : > { %4133 = vst.msk [vmem:[%s7241_s17 + $0x48] sm:$0xff] %vm641_vm1, %v4117_v60 }
0x129c   : > { %v4937_v41 = vpop.f32.mrb[108].mxu0 }
0x129d   : > { %v4102_v39 = vadd.f32 %v4937_v41, %v3961_v36  ;;  %v4093_v23 = vpop.f32.mrb[109].mxu0 }
0x129e   : > { %v4094_v12 = vadd.f32 %v4093_v23, %v3961_v36  ;;  %v4938_v52 = vpop.f32.mrb[110].mxu0 }
0x129f   : > { %v4122_v24 = vadd.f32 %v4102_v39, %v7024_v49  ;;  %v4105_v58 = vadd.f32 %v4938_v52, %v3961_v36  ;;  %v4096_v42 = vpop.f32.mrb[111].mxu0 }
0x12a0   : > { %v4120_v33 = vadd.f32 %v4094_v12, %v7020_v8  ;;  %v4097_v3 = vadd.f32 %v4096_v42, %v3961_v36 }
0x12a1   : > { %4138 = vst.msk [vmem:[%s7241_s17 + $0x70] sm:$0xff] %vm641_vm1, %v4122_v24  ;;  %v4123_v38 = vadd.f32 %v4105_v58, %v7032_v14 }
0x12a2   : > { %4136 = vst.msk [vmem:[%s7241_s17 + $0x60] sm:$0xff] %vm641_vm1, %v4120_v33  ;;  %v4121_v40 = vadd.f32 %v4097_v3, %v7027_v43 }
0x12a3   : > { %4139 = vst.msk [vmem:[%s7241_s17 + $0x78] sm:$0xff] %vm641_vm1, %v4123_v38 }
0x12a4   : > { %4137 = vst.msk [vmem:[%s7241_s17 + $0x68] sm:$0xff] %vm641_vm1, %v4121_v40 }
0x12a5 PF: > { %s20_s13 = sadd.s32 1, %s5485_s13  }
0x12a6   : > { %p17_p4 = scmp.ge.s32.totalorder %s20_s13, 4  }
0x12a8   :  { %19 = sbr.rel (!%p17_p4) target bundleno = 1 (0x1), region = 93 }

// kernel: vc_layer_forward.3
= control target key start
LH: loop header
LB: loop body
LE: loop exit
PB: predicated region body
PF: predicated region fallthrough
CT: control target
= control target key end

     0   :  { %s6697_s21 = smov 0   ;;  %s8528_s0 = inlined_call_operand.vmem [shape: f32[4,160,16], index: 0, kind: input, shape index: {}]   ;;  %s8529_s1 = inlined_call_operand.vmem [shape: bf16[4,96,32], index: 1, kind: input, shape index: {}]   ;;  %s8530_s2 = inlined_call_operand.vmem [shape: bf16[27,16,16], index: 2, kind: input, shape index: {}]   ;;  %s8531_s3 = inlined_call_operand.vmem [shape: bf16[16,16], index: 3, kind: input, shape index: {}]   ;;  %s8532_s4 = inlined_call_operand.vmem [shape: bf16[32,16], index: 4, kind: input, shape index: {}]   ;;  %s8533_s5 = inlined_call_operand.vmem [shape: f32[4,16], index: 5, kind: input, shape index: {}]   ;;  %s8534_s6 = inlined_call_operand.vmem [shape: f32[4,96,16], index: 6, kind: output, shape index: {}]  }
   0x1 LB: > { %s5385_s22 = sadd.s32 4294967295, %s6659_s21   ;;  %p5389_p0 = scmp.ge.s32.totalorder %s6659_s21, 1  ;;  %s6659_s21 = sphi %s6697_s21, %s16_s21  }
   0x2   : > { %p222_p1 = scmp.lt.s32.totalorder %s6659_s21, 5 }
   0x4   : > { %p223_p2 = pnand %p5389_p0, %p222_p1 }
   0x5   : > { %v6708_v0 = vld [vmem:[%s8530_s2 + $0x18] sm:$0xff] (!%p223_p2)   ;;  %p257_p3 = scmp.lt.s32.totalorder (!%p223_p2), %s5385_s22, 3  ;;  %v6608_v1 = vld [vmem:[%s8530_s2 + $0x8] sm:$0xff] (!%p223_p2)   ;;  %v6609_v2 = vld [vmem:[%s8530_s2 + $0x20] sm:$0xff] (!%p223_p2)   ;;  %vm8535_vm0 = vcmask (!%p223_p2), 130048  }
   0x6   : > { %226 = sbr.rel (%p223_p2) target bundleno = 1878 (0x756), region = 44  ;;  %5903 = vmatprep.subr.bf16.mxu0 (!%p223_p2), %v6708_v0  ;;  %5861 = vmatprep.subr.bf16.mxu1 (!%p223_p2), %v6608_v1  ;;  %v6611_v3 = vld [vmem:[%s8530_s2] sm:$0xff] (!%p223_p2)   ;;  %v6610_v19 = vld [vmem:[%s8530_s2 + $0x28] sm:$0xff] (!%p223_p2)   ;;  %v6613_v21 = vld [vmem:[%s8530_s2 + $0x10] sm:$0xff] (!%p223_p2)  }
   0x7   : > { %5904 = vmatpush3.bf16.msra.mxu0 (!%p223_p2), %v6708_v0  ;;  %5862 = vmatpush3.bf16.msra.mxu1 (!%p223_p2), %v6608_v1  ;;  %v6612_v40 = vld [vmem:[%s8530_s2 + $0x30] sm:$0xff] (!%p223_p2)  }
   0x8   : > { %5917 = vmatprep.subr.bf16.mxu0 (!%p223_p2), %v6609_v2  ;;  %5875 = vmatprep.subr.bf16.mxu1 (!%p223_p2), %v6611_v3 }
   0xd   : > { %s8920_s22 = smov (!%p257_p3, %s5385_s22), 3 }
   0xe   : > { %s6571_s29 = smul.u32 160, %s8920_s22 }
   0xf   : > { %s6572_s25 = smul.u32 48, %s8920_s22 }
  0x10   : > { %s6727_s10 = scalar_lea.vmem %s8528_s0, %s6571_s29 }
  0x11   : > { %v538_v4 = vld [vmem:[%s6727_s10 + $0x8] sm:$0xff]  ;;  %v539_v5 = vld [vmem:[%s6727_s10 + $0x10] sm:$0xff]  ;;  %v6732_v6 = vld [vmem:[%s6727_s10 + $0x1e] sm:$0xff]  ;;  %s266_s28 = scalar_lea.vmem %s8529_s1, %s6572_s25 }
  0x12   : > { %v550_v7 = vpack.c.bf16 %v539_v5, %v538_v4  ;;  %v6735_v8 = vld [vmem:[%s6727_s10 + $0x26] sm:$0xff]  ;;  %v540_v9 = vld [vmem:[%s6727_s10 + $0x18] sm:$0xff]  ;;  %v6742_v13 = vld [vmem:[%s6727_s10 + $0x2e] sm:$0xff] }
  0x13   : > { %v541_v10 = vld [vmem:[%s6727_s10 + $0x20] sm:$0xff]  ;;  %v919_v11 = vpack.c.bf16 %v6735_v8, %v6732_v6  ;;  %v6745_v14 = vld [vmem:[%s6727_s10 + $0x36] sm:$0xff]  ;;  %v542_v15 = vld [vmem:[%s6727_s10 + $0x28] sm:$0xff]  ;;  %v532_v48 = vpack.c.bf16 %v6742_v13, %v6735_v8 }
  0x14   : > { %v551_v12 = vpack.c.bf16 %v541_v10, %v540_v9  ;;  %5863 = vmatprep.mubr.msk.bf16.mxu1 %vm8535_vm0, %v550_v7  ;;  %v920_v16 = vpack.c.bf16 %v6745_v14, %v6742_v13  ;;  %v543_v17 = vld [vmem:[%s6727_s10 + $0x30] sm:$0xff]  ;;  %v1057_v18 = vpack.c.bf16 %v542_v15, %v541_v10  ;;  %v544_v22 = vld [vmem:[%s6727_s10 + $0x38] sm:$0xff]  ;;  %v545_v23 = vld [vmem:[%s6727_s10 + $0x40] sm:$0xff] }
  0x15   : > { %5905 = vmatprep.mubr.msk.bf16.mxu0 %vm8535_vm0, %v919_v11  ;;  %v552_v20 = vpack.c.bf16 %v543_v17, %v542_v15  ;;  %v546_v24 = vld [vmem:[%s6727_s10 + $0x48] sm:$0xff]  ;;  %v547_v25 = vld [vmem:[%s6727_s10 + $0x50] sm:$0xff]  ;;  %v6775_v29 = vpack.c.bf16 %v545_v23, %v544_v22  ;;  %v548_v31 = vld [vmem:[%s6727_s10 + $0x58] sm:$0xff]  ;;  %v1058_v33 = vpack.c.bf16 %v544_v22, %v543_v17 }
  0x16   : > { %5864 = vmatmul.mubr.msk.bf16.vlgmr.msra.gmra.mrb[0].mxu1 %vm8535_vm0, %v551_v12  ;;  %5906 = vmatmul.mubr.msk.bf16.vlgmr.msra.gmra.mrb[0].mxu0 %vm8535_vm0, %v920_v16  ;;  %v6767_v26 = vld [vmem:[%s6727_s10 + $0x68] sm:$0xff]  ;;  %v6770_v27 = vld [vmem:[%s6727_s10 + $0x70] sm:$0xff]  ;;  %v6777_v30 = vpack.c.bf16 %v547_v25, %v546_v24  ;;  %v549_v32 = vld [vmem:[%s6727_s10 + $0x60] sm:$0xff]  ;;  %v1059_v37 = vpack.c.bf16 %v546_v24, %v545_v23  ;;  %v1060_v44 = vpack.c.bf16 %v548_v31, %v547_v25 }
  0x17   : > { %5876 = vmatpush3.bf16.msra.mxu1 %v6611_v3  ;;  %5918 = vmatpush3.bf16.msra.mxu0 %v6609_v2  ;;  %v1474_v28 = vpack.c.bf16 %v6770_v27, %v6767_v26  ;;  %v518_v34 = vld [vmem:[%s6727_s10 + $0x6] sm:$0xff]  ;;  %v6790_v36 = vld [vmem:[%s6727_s10 + $0x72] sm:$0xff]  ;;  %v6798_v41 = vpack.c.bf16 %v549_v32, %v548_v31  ;;  %v1061_v45 = vpack.c.bf16 %v6767_v26, %v549_v32  ;;  %v6818_v51 = vld [vmem:[%s6727_s10 + $0x3e] sm:$0xff] }
  0x18   : > { %5867 = vmatprep.mubr.msk.bf16.mxu1 %vm8535_vm0, %v552_v20  ;;  %5919 = vmatprep.mubr.msk.bf16.mxu0 %vm8535_vm0, %v1057_v18  ;;  %v6787_v35 = vld [vmem:[%s6727_s10 + $0x6a] sm:$0xff]  ;;  %v520_v43 = vld [vmem:[%s6727_s10 + $0x16] sm:$0xff]  ;;  %v1183_v49 = vld [vmem:[%s6727_s10 + $0x22] sm:$0xff]  ;;  %v533_v56 = vpack.c.bf16 %v6818_v51, %v6745_v14 }
  0x19   : > { %5931 = vmatprep.subr.bf16.mxu0 %v6610_v19  ;;  %5889 = vmatprep.subr.bf16.mxu1 %v6613_v21  ;;  %v519_v38 = vld [vmem:[%s6727_s10 + $0xe] sm:$0xff]  ;;  %v1612_v39 = vpack.c.bf16 %v6790_v36, %v6787_v35  ;;  %v531_v46 = vpack.c.bf16 %v6732_v6, %v520_v43  ;;  %v6809_v47 = vld [vmem:[%s6727_s10 + $0x78] sm:$0xff]  ;;  %v6822_v52 = vld [vmem:[%s6727_s10 + $0x46] sm:$0xff] }
  0x1a   : > { %v530_v42 = vpack.c.bf16 %v519_v38, %v518_v34  ;;  %v1184_v50 = vld [vmem:[%s6727_s10 + $0x2a] sm:$0xff]  ;;  %v1062_v54 = vpack.c.bf16 %v6809_v47, %v6770_v27  ;;  %v1185_v58 = vld [vmem:[%s6727_s10 + $0x32] sm:$0xff]  ;;  %v1186_v59 = vld [vmem:[%s6727_s10 + $0x3a] sm:$0xff] }
  0x1b   : > { %v6825_v53 = vld [vmem:[%s6727_s10 + $0x4e] sm:$0xff]  ;;  %v1195_v55 = vpack.c.bf16 %v1184_v50, %v1183_v49  ;;  %v1187_v60 = vld [vmem:[%s6727_s10 + $0x42] sm:$0xff]  ;;  %v1196_v62 = vpack.c.bf16 %v1186_v59, %v1185_v58  ;;  %v528_v63 = vld [vmem:[%s6727_s10 + $0x56] sm:$0xff]  ;;  %v783_v15 = vpack.c.bf16 %v1185_v58, %v1184_v50 }
  0x1c   : > { %v534_v57 = vpack.c.bf16 %v6825_v53, %v6822_v52  ;;  %v1188_v61 = vld [vmem:[%s6727_s10 + $0x4a] sm:$0xff]  ;;  %v529_v1 = vld [vmem:[%s6727_s10 + $0x5e] sm:$0xff]  ;;  %v770_v4 = vld [vmem:[%s6727_s10 + $0x12] sm:$0xff]  ;;  %v784_v18 = vpack.c.bf16 %v1187_v60, %v1186_v59 }
  0x1d   : > { %v1197_v2 = vpack.c.bf16 %v1188_v61, %v1187_v60  ;;  %v769_v3 = vld [vmem:[%s6727_s10 + $0xa] sm:$0xff]  ;;  %v6614_v5 = vld [vmem:[%s8530_s2 + $0x38] sm:$0xff]   ;;  %v535_v6 = vpack.c.bf16 %v529_v1, %v528_v63  ;;  %v1191_v10 = vld [vmem:[%s6727_s10 + $0x62] sm:$0xff] }
  0x1e   : > { %5868 = vmatmul.mubr.msk.bf16.gmra.mrb[4].mxu1 %vm8535_vm0, %v6775_v29  ;;  %v781_v7 = vpack.c.bf16 %v770_v4, %v769_v3  ;;  %v1189_v8 = vld [vmem:[%s6727_s10 + $0x52] sm:$0xff]  ;;  %v1190_v9 = vld [vmem:[%s6727_s10 + $0x5a] sm:$0xff]  ;;  %v1199_v13 = vpack.c.bf16 %v6787_v35, %v1191_v10  ;;  %v1327_v22 = vld [vmem:[%s6727_s10 + $0x66] sm:$0xff] }
  0x1f   : > { %5871 = vmatprep.mubr.msk.bf16.mxu1 %vm8535_vm0, %v6777_v30  ;;  %v1198_v11 = vpack.c.bf16 %v1190_v9, %v1189_v8  ;;  %v771_v12 = vld [vmem:[%s6727_s10 + $0x1a] sm:$0xff]  ;;  %v1328_v23 = vld [vmem:[%s6727_s10 + $0x6e] sm:$0xff]  ;;  %v923_v34 = vpack.c.bf16 %v1327_v22, %v529_v1 }
  0x20   : > { %v782_v14 = vpack.c.bf16 %v1183_v49, %v771_v12  ;;  %v1194_v16 = vld [vmem:[%s6727_s10 + $0x7a] sm:$0xff]  ;;  %v1336_v31 = vpack.c.bf16 %v1328_v23, %v1327_v22  ;;  %v1332_v38 = vld [vmem:[%s6727_s10 + $0x8e] sm:$0xff] }
  0x21   : > { %v1200_v17 = vpack.c.bf16 %v1194_v16, %v6790_v36  ;;  %v6615_v20 = vld [vmem:[%s8530_s2 + $0x40] sm:$0xff]   ;;  %v1329_v24 = vld [vmem:[%s6727_s10 + $0x76] sm:$0xff]  ;;  %v1607_v26 = vld [vmem:[%s6727_s10 + $0x8a] sm:$0xff] }
  0x22   : > { %5920 = vmatmul.mubr.msk.bf16.vlgmr.msra.gmra.mrb[0].mxu0 %vm8535_vm0, %v1058_v33  ;;  %v1330_v25 = vld [vmem:[%s6727_s10 + $0x7e] sm:$0xff]  ;;  %v922_v33 = vpack.c.bf16 %v528_v63, %v6825_v53  ;;  %v1608_v27 = vld [vmem:[%s6727_s10 + $0x92] sm:$0xff] }
  0x23   : > { %5932 = vmatpush3.bf16.msra.mxu0 %v6610_v19  ;;  %5923 = vmatprep.mubr.msk.bf16.mxu0 %vm8535_vm0, %v1059_v37  ;;  %v785_v19 = vpack.c.bf16 %v1189_v8, %v1188_v61  ;;  %v1337_v32 = vpack.c.bf16 %v1330_v25, %v1329_v24  ;;  %v1331_v37 = vld [vmem:[%s6727_s10 + $0x86] sm:$0xff] }
  0x24   : > { %5945 = vmatprep.subr.bf16.mxu0 %v6612_v40  ;;  %v1468_v43 = vld [vmem:[%s6727_s10 + $0x80] sm:$0xff] }
  0x26   : > { %5872 = vmatmul.mubr.msk.bf16.gmra.mrb[8].mxu1 %vm8535_vm0, %v6798_v41 }
  0x27   : > { %5877 = vmatprep.mubr.msk.bf16.mxu1 %vm8535_vm0, %v530_v42  ;;  %v924_v42 = vpack.c.bf16 %v1329_v24, %v1328_v23 }
  0x2a   : > { %5924 = vmatmul.mubr.msk.bf16.gmra.mrb[4].mxu0 %vm8535_vm0, %v1060_v44  ;;  %v1475_v44 = vpack.c.bf16 %v1468_v43, %v6809_v47 }
  0x2b   : > { %5927 = vmatprep.mubr.msk.bf16.mxu0 %vm8535_vm0, %v1061_v45  ;;  %v1470_v45 = vld [vmem:[%s6727_s10 + $0x90] sm:$0xff] }
  0x2e   : > { %5878 = vmatmul.mubr.msk.bf16.vlgmr.msra.gmra.mrb[0].mxu1 %vm8535_vm0, %v531_v46 }
  0x2f   : > { %5881 = vmatprep.mubr.msk.bf16.mxu1 %vm8535_vm0, %v532_v48  ;;  %5890 = vmatpush3.bf16.msra.mxu1 %v6613_v21  ;;  %v786_v21 = vpack.c.bf16 %v1191_v10, %v1190_v9 }
  0x30   : > { %6269 = vmatprep.subr.bf16.mxu1 %v6708_v0 }
  0x32   : > { %5928 = vmatmul.mubr.msk.bf16.gmra.mrb[8].mxu0 %vm8535_vm0, %v1062_v54 }
  0x33   : > { %5933 = vmatprep.mubr.msk.bf16.mxu0 %vm8535_vm0, %v1195_v55 }
  0x36   : > { %5882 = vmatmul.mubr.msk.bf16.gmra.mrb[4].mxu1 %vm8535_vm0, %v533_v56 }
  0x37   : > { %5885 = vmatprep.mubr.msk.bf16.mxu1 %vm8535_vm0, %v534_v57 }
  0x3a   : > { %5934 = vmatmul.mubr.msk.bf16.vlgmr.msra.gmra.mrb[0].mxu0 %vm8535_vm0, %v1196_v62 }
  0x3b   : > { %5946 = vmatpush3.bf16.msra.mxu0 %v6612_v40  ;;  %5937 = vmatprep.mubr.msk.bf16.mxu0 %vm8535_vm0, %v1197_v2  ;;  %v1338_v40 = vpack.c.bf16 %v1332_v38, %v1331_v37 }
  0x3c   : > { %5959 = vmatprep.subr.bf16.mxu0 %v6614_v5 }
  0x3e   : > { %5886 = vmatmul.mubr.msk.bf16.gmra.mrb[8].mxu1 %vm8535_vm0, %v535_v6 }
  0x3f   : > { %5891 = vmatprep.mubr.msk.bf16.mxu1 %vm8535_vm0, %v781_v7 }
  0x42   : > { %5938 = vmatmul.mubr.msk.bf16.gmra.mrb[4].mxu0 %vm8535_vm0, %v1198_v11 }
  0x43   : > { %5941 = vmatprep.mubr.msk.bf16.mxu0 %vm8535_vm0, %v1199_v13 }
  0x46   : > { %5892 = vmatmul.mubr.msk.bf16.vlgmr.msra.gmra.mrb[0].mxu1 %vm8535_vm0, %v782_v14 }
  0x47   : > { %5895 = vmatprep.mubr.msk.bf16.mxu1 %vm8535_vm0, %v783_v15  ;;  %6270 = vmatpush3.bf16.msra.mxu1 %v6708_v0  ;;  %v921_v0 = vpack.c.bf16 %v6822_v52, %v6818_v51  ;;  %v273_v51 = vlaneseq }
  0x49   : > { %v6928_v52 = vshrl.u32 %v273_v51, 7 }
  0x4a   : > { %5942 = vmatmul.mubr.msk.bf16.gmra.mrb[8].mxu0 %vm8535_vm0, %v1200_v17 }
  0x4b   : > { %5947 = vmatprep.mubr.msk.bf16.mxu0 %vm8535_vm0, %v533_v56  ;;  %v276_v35 = vadd.s32 16, %v6928_v52  ;;  %v277_v55 = vadd.s32 24, %v6928_v52  ;;  %v275_v59 = vadd.s32 8, %v6928_v52  ;;  %v280_v61 = vadd.s32 48, %v6928_v52 }
  0x4c   : > { %v278_v3 = vadd.s32 32, %v6928_v52  ;;  %v6962_v7 = vadd.s32 56, %v6928_v52  ;;  %v6976_v15 = vadd.s32 40, %v6928_v52  ;;  %v6989_v23 = vadd.s32 80, %v6928_v52 }
  0x4d   : > { %v6935_v53 = vmul.u32.u64.low 2863311531, %v276_v35  ;;  %v6936_v54 = vmul.u32.u64.high 2863311531, %v276_v35, %v6935_v53  ;;  %v6949_v62 = vmul.u32.u64.low 2863311531, %v277_v55  ;;  %v6950_v63 = vmul.u32.u64.high 2863311531, %v277_v55, %v6949_v62 }
  0x4e   : > { %5896 = vmatmul.mubr.msk.bf16.gmra.mrb[4].mxu1 %vm8535_vm0, %v784_v18  ;;  %v6952_v1 = vmul.u32.u64.low 2863311531, %v275_v59  ;;  %v6953_v2 = vmul.u32.u64.high 2863311531, %v275_v59, %v6952_v1  ;;  %v6970_v12 = vmul.u32.u64.low 2863311531, %v278_v3  ;;  %v6971_v13 = vmul.u32.u64.high 2863311531, %v278_v3, %v6970_v12 }
  0x4f   : > { %5899 = vmatprep.mubr.msk.bf16.mxu1 %vm8535_vm0, %v785_v19  ;;  %v314_v9 = vshrl.u32 %v6936_v54, 3  ;;  %v6992_v24 = vadd.s32 64, %v6928_v52 }
  0x50   : > { %v336_v37 = vshrl.u32 %v6971_v13, 3 }
  0x52   : > { %5948 = vmatmul.mubr.msk.bf16.vlgmr.msra.gmra.mrb[0].mxu0 %vm8535_vm0, %v534_v57  ;;  %v6942_v57 = vmul.u32.u64.low 2863311531, %v6928_v52  ;;  %v6943_v58 = vmul.u32.u64.high 2863311531, %v6928_v52, %v6942_v57 }
  0x53   : > { %5960 = vmatpush3.bf16.msra.mxu0 %v6614_v5  ;;  %5951 = vmatprep.mubr.msk.bf16.mxu0 %vm8535_vm0, %v535_v6  ;;  %v6958_v5 = vmul.u32.u64.low 2863311531, %v280_v61  ;;  %v6959_v6 = vmul.u32.u64.high 2863311531, %v280_v61, %v6958_v5 }
  0x54   : > { %5973 = vmatprep.subr.bf16.mxu0 %v6615_v20  ;;  %v292_v11 = vshrl.u32 %v6943_v58, 3  ;;  %v1737_v5 = vsub.s32 0, %v6928_v52 }
  0x55   : > { %v358_v25 = vshrl.u32 %v6959_v6, 3 }
  0x56   : > { %5900 = vmatmul.mubr.msk.bf16.gmra.mrb[8].mxu1 %vm8535_vm0, %v786_v21 }
  0x57   : > { %5909 = vmatprep.mubr.msk.bf16.mxu1 %vm8535_vm0, %v921_v0  ;;  %v6985_v0 = vmul.u32.u64.low 2863311531, %v6976_v15  ;;  %v6986_v22 = vmul.u32.u64.high 2863311531, %v6976_v15, %v6985_v0 }
  0x5a   : > { %5952 = vmatmul.mubr.msk.bf16.gmra.mrb[4].mxu0 %vm8535_vm0, %v1336_v31 }
  0x5b   : > { %5955 = vmatprep.mubr.msk.bf16.mxu0 %vm8535_vm0, %v1337_v32 }
  0x5e   : > { %5910 = vmatmul.mubr.msk.bf16.vlgmr.msra.gmra.mrb[4].mxu1 %vm8535_vm0, %v922_v33 }
  0x5f   : > { %5913 = vmatprep.mubr.msk.bf16.mxu1 %vm8535_vm0, %v923_v34 }
  0x62   : > { %5956 = vmatmul.mubr.msk.bf16.gmra.mrb[8].mxu0 %vm8535_vm0, %v1338_v40  ;;  %v6998_v38 = vmul.u32.u64.low 2863311531, %v6989_v23  ;;  %v6999_v40 = vmul.u32.u64.high 2863311531, %v6989_v23, %v6998_v38 }
  0x63   : > { %5961 = vmatprep.mubr.msk.bf16.mxu0 %vm8535_vm0, %v6775_v29  ;;  %v1469_v29 = vld [vmem:[%s6727_s10 + $0x88] sm:$0xff] }
  0x64   : > { %v1476_v46 = vpack.c.bf16 %v1470_v45, %v1469_v29  ;;  %v7007_v45 = vadd.s32 72, %v6928_v52 }
  0x66   : > { %5914 = vmatmul.mubr.msk.bf16.gmra.mrb[8].mxu1 %vm8535_vm0, %v924_v42  ;;  %v7002_v42 = vmul.u32.u64.low 2863311531, %v6992_v24  ;;  %v7003_v43 = vmul.u32.u64.high 2863311531, %v6992_v24, %v7002_v42  ;;  %v7014_v53 = vmul.u32.u64.low 2863311531, %v7007_v45  ;;  %v7015_v54 = vmul.u32.u64.high 2863311531, %v7007_v45, %v7014_v53 }
  0x67   : > { %v7115_v53 = vld [vmem:[%s8530_s2 + $0x48] sm:$0xff]  }
  0x68   : > { %v391_v0 = vshrl.u32 %v7015_v54, 3 }
  0x6a   : > { %5962 = vmatmul.mubr.msk.bf16.vlgmr.msra.gmra.mrb[0].mxu0 %vm8535_vm0, %v6777_v30  ;;  %v1606_v30 = vld [vmem:[%s6727_s10 + $0x82] sm:$0xff]  ;;  %v392_v42 = vmul.u32 12, %v391_v0 }
  0x6b   : > { %5974 = vmatpush3.bf16.msra.mxu0 %v6615_v20  ;;  %5965 = vmatprep.mubr.msk.bf16.mxu0 %vm8535_vm0, %v6798_v41  ;;  %v1613_v41 = vpack.c.bf16 %v1606_v30, %v1194_v16  ;;  %v6979_v16 = vmul.u32.u64.low 2863311531, %v6962_v7  ;;  %v6980_v17 = vmul.u32.u64.high 2863311531, %v6962_v7, %v6979_v16  ;;  %v293_v20 = vmul.u32 12, %v292_v11  ;;  %v514_v11 = vld [vmem:[%s8533_s5] sm:$0xf] }
  0x6d   : > { %v294_v33 = vsub.s32 %v6928_v52, %v293_v20  ;;  %v369_v29 = vshrl.u32 %v6980_v17, 3  ;;  %v6616_v20 = vld [vmem:[%s8530_s2 + $0x50] sm:$0xff]  }
  0x6e   : > { %5987 = vmatprep.subr.bf16.mxu1 %v6616_v20 }
  0x6f   : > { %vm418_vm3 = vcmp.ne.s32.totalorder %v294_v33, 0  ;;  %vm430_vm4 = vcmp.lt.s32.totalorder %v294_v33, 0  ;;  %5988 = vmatpush3.bf16.msra.mxu1 %v6616_v20 }
  0x70   : > { %vm442_vm8 = vmand %vm430_vm4, %vm418_vm3  ;;  %6001 = vmatprep.subr.bf16.mxu1 %v7115_v53 }
  0x72   : > { %5966 = vmatmul.mubr.msk.bf16.gmra.mrb[4].mxu0 %vm8535_vm0, %v1474_v28  ;;  %v1614_v28 = vpack.c.bf16 %v1608_v27, %v1607_v26  ;;  %v7010_v26 = vadd.s32 88, %v6928_v52 }
  0x73   : > { %5969 = vmatprep.mubr.msk.bf16.mxu0 %vm8535_vm0, %v1475_v44  ;;  %v359_v44 = vmul.u32 12, %v358_v25 }
  0x75   : > { %v360_v51 = vsub.s32 %v280_v61, %v359_v44  ;;  %v402_v61 = vshrl.u32 %v6999_v40, 3 }
  0x77   : > { %vm424_vm11 = vcmp.ne.s32.totalorder %v360_v51, 0  ;;  %vm436_vm12 = vcmp.lt.s32.totalorder %v360_v51, 0  ;;  %v460_v13 = vadd.s32 12, %v360_v51 }
  0x78   : > { %vm7047_vm3 = vmand %vm436_vm12, %vm424_vm11 }
  0x7a   : > { %5970 = vmatmul.mubr.msk.bf16.gmra.mrb[8].mxu0 %vm8535_vm0, %v1476_v46 }
  0x7b   : > { %5975 = vmatprep.mubr.msk.bf16.mxu0 %vm8535_vm0, %v784_v18  ;;  %v315_v18 = vmul.u32 12, %v314_v9 }
  0x7d   : > { %v316_v31 = vsub.s32 %v276_v35, %v315_v18  ;;  %v370_v35 = vmul.u32 12, %v369_v29  ;;  %v403_v18 = vmul.u32 12, %v402_v61 }
  0x7f   : > { %vm420_vm1 = vcmp.ne.s32.totalorder %v316_v31, 0  ;;  %vm432_vm2 = vcmp.lt.s32.totalorder %v316_v31, 0  ;;  %v456_v27 = vadd.s32 12, %v316_v31 }
  0x80   : > { %vm444_vm5 = vmand %vm432_vm2, %vm420_vm1 }
  0x81   : > { %v7024_v1 = vsel %vm444_vm5, %v456_v27, %v316_v31  ;;  %v7070_v31 = vsel %vm7047_vm3, %v460_v13, %v360_v51 }
  0x82   : > { %5976 = vmatmul.mubr.msk.bf16.vlgmr.msra.gmra.mrb[0].mxu0 %vm8535_vm0, %v785_v19  ;;  %v325_v19 = vshrl.u32 %v6950_v63, 3  ;;  %v380_v63 = vshrl.u32 %v7003_v43, 3  ;;  %vm480_vm2 = vcmp.ge.s32.totalorder %v7024_v1, 2 }
  0x83   : > { %5979 = vmatprep.mubr.msk.bf16.mxu0 %vm8535_vm0, %v786_v21  ;;  %v303_v21 = vshrl.u32 %v6953_v2, 3  ;;  %v371_v2 = vsub.s32 %v6962_v7, %v370_v35  ;;  %v393_v35 = vsub.s32 %v7007_v45, %v392_v42 }
  0x84   : > { %v326_v32 = vmul.u32 12, %v325_v19  ;;  %v381_v19 = vmul.u32 12, %v380_v63 }
  0x85   : > { %v304_v34 = vmul.u32 12, %v303_v21  ;;  %vm425_vm4 = vcmp.ne.s32.totalorder %v371_v2, 0  ;;  %vm437_vm5 = vcmp.lt.s32.totalorder %v371_v2, 0  ;;  %v463_v16 = vadd.s32 12, %v393_v35 }
  0x86   : > { %v327_v46 = vsub.s32 %v277_v55, %v326_v32  ;;  %v454_v55 = vadd.s32 12, %v294_v33  ;;  %v461_v32 = vadd.s32 12, %v371_v2  ;;  %v382_v38 = vsub.s32 %v6992_v24, %v381_v19 }
  0x87   : > { %v305_v30 = vsub.s32 %v275_v59, %v304_v34  ;;  %v7019_v58 = vmul.u32.u64.low 2863311531, %v7010_v26  ;;  %v7020_v59 = vmul.u32.u64.high 2863311531, %v7010_v26, %v7019_v58  ;;  %v8584_v34 = vmov 0 }
  0x88   : > { %vm421_vm6 = vcmp.ne.s32.totalorder %v327_v46, 0  ;;  %vm433_vm7 = vcmp.lt.s32.totalorder %v327_v46, 0  ;;  %v7028_v6 = vsel %vm442_vm8, %v454_v55, %v294_v33  ;;  %v457_v9 = vadd.s32 12, %v327_v46 }
  0x89   : > { %vm419_vm9 = vcmp.ne.s32.totalorder %v305_v30, 0  ;;  %vm431_vm10 = vcmp.lt.s32.totalorder %v305_v30, 0  ;;  %vm7032_vm13 = vmand %vm433_vm7, %vm421_vm6  ;;  %v455_v7 = vadd.s32 12, %v305_v30  ;;  %vm492_vm6 = vcmp.lt.s32.totalorder %v7024_v1, 10 }
  0x8a   : > { %5980 = vmatmul.mubr.msk.bf16.gmra.mrb[4].mxu0 %vm8535_vm0, %v1612_v39  ;;  %vm7040_vm14 = vmand %vm431_vm10, %vm419_vm9  ;;  %vm478_vm7 = vcmp.ge.s32.totalorder %v7028_v6, 2  ;;  %v413_v33 = vshrl.u32 %v7020_v59, 3  ;;  %vm490_vm12 = vcmp.lt.s32.totalorder %v7028_v6, 10 }
  0x8b   : > { %5983 = vmatprep.mubr.msk.bf16.mxu0 %vm8535_vm0, %v1613_v41  ;;  %v337_v41 = vmul.u32 12, %v336_v37  ;;  %v467_v25 = vsel %vm7040_vm14, %v455_v7, %v305_v30  ;;  %vm7073_vm9 = vmand %vm437_vm5, %vm425_vm4  ;;  %v404_v37 = vsub.s32 %v6989_v23, %v403_v18  ;;  %vm439_vm4 = vcmp.lt.s32.totalorder %v393_v35, 0 }
  0x8c   : > { %v7089_v23 = vsel %vm7073_vm9, %v461_v32, %v371_v2  ;;  %v414_v30 = vmul.u32 12, %v413_v33  ;;  %vm7103_vm9 = vmand %vm480_vm2, %vm492_vm6  ;;  %vm427_vm6 = vcmp.ne.s32.totalorder %v393_v35, 0 }
  0x8d   : > { %v338_v57 = vsub.s32 %v278_v3, %v337_v41  ;;  %vm440_vm3 = vcmp.lt.s32.totalorder %v404_v37, 0  ;;  %vm7121_vm2 = vmand %vm478_vm7, %vm490_vm12 }
  0x8e   : > { %v7142_v61 = vsub.s32 %v7010_v26, %v414_v30  ;;  %v8591_v30 = vmov 0 }
  0x8f   : > { %vm422_vm15 = vcmp.ne.s32.totalorder %v338_v57, 0  ;;  %vm434_vm1 = vcmp.lt.s32.totalorder %v338_v57, 0  ;;  %v458_v21 = vadd.s32 12, %v338_v57 }
  0x90   : > { %vm446_vm8 = vmand %vm434_vm1, %vm422_vm15  ;;  %vm479_vm15 = vcmp.ge.s32.totalorder %v467_v25, 2  ;;  %vm491_vm1 = vcmp.lt.s32.totalorder %v467_v25, 10 }
  0x91   : > { %v7081_v40 = vsel %vm446_vm8, %v458_v21, %v338_v57  ;;  %v464_v57 = vadd.s32 12, %v404_v37 }
  0x92   : > { %5984 = vmatmul.mubr.msk.bf16.gmra.mrb[8].mxu0 %vm8535_vm0, %v1614_v28  ;;  %v347_v28 = vshrl.u32 %v6986_v22, 3  ;;  %v7057_v22 = vrot.slane %v514_v11, %v1737_v5  ;;  %vm428_vm0 = vcmp.ne.s32.totalorder %v404_v37, 0 }
  0x93   : > { %vm7137_vm7 = vmand %vm440_vm3, %vm428_vm0 }
  0x94   : > { %v348_v62 = vmul.u32 12, %v347_v28  ;;  %vm7156_vm3 = vmand %vm479_vm15, %vm491_vm1  ;;  %vm429_vm1 = vcmp.ne.s32.totalorder %v7142_v61, 0 }
  0x96   : > { %v349_v17 = vsub.s32 %v6976_v15, %v348_v62  ;;  %v7062_v15 = vsel %vm7032_vm13, %v457_v9, %v327_v46  ;;  %vm426_vm13 = vcmp.ne.s32.totalorder %v382_v38, 0  ;;  %v462_v62 = vadd.s32 12, %v382_v38 }
  0x97   : > { %vm493_vm14 = vcmp.lt.s32.totalorder %v7062_v15, 10  ;;  %v7168_v9 = vsel %vm7137_vm7, %v464_v57, %v404_v37  ;;  %vm8580_vm7 = vcmask 130048  }
  0x98   : > { %vm423_vm10 = vcmp.ne.s32.totalorder %v349_v17, 0  ;;  %vm435_vm11 = vcmp.lt.s32.totalorder %v349_v17, 0  ;;  %v459_v44 = vadd.s32 12, %v349_v17 }
  0x99   : > { %vm7093_vm5 = vmand %vm435_vm11, %vm423_vm10  ;;  %vm438_vm10 = vcmp.lt.s32.totalorder %v382_v38, 0  ;;  %vm8587_vm11 = vcmp.ge.s32.totalorder %v7081_v40, 2 }
  0x9a   : > { %v471_v45 = vsel %vm7093_vm5, %v459_v44, %v349_v17  ;;  %vm450_vm12 = vmand %vm438_vm10, %vm426_vm13  ;;  %vm8575_vm13 = vcmp.ge.s32.totalorder %v7062_v15, 2 }
  0x9b   : > { %vm483_vm5 = vcmp.ge.s32.totalorder %v471_v45, 2  ;;  %vm495_vm8 = vcmp.lt.s32.totalorder %v471_v45, 10  ;;  %vm7174_vm15 = vmand %vm8575_vm13, %vm493_vm14  ;;  %v474_v13 = vsel %vm450_vm12, %v462_v62, %v382_v38  ;;  %vm441_vm14 = vcmp.lt.s32.totalorder %v7142_v61, 0 }
  0x9c   : > { %vm7192_vm10 = vmand %vm439_vm4, %vm427_vm6  ;;  %vm8582_vm4 = vcmp.lt.s32.totalorder %v7070_v31, 10  ;;  %vm8583_vm6 = vcmp.ge.s32.totalorder %v7070_v31, 2  ;;  %vm8586_vm13 = vcmp.lt.s32.totalorder %v7081_v40, 10  ;;  %v8596_v45 = vmov 0 }
  0x9d   : > { %vm8581_vm12 = vmmov %vm8580_vm7  ;;  %v475_v44 = vsel %vm7192_vm10, %v463_v16, %v393_v35  ;;  %vm500_vm10 = vcmp.lt.s32.totalorder %v7168_v9, 10 }
  0x9e   : > { %vm7224_vm0 = vmand %vm8587_vm11, %vm8586_vm13 }
  0x9f   : > { %vm453_vm11 = vmand %vm441_vm14, %vm429_vm1 }
  0xa0   : > { %vm8590_vm13 = vmmov %vm8581_vm12 }
  0xa1   : > { %vm8593_vm1 = vmmov %vm8590_vm13 }
 0x119   : > { %v6920_v47 = vpop.f32.mrb[0].mxu1 }
 0x11a   : > { %v6922_v48 = vpop.f32.mrb[1].mxu1 }
 0x11b   : > { %v6924_v49 = vpop.f32.mrb[2].mxu1 }
 0x11c   : > { %v6926_v50 = vpop.f32.mrb[3].mxu1 }
 0x131   : > { %v6931_v36 = vpop.f32.mrb[4].mxu1 }
 0x132   : > { %v6933_v39 = vpop.f32.mrb[5].mxu1 }
 0x133   : > { %v6939_v56 = vpop.f32.mrb[6].mxu1 }
 0x134   : > { %v6946_v60 = vpop.f32.mrb[7].mxu1 }
 0x139   : > { %v6956_v4 = vpop.f32.mrb[8].mxu1 }
 0x13a   : > { %v6964_v8 = vpop.f32.mrb[9].mxu1 }
 0x13b   : > { %v6967_v10 = vpop.f32.mrb[10].mxu1 }
 0x13c   : > { %v6973_v14 = vpop.f32.mrb[11].mxu1 }
 0x155   : > { %v5977_v43 = vpop.f32.mrb[0].mxu0 }
 0x156   : > { %v6271_v29 = vadd.f32 %v5977_v43, %v6920_v47  ;;  %v1676_v46 = vpop.f32.mrb[1].mxu0  ;;  %v465_v43 = vadd.s32 12, %v7142_v61 }
 0x157   : > { %v6272_v41 = vadd.f32 %v1676_v46, %v6922_v48  ;;  %v5978_v27 = vpop.f32.mrb[2].mxu0 }
 0x158   : > { %v7108_v28 = vadd.f32 %v6271_v29, %v7057_v22  ;;  %v6273_v51 = vadd.f32 %v5978_v27, %v6924_v49  ;;  %v1679_v48 = vpop.f32.mrb[3].mxu0  ;;  %v477_v62 = vsel %vm453_vm11, %v465_v43, %v7142_v61  ;;  %vm8601_vm11 = vcmp.ge.s32.totalorder %v7168_v9, 2 }
 0x159   : > { %v7126_v55 = vadd.f32 %v6272_v41, %v7057_v22  ;;  %v6274_v49 = vadd.f32 %v1679_v48, %v6926_v50 }
 0x15a   : > { %v7132_v58 = vadd.f32 %v6273_v51, %v7057_v22  ;;  %v1753_v50 = vmax.f32 %v7108_v28, 0.0 }
 0x15b   : > { %v1751_v63 = vmax.f32 %v7126_v55, 0.0  ;;  %v7148_v1 = vadd.f32 %v6274_v49, %v7057_v22 }
 0x15c   : > { %v1754_v5 = vmax.f32 %v7132_v58, 0.0  ;;  %v1765_v17 = vsel %vm7103_vm9, %v1753_v50, 0.0 }
 0x15d   : > { %v1763_v2 = vsel %vm7121_vm2, %v1751_v63, 0.0  ;;  %v1752_v6 = vmax.f32 %v7148_v1, 0.0  ;;  %v5981_v3 = vpop.f32.mrb[4].mxu0  ;;  %v1778_v38 = vsel %vm8581_vm12, %v1765_v17, 0.0 }
 0x15e   : > { %v6275_v12 = vadd.f32 %v5981_v3, %v6931_v36  ;;  %v1692_v7 = vpop.f32.mrb[5].mxu0  ;;  %v1775_v21 = vsel %vm8580_vm7, %v1763_v2, 0.0  ;;  %vm7211_vm7 = vmand %vm8583_vm6, %vm8582_vm4  ;;  %vm486_vm6 = vcmp.ge.s32.totalorder %v474_v13, 2 }
 0x15f   : > { %v1764_v18 = vsel %vm7156_vm3, %v1752_v6, 0.0  ;;  %v6276_v19 = vadd.f32 %v1692_v7, %v6933_v39  ;;  %v5982_v20 = vpop.f32.mrb[6].mxu0  ;;  %v1766_v39 = vsel %vm7174_vm15, %v1754_v5, 0.0  ;;  %v8585_v34 = vsel %vm7211_vm7, 4294967295, %v8584_v34  ;;  %vm7246_vm4 = vmand %vm483_vm5, %vm495_vm8 }
 0x160   : > { %v1776_v0 = vsel %vm8581_vm12, %v1764_v18, 0.0  ;;  %v7199_v15 = vadd.f32 %v6275_v12, %v7057_v22  ;;  %v6277_v25 = vadd.f32 %v5982_v20, %v6939_v56  ;;  %v1695_v32 = vpop.f32.mrb[7].mxu0  ;;  %v1780_v40 = vsel %vm8590_vm13, %v1766_v39, 0.0 }
 0x161   : > { %v1777_v33 = vadd.f32 %v1776_v0, %v1775_v21  ;;  %v7216_v37 = vadd.f32 %v6276_v19, %v7057_v22  ;;  %v6278_v56 = vadd.f32 %v1695_v32, %v6946_v60  ;;  %v8592_v30 = vsel %vm7246_vm4, 4294967295, %v8591_v30 }
 0x162   : > { %v7229_v31 = vadd.f32 %v6277_v25, %v7057_v22  ;;  %v1757_v60 = vmax.f32 %v7199_v15, 0.0  ;;  %vm498_vm12 = vcmp.lt.s32.totalorder %v474_v13, 10  ;;  %vm8594_vm8 = vcmp.lt.s32.totalorder %v7089_v23, 10 }
 0x163   : > { %v1779_v29 = vadd.f32 %v1778_v38, %v1777_v33  ;;  %v1755_v46 = vmax.f32 %v7216_v37, 0.0  ;;  %v7237_v24 = vadd.f32 %v6278_v56, %v7057_v22  ;;  %vm8595_vm5 = vcmp.ge.s32.totalorder %v7089_v23, 2 }
 0x164   : > { %v1758_v51 = vmax.f32 %v7229_v31, 0.0  ;;  %vm7262_vm14 = vmand %vm8595_vm5, %vm8594_vm8  ;;  %v1769_v2 = vsel %vm7211_vm7, %v1757_v60, 0.0  ;;  %v8599_v21 = vmov 0  ;;  %vm501_vm13 = vcmp.lt.s32.totalorder %v477_v62, 10 }
 0x165   : > { %v1767_v41 = vsel %vm7224_vm0, %v1755_v46, 0.0  ;;  %v1781_v27 = vadd.f32 %v1780_v40, %v1779_v29  ;;  %v1756_v48 = vmax.f32 %v7237_v24, 0.0  ;;  %v5985_v35 = vpop.f32.mrb[8].mxu0  ;;  %v8597_v45 = vsel %vm7262_vm14, 4294967295, %v8596_v45  ;;  %vm8598_vm8 = vmmov %vm8593_vm1 }
 0x166   : > { %v1782_v49 = vsel %vm8593_vm1, %v1767_v41, 0.0  ;;  %v6279_v57 = vadd.f32 %v5985_v35, %v6956_v4  ;;  %v1708_v59 = vpop.f32.mrb[9].mxu0  ;;  %v1770_v18 = vsel %vm7262_vm14, %v1758_v51, 0.0  ;;  %vm7287_vm5 = vmand %vm486_vm6, %vm498_vm12  ;;  %v8602_v25 = vmov 0 }
 0x167   : > { %v1783_v3 = vadd.f32 %v1782_v49, %v1781_v27  ;;  %v1768_v12 = vsel %vm7246_vm4, %v1756_v48, 0.0  ;;  %v6280_v23 = vadd.f32 %v1708_v59, %v6964_v8  ;;  %v5986_v7 = vpop.f32.mrb[10].mxu0  ;;  %v1786_v8 = vsel %vm8598_vm8, %v1769_v2, 0.0  ;;  %vm7296_vm14 = vmand %vm8601_vm11, %vm500_vm10 }
 0x168   : > { %v1784_v16 = vsel %vm8593_vm1, %v1768_v12, 0.0  ;;  %v1749_v4 = vadd.f32 %v6279_v57, %v7057_v22  ;;  %v6281_v17 = vadd.f32 %v5986_v7, %v6967_v10  ;;  %v1711_v61 = vpop.f32.mrb[11].mxu0  ;;  %v8600_v21 = vsel %vm7287_vm5, 4294967295, %v8599_v21  ;;  %vm8604_vm6 = vmmov %vm8593_vm1 }
 0x169   : > { %v1785_v19 = vadd.f32 %v1784_v16, %v1783_v3  ;;  %v1747_v20 = vadd.f32 %v6280_v23, %v7057_v22  ;;  %v6282_v36 = vadd.f32 %v1711_v61, %v6973_v14  ;;  %v8603_v25 = vsel %vm7296_vm14, 4294967295, %v8602_v25  ;;  %vm8609_vm10 = vmmov %vm8604_vm6 }
 0x16a   : > { %v1750_v10 = vadd.f32 %v6281_v17, %v7057_v22  ;;  %v1761_v14 = vmax.f32 %v1749_v4, 0.0  ;;  %v1788_v39 = vsel %vm8604_vm6, %v1770_v18, 0.0  ;;  %vm8605_vm12 = vcmp.lt.s32.totalorder %v475_v44, 10 }
 0x16b   : > { %v1787_v0 = vadd.f32 %v1786_v8, %v1785_v19  ;;  %v1759_v32 = vmax.f32 %v1747_v20, 0.0  ;;  %v1748_v13 = vadd.f32 %v6282_v36, %v7057_v22  ;;  %vm8606_vm8 = vcmp.ge.s32.totalorder %v475_v44, 2 }
 0x16c   : > { %vm7304_vm1 = vmand %vm8606_vm8, %vm8605_vm12  ;;  %v8607_v33 = vmov 0  ;;  %v1762_v38 = vmax.f32 %v1750_v10, 0.0  ;;  %vm8610_vm11 = vcmp.ge.s32.totalorder %v477_v62, 2  ;;  %v8611_v24 = vmov 0 }
 0x16d   : > { %v8608_v33 = vsel %vm7304_vm1, 4294967295, %v8607_v33  ;;  %v1771_v56 = vsel %vm7287_vm5, %v1759_v32, 0.0  ;;  %v1789_v9 = vadd.f32 %v1788_v39, %v1787_v0  ;;  %v1760_v43 = vmax.f32 %v1748_v13, 0.0  ;;  %vm7312_vm7 = vmand %vm8610_vm11, %vm501_vm13 }
 0x16e   : > { %v1790_v29 = vsel %vm8609_vm10, %v1771_v56, 0.0  ;;  %v8612_v24 = vsel %vm7312_vm7, 4294967295, %v8611_v24  ;;  %v1773_v22 = vsel %vm7296_vm14, %v1761_v14, 0.0  ;;  %v1774_v27 = vsel %vm7312_vm7, %v1762_v38, 0.0  ;;  %vm8613_vm12 = vmmov %vm8604_vm6 }
 0x16f   : > { %v1791_v44 = vadd.f32 %v1790_v29, %v1789_v9  ;;  %v1772_v40 = vsel %vm7304_vm1, %v1760_v43, 0.0  ;;  %v1794_v49 = vsel %vm8613_vm12, %v1773_v22, 0.0  ;;  %vm8614_vm13 = vmmov %vm8604_vm6 }
 0x170   : > { %v1792_v41 = vsel %vm8604_vm6, %v1772_v40, 0.0  ;;  %v1796_v59 = vsel %vm8614_vm13, %v1774_v27, 0.0  ;;  %vm8615_vm8 = vmmov %vm8604_vm6  ;;  %vm8620_vm13 = vnez %v8597_v45 }
 0x171   : > { %v1793_v35 = vadd.f32 %v1792_v41, %v1791_v44  ;;  %vm8616_vm10 = vmmov %vm8604_vm6 }
 0x172   : > { %vm8617_vm11 = vmmov %vm8604_vm6  ;;  %vm8618_vm6 = vnez %v8585_v34 }
 0x173   : > { %v1795_v57 = vadd.f32 %v1794_v49, %v1793_v35  ;;  %vm8619_vm12 = vmmov %vm8615_vm8 }
 0x175   : > { %v1797_v62 = vadd.f32 %v1796_v59, %v1795_v57 }
 0x177   : > { %v1798_v2 = vrot.slane %v1797_v62, 4 }
 0x179   : > { %v1799_v3 = vadd.f32 %v1798_v2, %v1797_v62 }
 0x17b   : > { %v1800_v12 = vrot.slane %v1799_v3, 2 }
 0x17d   : > { %v1801_v23 = vadd.f32 %v1800_v12, %v1799_v3 }
 0x17f   : > { %v1802_v7 = vrot.slane %v1801_v23, 1 }
 0x181   : > { %v1803_v16 = vadd.f32 %v1802_v7, %v1801_v23 }
 0x183   : > { %v1805_v4 = vmul.f32 0.015625, %v1803_v16 }
 0x185   : > { %v7327_v17 = vsub.f32 %v1751_v63, %v1805_v4  ;;  %v7331_v61 = vsub.f32 %v1752_v6, %v1805_v4  ;;  %v7335_v18 = vsub.f32 %v1753_v50, %v1805_v4  ;;  %v7339_v19 = vsub.f32 %v1754_v5, %v1805_v4 }
 0x186   : > { %v7343_v20 = vsub.f32 %v1755_v46, %v1805_v4  ;;  %v7345_v36 = vsub.f32 %v1756_v48, %v1805_v4  ;;  %v7349_v55 = vsub.f32 %v1757_v60, %v1805_v4  ;;  %v7353_v63 = vsub.f32 %v1758_v51, %v1805_v4 }
 0x187   : > { %v7355_v28 = vsub.f32 %v1759_v32, %v1805_v4  ;;  %v7357_v50 = vsub.f32 %v1760_v43, %v1805_v4  ;;  %v7359_v58 = vsub.f32 %v1761_v14, %v1805_v4  ;;  %v7361_v1 = vsub.f32 %v1762_v38, %v1805_v4 }
 0x188   : > { %v1818_v5 = vsel %vm7121_vm2, %v7327_v17, 0.0  ;;  %v1819_v6 = vsel %vm7156_vm3, %v7331_v61, 0.0  ;;  %v1820_v15 = vsel %vm7103_vm9, %v7335_v18, 0.0  ;;  %v1821_v37 = vsel %vm7174_vm15, %v7339_v19, 0.0 }
 0x189   : > { %v1830_v31 = vmul.f32 %v1818_v5, %v1818_v5  ;;  %v1831_v60 = vmul.f32 %v1819_v6, %v1819_v6  ;;  %v1832_v46 = vmul.f32 %v1820_v15, %v1820_v15  ;;  %v1822_v51 = vsel %vm7224_vm0, %v7343_v20, 0.0 }
 0x18a   : > { %v1833_v48 = vmul.f32 %v1821_v37, %v1821_v37  ;;  %v1823_v0 = vsel %vm7246_vm4, %v7345_v36, 0.0  ;;  %v1834_v32 = vmul.f32 %v1822_v51, %v1822_v51  ;;  %v1824_v39 = vsel %vm8618_vm6, %v7349_v55, 0.0 }
 0x18b   : > { %v1842_v8 = vsel %vm8615_vm8, %v1830_v31, 0.0  ;;  %v1843_v10 = vsel %vm8616_vm10, %v1831_v60, 0.0  ;;  %v1845_v13 = vsel %vm8617_vm11, %v1832_v46, 0.0  ;;  %v1835_v9 = vmul.f32 %v1823_v0, %v1823_v0  ;;  %vm8621_vm10 = vmmov %vm8615_vm8 }
 0x18c   : > { %v1844_v14 = vadd.f32 %v1843_v10, %v1842_v8  ;;  %v1847_v38 = vsel %vm8619_vm12, %v1833_v48, 0.0  ;;  %v1825_v43 = vsel %vm8620_vm13, %v7353_v63, 0.0  ;;  %v1836_v22 = vmul.f32 %v1824_v39, %v1824_v39  ;;  %vm8622_vm11 = vmmov %vm8615_vm8 }
 0x18d   : > { %v1849_v44 = vsel %vm8615_vm8, %v1834_v32, 0.0  ;;  %v1826_v40 = vsel %vm7287_vm5, %v7355_v28, 0.0  ;;  %v1837_v27 = vmul.f32 %v1825_v43, %v1825_v43  ;;  %v1851_v35 = vsel %vm8621_vm10, %v1835_v9, 0.0  ;;  %vm8623_vm12 = vmmov %vm8615_vm8 }
 0x18e   : > { %v1846_v56 = vadd.f32 %v1845_v13, %v1844_v14  ;;  %v1827_v49 = vsel %vm7304_vm1, %v7357_v50, 0.0  ;;  %v1838_v59 = vmul.f32 %v1826_v40, %v1826_v40  ;;  %v1853_v62 = vsel %vm8622_vm11, %v1836_v22, 0.0  ;;  %vm8624_vm10 = vmmov %vm8615_vm8 }
 0x18f   : > { %v1828_v2 = vsel %vm7296_vm14, %v7359_v58, 0.0  ;;  %v1839_v12 = vmul.f32 %v1827_v49, %v1827_v49  ;;  %v1855_v23 = vsel %vm8623_vm12, %v1837_v27, 0.0  ;;  %v1829_v7 = vsel %vm7312_vm7, %v7361_v1, 0.0  ;;  %vm8625_vm11 = vmmov %vm8615_vm8 }
 0x190   : > { %v1848_v29 = vadd.f32 %v1847_v38, %v1846_v56  ;;  %v1840_v4 = vmul.f32 %v1828_v2, %v1828_v2  ;;  %v1857_v5 = vsel %vm8615_vm8, %v1838_v59, 0.0  ;;  %v1841_v15 = vmul.f32 %v1829_v7, %v1829_v7  ;;  %vm8626_vm1 = vmmov %vm8615_vm8 }
 0x191   : > { %v1859_v37 = vsel %vm8624_vm10, %v1839_v12, 0.0  ;;  %vm8627_vm10 = vmmov %vm8626_vm1 }
 0x192   : > { %v1850_v41 = vadd.f32 %v1849_v44, %v1848_v29  ;;  %v1861_v60 = vsel %vm8625_vm11, %v1840_v4, 0.0  ;;  %v1863_v51 = vsel %vm8626_vm1, %v1841_v15, 0.0  ;;  %vm8628_vm11 = vmmov %vm8626_vm1 }
 0x193   : > { %vm8629_vm8 = vmmov %vm8626_vm1 }
 0x194   : > { %v1852_v57 = vadd.f32 %v1851_v35, %v1850_v41  ;;  %vm8630_vm12 = vmmov %vm8626_vm1 }
 0x195   : > { %vm8631_vm7 = vmmov %vm8626_vm1 }
 0x196   : > { %v1854_v3 = vadd.f32 %v1853_v62, %v1852_v57  ;;  %vm8632_vm14 = vmmov %vm8626_vm1 }
 0x197   : > { %vm8633_vm5 = vmmov %vm8626_vm1 }
 0x198   : > { %v1856_v16 = vadd.f32 %v1855_v23, %v1854_v3 }
 0x19a   : > { %v1858_v6 = vadd.f32 %v1857_v5, %v1856_v16 }
 0x19c   : > { %v1860_v31 = vadd.f32 %v1859_v37, %v1858_v6 }
 0x19e   : > { %v1862_v46 = vadd.f32 %v1861_v60, %v1860_v31 }
 0x1a0   : > { %v1864_v48 = vadd.f32 %v1863_v51, %v1862_v46 }
 0x1a2   : > { %v1865_v8 = vrot.slane %v1864_v48, 4 }
 0x1a4   : > { %v1866_v10 = vadd.f32 %v1865_v8, %v1864_v48 }
 0x1a6   : > { %v1867_v0 = vrot.slane %v1866_v10, 2 }
 0x1a8   : > { %v1868_v14 = vadd.f32 %v1867_v0, %v1866_v10 }
 0x1aa   : > { %v1869_v32 = vrot.slane %v1868_v14, 1 }
 0x1ac   : > { %v1870_v13 = vadd.f32 %v1869_v32, %v1868_v14 }
 0x1ae   : > { %v1871_v39 = vmul.f32 0.015625, %v1870_v13 }
 0x1b0   : > { %v1872_v56 = vadd.f32 1e-05, %v1871_v39 }
 0x1b2   : > { %6643 = vrsqrt.f32 %v1872_v56 }
 0x1bc   : > { %v6644_v9 = vpop.eup %6643 }
 0x1bd   : > { %v1874_v38 = vmul.f32 %v6644_v9, %v7327_v17  ;;  %v1875_v43 = vmul.f32 %v6644_v9, %v7331_v61  ;;  %v1876_v29 = vmul.f32 %v6644_v9, %v7335_v18  ;;  %v1877_v22 = vmul.f32 %v6644_v9, %v7339_v19 }
 0x1be   : > { %v1878_v44 = vmul.f32 %v6644_v9, %v7343_v20  ;;  %v1879_v40 = vmul.f32 %v6644_v9, %v7345_v36  ;;  %v1880_v41 = vmul.f32 %v6644_v9, %v7349_v55  ;;  %v1881_v27 = vmul.f32 %v6644_v9, %v7353_v63 }
 0x1bf   : > { %v7420_v35 = vmul.f32 %v6644_v9, %v7355_v28  ;;  %v7423_v49 = vmul.f32 %v6644_v9, %v7357_v50  ;;  %v7426_v17 = vmul.f32 %v6644_v9, %v7359_v58  ;;  %v7429_v61 = vmul.f32 %v6644_v9, %v7361_v1  ;;  %1886 = vst.msk [vmem:[#allocation2 + $0x20] sm:$0xff] %vm8626_vm1, %v1874_v38 }
 0x1c0   : > { %1887 = vst.msk [vmem:[#allocation2 + $0x28] sm:$0xff] %vm8627_vm10, %v1875_v43  ;;  %v1899_v18 = vrot.slane %v1874_v38, 2  ;;  %v1901_v19 = vrot.slane %v1874_v38, 1  ;;  %v1908_v20 = vrot.slane %v1875_v43, 1  ;;  %v1912_v36 = vrot.slane %v1875_v43, 6  ;;  %vm8634_vm10 = vmmov %vm8626_vm1 }
 0x1c1   : > { %1888 = vst.msk [vmem:[#allocation2 + $0x30] sm:$0xff] %vm8628_vm11, %v1876_v29  ;;  %v1914_v55 = vrot.slane %v1875_v43, 5  ;;  %v1919_v63 = vrot.slane %v1876_v29, 5  ;;  %v1921_v28 = vrot.slane %v1876_v29, 4  ;;  %v1926_v50 = vrot.slane %v1877_v22, 2 }
 0x1c2   : > { %1889 = vst.msk [vmem:[#allocation2 + $0x38] sm:$0xff] %vm8629_vm8, %v1877_v22  ;;  %vm8635_vm8 = vmmov %vm8626_vm1  ;;  %v1928_v57 = vrot.slane %v1877_v22, 1  ;;  %v1933_v59 = vrot.slane %v1878_v44, 1  ;;  %v1937_v3 = vrot.slane %v1878_v44, 6  ;;  %v1939_v12 = vrot.slane %v1878_v44, 5 }
 0x1c3   : > { %1890 = vst.msk [vmem:[#allocation2 + $0x40] sm:$0xff] %vm8630_vm12, %v1878_v44  ;;  %vm8639_vm12 = vcmask 123904   ;;  %v1944_v16 = vrot.slane %v1879_v40, 5  ;;  %v1946_v4 = vrot.slane %v1879_v40, 4  ;;  %v1951_v6 = vrot.slane %v1880_v41, 2 }
 0x1c4   : > { %1891 = vst.msk [vmem:[#allocation2 + $0x48] sm:$0xff] %vm8631_vm7, %v1879_v40  ;;  %vm8636_vm7 = vmmov %vm8626_vm1  ;;  %v1953_v15 = vrot.slane %v1880_v41, 1  ;;  %v1958_v37 = vrot.slane %v1881_v27, 1  ;;  %v1962_v60 = vrot.slane %v1881_v27, 6  ;;  %v1964_v46 = vrot.slane %v1881_v27, 5 }
 0x1c5   : > { %1892 = vst.msk [vmem:[#allocation2 + $0x50] sm:$0xff] %vm8632_vm14, %v1880_v41  ;;  %vm8637_vm14 = vcmask 1040384   ;;  %v1969_v51 = vrot.slane %v7420_v35, 5  ;;  %v1971_v10 = vrot.slane %v7420_v35, 4  ;;  %v1976_v0 = vrot.slane %v7423_v49, 2 }
 0x1c6   : > { %1893 = vst.msk [vmem:[#allocation2 + $0x58] sm:$0xff] %vm8633_vm5, %v1881_v27  ;;  %v1904_v58 = vsel %vm8637_vm14, %v1899_v18, %v1901_v19  ;;  %vm8638_vm5 = vmmov %vm8637_vm14  ;;  %v1978_v32 = vrot.slane %v7423_v49, 1  ;;  %v1983_v13 = vrot.slane %v7426_v17, 1  ;;  %v1987_v39 = vrot.slane %v7426_v17, 6 }
 0x1c7   : > { %1894 = vst.msk [vmem:[#allocation2 + $0x60] sm:$0xff] %vm8626_vm1, %v7420_v35  ;;  %v1910_v1 = vsel %vm8638_vm5, %v1908_v20, %v1875_v43  ;;  %vm8640_vm11 = vmmov %vm8638_vm5  ;;  %v1989_v9 = vrot.slane %v7426_v17, 5  ;;  %v1994_v38 = vrot.slane %v7429_v61, 5  ;;  %v1996_v43 = vrot.slane %v7429_v61, 4 }
 0x1c8   : > { %1895 = vst.msk [vmem:[#allocation2 + $0x68] sm:$0xff] %vm8634_vm10, %v7423_v49  ;;  %v1916_v62 = vsel %vm8640_vm11, %v1912_v36, %v1914_v55  ;;  %vm8641_vm1 = vmmov %vm8638_vm5  ;;  %v6618_v55 = vld [vmem:[%s8530_s2 + $0x58] sm:$0xff]  }
 0x1c9   : > { %1896 = vst.msk [vmem:[#allocation2 + $0x70] sm:$0xff] %vm8635_vm8, %v7426_v17  ;;  %v1923_v2 = vsel %vm8641_vm1, %v1919_v63, %v1921_v28  ;;  %vm8642_vm10 = vmmov %vm8639_vm12  ;;  %v1948_v31 = vsel %vm8641_vm1, %v1944_v16, %v1946_v4  ;;  %v1973_v56 = vsel %vm8641_vm1, %v1969_v51, %v1971_v10 }
 0x1ca   : > { %1897 = vst.msk [vmem:[#allocation2 + $0x78] sm:$0xff] %vm8636_vm7, %v7429_v61  ;;  %vm8643_vm8 = vmmov %vm8642_vm10 }
 0x1cb   : > { %1911 = vst.msk [vmem:[#allocation2 + $0x2a] sm:$0x3] %vm8639_vm12, %v1910_v1  ;;  %vm8644_vm7 = vmmov %vm8643_vm8 }
 0x1cc   : > { %1906 = vst.msk [vmem:[#allocation2 + $0x20] sm:$0x3] %vm8642_vm10, %v1904_v58  ;;  %vm8645_vm13 = vmmov %vm8641_vm1 }
 0x1cd   : > { %1917 = vst.msk [vmem:[#allocation2 + $0x2c] sm:$0x3] %vm8643_vm8, %v1916_v62  ;;  %v1930_v23 = vsel %vm8645_vm13, %v1926_v50, %v1928_v57  ;;  %vm8646_vm14 = vmmov %vm8641_vm1 }
 0x1ce   : > { %1924 = vst.msk [vmem:[#allocation2 + $0x36] sm:$0x3] %vm8644_vm7, %v1923_v2  ;;  %v1935_v7 = vsel %vm8646_vm14, %v1933_v59, %v1878_v44  ;;  %vm8647_vm5 = vmmov %vm8644_vm7 }
 0x1cf   : > { %1931 = vst.msk [vmem:[#allocation2 + $0x38] sm:$0x3] %vm8647_vm5, %v1930_v23  ;;  %vm8648_vm12 = vmmov %vm8647_vm5 }
 0x1d0   : > { %1936 = vst.msk [vmem:[#allocation2 + $0x42] sm:$0x3] %vm8648_vm12, %v1935_v7  ;;  %vm8649_vm11 = vmmov %vm8641_vm1 }
 0x1d1   : > { %v1941_v5 = vsel %vm8649_vm11, %v1937_v3, %v1939_v12  ;;  %vm8650_vm13 = vmmov %vm8647_vm5 }
 0x1d2   : > { %1942 = vst.msk [vmem:[#allocation2 + $0x44] sm:$0x3] %vm8650_vm13, %v1941_v5  ;;  %vm8651_vm10 = vmmov %vm8647_vm5  ;;  %v2001_v40 = vld [vmem:[#allocation2 + $0x28] sm:$0xf] }
 0x1d3   : > { %1949 = vst.msk [vmem:[#allocation2 + $0x4e] sm:$0x3] %vm8651_vm10, %v1948_v31  ;;  %vm8652_vm8 = vmmov %vm8641_vm1  ;;  %v7483_v44 = vld [vmem:[#allocation2 + $0x20] sm:$0xff] }
 0x1d4   : > { %v1955_v48 = vsel %vm8652_vm8, %v1951_v6, %v1953_v15  ;;  %vm8653_vm7 = vmmov %vm8641_vm1  ;;  %v2036_v35 = vld [vmem:[#allocation2 + $0x24] sm:$0xff]  ;;  %v7497_v49 = vld [vmem:[#allocation2 + $0x2c] sm:$0xff] }
 0x1d5   : > { %v1960_v8 = vsel %vm8653_vm7, %v1958_v37, %v1881_v27  ;;  %vm8654_vm14 = vmmov %vm8647_vm5  ;;  %v2047_v36 = vpack.c.bf16 %v7497_v49, %v2036_v35  ;;  %v2015_v4 = vld [vmem:[#allocation2 + $0x23] sm:$0xff]  ;;  %v7543_v5 = vld [vmem:[#allocation2 + $0x2b] sm:$0xff] }
 0x1d6   : > { %1956 = vst.msk [vmem:[#allocation2 + $0x50] sm:$0x3] %vm8654_vm14, %v1955_v48  ;;  %vm8655_vm12 = vmmov %vm8641_vm1  ;;  %v7545_v6 = vld [vmem:[#allocation2 + $0x33] sm:$0xff]  ;;  %v2026_v37 = vpack.c.bf16 %v7543_v5, %v2015_v4  ;;  %v6619_v31 = vld [vmem:[%s8530_s2 + $0x60] sm:$0xff]  }
 0x1d7   : > { %1961 = vst.msk [vmem:[#allocation2 + $0x5a] sm:$0x3] %vm8647_vm5, %v1960_v8  ;;  %v1966_v14 = vsel %vm8655_vm12, %v1962_v60, %v1964_v46  ;;  %vm8656_vm11 = vmmov %vm8647_vm5  ;;  %v7501_v19 = vld [vmem:[#allocation2 + $0x3c] sm:$0xff] }
 0x1d8   : > { %1967 = vst.msk [vmem:[#allocation2 + $0x5c] sm:$0x3] %vm8656_vm11, %v1966_v14  ;;  %vm8657_vm13 = vmmov %vm8647_vm5  ;;  %vm8664_vm11 = vcmask 130048   ;;  %v7547_v15 = vld [vmem:[#allocation2 + $0x3b] sm:$0xff] }
 0x1d9   : > { %1974 = vst.msk [vmem:[#allocation2 + $0x66] sm:$0x3] %vm8657_vm13, %v1973_v56  ;;  %vm8658_vm10 = vmmov %vm8641_vm1  ;;  %v7513_v28 = vld [vmem:[#allocation2 + $0x44] sm:$0xff]  ;;  %v2027_v60 = vpack.c.bf16 %v7547_v15, %v7545_v6 }
 0x1da   : > { %v1980_v29 = vsel %vm8658_vm10, %v1976_v0, %v1978_v32  ;;  %vm8659_vm8 = vmmov %vm8641_vm1  ;;  %2005 = vst.msk [vmem:[#allocation2 + $0x14] sm:$0xff] %vm8664_vm11, %v7483_v44  ;;  %v7557_v46 = vld [vmem:[#allocation2 + $0x43] sm:$0xff] }
 0x1db   : > { %v1985_v22 = vsel %vm8659_vm8, %v1983_v13, %v7426_v17  ;;  %vm8660_vm7 = vmmov %vm8647_vm5  ;;  %v7499_v17 = vld [vmem:[#allocation2 + $0x34] sm:$0xff]  ;;  %v7593_v35 = vld [vmem:[#allocation2 + $0x45] sm:$0xff] }
 0x1dc   : > { %1981 = vst.msk [vmem:[#allocation2 + $0x68] sm:$0x3] %vm8660_vm7, %v1980_v29  ;;  %vm8661_vm14 = vmmov %vm8647_vm5  ;;  %v2048_v63 = vpack.c.bf16 %v7501_v19, %v7499_v17  ;;  %v7581_v29 = vld [vmem:[#allocation2 + $0x35] sm:$0xff]  ;;  %v2407_v4 = vld [vmem:[#allocation2 + $0x3f] sm:$0xff] }
 0x1dd   : > { %1986 = vst.msk [vmem:[#allocation2 + $0x72] sm:$0x3] %vm8661_vm14, %v1985_v22  ;;  %vm8662_vm5 = vmmov %vm8641_vm1  ;;  %v7515_v50 = vld [vmem:[#allocation2 + $0x4c] sm:$0xff]  ;;  %v7583_v22 = vld [vmem:[#allocation2 + $0x3d] sm:$0xff] }
 0x1de   : > { %v1991_v41 = vsel %vm8662_vm5, %v1987_v39, %v1989_v9  ;;  %vm8663_vm12 = vmmov %vm8641_vm1  ;;  %vm8665_vm1 = vcmask 125952   ;;  %v7517_v58 = vld [vmem:[#allocation2 + $0x54] sm:$0xff]  ;;  %v2049_v57 = vpack.c.bf16 %v7515_v50, %v7513_v28  ;;  %v7559_v51 = vld [vmem:[#allocation2 + $0x4b] sm:$0xff] }
 0x1df   : > { %v1998_v27 = vsel %vm8663_vm12, %v1994_v38, %v1996_v43  ;;  %2006 = vst.msk [vmem:[#allocation2 + $0x1c] sm:$0xf] %vm8665_vm1, %v2001_v40  ;;  %vm8666_vm13 = vmmov %vm8664_vm11  ;;  %v7519_v1 = vld [vmem:[#allocation2 + $0x5c] sm:$0xff]  ;;  %v7561_v48 = vld [vmem:[#allocation2 + $0x53] sm:$0xff]  ;;  %v2028_v10 = vpack.c.bf16 %v7559_v51, %v7557_v46 }
 0x1e0   : > { %2002 = vst.msk [vmem:[#allocation2 + $0x8] sm:$0xff] %vm8666_vm13, %v7483_v44  ;;  %vm8667_vm10 = vmmov %vm8665_vm1  ;;  %v2050_v59 = vpack.c.bf16 %v7519_v1, %v7517_v58  ;;  %v7563_v8 = vld [vmem:[#allocation2 + $0x5b] sm:$0xff]  ;;  %v2267_v38 = vld [vmem:[#allocation2 + $0x25] sm:$0xff] }
 0x1e1   : > { %2004 = vst.msk [vmem:[#allocation2 + $0x10] sm:$0xf] %vm8667_vm10, %v2001_v40  ;;  %vm8668_vm8 = vmmov %vm8660_vm7  ;;  %v2034_v61 = vld [vmem:[#allocation2 + $0x14] sm:$0xff]  ;;  %v2029_v0 = vpack.c.bf16 %v7563_v8, %v7561_v48 }
 0x1e2   : > { %1992 = vst.msk [vmem:[#allocation2 + $0x74] sm:$0x3] %vm8668_vm8, %v1991_v41  ;;  %vm8669_vm4 = vmmov %vm8660_vm7  ;;  %v7579_v43 = vld [vmem:[#allocation2 + $0x2d] sm:$0xff] }
 0x1e3   : > { %1999 = vst.msk [vmem:[#allocation2 + $0x7e] sm:$0x3] %vm8669_vm4, %v1998_v27  ;;  %vm8670_vm7 = vmmov %vm8664_vm11  ;;  %v7571_v14 = vld [vmem:[#allocation2 + $0x63] sm:$0xff]  ;;  %v2278_v40 = vpack.c.bf16 %v7579_v43, %v2267_v38  ;;  %v2279_v27 = vpack.c.bf16 %v7583_v22, %v7581_v29 }
 0x1e4   : > { %vm8671_vm4 = vmmov %vm8670_vm7  ;;  %v7529_v62 = vld [vmem:[#allocation2 + $0x6c] sm:$0xff] }
 0x1e5   : > { %vm8672_vm14 = vmmov %vm8671_vm4  ;;  %v7573_v32 = vld [vmem:[#allocation2 + $0x6b] sm:$0xff] }
 0x1e6   : > { %v2035_v18 = vld [vmem:[#allocation2 + $0x1c] sm:$0xff]  ;;  %vm8673_vm5 = vmmov %vm8671_vm4  ;;  %v2030_v56 = vpack.c.bf16 %v7573_v32, %v7571_v14  ;;  %v6620_v41 = vld [vmem:[%s8530_s2 + $0x68] sm:$0xff]  }
 0x1e7   : > { %v2046_v20 = vpack.c.bf16 %v2035_v18, %v2034_v61  ;;  %vm8674_vm12 = vmmov %vm8671_vm4  ;;  %v2014_v12 = vld [vmem:[#allocation2 + $0x1b] sm:$0xff]  ;;  %v7595_v61 = vld [vmem:[#allocation2 + $0x4d] sm:$0xff] }
 0x1e8   : > { %v2013_v3 = vld [vmem:[#allocation2 + $0x13] sm:$0xff]  ;;  %vm8675_vm11 = vmmov %vm8671_vm4  ;;  %v2266_v39 = vld [vmem:[#allocation2 + $0x1d] sm:$0xff] }
 0x1e9   : > { %5989 = vmatprep.mubr.msk.bf16.mxu1 %vm8670_vm7, %v2046_v20  ;;  %v7531_v2 = vld [vmem:[#allocation2 + $0x74] sm:$0xff]  ;;  %vm8676_vm1 = vmmov %vm8671_vm4  ;;  %v2025_v16 = vpack.c.bf16 %v2014_v12, %v2013_v3  ;;  %v7599_v20 = vld [vmem:[#allocation2 + $0x5d] sm:$0xff] }
 0x1ea   : > { %5990 = vmatmul.mubr.msk.bf16.vlgmr.msra.gmra.mrb[12].mxu1 %vm8671_vm4, %v2047_v36  ;;  %2009 = vst.msk [vmem:[#allocation2 + $0x80] sm:$0xff] %vm8675_vm11, %v7531_v2  ;;  %v2008_v23 = vld [vmem:[#allocation2 + $0x7c] sm:$0xf]  ;;  %vm8677_vm13 = vmmov %vm8667_vm10  ;;  %v2280_v36 = vpack.c.bf16 %v7595_v61, %v7593_v35  ;;  %v2404_v12 = vld [vmem:[#allocation2 + $0x27] sm:$0xff] }
 0x1eb   : > { %6002 = vmatpush3.bf16.msra.mxu1 %v7115_v53  ;;  %5993 = vmatprep.mubr.msk.bf16.mxu1 %vm8672_vm14, %v2048_v63  ;;  %v7527_v53 = vld [vmem:[#allocation2 + $0x64] sm:$0xff]  ;;  %2011 = vst.msk [vmem:[#allocation2 + $0x8c] sm:$0xff] %vm8676_vm1, %v7531_v2  ;;  %vm8678_vm8 = vmmov %vm8676_vm1  ;;  %v2265_v13 = vld [vmem:[#allocation2 + $0x15] sm:$0xff] }
 0x1ec   : > { %6015 = vmatprep.subr.bf16.mxu1 %v6618_v55  ;;  %v2051_v7 = vpack.c.bf16 %v7529_v62, %v7527_v53  ;;  %2010 = vst.msk [vmem:[#allocation2 + $0x88] sm:$0xf] %vm8677_vm13, %v2008_v23  ;;  %vm8679_vm7 = vmmov %vm8676_vm1  ;;  %v2277_v9 = vpack.c.bf16 %v2266_v39, %v2265_v13  ;;  %v7597_v18 = vld [vmem:[#allocation2 + $0x55] sm:$0xff]  ;;  %v7607_v63 = vld [vmem:[#allocation2 + $0x65] sm:$0xff] }
 0x1ed   : > { %2012 = vst.msk [vmem:[#allocation2 + $0x94] sm:$0xf] %vm8667_vm10, %v2008_v23  ;;  %vm8680_vm4 = vmmov %vm8676_vm1  ;;  %v2410_v13 = vld [vmem:[#allocation2 + $0x57] sm:$0xff]  ;;  %v2411_v39 = vld [vmem:[#allocation2 + $0x5f] sm:$0xff] }
 0x1ee   : > { %vm8681_vm14 = vmmov %vm8676_vm1 }
 0x1ef   : > { %vm8684_vm11 = vmmov %vm8676_vm1 }
 0x1f0   : > { %vm8685_vm13 = vmmov %vm8676_vm1 }
 0x1f1   : > { %vm8686_vm10 = vmmov %vm8676_vm1 }
 0x1f2   : > { %5994 = vmatmul.mubr.msk.bf16.gmra.mrb[16].mxu1 %vm8673_vm5, %v2049_v57  ;;  %vm8682_vm5 = vmmov %vm8676_vm1  ;;  %v7609_v57 = vld [vmem:[#allocation2 + $0x6d] sm:$0xff] }
 0x1f3   : > { %5997 = vmatprep.mubr.msk.bf16.mxu1 %vm8674_vm12, %v2050_v59  ;;  %vm8683_vm12 = vmmov %vm8676_vm1  ;;  %v2403_v59 = vld [vmem:[#allocation2 + $0x1f] sm:$0xff]  ;;  %v2282_v3 = vpack.c.bf16 %v7609_v57, %v7607_v63 }
 0x1f4   : > { %v2415_v23 = vpack.c.bf16 %v2404_v12, %v2403_v59  ;;  %v2545_v12 = vld [vmem:[#allocation2 + $0x40] sm:$0xff] }
 0x1fa   : > { %5998 = vmatmul.mubr.msk.bf16.gmra.mrb[20].mxu1 %vm8678_vm8, %v2051_v7  ;;  %vm8687_vm8 = vmmov %vm8676_vm1  ;;  %v2405_v7 = vld [vmem:[#allocation2 + $0x2f] sm:$0xff] }
 0x1fb   : > { %6003 = vmatprep.mubr.msk.bf16.mxu1 %vm8679_vm7, %v2025_v16  ;;  %vm8688_vm7 = vmmov %vm8676_vm1  ;;  %v2406_v16 = vld [vmem:[#allocation2 + $0x37] sm:$0xff] }
 0x202   : > { %6004 = vmatmul.mubr.msk.bf16.vlgmr.msra.gmra.mrb[12].mxu1 %vm8680_vm4, %v2026_v37  ;;  %vm8689_vm4 = vmmov %vm8676_vm1  ;;  %v2408_v37 = vld [vmem:[#allocation2 + $0x47] sm:$0xff] }
 0x203   : > { %6016 = vmatpush3.bf16.msra.mxu1 %v6618_v55  ;;  %6007 = vmatprep.mubr.msk.bf16.mxu1 %vm8681_vm14, %v2027_v60  ;;  %v2281_v55 = vpack.c.bf16 %v7599_v20, %v7597_v18  ;;  %vm8690_vm14 = vmmov %vm8676_vm1  ;;  %v6621_v60 = vld [vmem:[%s8530_s2 + $0x70] sm:$0xff]  }
 0x204   : > { %6029 = vmatprep.subr.bf16.mxu1 %v6619_v31 }
 0x20a   : > { %6008 = vmatmul.mubr.msk.bf16.gmra.mrb[16].mxu1 %vm8682_vm5, %v2028_v10  ;;  %v2417_v10 = vpack.c.bf16 %v2408_v37, %v2407_v4  ;;  %vm8691_vm5 = vmmov %vm8676_vm1  ;;  %v2548_v37 = vld [vmem:[#allocation2 + $0x58] sm:$0xff] }
 0x20b   : > { %6011 = vmatprep.mubr.msk.bf16.mxu1 %vm8683_vm12, %v2029_v0  ;;  %vm8692_vm12 = vmmov %vm8676_vm1  ;;  %v2409_v0 = vld [vmem:[#allocation2 + $0x4f] sm:$0xff] }
 0x212   : > { %6012 = vmatmul.mubr.msk.bf16.gmra.mrb[20].mxu1 %vm8684_vm11, %v2030_v56  ;;  %v2412_v56 = vld [vmem:[#allocation2 + $0x67] sm:$0xff]  ;;  %vm8693_vm11 = vmmov %vm8676_vm1 }
 0x213   : > { %6017 = vmatprep.mubr.msk.bf16.mxu1 %vm8676_vm1, %v2277_v9  ;;  %v2418_v9 = vpack.c.bf16 %v2410_v13, %v2409_v0  ;;  %v2419_v38 = vpack.c.bf16 %v2412_v56, %v2411_v39  ;;  %v2551_v39 = vld [vmem:[#allocation2 + $0x70] sm:$0xff]  ;;  %v2552_v56 = vld [vmem:[#allocation2 + $0x78] sm:$0xff] }
 0x21a   : > { %6018 = vmatmul.mubr.msk.bf16.vlgmr.msra.gmra.mrb[12].mxu1 %vm8685_vm13, %v2278_v40  ;;  %v2413_v40 = vld [vmem:[#allocation2 + $0x6f] sm:$0xff]  ;;  %vm8694_vm13 = vmmov %vm8676_vm1 }
 0x21b   : > { %6030 = vmatpush3.bf16.msra.mxu1 %v6619_v31  ;;  %6021 = vmatprep.mubr.msk.bf16.mxu1 %vm8686_vm10, %v2279_v27  ;;  %v2416_v31 = vpack.c.bf16 %v2406_v16, %v2405_v7  ;;  %v2414_v27 = vld [vmem:[#allocation2 + $0x77] sm:$0xff]  ;;  %vm8695_vm10 = vmmov %vm8676_vm1 }
 0x21c   : > { %6043 = vmatprep.subr.bf16.mxu1 %v6620_v41  ;;  %v6622_v16 = vld [vmem:[%s8530_s2 + $0x78] sm:$0xff]  }
 0x222   : > { %6022 = vmatmul.mubr.msk.bf16.gmra.mrb[16].mxu1 %vm8687_vm8, %v2280_v36  ;;  %v2542_v36 = vld [vmem:[#allocation2 + $0x28] sm:$0xff]  ;;  %vm8696_vm8 = vmmov %vm8676_vm1 }
 0x223   : > { %6025 = vmatprep.mubr.msk.bf16.mxu1 %vm8688_vm7, %v2281_v55  ;;  %v2420_v55 = vpack.c.bf16 %v2414_v27, %v2413_v40  ;;  %v2553_v59 = vpack.c.bf16 %v2542_v36, %v7483_v44  ;;  %vm8697_vm7 = vmmov %vm8676_vm1  ;;  %v2547_v44 = vld [vmem:[#allocation2 + $0x50] sm:$0xff]  ;;  %v2558_v40 = vpack.c.bf16 %v2552_v56, %v2551_v39  ;;  %v2682_v36 = vld [vmem:[#allocation2 + $0x39] sm:$0xff]  ;;  %v2829_v39 = vpack.c.bf16 %v7545_v6, %v7543_v5 }
 0x224   : > { %v2556_v0 = vpack.c.bf16 %v2548_v37, %v2547_v44  ;;  %v2688_v44 = vld [vmem:[#allocation2 + $0x69] sm:$0xff]  ;;  %v2826_v5 = vld [vmem:[#allocation2 + $0x73] sm:$0xff]  ;;  %v2832_v6 = vpack.c.bf16 %v7571_v14, %v7563_v8  ;;  %v2969_v8 = vpack.c.bf16 %v7517_v58, %v7515_v50  ;;  %v2970_v14 = vpack.c.bf16 %v7527_v53, %v7519_v1 }
 0x225   : > { %v6624_v56 = vld [vmem:[%s8530_s2 + $0x88] sm:$0xff]   ;;  %v3105_v50 = vpack.c.bf16 %v7581_v29, %v7579_v43  ;;  %v3106_v58 = vpack.c.bf16 %v7593_v35, %v7583_v22  ;;  %v3107_v1 = vpack.c.bf16 %v7597_v18, %v7595_v61  ;;  %v3102_v53 = vld [vmem:[#allocation2 + $0x75] sm:$0xff]  ;;  %v3233_v35 = vsub.s32 1, %v6928_v52  ;;  %v7698_v61 = vld [vmem:[%s8533_s5] sm:$0xf] }
 0x226   : > { %v3104_v43 = vld [vmem:[#allocation2 + $0x85] sm:$0xff]  ;;  %v6625_v22 = vld [vmem:[%s8530_s2 + $0x98] sm:$0xff]  }
 0x227   : > { %6113 = vmatprep.subr.bf16.mxu0 %v6625_v22  ;;  %v3234_v18 = vrot.slane %v7698_v61, %v3233_v35 }
 0x228   : > { %6114 = vmatpush3.bf16.msra.mxu0 %v6625_v22 }
 0x22a   : > { %6026 = vmatmul.mubr.msk.bf16.gmra.mrb[20].mxu1 %vm8689_vm4, %v2282_v3  ;;  %v2544_v3 = vld [vmem:[#allocation2 + $0x38] sm:$0xff]  ;;  %vm8698_vm4 = vmmov %vm8676_vm1 }
 0x22b   : > { %6031 = vmatprep.mubr.msk.bf16.mxu1 %vm8690_vm14, %v2415_v23  ;;  %v2546_v23 = vld [vmem:[#allocation2 + $0x48] sm:$0xff]  ;;  %vm8699_vm14 = vmmov %vm8676_vm1 }
 0x22c   : > { %v2555_v4 = vpack.c.bf16 %v2546_v23, %v2545_v12  ;;  %v2685_v23 = vld [vmem:[#allocation2 + $0x51] sm:$0xff] }
 0x232   : > { %6032 = vmatmul.mubr.msk.bf16.vlgmr.msra.gmra.mrb[12].mxu1 %vm8691_vm5, %v2416_v31  ;;  %v2549_v31 = vld [vmem:[#allocation2 + $0x60] sm:$0xff]  ;;  %vm8700_vm5 = vmmov %vm8676_vm1 }
 0x233   : > { %6044 = vmatpush3.bf16.msra.mxu1 %v6620_v41  ;;  %6035 = vmatprep.mubr.msk.bf16.mxu1 %vm8692_vm12, %v2417_v10  ;;  %v2543_v41 = vld [vmem:[#allocation2 + $0x30] sm:$0xff]  ;;  %v2550_v10 = vld [vmem:[#allocation2 + $0x68] sm:$0xff]  ;;  %vm8701_vm12 = vmmov %vm8676_vm1 }
 0x234   : > { %6057 = vmatprep.subr.bf16.mxu1 %v6621_v60  ;;  %v2554_v7 = vpack.c.bf16 %v2544_v3, %v2543_v41  ;;  %v2557_v13 = vpack.c.bf16 %v2550_v10, %v2549_v31  ;;  %v6623_v3 = vld [vmem:[%s8530_s2 + $0x80] sm:$0xff]  }
 0x235   : > { %v2690_v10 = vld [vmem:[#allocation2 + $0x79] sm:$0xff] }
 0x23a   : > { %6036 = vmatmul.mubr.msk.bf16.gmra.mrb[16].mxu1 %vm8693_vm11, %v2418_v9  ;;  %v2679_v9 = vld [vmem:[#allocation2 + $0x21] sm:$0xff]  ;;  %vm8702_vm11 = vmmov %vm8676_vm1 }
 0x23b   : > { %6039 = vmatprep.mubr.msk.bf16.mxu1 %vm8676_vm1, %v2419_v38  ;;  %v2680_v38 = vld [vmem:[#allocation2 + $0x29] sm:$0xff] }
 0x23c   : > { %v2691_v27 = vpack.c.bf16 %v2680_v38, %v2679_v9  ;;  %v2831_v9 = vpack.c.bf16 %v7561_v48, %v7559_v51  ;;  %v2833_v38 = vpack.c.bf16 %v2826_v5, %v7573_v32  ;;  %v2967_v51 = vpack.c.bf16 %v7499_v17, %v7497_v49  ;;  %v2965_v17 = vld [vmem:[#allocation2 + $0x7c] sm:$0xff] }
 0x23d   : > { %v2968_v48 = vpack.c.bf16 %v7513_v28, %v7501_v19  ;;  %v2971_v49 = vpack.c.bf16 %v7531_v2, %v7529_v62  ;;  %v2966_v19 = vld [vmem:[#allocation2 + $0x84] sm:$0xff]  ;;  %v3108_v62 = vpack.c.bf16 %v7607_v63, %v7599_v20  ;;  %v3109_v2 = vpack.c.bf16 %v3102_v53, %v7609_v57 }
 0x23e   : > { %v2972_v28 = vpack.c.bf16 %v2966_v19, %v2965_v17  ;;  %v3103_v32 = vld [vmem:[#allocation2 + $0x7d] sm:$0xff] }
 0x23f   : > { %v3110_v29 = vpack.c.bf16 %v3104_v43, %v3103_v32 }
 0x242   : > { %6040 = vmatmul.mubr.msk.bf16.gmra.mrb[20].mxu1 %vm8694_vm13, %v2420_v55  ;;  %v2683_v55 = vld [vmem:[#allocation2 + $0x41] sm:$0xff]  ;;  %vm8703_vm13 = vmmov %vm8676_vm1 }
 0x243   : > { %6045 = vmatprep.mubr.msk.bf16.mxu1 %vm8695_vm10, %v2553_v59  ;;  %v2684_v59 = vld [vmem:[#allocation2 + $0x49] sm:$0xff]  ;;  %vm8704_vm10 = vmmov %vm8676_vm1 }
 0x244   : > { %v2693_v12 = vpack.c.bf16 %v2684_v59, %v2683_v55 }
 0x24a   : > { %6046 = vmatmul.mubr.msk.bf16.vlgmr.msra.gmra.mrb[12].mxu1 %vm8696_vm8, %v2554_v7  ;;  %v2686_v7 = vld [vmem:[#allocation2 + $0x59] sm:$0xff]  ;;  %vm8705_vm8 = vmmov %vm8676_vm1 }
 0x24b   : > { %6058 = vmatpush3.bf16.msra.mxu1 %v6621_v60  ;;  %6049 = vmatprep.mubr.msk.bf16.mxu1 %vm8697_vm7, %v2555_v4  ;;  %v2681_v60 = vld [vmem:[#allocation2 + $0x31] sm:$0xff]  ;;  %v2687_v4 = vld [vmem:[#allocation2 + $0x61] sm:$0xff]  ;;  %v2694_v37 = vpack.c.bf16 %v2686_v7, %v2685_v23  ;;  %vm8706_vm7 = vmmov %vm8676_vm1 }
 0x24c   : > { %6071 = vmatprep.subr.bf16.mxu1 %v6622_v16  ;;  %v2692_v41 = vpack.c.bf16 %v2682_v36, %v2681_v60  ;;  %v2695_v31 = vpack.c.bf16 %v2688_v44, %v2687_v4 }
 0x252   : > { %6050 = vmatmul.mubr.msk.bf16.gmra.mrb[16].mxu1 %vm8698_vm4, %v2556_v0  ;;  %v2689_v0 = vld [vmem:[#allocation2 + $0x71] sm:$0xff]  ;;  %vm8707_vm4 = vmmov %vm8676_vm1 }
 0x253   : > { %6053 = vmatprep.mubr.msk.bf16.mxu1 %vm8699_vm14, %v2557_v13  ;;  %v2696_v13 = vpack.c.bf16 %v2690_v10, %v2689_v0  ;;  %vm8708_vm14 = vmmov %vm8676_vm1 }
 0x25a   : > { %6054 = vmatmul.mubr.msk.bf16.gmra.mrb[20].mxu1 %vm8700_vm5, %v2558_v40  ;;  %vm8709_vm5 = vmmov %vm8676_vm1 }
 0x25b   : > { %6059 = vmatprep.mubr.msk.bf16.mxu1 %vm8701_vm12, %v2691_v27  ;;  %vm8710_vm12 = vmmov %vm8676_vm1  ;;  %v7706_v27 = vld [vmem:[%s8530_s2 + $0x90] sm:$0xff]  }
 0x25c   : > { %6127 = vmatprep.subr.bf16.mxu0 %v7706_v27 }
 0x262   : > { %6060 = vmatmul.mubr.msk.bf16.vlgmr.msra.gmra.mrb[12].mxu1 %vm8702_vm11, %v2692_v41  ;;  %vm8711_vm11 = vmmov %vm8676_vm1 }
 0x263   : > { %6072 = vmatpush3.bf16.msra.mxu1 %v6622_v16  ;;  %6063 = vmatprep.mubr.msk.bf16.mxu1 %vm8676_vm1, %v2693_v12  ;;  %v2830_v16 = vpack.c.bf16 %v7557_v46, %v7547_v15  ;;  %v2827_v15 = vld [vmem:[#allocation2 + $0x7b] sm:$0xff]  ;;  %v2828_v46 = vld [vmem:[#allocation2 + $0x83] sm:$0xff] }
 0x264   : > { %6085 = vmatprep.subr.bf16.mxu1 %v6623_v3  ;;  %v2834_v40 = vpack.c.bf16 %v2828_v46, %v2827_v15  ;;  %v6661_v46 = vmov 0.0  }
 0x26a   : > { %6064 = vmatmul.mubr.msk.bf16.gmra.mrb[16].mxu1 %vm8703_vm13, %v2694_v37  ;;  %vm8712_vm13 = vmmov %vm8676_vm1 }
 0x26b   : > { %6067 = vmatprep.mubr.msk.bf16.mxu1 %vm8704_vm10, %v2695_v31  ;;  %vm8713_vm10 = vmmov %vm8676_vm1 }
 0x272   : > { %6068 = vmatmul.mubr.msk.bf16.gmra.mrb[20].mxu1 %vm8705_vm8, %v2696_v13  ;;  %vm8714_vm8 = vmmov %vm8676_vm1 }
 0x273   : > { %6073 = vmatprep.mubr.msk.bf16.mxu1 %vm8706_vm7, %v2829_v39  ;;  %vm8715_vm7 = vmmov %vm8676_vm1 }
 0x27a   : > { %6074 = vmatmul.mubr.msk.bf16.vlgmr.msra.gmra.mrb[12].mxu1 %vm8707_vm4, %v2830_v16  ;;  %vm8716_vm4 = vmmov %vm8676_vm1 }
 0x27b   : > { %6086 = vmatpush3.bf16.msra.mxu1 %v6623_v3  ;;  %6077 = vmatprep.mubr.msk.bf16.mxu1 %vm8708_vm14, %v2831_v9  ;;  %vm8717_vm14 = vmmov %vm8676_vm1 }
 0x27c   : > { %6099 = vmatprep.subr.bf16.mxu1 %v6624_v56 }
 0x282   : > { %6078 = vmatmul.mubr.msk.bf16.gmra.mrb[16].mxu1 %vm8709_vm5, %v2832_v6  ;;  %vm8718_vm5 = vmmov %vm8676_vm1 }
 0x283   : > { %6081 = vmatprep.mubr.msk.bf16.mxu1 %vm8710_vm12, %v2833_v38  ;;  %vm8719_vm12 = vmmov %vm8676_vm1 }
 0x28a   : > { %6082 = vmatmul.mubr.msk.bf16.gmra.mrb[20].mxu1 %vm8711_vm11, %v2834_v40  ;;  %vm8720_vm11 = vmmov %vm8676_vm1 }
 0x28b   : > { %6087 = vmatprep.mubr.msk.bf16.mxu1 %vm8676_vm1, %v2967_v51 }
 0x292   : > { %6088 = vmatmul.mubr.msk.bf16.vlgmr.msra.gmra.mrb[12].mxu1 %vm8712_vm13, %v2968_v48  ;;  %vm8721_vm13 = vmmov %vm8676_vm1 }
 0x293   : > { %6100 = vmatpush3.bf16.msra.mxu1 %v6624_v56  ;;  %6091 = vmatprep.mubr.msk.bf16.mxu1 %vm8713_vm10, %v2969_v8  ;;  %vm8722_vm10 = vmmov %vm8676_vm1 }
 0x29a   : > { %6092 = vmatmul.mubr.msk.bf16.gmra.mrb[16].mxu1 %vm8714_vm8, %v2970_v14  ;;  %vm8723_vm8 = vmmov %vm8676_vm1 }
 0x29b   : > { %6095 = vmatprep.mubr.msk.bf16.mxu1 %vm8715_vm7, %v2971_v49  ;;  %vm8724_vm7 = vmmov %vm8676_vm1 }
 0x2a2   : > { %6096 = vmatmul.mubr.msk.bf16.gmra.mrb[20].mxu1 %vm8716_vm4, %v2972_v28  ;;  %vm8725_vm4 = vmmov %vm8676_vm1 }
 0x2a3   : > { %6101 = vmatprep.mubr.msk.bf16.mxu1 %vm8717_vm14, %v3105_v50  ;;  %516 = vst.msk [vmem:[#allocation2] sm:$0xff] %vm8725_vm4, %v6661_v46  ;;  %vm8726_vm14 = vmmov %vm8676_vm1 }
 0x2a4   : > { %517 = vst.msk [vmem:[#allocation2 + $0x98] sm:$0xff] %vm8726_vm14, %v6661_v46  ;;  %vm8734_vm4 = vmmov %vm8676_vm1  ;;  %vm8735_vm14 = vnez %v8603_v25 }
 0x2aa   : > { %6102 = vmatmul.mubr.msk.bf16.vlgmr.msra.gmra.mrb[12].mxu1 %vm8718_vm5, %v3106_v58  ;;  %vm8727_vm5 = vmmov %vm8676_vm1 }
 0x2ab   : > { %6105 = vmatprep.mubr.msk.bf16.mxu1 %vm8719_vm12, %v3107_v1  ;;  %vm8728_vm12 = vmmov %vm8676_vm1 }
 0x2b2   : > { %6106 = vmatmul.mubr.msk.bf16.gmra.mrb[16].mxu1 %vm8720_vm11, %v3108_v62  ;;  %vm8729_vm11 = vnez %v8592_v30 }
 0x2b3   : > { %6109 = vmatprep.mubr.msk.bf16.mxu1 %vm8676_vm1, %v3109_v2 }
 0x2ba   : > { %6110 = vmatmul.mubr.msk.bf16.gmra.mrb[20].mxu1 %vm8721_vm13, %v3110_v29  ;;  %vm8730_vm13 = vnez %v8597_v45 }
 0x37d   : > { %v6103_v20 = vpop.f32.mrb[12].mxu1 }
 0x37e   : > { %v7701_v63 = vadd.f32 %v6103_v20, %v3234_v18  ;;  %v3172_v57 = vpop.f32.mrb[13].mxu1 }
 0x37f   : > { %v7708_v60 = vadd.f32 %v3234_v18, %v3172_v57  ;;  %v6104_v36 = vpop.f32.mrb[14].mxu1 }
 0x380   : > { %v7710_v55 = vadd.f32 %v6104_v36, %v3234_v18  ;;  %v3175_v59 = vpop.f32.mrb[15].mxu1  ;;  %v3249_v41 = vmax.f32 %v7701_v63, 0.0 }
 0x381   : > { %v3247_v3 = vmax.f32 %v7708_v60, 0.0  ;;  %v7715_v12 = vadd.f32 %v3234_v18, %v3175_v59 }
 0x382   : > { %v3250_v7 = vmax.f32 %v7710_v55, 0.0  ;;  %v3261_v44 = vsel %vm7103_vm9, %v3249_v41, 0.0 }
 0x383   : > { %v3259_v23 = vsel %vm7121_vm2, %v3247_v3, 0.0  ;;  %v3248_v4 = vmax.f32 %v7715_v12, 0.0  ;;  %v3274_v6 = vsel %vm8724_vm7, %v3261_v44, 0.0  ;;  %vm8733_vm7 = vnez %v8600_v21 }
 0x384   : > { %v3271_v10 = vsel %vm8722_vm10, %v3259_v23, 0.0  ;;  %v3262_v16 = vsel %vm7174_vm15, %v3250_v7, 0.0  ;;  %vm8731_vm10 = vmmov %vm8676_vm1 }
 0x385   : > { %v3260_v37 = vsel %vm7156_vm3, %v3248_v4, 0.0  ;;  %v6107_v31 = vpop.f32.mrb[16].mxu1  ;;  %v3276_v14 = vsel %vm8727_vm5, %v3262_v16, 0.0  ;;  %vm8736_vm5 = vnez %v8608_v33 }
 0x386   : > { %v3272_v0 = vsel %vm8723_vm8, %v3260_v37, 0.0  ;;  %v7733_v13 = vadd.f32 %v6107_v31, %v3234_v18  ;;  %v3188_v39 = vpop.f32.mrb[17].mxu1  ;;  %vm8732_vm8 = vmmov %vm8676_vm1 }
 0x387   : > { %v3273_v56 = vadd.f32 %v3272_v0, %v3271_v10  ;;  %v7739_v9 = vadd.f32 %v3234_v18, %v3188_v39  ;;  %v6108_v5 = vpop.f32.mrb[18].mxu1 }
 0x388   : > { %v7742_v38 = vadd.f32 %v6108_v5, %v3234_v18  ;;  %v3191_v15 = vpop.f32.mrb[19].mxu1  ;;  %v3253_v51 = vmax.f32 %v7733_v13, 0.0 }
 0x389   : > { %v3275_v40 = vadd.f32 %v3274_v6, %v3273_v56  ;;  %v3251_v48 = vmax.f32 %v7739_v9, 0.0  ;;  %v3240_v8 = vadd.f32 %v3234_v18, %v3191_v15 }
 0x38a   : > { %v3254_v19 = vmax.f32 %v7742_v38, 0.0  ;;  %v3265_v58 = vsel %vm8618_vm6, %v3253_v51, 0.0 }
 0x38b   : > { %v3263_v49 = vsel %vm7224_vm0, %v3251_v48, 0.0  ;;  %v3277_v17 = vadd.f32 %v3276_v14, %v3275_v40  ;;  %v3252_v28 = vmax.f32 %v3240_v8, 0.0  ;;  %v3282_v57 = vsel %vm8731_vm10, %v3265_v58, 0.0  ;;  %vm8739_vm10 = vmmov %vm8734_vm4 }
 0x38c   : > { %v3278_v50 = vsel %vm8728_vm12, %v3263_v49, 0.0  ;;  %v3266_v29 = vsel %vm8730_vm13, %v3254_v19, 0.0  ;;  %vm8737_vm12 = vmmov %vm8676_vm1 }
 0x38d   : > { %v3279_v1 = vadd.f32 %v3278_v50, %v3277_v17  ;;  %v3264_v53 = vsel %vm8729_vm11, %v3252_v28, 0.0  ;;  %v6111_v62 = vpop.f32.mrb[20].mxu1  ;;  %v3284_v10 = vsel %vm8732_vm8, %v3266_v29, 0.0  ;;  %vm8740_vm8 = vmmov %vm8734_vm4 }
 0x38e   : > { %v3280_v2 = vsel %vm8676_vm1, %v3264_v53, 0.0  ;;  %v3245_v32 = vadd.f32 %v6111_v62, %v3234_v18  ;;  %v3204_v43 = vpop.f32.mrb[21].mxu1  ;;  %vm8738_vm1 = vnez %v8612_v24 }
 0x38f   : > { %v3281_v22 = vadd.f32 %v3280_v2, %v3279_v1  ;;  %v3243_v35 = vadd.f32 %v3234_v18, %v3204_v43  ;;  %v6112_v20 = vpop.f32.mrb[22].mxu1 }
 0x390   : > { %v3246_v36 = vadd.f32 %v6112_v20, %v3234_v18  ;;  %v3207_v59 = vpop.f32.mrb[23].mxu1  ;;  %v3257_v44 = vmax.f32 %v3245_v32, 0.0 }
 0x391   : > { %v3283_v23 = vadd.f32 %v3282_v57, %v3281_v22  ;;  %v3255_v37 = vmax.f32 %v3243_v35, 0.0  ;;  %v3244_v31 = vadd.f32 %v3234_v18, %v3207_v59 }
 0x392   : > { %v3258_v39 = vmax.f32 %v3246_v36, 0.0  ;;  %v3269_v9 = vsel %vm8735_vm14, %v3257_v44, 0.0 }
 0x393   : > { %v3267_v0 = vsel %vm8733_vm7, %v3255_v37, 0.0  ;;  %v3285_v13 = vadd.f32 %v3284_v10, %v3283_v23  ;;  %v3256_v16 = vmax.f32 %v3244_v31, 0.0  ;;  %v3290_v46 = vsel %vm8739_vm10, %v3269_v9, 0.0  ;;  %vm8742_vm10 = vmmov %vm8734_vm4 }
 0x394   : > { %v3286_v56 = vsel %vm8734_vm4, %v3267_v0, 0.0  ;;  %v3270_v18 = vsel %vm8738_vm1, %v3258_v39, 0.0 }
 0x395   : > { %v3287_v5 = vadd.f32 %v3286_v56, %v3285_v13  ;;  %v3268_v6 = vsel %vm8736_vm5, %v3256_v16, 0.0  ;;  %v3292_v8 = vsel %vm8740_vm8, %v3270_v18, 0.0  ;;  %vm8743_vm8 = vmmov %vm8734_vm4 }
 0x396   : > { %v3288_v38 = vsel %vm8737_vm12, %v3268_v6, 0.0  ;;  %vm8741_vm12 = vmmov %vm8734_vm4 }
 0x397   : > { %v3289_v15 = vadd.f32 %v3288_v38, %v3287_v5 }
 0x399   : > { %v3291_v40 = vadd.f32 %v3290_v46, %v3289_v15 }
 0x39b   : > { %v3293_v14 = vadd.f32 %v3292_v8, %v3291_v40 }
 0x39d   : > { %v3294_v49 = vrot.slane %v3293_v14, 4 }
 0x39f   : > { %v3295_v17 = vadd.f32 %v3294_v49, %v3293_v14 }
 0x3a1   : > { %v3296_v50 = vrot.slane %v3295_v17, 2 }
 0x3a3   : > { %v3297_v58 = vadd.f32 %v3296_v50, %v3295_v17 }
 0x3a5   : > { %v3298_v1 = vrot.slane %v3297_v58, 1 }
 0x3a7   : > { %v3299_v53 = vadd.f32 %v3298_v1, %v3297_v58 }
 0x3a9   : > { %v3300_v62 = vmul.f32 0.015625, %v3299_v53 }
 0x3ab   : > { %v7776_v2 = vsub.f32 %v3247_v3, %v3300_v62  ;;  %v7780_v32 = vsub.f32 %v3248_v4, %v3300_v62  ;;  %v7784_v43 = vsub.f32 %v3249_v41, %v3300_v62  ;;  %v7788_v29 = vsub.f32 %v3250_v7, %v3300_v62 }
 0x3ac   : > { %v7790_v22 = vsub.f32 %v3251_v48, %v3300_v62  ;;  %v7792_v35 = vsub.f32 %v3252_v28, %v3300_v62  ;;  %v7794_v20 = vsub.f32 %v3253_v51, %v3300_v62  ;;  %v7796_v60 = vsub.f32 %v3254_v19, %v3300_v62 }
 0x3ad   : > { %v7798_v3 = vsub.f32 %v3255_v37, %v3300_v62  ;;  %v7800_v12 = vsub.f32 %v3256_v16, %v3300_v62  ;;  %v7802_v4 = vsub.f32 %v3257_v44, %v3300_v62  ;;  %v7804_v63 = vsub.f32 %v3258_v39, %v3300_v62 }
 0x3ae   : > { %v3313_v55 = vsel %vm7121_vm2, %v7776_v2, 0.0  ;;  %v3314_v41 = vsel %vm7156_vm3, %v7780_v32, 0.0  ;;  %v3315_v7 = vsel %vm7103_vm9, %v7784_v43, 0.0  ;;  %v3316_v51 = vsel %vm7174_vm15, %v7788_v29, 0.0 }
 0x3af   : > { %v3325_v48 = vmul.f32 %v3313_v55, %v3313_v55  ;;  %v3326_v19 = vmul.f32 %v3314_v41, %v3314_v41  ;;  %v3327_v28 = vmul.f32 %v3315_v7, %v3315_v7  ;;  %v3317_v57 = vsel %vm7224_vm0, %v7790_v22, 0.0 }
 0x3b0   : > { %v3328_v36 = vmul.f32 %v3316_v51, %v3316_v51  ;;  %v3318_v44 = vsel %vm8729_vm11, %v7792_v35, 0.0  ;;  %v3329_v31 = vmul.f32 %v3317_v57, %v3317_v57  ;;  %v3319_v0 = vsel %vm8618_vm6, %v7794_v20, 0.0 }
 0x3b1   : > { %v3337_v59 = vsel %vm8734_vm4, %v3325_v48, 0.0  ;;  %v3338_v23 = vsel %vm8741_vm12, %v3326_v19, 0.0  ;;  %v3340_v10 = vsel %vm8742_vm10, %v3327_v28, 0.0  ;;  %v3330_v39 = vmul.f32 %v3318_v44, %v3318_v44  ;;  %vm8744_vm12 = vmmov %vm8734_vm4 }
 0x3b2   : > { %v3339_v37 = vadd.f32 %v3338_v23, %v3337_v59  ;;  %v3342_v16 = vsel %vm8743_vm8, %v3328_v36, 0.0  ;;  %v3320_v56 = vsel %vm8730_vm13, %v7796_v60, 0.0  ;;  %v3331_v5 = vmul.f32 %v3319_v0, %v3319_v0  ;;  %vm8745_vm10 = vmmov %vm8734_vm4 }
 0x3b3   : > { %v3344_v6 = vsel %vm8734_vm4, %v3329_v31, 0.0  ;;  %v3321_v38 = vsel %vm8733_vm7, %v7798_v3, 0.0  ;;  %v3332_v15 = vmul.f32 %v3320_v56, %v3320_v56  ;;  %v3346_v46 = vsel %vm8744_vm12, %v3330_v39, 0.0  ;;  %vm8746_vm8 = vmmov %vm8734_vm4 }
 0x3b4   : > { %v3341_v13 = vadd.f32 %v3340_v10, %v3339_v37  ;;  %v3322_v40 = vsel %vm8736_vm5, %v7800_v12, 0.0  ;;  %v3333_v14 = vmul.f32 %v3321_v38, %v3321_v38  ;;  %v3348_v49 = vsel %vm8745_vm10, %v3331_v5, 0.0  ;;  %vm8747_vm12 = vmmov %vm8734_vm4 }
 0x3b5   : > { %v3323_v17 = vsel %vm8735_vm14, %v7802_v4, 0.0  ;;  %v3334_v58 = vmul.f32 %v3322_v40, %v3322_v40  ;;  %v3350_v1 = vsel %vm8746_vm8, %v3332_v15, 0.0  ;;  %v3324_v53 = vsel %vm8738_vm1, %v7804_v63, 0.0  ;;  %vm8748_vm10 = vmmov %vm8734_vm4 }
 0x3b6   : > { %v3343_v9 = vadd.f32 %v3342_v16, %v3341_v13  ;;  %v3335_v55 = vmul.f32 %v3323_v17, %v3323_v17  ;;  %v3352_v41 = vsel %vm8734_vm4, %v3333_v14, 0.0  ;;  %v3336_v51 = vmul.f32 %v3324_v53, %v3324_v53  ;;  %vm8749_vm5 = vmmov %vm8734_vm4 }
 0x3b7   : > { %v3354_v48 = vsel %vm8747_vm12, %v3334_v58, 0.0  ;;  %vm8751_vm8 = vmmov %vm8734_vm4 }
 0x3b8   : > { %v3345_v18 = vadd.f32 %v3344_v6, %v3343_v9  ;;  %v3356_v28 = vsel %vm8748_vm10, %v3335_v55, 0.0  ;;  %v3358_v36 = vsel %vm8749_vm5, %v3336_v51, 0.0  ;;  %vm8750_vm5 = vmmov %vm8734_vm4 }
 0x3b9   : > { %vm8752_vm12 = vmmov %vm8734_vm4 }
 0x3ba   : > { %v3347_v8 = vadd.f32 %v3346_v46, %v3345_v18  ;;  %vm8753_vm10 = vmmov %vm8734_vm4 }
 0x3bb   : > { %vm8754_vm1 = vmmov %vm8734_vm4 }
 0x3bc   : > { %v3349_v50 = vadd.f32 %v3348_v49, %v3347_v8  ;;  %vm8755_vm14 = vmmov %vm8754_vm1 }
 0x3bd   : > { %vm8756_vm7 = vmmov %vm8754_vm1 }
 0x3be   : > { %v3351_v62 = vadd.f32 %v3350_v1, %v3349_v50 }
 0x3c0   : > { %v3353_v7 = vadd.f32 %v3352_v41, %v3351_v62 }
 0x3c2   : > { %v3355_v19 = vadd.f32 %v3354_v48, %v3353_v7 }
 0x3c4   : > { %v3357_v57 = vadd.f32 %v3356_v28, %v3355_v19 }
 0x3c6   : > { %v3359_v59 = vadd.f32 %v3358_v36, %v3357_v57 }
 0x3c8   : > { %v3360_v23 = vrot.slane %v3359_v59, 4 }
 0x3ca   : > { %v3361_v44 = vadd.f32 %v3360_v23, %v3359_v59 }
 0x3cc   : > { %v3362_v37 = vrot.slane %v3361_v44, 2 }
 0x3ce   : > { %v3363_v31 = vadd.f32 %v3362_v37, %v3361_v44 }
 0x3d0   : > { %v3364_v10 = vrot.slane %v3363_v31, 1 }
 0x3d2   : > { %v3365_v0 = vadd.f32 %v3364_v10, %v3363_v31 }
 0x3d4   : > { %v3366_v13 = vmul.f32 0.015625, %v3365_v0 }
 0x3d6   : > { %v3367_v39 = vadd.f32 1e-05, %v3366_v13 }
 0x3d8   : > { %6645 = vrsqrt.f32 %v3367_v39 }
 0x3e2   : > { %v6646_v16 = vpop.eup %6645 }
 0x3e3   : > { %v3369_v56 = vmul.f32 %v6646_v16, %v7776_v2  ;;  %v3370_v9 = vmul.f32 %v6646_v16, %v7780_v32  ;;  %v3371_v5 = vmul.f32 %v6646_v16, %v7784_v43  ;;  %v3372_v6 = vmul.f32 %v6646_v16, %v7788_v29 }
 0x3e4   : > { %v3373_v38 = vmul.f32 %v6646_v16, %v7790_v22  ;;  %v3374_v18 = vmul.f32 %v6646_v16, %v7792_v35  ;;  %v3375_v15 = vmul.f32 %v6646_v16, %v7794_v20  ;;  %v3376_v46 = vmul.f32 %v6646_v16, %v7796_v60 }
 0x3e5   : > { %v7863_v40 = vmul.f32 %v6646_v16, %v7798_v3  ;;  %v7866_v8 = vmul.f32 %v6646_v16, %v7800_v12  ;;  %v7869_v2 = vmul.f32 %v6646_v16, %v7802_v4  ;;  %v7872_v32 = vmul.f32 %v6646_v16, %v7804_v63  ;;  %3381 = vst.msk [vmem:[#allocation2 + $0x20] sm:$0xff] %vm8750_vm5, %v3369_v56  ;;  %vm8757_vm5 = vmmov %vm8754_vm1 }
 0x3e6   : > { %3382 = vst.msk [vmem:[#allocation2 + $0x28] sm:$0xff] %vm8751_vm8, %v3370_v9  ;;  %v3394_v43 = vrot.slane %v3369_v56, 2  ;;  %v3396_v29 = vrot.slane %v3369_v56, 1  ;;  %v3401_v22 = vrot.slane %v3370_v9, 1  ;;  %v3405_v35 = vrot.slane %v3370_v9, 6  ;;  %vm8758_vm8 = vmmov %vm8754_vm1 }
 0x3e7   : > { %3383 = vst.msk [vmem:[#allocation2 + $0x30] sm:$0xff] %vm8734_vm4, %v3371_v5  ;;  %v3407_v20 = vrot.slane %v3370_v9, 5  ;;  %v3412_v60 = vrot.slane %v3371_v5, 5  ;;  %v3414_v3 = vrot.slane %v3371_v5, 4  ;;  %v3419_v12 = vrot.slane %v3372_v6, 2  ;;  %vm8759_vm4 = vmmov %vm8754_vm1 }
 0x3e8   : > { %3384 = vst.msk [vmem:[#allocation2 + $0x38] sm:$0xff] %vm8752_vm12, %v3372_v6  ;;  %vm8760_vm12 = vmmov %vm8754_vm1  ;;  %v3421_v14 = vrot.slane %v3372_v6, 1  ;;  %v3426_v49 = vrot.slane %v3373_v38, 1  ;;  %v3430_v58 = vrot.slane %v3373_v38, 6  ;;  %v3432_v1 = vrot.slane %v3373_v38, 5 }
 0x3e9   : > { %3385 = vst.msk [vmem:[#allocation2 + $0x40] sm:$0xff] %vm8753_vm10, %v3373_v38  ;;  %v3437_v55 = vrot.slane %v3374_v18, 5  ;;  %v3439_v41 = vrot.slane %v3374_v18, 4  ;;  %v3444_v51 = vrot.slane %v3375_v15, 2  ;;  %v3446_v48 = vrot.slane %v3375_v15, 1 }
 0x3ea   : > { %3386 = vst.msk [vmem:[#allocation2 + $0x48] sm:$0xff] %vm8754_vm1, %v3374_v18  ;;  %vm8761_vm1 = vcmask 1040384   ;;  %v3451_v19 = vrot.slane %v3376_v46, 1  ;;  %v3455_v57 = vrot.slane %v3376_v46, 6  ;;  %v3457_v36 = vrot.slane %v3376_v46, 5 }
 0x3eb   : > { %3387 = vst.msk [vmem:[#allocation2 + $0x50] sm:$0xff] %vm8755_vm14, %v3375_v15  ;;  %v3398_v4 = vsel %vm8761_vm1, %v3394_v43, %v3396_v29  ;;  %vm8762_vm14 = vmmov %vm8761_vm1  ;;  %v3462_v59 = vrot.slane %v7863_v40, 5  ;;  %v3464_v37 = vrot.slane %v7863_v40, 4  ;;  %v3469_v31 = vrot.slane %v7866_v8, 2 }
 0x3ec   : > { %3388 = vst.msk [vmem:[#allocation2 + $0x58] sm:$0xff] %vm8756_vm7, %v3376_v46  ;;  %v3403_v63 = vsel %vm8762_vm14, %v3401_v22, %v3370_v9  ;;  %vm8763_vm7 = vcmask 123904   ;;  %vm8766_vm13 = vmmov %vm8761_vm1  ;;  %v3471_v0 = vrot.slane %v7866_v8, 1  ;;  %v3476_v13 = vrot.slane %v7869_v2, 1 }
 0x3ed   : > { %3389 = vst.msk [vmem:[#allocation2 + $0x60] sm:$0xff] %vm8757_vm5, %v7863_v40  ;;  %vm8764_vm10 = vmmov %vm8763_vm7  ;;  %v3416_v50 = vsel %vm8766_vm13, %v3412_v60, %v3414_v3  ;;  %v3480_v39 = vrot.slane %v7869_v2, 6  ;;  %v3482_v56 = vrot.slane %v7869_v2, 5  ;;  %v3487_v9 = vrot.slane %v7872_v32, 5  ;;  %v7946_v43 = vld [vmem:[#allocation2 + $0x22] sm:$0xff] }
 0x3ee   : > { %3390 = vst.msk [vmem:[#allocation2 + $0x68] sm:$0xff] %vm8758_vm8, %v7866_v8  ;;  %vm8765_vm5 = vmmov %vm8761_vm1  ;;  %v3489_v5 = vrot.slane %v7872_v32, 4 }
 0x3ef   : > { %3391 = vst.msk [vmem:[#allocation2 + $0x70] sm:$0xff] %vm8759_vm4, %v7869_v2  ;;  %v3409_v17 = vsel %vm8765_vm5, %v3405_v35, %v3407_v20  ;;  %vm8767_vm8 = vmmov %vm8761_vm1 }
 0x3f0   : > { %3392 = vst.msk [vmem:[#allocation2 + $0x78] sm:$0xff] %vm8760_vm12, %v7872_v32  ;;  %v3423_v53 = vsel %vm8767_vm8, %v3419_v12, %v3421_v14  ;;  %vm8768_vm4 = vmmov %vm8761_vm1 }
 0x3f1   : > { %3399 = vst.msk [vmem:[#allocation2 + $0x20] sm:$0x3] %vm8763_vm7, %v3398_v4  ;;  %v3428_v62 = vsel %vm8768_vm4, %v3426_v49, %v3373_v38  ;;  %vm8769_vm12 = vmmov %vm8763_vm7  ;;  %v3453_v44 = vsel %vm8768_vm4, %v3451_v19, %v3376_v46  ;;  %v7962_v4 = vld [vmem:[#allocation2 + $0x3a] sm:$0xff] }
 0x3f2   : > { %3404 = vst.msk [vmem:[#allocation2 + $0x2a] sm:$0x3] %vm8764_vm10, %v3403_v63  ;;  %vm8770_vm1 = vmmov %vm8763_vm7 }
 0x3f3   : > { %3410 = vst.msk [vmem:[#allocation2 + $0x2c] sm:$0x3] %vm8769_vm12, %v3409_v17  ;;  %vm8771_vm14 = vmmov %vm8768_vm4 }
 0x3f4   : > { %3417 = vst.msk [vmem:[#allocation2 + $0x36] sm:$0x3] %vm8770_vm1, %v3416_v50  ;;  %v3434_v7 = vsel %vm8771_vm14, %v3430_v58, %v3432_v1  ;;  %vm8772_vm7 = vmmov %vm8770_vm1  ;;  %v7976_v1 = vld [vmem:[#allocation2 + $0x52] sm:$0xff] }
 0x3f5   : > { %3424 = vst.msk [vmem:[#allocation2 + $0x38] sm:$0x3] %vm8772_vm7, %v3423_v53  ;;  %vm8773_vm13 = vmmov %vm8770_vm1  ;;  %v6629_v50 = vld [vmem:[%s8530_s2 + $0xb0] sm:$0xff]  }
 0x3f6   : > { %3429 = vst.msk [vmem:[#allocation2 + $0x42] sm:$0x3] %vm8773_vm13, %v3428_v62  ;;  %vm8774_vm10 = vmmov %vm8768_vm4 }
 0x3f7   : > { %v3441_v28 = vsel %vm8774_vm10, %v3437_v55, %v3439_v41  ;;  %vm8775_vm5 = vmmov %vm8770_vm1 }
 0x3f8   : > { %3435 = vst.msk [vmem:[#allocation2 + $0x44] sm:$0x3] %vm8775_vm5, %v3434_v7  ;;  %vm8776_vm8 = vmmov %vm8768_vm4  ;;  %v7926_v18 = vld [vmem:[#allocation2 + $0x20] sm:$0xff] }
 0x3f9   : > { %v3448_v23 = vsel %vm8776_vm8, %v3444_v51, %v3446_v48  ;;  %vm8777_vm12 = vmmov %vm8770_vm1  ;;  %v3494_v15 = vld [vmem:[#allocation2 + $0x28] sm:$0xf] }
 0x3fa   : > { %3442 = vst.msk [vmem:[#allocation2 + $0x4e] sm:$0x3] %vm8777_vm12, %v3441_v28  ;;  %vm8778_vm1 = vmmov %vm8768_vm4  ;;  %v7938_v8 = vld [vmem:[#allocation2 + $0x28] sm:$0xff] }
 0x3fb   : > { %v3459_v10 = vsel %vm8778_vm1, %v3455_v57, %v3457_v36  ;;  %vm8779_vm14 = vmmov %vm8775_vm5  ;;  %v3491_v40 = vsel %vm8778_vm1, %v3487_v9, %v3489_v5  ;;  %v7948_v29 = vld [vmem:[#allocation2 + $0x2a] sm:$0xff]  ;;  %v4045_v22 = vpack.c.bf16 %v7938_v8, %v7926_v18  ;;  %v6627_v57 = vld [vmem:[%s8530_s2 + $0xa0] sm:$0xff]  }
 0x3fc   : > { %3449 = vst.msk [vmem:[#allocation2 + $0x50] sm:$0x3] %vm8779_vm14, %v3448_v23  ;;  %vm8780_vm7 = vmmov %vm8775_vm5  ;;  %v7944_v32 = vld [vmem:[#allocation2 + $0x38] sm:$0xff] }
 0x3fd   : > { %3454 = vst.msk [vmem:[#allocation2 + $0x5a] sm:$0x3] %vm8780_vm7, %v3453_v44  ;;  %vm8781_vm13 = vmmov %vm8778_vm1  ;;  %v7954_v20 = vld [vmem:[#allocation2 + $0x32] sm:$0xff] }
 0x3fe   : > { %v3466_v16 = vsel %vm8781_vm13, %v3462_v59, %v3464_v37  ;;  %vm8782_vm10 = vmmov %vm8775_vm5  ;;  %vm8789_vm13 = vcmask 130048   ;;  %v3771_v3 = vpack.c.bf16 %v7954_v20, %v7948_v29 }
 0x3ff   : > { %3460 = vst.msk [vmem:[#allocation2 + $0x5c] sm:$0x3] %vm8782_vm10, %v3459_v10  ;;  %vm8783_vm5 = vmmov %vm8778_vm1  ;;  %vm8790_vm10 = vcmask 125952   ;;  %v7952_v35 = vld [vmem:[#allocation2 + $0x40] sm:$0xff] }
 0x400   : > { %v3473_v6 = vsel %vm8783_vm5, %v3469_v31, %v3471_v0  ;;  %vm8784_vm8 = vmmov %vm8778_vm1  ;;  %3495 = vst.msk [vmem:[#allocation2 + $0x8] sm:$0xff] %vm8789_vm13, %v7926_v18  ;;  %v7964_v63 = vld [vmem:[#allocation2 + $0x42] sm:$0xff]  ;;  %v8004_v31 = vld [vmem:[#allocation2 + $0x6a] sm:$0xff] }
 0x401   : > { %v3478_v38 = vsel %vm8784_vm8, %v3476_v13, %v7869_v2  ;;  %vm8785_vm4 = vmmov %vm8780_vm7  ;;  %3496 = vst.msk [vmem:[#allocation2 + $0x10] sm:$0xf] %vm8790_vm10, %v3494_v15  ;;  %v7940_v2 = vld [vmem:[#allocation2 + $0x30] sm:$0xff]  ;;  %v7960_v12 = vld [vmem:[#allocation2 + $0x48] sm:$0xff] }
 0x402   : > { %3467 = vst.msk [vmem:[#allocation2 + $0x66] sm:$0x3] %vm8785_vm4, %v3466_v16  ;;  %vm8786_vm12 = vmmov %vm8778_vm1  ;;  %v4046_v60 = vpack.c.bf16 %v7944_v32, %v7940_v2  ;;  %v3540_v36 = vpack.c.bf16 %v7940_v2, %v7938_v8  ;;  %v3516_v16 = vld [vmem:[#allocation2 + $0x5e] sm:$0xff] }
 0x403   : > { %v3484_v46 = vsel %vm8786_vm12, %v3480_v39, %v3482_v56  ;;  %vm8787_vm14 = vmmov %vm8785_vm4  ;;  %v7966_v14 = vld [vmem:[#allocation2 + $0x50] sm:$0xff]  ;;  %v8020_v56 = vpack.c.bf16 %v7952_v35, %v7944_v32 }
 0x404   : > { %3474 = vst.msk [vmem:[#allocation2 + $0x68] sm:$0x3] %vm8787_vm14, %v3473_v6  ;;  %vm8788_vm7 = vmmov %vm8785_vm4  ;;  %v7968_v49 = vld [vmem:[#allocation2 + $0x4a] sm:$0xff]  ;;  %v8024_v9 = vpack.c.bf16 %v7966_v14, %v7960_v12 }
 0x405   : > { %3479 = vst.msk [vmem:[#allocation2 + $0x72] sm:$0x3] %vm8788_vm7, %v3478_v38  ;;  %vm8791_vm5 = vmmov %vm8789_vm13 }
 0x406   : > { %3497 = vst.msk [vmem:[#allocation2 + $0x14] sm:$0xff] %vm8791_vm5, %v7926_v18  ;;  %vm8792_vm8 = vmmov %vm8790_vm10  ;;  %v7974_v58 = vld [vmem:[#allocation2 + $0x58] sm:$0xff] }
 0x407   : > { %3498 = vst.msk [vmem:[#allocation2 + $0x1c] sm:$0xf] %vm8792_vm8, %v3494_v15  ;;  %vm8793_vm12 = vmmov %vm8785_vm4  ;;  %v7978_v53 = vld [vmem:[#allocation2 + $0x5a] sm:$0xff]  ;;  %v3526_v7 = vld [vmem:[#allocation2 + $0x8] sm:$0xff]  ;;  %v8823_v8 = vpack.c.bf16 %v7974_v58, %v7966_v14 }
 0x408   : > { %3485 = vst.msk [vmem:[#allocation2 + $0x74] sm:$0x3] %vm8785_vm4, %v3484_v46  ;;  %vm8794_vm1 = vmmov %vm8791_vm5  ;;  %v3505_v6 = vld [vmem:[#allocation2 + $0x6] sm:$0xff] }
 0x409   : > { %3492 = vst.msk [vmem:[#allocation2 + $0x7e] sm:$0x3] %vm8793_vm12, %v3491_v40  ;;  %vm8795_vm14 = vmmov %vm8794_vm1  ;;  %v8030_v5 = vld [vmem:[#allocation2 + $0x60] sm:$0xff] }
 0x40a   : > { %vm8796_vm7 = vmmov %vm8794_vm1  ;;  %v8034_v15 = vpack.c.bf16 %v8030_v5, %v7974_v58 }
 0x40b   : > { %v7993_v59 = vld [vmem:[#allocation2 + $0x66] sm:$0xff]  ;;  %vm8797_vm13 = vmmov %vm8794_vm1 }
 0x40c   : > { %v7998_v44 = vld [vmem:[#allocation2 + $0x68] sm:$0xff]  ;;  %vm8798_vm10 = vmmov %vm8794_vm1 }
 0x40d   : > { %v3527_v51 = vld [vmem:[#allocation2 + $0x10] sm:$0xff]  ;;  %vm8799_vm5 = vmmov %vm8792_vm8 }
 0x40e   : > { %v3528_v48 = vld [vmem:[#allocation2 + $0x18] sm:$0xff]  ;;  %v3538_v19 = vpack.c.bf16 %v3527_v51, %v3526_v7  ;;  %vm8800_vm8 = vmmov %vm8799_vm5  ;;  %v3506_v38 = vld [vmem:[#allocation2 + $0xe] sm:$0xff] }
 0x40f   : > { %v3539_v28 = vpack.c.bf16 %v7926_v18, %v3528_v48  ;;  %v7996_v23 = vld [vmem:[#allocation2 + $0x6e] sm:$0xff]  ;;  %vm8801_vm4 = vmmov %vm8794_vm1  ;;  %v3517_v46 = vpack.c.bf16 %v3506_v38, %v3505_v6  ;;  %v3507_v40 = vld [vmem:[#allocation2 + $0x16] sm:$0xff]  ;;  %v4049_v18 = vpack.c.bf16 %v7998_v44, %v8030_v5 }
 0x410   : > { %6115 = vmatprep.mubr.msk.bf16.mxu0 %vm8794_vm1, %v3538_v19  ;;  %v8000_v37 = vld [vmem:[#allocation2 + $0x70] sm:$0xff]  ;;  %v3500_v39 = vld [vmem:[#allocation2 + $0x7c] sm:$0xf]  ;;  %vm8802_vm12 = vmmov %vm8794_vm1  ;;  %v8839_v58 = vpack.c.bf16 %v7996_v23, %v7993_v59 }
 0x411   : > { %6116 = vmatmul.mubr.msk.bf16.vlgmr.msra.gmra.mrb[12].mxu0 %vm8795_vm14, %v3539_v28  ;;  %v3499_v10 = vld [vmem:[#allocation2 + $0x74] sm:$0xff]  ;;  %3502 = vst.msk [vmem:[#allocation2 + $0x88] sm:$0xf] %vm8799_vm5, %v3500_v39  ;;  %vm8803_vm14 = vmmov %vm8794_vm1  ;;  %v3508_v7 = vld [vmem:[#allocation2 + $0x1e] sm:$0xff] }
 0x412   : > { %6128 = vmatpush3.bf16.msra.mxu0 %v7706_v27  ;;  %6119 = vmatprep.mubr.msk.bf16.mxu0 %vm8796_vm7, %v3540_v36  ;;  %v8006_v0 = vld [vmem:[#allocation2 + $0x72] sm:$0xff]  ;;  %3501 = vst.msk [vmem:[#allocation2 + $0x80] sm:$0xff] %vm8797_vm13, %v3499_v10  ;;  %v3509_v51 = vld [vmem:[#allocation2 + $0x26] sm:$0xff]  ;;  %v3518_v48 = vpack.c.bf16 %v3508_v7, %v3507_v40  ;;  %vm8804_vm7 = vmmov %vm8794_vm1 }
 0x413   : > { %6141 = vmatprep.subr.bf16.mxu0 %v6627_v57  ;;  %3503 = vst.msk [vmem:[#allocation2 + $0x8c] sm:$0xff] %vm8798_vm10, %v3499_v10  ;;  %v3510_v19 = vld [vmem:[#allocation2 + $0x2e] sm:$0xff]  ;;  %vm8805_vm13 = vmmov %vm8794_vm1  ;;  %v3511_v10 = vld [vmem:[#allocation2 + $0x36] sm:$0xff] }
 0x414   : > { %3504 = vst.msk [vmem:[#allocation2 + $0x94] sm:$0xf] %vm8800_vm8, %v3500_v39  ;;  %v6628_v28 = vld [vmem:[%s8530_s2 + $0xa8] sm:$0xff]   ;;  %v3519_v36 = vpack.c.bf16 %v3510_v19, %v3509_v51  ;;  %v3512_v39 = vld [vmem:[#allocation2 + $0x3e] sm:$0xff]  ;;  %vm8806_vm10 = vmmov %vm8794_vm1 }
 0x415   : > { %v3514_v6 = vld [vmem:[#allocation2 + $0x4e] sm:$0xff]  ;;  %v8044_v38 = vpack.c.bf16 %v3512_v39, %v3511_v10  ;;  %vm8807_vm5 = vmmov %vm8794_vm1  ;;  %v3515_v40 = vld [vmem:[#allocation2 + $0x56] sm:$0xff] }
 0x416   : > { %vm8808_vm8 = vmmov %vm8794_vm1  ;;  %v3759_v41 = vld [vmem:[#allocation2 + $0x1a] sm:$0xff]  ;;  %v3910_v17 = vpack.c.bf16 %v3515_v40, %v3514_v6 }
 0x417   : > { %v3770_v62 = vpack.c.bf16 %v7946_v43, %v3759_v41  ;;  %v8071_v41 = vpack.c.bf16 %v7976_v1, %v7968_v49  ;;  %v4044_v2 = vld [vmem:[#allocation2 + $0x78] sm:$0xff] }
 0x418   : > { %v4050_v32 = vpack.c.bf16 %v4044_v2, %v8000_v37 }
 0x419   : > { %6120 = vmatmul.mubr.msk.bf16.gmra.mrb[16].mxu0 %vm8801_vm4, %v8020_v56  ;;  %vm8809_vm4 = vmmov %vm8794_vm1  ;;  %v4182_v14 = vld [vmem:[#allocation2 + $0x7a] sm:$0xff] }
 0x41a   : > { %6123 = vmatprep.mubr.msk.bf16.mxu0 %vm8802_vm12, %v8024_v9  ;;  %vm8810_vm12 = vmmov %vm8794_vm1 }
 0x41b   : > { %v4458_v5 = vld [vmem:[#allocation2 + $0x90] sm:$0xff] }
 0x421   : > { %6124 = vmatmul.mubr.msk.bf16.gmra.mrb[20].mxu0 %vm8794_vm1, %v8034_v15 }
 0x422   : > { %6129 = vmatprep.mubr.msk.bf16.mxu0 %vm8803_vm14, %v3517_v46  ;;  %v3513_v46 = vld [vmem:[#allocation2 + $0x46] sm:$0xff]  ;;  %vm8811_vm14 = vmmov %vm8794_vm1 }
 0x423   : > { %v8046_v27 = vpack.c.bf16 %v3514_v6, %v3513_v46  ;;  %v3909_v55 = vpack.c.bf16 %v3513_v46, %v3512_v39  ;;  %v6634_v6 = vld [vmem:[%s8532_s4] sm:$0xff]  }
 0x424   : > { %6239 = vmatprep.subr.bf16.mxu1 %v6634_v6  ;;  %v6637_v46 = vld [vmem:[%s8531_s3] sm:$0xff]  }
 0x425   : > { %6240 = vmatpush3.bf16.msra.mxu1 %v6634_v6 }
 0x429   : > { %6130 = vmatmul.mubr.msk.bf16.vlgmr.msra.gmra.mrb[12].mxu0 %vm8804_vm7, %v3518_v48  ;;  %v3757_v48 = vld [vmem:[#allocation2 + $0xa] sm:$0xff]  ;;  %vm8812_vm7 = vmmov %vm8794_vm1 }
 0x42a   : > { %6142 = vmatpush3.bf16.msra.mxu0 %v6627_v57  ;;  %6133 = vmatprep.mubr.msk.bf16.mxu0 %vm8805_vm13, %v3519_v36  ;;  %v3758_v57 = vld [vmem:[#allocation2 + $0x12] sm:$0xff]  ;;  %v8052_v36 = vpack.c.bf16 %v3516_v16, %v3515_v40  ;;  %vm8813_vm13 = vmmov %vm8794_vm1 }
 0x42b   : > { %6155 = vmatprep.subr.bf16.mxu0 %v6628_v28  ;;  %v3769_v13 = vpack.c.bf16 %v3758_v57, %v3757_v48  ;;  %v8067_v48 = vpack.c.bf16 %v7964_v63, %v7962_v4  ;;  %v6630_v57 = vld [vmem:[%s8530_s2 + $0xb8] sm:$0xff]   ;;  %v6639_v40 = vld [vmem:[%s266_s28 + $0x10] sm:$0xff]  }
 0x431   : > { %6134 = vmatmul.mubr.msk.bf16.gmra.mrb[16].mxu0 %vm8806_vm10, %v8044_v38  ;;  %vm8814_vm10 = vmmov %vm8794_vm1 }
 0x432   : > { %6137 = vmatprep.mubr.msk.bf16.mxu0 %vm8807_vm5, %v8046_v27  ;;  %vm8815_vm5 = vmmov %vm8794_vm1 }
 0x439   : > { %6138 = vmatmul.mubr.msk.bf16.gmra.mrb[20].mxu0 %vm8808_vm8, %v8052_v36  ;;  %vm8816_vm8 = vmmov %vm8794_vm1 }
 0x43a   : > { %6143 = vmatprep.mubr.msk.bf16.mxu0 %vm8809_vm4, %v3769_v13  ;;  %v3768_v13 = vld [vmem:[#allocation2 + $0x62] sm:$0xff]  ;;  %vm8817_vm4 = vmmov %vm8794_vm1 }
 0x441   : > { %6144 = vmatmul.mubr.msk.bf16.vlgmr.msra.gmra.mrb[12].mxu0 %vm8810_vm12, %v3770_v62  ;;  %v8078_v62 = vpack.c.bf16 %v3768_v13, %v7978_v53  ;;  %vm8818_vm12 = vmmov %vm8794_vm1 }
 0x442   : > { %6156 = vmatpush3.bf16.msra.mxu0 %v6628_v28  ;;  %6147 = vmatprep.mubr.msk.bf16.mxu0 %vm8794_vm1, %v3771_v3  ;;  %v3907_v3 = vpack.c.bf16 %v3509_v51, %v3508_v7  ;;  %v3908_v28 = vpack.c.bf16 %v3511_v10, %v3510_v19  ;;  %v3911_v7 = vpack.c.bf16 %v7993_v59, %v3516_v16  ;;  %v3906_v51 = vld [vmem:[#allocation2 + $0x76] sm:$0xff]  ;;  %v4456_v59 = vld [vmem:[#allocation2 + $0x80] sm:$0xff] }
 0x443   : > { %6169 = vmatprep.subr.bf16.mxu0 %v6629_v50  ;;  %v3912_v19 = vpack.c.bf16 %v3906_v51, %v7996_v23  ;;  %v4463_v23 = vpack.c.bf16 %v4456_v59, %v4044_v2  ;;  %v8845_v16 = vpack.c.bf16 %v8000_v37, %v7998_v44  ;;  %v4594_v44 = vld [vmem:[#allocation2 + $0x82] sm:$0xff] }
 0x444   : > { %v4601_v37 = vpack.c.bf16 %v4594_v44, %v4182_v14 }
 0x449   : > { %6148 = vmatmul.mubr.msk.bf16.gmra.mrb[16].mxu0 %vm8811_vm14, %v8067_v48  ;;  %vm8819_vm14 = vmmov %vm8794_vm1 }
 0x44a   : > { %6151 = vmatprep.mubr.msk.bf16.mxu0 %vm8812_vm7, %v8071_v41  ;;  %vm8820_vm7 = vmmov %vm8794_vm1 }
 0x451   : > { %6152 = vmatmul.mubr.msk.bf16.gmra.mrb[20].mxu0 %vm8813_vm13, %v8078_v62  ;;  %vm8822_vm13 = vmmov %vm8794_vm1 }
 0x452   : > { %6157 = vmatprep.mubr.msk.bf16.mxu0 %vm8814_vm10, %v3907_v3  ;;  %vm8824_vm10 = vmmov %vm8794_vm1 }
 0x459   : > { %6158 = vmatmul.mubr.msk.bf16.vlgmr.msra.gmra.mrb[12].mxu0 %vm8815_vm5, %v3908_v28  ;;  %vm8825_vm5 = vmmov %vm8794_vm1 }
 0x45a   : > { %6170 = vmatpush3.bf16.msra.mxu0 %v6629_v50  ;;  %6161 = vmatprep.mubr.msk.bf16.mxu0 %vm8816_vm8, %v3909_v55  ;;  %v6631_v50 = vld [vmem:[%s8530_s2 + $0xc0] sm:$0xff]   ;;  %vm8826_vm8 = vmmov %vm8794_vm1 }
 0x45b   : > { %6183 = vmatprep.subr.bf16.mxu0 %v6630_v57 }
 0x461   : > { %6162 = vmatmul.mubr.msk.bf16.gmra.mrb[16].mxu0 %vm8817_vm4, %v3910_v17  ;;  %v8821_v17 = vpack.c.bf16 %v7960_v12, %v7952_v35  ;;  %vm8828_vm4 = vmmov %vm8794_vm1  ;;  %v6632_v35 = vld [vmem:[%s8530_s2 + $0xc8] sm:$0xff]   ;;  %v8831_v12 = vpack.c.bf16 %v7968_v49, %v7964_v63  ;;  %v4318_v63 = vld [vmem:[#allocation2 + $0x7e] sm:$0xff] }
 0x462   : > { %6165 = vmatprep.mubr.msk.bf16.mxu0 %vm8818_vm12, %v3911_v7  ;;  %vm8830_vm12 = vmmov %vm8794_vm1  ;;  %v4325_v49 = vpack.c.bf16 %v4318_v63, %v3906_v51 }
 0x469   : > { %6166 = vmatmul.mubr.msk.bf16.gmra.mrb[20].mxu0 %vm8794_vm1, %v3912_v19 }
 0x46a   : > { %6171 = vmatprep.mubr.msk.bf16.mxu0 %vm8819_vm14, %v4045_v22  ;;  %v8827_v22 = vpack.c.bf16 %v7948_v29, %v7946_v43  ;;  %v4187_v43 = vpack.c.bf16 %v8004_v31, %v3768_v13  ;;  %v8832_v29 = vpack.c.bf16 %v7978_v53, %v7976_v1  ;;  %vm8833_vm14 = vmmov %vm8794_vm1  ;;  %v4319_v1 = vld [vmem:[#allocation2 + $0x86] sm:$0xff]  ;;  %v4320_v53 = vld [vmem:[#allocation2 + $0x8e] sm:$0xff]  ;;  %v4725_v13 = vsub.s32 2, %v6928_v52 }
 0x46b   : > { %v4326_v55 = vpack.c.bf16 %v4320_v53, %v4319_v1 }
 0x471   : > { %6172 = vmatmul.mubr.msk.bf16.vlgmr.msra.gmra.mrb[12].mxu0 %vm8820_vm7, %v4046_v60  ;;  %v8829_v60 = vpack.c.bf16 %v7962_v4, %v7954_v20  ;;  %vm8834_vm7 = vmmov %vm8794_vm1  ;;  %v4188_v20 = vpack.c.bf16 %v4182_v14, %v8006_v0  ;;  %v6633_v4 = vld [vmem:[%s8530_s2 + $0xd0] sm:$0xff]  }
 0x472   : > { %6184 = vmatpush3.bf16.msra.mxu0 %v6630_v57  ;;  %6175 = vmatprep.mubr.msk.bf16.mxu0 %vm8822_vm13, %v8821_v17  ;;  %vm8835_vm13 = vmmov %vm8794_vm1 }
 0x473   : > { %6197 = vmatprep.subr.bf16.mxu0 %v6631_v50 }
 0x479   : > { %6176 = vmatmul.mubr.msk.bf16.gmra.mrb[16].mxu0 %vm8824_vm10, %v8823_v8  ;;  %vm8836_vm10 = vmmov %vm8794_vm1 }
 0x47a   : > { %6179 = vmatprep.mubr.msk.bf16.mxu0 %vm8825_vm5, %v4049_v18  ;;  %vm8837_vm5 = vmmov %vm8794_vm1 }
 0x481   : > { %6180 = vmatmul.mubr.msk.bf16.gmra.mrb[20].mxu0 %vm8826_vm8, %v4050_v32  ;;  %vm8838_vm8 = vmmov %vm8794_vm1 }
 0x482   : > { %6185 = vmatprep.mubr.msk.bf16.mxu0 %vm8828_vm4, %v8827_v22  ;;  %vm8840_vm4 = vmmov %vm8794_vm1 }
 0x489   : > { %6186 = vmatmul.mubr.msk.bf16.vlgmr.msra.gmra.mrb[12].mxu0 %vm8830_vm12, %v8829_v60  ;;  %vm8841_vm12 = vmmov %vm8794_vm1 }
 0x48a   : > { %6198 = vmatpush3.bf16.msra.mxu0 %v6631_v50  ;;  %6189 = vmatprep.mubr.msk.bf16.mxu0 %vm8794_vm1, %v8831_v12 }
 0x48b   : > { %6211 = vmatprep.subr.bf16.mxu0 %v6632_v35 }
 0x491   : > { %6190 = vmatmul.mubr.msk.bf16.gmra.mrb[16].mxu0 %vm8833_vm14, %v8832_v29  ;;  %vm8842_vm14 = vmmov %vm8794_vm1 }
 0x492   : > { %6193 = vmatprep.mubr.msk.bf16.mxu0 %vm8834_vm7, %v4187_v43  ;;  %vm8843_vm7 = vmmov %vm8794_vm1 }
 0x499   : > { %6194 = vmatmul.mubr.msk.bf16.gmra.mrb[20].mxu0 %vm8835_vm13, %v4188_v20  ;;  %vm8844_vm13 = vmmov %vm8794_vm1 }
 0x49a   : > { %6199 = vmatprep.mubr.msk.bf16.mxu0 %vm8836_vm10, %v8044_v38  ;;  %vm8846_vm10 = vmmov %vm8794_vm1  ;;  %v6635_v38 = vld [vmem:[%s8532_s4 + $0x8] sm:$0xff]  }
 0x49b   : > { %6241 = vmatprep.subr.bf16.mxu1 %v6635_v38 }
 0x49c   : > { %6242 = vmatpush3.bf16.msra.mxu1 %v6635_v38 }
 0x49d   : > { %6255 = vmatprep.subr.bf16.mxu1 %v6637_v46 }
 0x4a1   : > { %6200 = vmatmul.mubr.msk.bf16.vlgmr.msra.gmra.mrb[12].mxu0 %vm8837_vm5, %v8046_v27  ;;  %vm8847_vm5 = vmmov %vm8794_vm1  ;;  %v4457_v27 = vld [vmem:[#allocation2 + $0x88] sm:$0xff] }
 0x4a2   : > { %6212 = vmatpush3.bf16.msra.mxu0 %v6632_v35  ;;  %6203 = vmatprep.mubr.msk.bf16.mxu0 %vm8838_vm8, %v8052_v36  ;;  %v4464_v10 = vpack.c.bf16 %v4458_v5, %v4457_v27  ;;  %vm8848_vm8 = vmmov %vm8794_vm1  ;;  %v6640_v36 = vld [vmem:[%s266_s28 + $0x18] sm:$0xff]  }
 0x4a3   : > { %6225 = vmatprep.subr.bf16.mxu0 %v6633_v4 }
 0x4a9   : > { %6204 = vmatmul.mubr.msk.bf16.gmra.mrb[16].mxu0 %vm8840_vm4, %v8839_v58  ;;  %vm8849_vm4 = vmmov %vm8794_vm1 }
 0x4aa   : > { %6207 = vmatprep.mubr.msk.bf16.mxu0 %vm8841_vm12, %v4325_v49  ;;  %vm8850_vm12 = vmmov %vm8794_vm1 }
 0x4b1   : > { %6208 = vmatmul.mubr.msk.bf16.gmra.mrb[20].mxu0 %vm8794_vm1, %v4326_v55 }
 0x4b2   : > { %6213 = vmatprep.mubr.msk.bf16.mxu0 %vm8842_vm14, %v8020_v56  ;;  %v8851_v56 = vpack.c.bf16 %v8006_v0, %v8004_v31  ;;  %vm8852_vm14 = vmmov %vm8794_vm1  ;;  %v6636_v31 = vld [vmem:[%s266_s28] sm:$0xff]   ;;  %v6638_v0 = vld [vmem:[%s266_s28 + $0x8] sm:$0xff]  }
 0x4b9   : > { %6214 = vmatmul.mubr.msk.bf16.vlgmr.msra.gmra.mrb[12].mxu0 %vm8843_vm7, %v8024_v9  ;;  %vm8853_vm7 = vmmov %vm8794_vm1  ;;  %v4595_v9 = vld [vmem:[#allocation2 + $0x8a] sm:$0xff] }
 0x4ba   : > { %6226 = vmatpush3.bf16.msra.mxu0 %v6633_v4  ;;  %6217 = vmatprep.mubr.msk.bf16.mxu0 %vm8844_vm13, %v8034_v15  ;;  %v4596_v15 = vld [vmem:[#allocation2 + $0x92] sm:$0xff]  ;;  %vm8854_vm13 = vmmov %vm8794_vm1 }
 0x4bb   : > { %v4602_v39 = vpack.c.bf16 %v4596_v15, %v4595_v9 }
 0x4c1   : > { %6218 = vmatmul.mubr.msk.bf16.gmra.mrb[16].mxu0 %vm8846_vm10, %v8845_v16  ;;  %vm4951_vm10 = vcmask 261120  }
 0x4c2   : > { %6221 = vmatprep.mubr.msk.bf16.mxu0 %vm8847_vm5, %v4463_v23  ;;  %6243 = vmatprep.mubr.msk.bf16.mxu1 %vm4951_vm10, %v6636_v31  ;;  %vm8855_vm5 = vmmov %vm8794_vm1 }
 0x4c3   : > { %6244 = vmatmul.mubr.msk.bf16.vlgmr.msra.gmra.mrb[24].mxu1 %vm4951_vm10, %v6638_v0 }
 0x4c4   : > { %6247 = vmatprep.mubr.msk.bf16.mxu1 %vm4951_vm10, %v6639_v40  ;;  %6256 = vmatpush3.bf16.msra.mxu1 %v6637_v46 }
 0x4c9   : > { %6222 = vmatmul.mubr.msk.bf16.gmra.mrb[20].mxu0 %vm8848_vm8, %v4464_v10  ;;  %vm8856_vm8 = vmmov %vm8794_vm1 }
 0x4ca   : > { %6227 = vmatprep.mubr.msk.bf16.mxu0 %vm8849_vm4, %v8067_v48  ;;  %v6641_v48 = vld [vmem:[%s266_s28 + $0x20] sm:$0xff]   ;;  %vm8857_vm4 = vmmov %vm8794_vm1 }
 0x4cb   : > { %6248 = vmatmul.mubr.msk.bf16.gmra.mrb[28].mxu1 %vm4951_vm10, %v6640_v36 }
 0x4cc   : > { %6251 = vmatprep.mubr.msk.bf16.mxu1 %vm4951_vm10, %v6641_v48 }
 0x4d1   : > { %6228 = vmatmul.mubr.msk.bf16.vlgmr.msra.gmra.mrb[12].mxu0 %vm8850_vm12, %v8071_v41  ;;  %v6642_v41 = vld [vmem:[%s266_s28 + $0x28] sm:$0xff]   ;;  %vm8858_vm12 = vmmov %vm8794_vm1 }
 0x4d2   : > { %6231 = vmatprep.mubr.msk.bf16.mxu0 %vm8794_vm1, %v8078_v62  ;;  %v4726_v62 = vrot.slane %v7698_v61, %v4725_v13 }
 0x4d3   : > { %6252 = vmatmul.mubr.msk.bf16.gmra.mrb[32].mxu1 %vm4951_vm10, %v6642_v41  ;;  %vm8862_vm10 = vmmov %vm8794_vm1 }
 0x4d9   : > { %6232 = vmatmul.mubr.msk.bf16.gmra.mrb[16].mxu0 %vm8852_vm14, %v8851_v56  ;;  %vm8859_vm14 = vmmov %vm8794_vm1 }
 0x4da   : > { %6235 = vmatprep.mubr.msk.bf16.mxu0 %vm8853_vm7, %v4601_v37  ;;  %vm8860_vm7 = vnez %v8597_v45 }
 0x4e1   : > { %6236 = vmatmul.mubr.msk.bf16.gmra.mrb[20].mxu0 %vm8854_vm13, %v4602_v39  ;;  %vm8861_vm13 = vmmov %vm8794_vm1 }
 0x5a4   : > { %v6229_v3 = vpop.f32.mrb[12].mxu0 }
 0x5a5   : > { %v8194_v28 = vadd.f32 %v6229_v3, %v4726_v62  ;;  %v4664_v57 = vpop.f32.mrb[13].mxu0 }
 0x5a6   : > { %v8196_v7 = vadd.f32 %v4726_v62, %v4664_v57  ;;  %v6230_v51 = vpop.f32.mrb[14].mxu0 }
 0x5a7   : > { %v8198_v19 = vadd.f32 %v6230_v51, %v4726_v62  ;;  %v4667_v50 = vpop.f32.mrb[15].mxu0  ;;  %v4741_v17 = vmax.f32 %v8194_v28, 0.0 }
 0x5a8   : > { %v4739_v18 = vmax.f32 %v8196_v7, 0.0  ;;  %v8202_v8 = vadd.f32 %v4726_v62, %v4667_v50 }
 0x5a9   : > { %v4742_v2 = vmax.f32 %v8198_v19, 0.0  ;;  %v4753_v22 = vsel %vm7103_vm9, %v4741_v17, 0.0 }
 0x5aa   : > { %v4751_v61 = vsel %vm7121_vm2, %v4739_v18, 0.0  ;;  %v4740_v32 = vmax.f32 %v8202_v8, 0.0  ;;  %v4766_v58 = vsel %vm8857_vm4, %v4753_v22, 0.0  ;;  %vm8865_vm4 = vnez %v8603_v25 }
 0x5ab   : > { %v4763_v12 = vsel %vm8855_vm5, %v4751_v61, 0.0  ;;  %v4754_v20 = vsel %vm7174_vm15, %v4742_v2, 0.0  ;;  %vm8863_vm5 = vnez %v8600_v21 }
 0x5ac   : > { %v4752_v35 = vsel %vm7156_vm3, %v4740_v32, 0.0  ;;  %v6233_v60 = vpop.f32.mrb[16].mxu0  ;;  %v4768_v27 = vsel %vm8858_vm12, %v4754_v20, 0.0  ;;  %vm8866_vm12 = vnez %v8608_v33 }
 0x5ad   : > { %v4764_v43 = vsel %vm8856_vm8, %v4752_v35, 0.0  ;;  %v8220_v29 = vadd.f32 %v6233_v60, %v4726_v62  ;;  %v4680_v14 = vpop.f32.mrb[17].mxu0  ;;  %vm8864_vm8 = vmmov %vm8794_vm1 }
 0x5ae   : > { %v4765_v4 = vadd.f32 %v4764_v43, %v4763_v12  ;;  %v4731_v63 = vadd.f32 %v4726_v62, %v4680_v14  ;;  %v6234_v49 = vpop.f32.mrb[18].mxu0 }
 0x5af   : > { %v4734_v1 = vadd.f32 %v6234_v49, %v4726_v62  ;;  %v4683_v53 = vpop.f32.mrb[19].mxu0  ;;  %v4745_v59 = vmax.f32 %v8220_v29, 0.0 }
 0x5b0   : > { %v4767_v55 = vadd.f32 %v4766_v58, %v4765_v4  ;;  %v4743_v23 = vmax.f32 %v4731_v63, 0.0  ;;  %v4732_v16 = vadd.f32 %v4726_v62, %v4683_v53 }
 0x5b1   : > { %v4746_v44 = vmax.f32 %v4734_v1, 0.0  ;;  %v4757_v9 = vsel %vm8618_vm6, %v4745_v59, 0.0 }
 0x5b2   : > { %v4755_v5 = vsel %vm7224_vm0, %v4743_v23, 0.0  ;;  %v4769_v10 = vadd.f32 %v4768_v27, %v4767_v55  ;;  %v4744_v37 = vmax.f32 %v4732_v16, 0.0  ;;  %v4774_v41 = vsel %vm8861_vm13, %v4757_v9, 0.0  ;;  %vm8868_vm13 = vmmov %vm8794_vm1 }
 0x5b3   : > { %v4770_v56 = vsel %vm8794_vm1, %v4755_v5, 0.0  ;;  %v4758_v46 = vsel %vm8860_vm7, %v4746_v44, 0.0 }
 0x5b4   : > { %v4771_v15 = vadd.f32 %v4770_v56, %v4769_v10  ;;  %v4756_v39 = vsel %vm8729_vm11, %v4744_v37, 0.0  ;;  %v6237_v6 = vpop.f32.mrb[20].mxu0  ;;  %v4776_v22 = vsel %vm8862_vm10, %v4758_v46, 0.0  ;;  %vm8869_vm10 = vmmov %vm8794_vm1 }
 0x5b5   : > { %v4772_v38 = vsel %vm8859_vm14, %v4756_v39, 0.0  ;;  %v4737_v31 = vadd.f32 %v6237_v6, %v4726_v62  ;;  %v4696_v0 = vpop.f32.mrb[21].mxu0  ;;  %vm8867_vm14 = vnez %v8612_v24 }
 0x5b6   : > { %v4773_v40 = vadd.f32 %v4772_v38, %v4771_v15  ;;  %v4735_v36 = vadd.f32 %v4726_v62, %v4696_v0  ;;  %v6238_v48 = vpop.f32.mrb[22].mxu0 }
 0x5b7   : > { %v4738_v13 = vadd.f32 %v6238_v48, %v4726_v62  ;;  %v4699_v3 = vpop.f32.mrb[23].mxu0  ;;  %v4749_v51 = vmax.f32 %v4737_v31, 0.0 }
 0x5b8   : > { %v4775_v57 = vadd.f32 %v4774_v41, %v4773_v40  ;;  %v4747_v50 = vmax.f32 %v4735_v36, 0.0  ;;  %v4736_v61 = vadd.f32 %v4726_v62, %v4699_v3 }
 0x5b9   : > { %v4750_v12 = vmax.f32 %v4738_v13, 0.0  ;;  %v4761_v14 = vsel %vm8865_vm4, %v4749_v51, 0.0 }
 0x5ba   : > { %v4759_v35 = vsel %vm8863_vm5, %v4747_v50, 0.0  ;;  %v4777_v60 = vadd.f32 %v4776_v22, %v4775_v57  ;;  %v4748_v43 = vmax.f32 %v4736_v61, 0.0  ;;  %v4782_v58 = vsel %vm8868_vm13, %v4761_v14, 0.0  ;;  %vm8871_vm13 = vmmov %vm8794_vm1 }
 0x5bb   : > { %v4778_v29 = vsel %vm8864_vm8, %v4759_v35, 0.0  ;;  %v4762_v62 = vsel %vm8867_vm14, %v4750_v12, 0.0  ;;  %vm8870_vm8 = vmmov %vm8794_vm1 }
 0x5bc   : > { %v4779_v20 = vadd.f32 %v4778_v29, %v4777_v60  ;;  %v4760_v4 = vsel %vm8866_vm12, %v4748_v43, 0.0  ;;  %v4784_v53 = vsel %vm8869_vm10, %v4762_v62, 0.0  ;;  %vm8872_vm10 = vmmov %vm8794_vm1 }
 0x5bd   : > { %v4780_v63 = vsel %vm8794_vm1, %v4760_v4, 0.0 }
 0x5be   : > { %v4781_v49 = vadd.f32 %v4780_v63, %v4779_v20 }
 0x5c0   : > { %v4783_v1 = vadd.f32 %v4782_v58, %v4781_v49 }
 0x5c2   : > { %v4785_v55 = vadd.f32 %v4784_v53, %v4783_v1 }
 0x5c4   : > { %v4786_v16 = vrot.slane %v4785_v55, 4 }
 0x5c6   : > { %v4787_v27 = vadd.f32 %v4786_v16, %v4785_v55 }
 0x5c8   : > { %v4788_v5 = vrot.slane %v4787_v27, 2 }
 0x5ca   : > { %v4789_v10 = vadd.f32 %v4788_v5, %v4787_v27 }
 0x5cc   : > { %v4790_v56 = vrot.slane %v4789_v10, 1 }
 0x5ce   : > { %v4791_v9 = vadd.f32 %v4790_v56, %v4789_v10 }
 0x5d0   : > { %v4792_v15 = vmul.f32 0.015625, %v4791_v9 }
 0x5d2   : > { %v8255_v39 = vsub.f32 %v4739_v18, %v4792_v15  ;;  %v8259_v6 = vsub.f32 %v4740_v32, %v4792_v15  ;;  %v8263_v38 = vsub.f32 %v4741_v17, %v4792_v15  ;;  %v8267_v31 = vsub.f32 %v4742_v2, %v4792_v15 }
 0x5d3   : > { %v8269_v0 = vsub.f32 %v4743_v23, %v4792_v15  ;;  %v8271_v46 = vsub.f32 %v4744_v37, %v4792_v15  ;;  %v8273_v40 = vsub.f32 %v4745_v59, %v4792_v15  ;;  %v8275_v7 = vsub.f32 %v4746_v44, %v4792_v15 }
 0x5d4   : > { %v4801_v18 = vsub.f32 %v4747_v50, %v4792_v15  ;;  %v4802_v8 = vsub.f32 %v4748_v43, %v4792_v15  ;;  %v8277_v32 = vsub.f32 %v4749_v51, %v4792_v15  ;;  %v8279_v36 = vsub.f32 %v4750_v12, %v4792_v15 }
 0x5d5   : > { %v4805_v28 = vsel %vm7121_vm2, %v8255_v39, 0.0  ;;  %v4806_v19 = vsel %vm7156_vm3, %v8259_v6, 0.0  ;;  %v4807_v17 = vsel %vm7103_vm9, %v8263_v38, 0.0  ;;  %v4808_v2 = vsel %vm7174_vm15, %v8267_v31, 0.0 }
 0x5d6   : > { %v4817_v59 = vmul.f32 %v4805_v28, %v4805_v28  ;;  %v4818_v23 = vmul.f32 %v4806_v19, %v4806_v19  ;;  %v4819_v44 = vmul.f32 %v4807_v17, %v4807_v17  ;;  %v4809_v37 = vsel %vm7224_vm0, %v8269_v0, 0.0 }
 0x5d7   : > { %v4820_v48 = vmul.f32 %v4808_v2, %v4808_v2  ;;  %v4810_v3 = vsel %vm8729_vm11, %v8271_v46, 0.0  ;;  %v4821_v51 = vmul.f32 %v4809_v37, %v4809_v37  ;;  %v4811_v61 = vsel %vm8618_vm6, %v8273_v40, 0.0 }
 0x5d8   : > { %v4829_v41 = vsel %vm8870_vm8, %v4817_v59, 0.0  ;;  %v4830_v13 = vsel %vm8794_vm1, %v4818_v23, 0.0  ;;  %v4832_v50 = vsel %vm8871_vm13, %v4819_v44, 0.0  ;;  %v4822_v35 = vmul.f32 %v4810_v3, %v4810_v3  ;;  %vm8873_vm8 = vmmov %vm8794_vm1 }
 0x5d9   : > { %v4831_v57 = vadd.f32 %v4830_v13, %v4829_v41  ;;  %v4834_v60 = vsel %vm8872_vm10, %v4820_v48, 0.0  ;;  %v4812_v12 = vsel %vm8860_vm7, %v8275_v7, 0.0  ;;  %v4823_v29 = vmul.f32 %v4811_v61, %v4811_v61  ;;  %vm8874_vm13 = vmmov %vm8794_vm1 }
 0x5da   : > { %v4836_v14 = vsel %vm8873_vm8, %v4821_v51, 0.0  ;;  %v4813_v20 = vsel %vm8863_vm5, %v4801_v18, 0.0  ;;  %v4824_v63 = vmul.f32 %v4812_v12, %v4812_v12  ;;  %v4838_v62 = vsel %vm8794_vm1, %v4822_v35, 0.0  ;;  %vm8875_vm10 = vmmov %vm8794_vm1 }
 0x5db   : > { %v4833_v22 = vadd.f32 %v4832_v50, %v4831_v57  ;;  %v4814_v49 = vsel %vm8866_vm12, %v4802_v8, 0.0  ;;  %v4825_v1 = vmul.f32 %v4813_v20, %v4813_v20  ;;  %v4840_v53 = vsel %vm8874_vm13, %v4823_v29, 0.0  ;;  %vm8876_vm8 = vmmov %vm8794_vm1 }
 0x5dc   : > { %v4815_v55 = vsel %vm8865_vm4, %v8277_v32, 0.0  ;;  %v4826_v27 = vmul.f32 %v4814_v49, %v4814_v49  ;;  %v4842_v5 = vsel %vm8875_vm10, %v4824_v63, 0.0  ;;  %v4816_v10 = vsel %vm8867_vm14, %v8279_v36, 0.0  ;;  %vm8877_vm13 = vmmov %vm8794_vm1 }
 0x5dd   : > { %v4835_v43 = vadd.f32 %v4834_v60, %v4833_v22  ;;  %v4827_v9 = vmul.f32 %v4815_v55, %v4815_v55  ;;  %v4844_v15 = vsel %vm8876_vm8, %v4825_v1, 0.0  ;;  %v4828_v19 = vmul.f32 %v4816_v10, %v4816_v10  ;;  %vm8878_vm12 = vmmov %vm8794_vm1  ;;  %v4873_v1 = vld [vmem:[%s6727_s10 + $0x20] sm:$0xff] }
 0x5de   : > { %v4846_v17 = vsel %vm8794_vm1, %v4826_v27, 0.0  ;;  %vm8880_vm10 = vmmov %vm8794_vm1  ;;  %v4876_v27 = vld [vmem:[%s6727_s10 + $0x38] sm:$0xff] }
 0x5df   : > { %v4837_v4 = vadd.f32 %v4836_v14, %v4835_v43  ;;  %v4848_v59 = vsel %vm8877_vm13, %v4827_v9, 0.0  ;;  %v4850_v44 = vsel %vm8878_vm12, %v4828_v19, 0.0  ;;  %vm8879_vm12 = vmmov %vm8794_vm1 }
 0x5e0   : > { %vm8881_vm8 = vmmov %vm8794_vm1 }
 0x5e1   : > { %v4839_v58 = vadd.f32 %v4838_v62, %v4837_v4  ;;  %vm8882_vm13 = vmmov %vm8794_vm1 }
 0x5e2   : > { %vm8883_vm14 = vmmov %vm8794_vm1 }
 0x5e3   : > { %v4841_v16 = vadd.f32 %v4840_v53, %v4839_v58 }
 0x5e5   : > { %v4843_v56 = vadd.f32 %v4842_v5, %v4841_v16 }
 0x5e7   : > { %v4845_v28 = vadd.f32 %v4844_v15, %v4843_v56 }
 0x5e9   : > { %v4847_v2 = vadd.f32 %v4846_v17, %v4845_v28 }
 0x5eb   : > { %v4849_v23 = vadd.f32 %v4848_v59, %v4847_v2 }
 0x5ed   : > { %v4851_v37 = vadd.f32 %v4850_v44, %v4849_v23 }
 0x5ef   : > { %v4852_v48 = vrot.slane %v4851_v37, 4 }
 0x5f1   : > { %v4853_v41 = vadd.f32 %v4852_v48, %v4851_v37  ;;  %v4879_v48 = vld [vmem:[%s6727_s10 + $0x50] sm:$0xff] }
 0x5f3   : > { %v4854_v13 = vrot.slane %v4853_v41, 2 }
 0x5f5   : > { %v4855_v3 = vadd.f32 %v4854_v13, %v4853_v41  ;;  %v4877_v13 = vld [vmem:[%s6727_s10 + $0x40] sm:$0xff] }
 0x5f7   : > { %v4856_v57 = vrot.slane %v4855_v3, 1 }
 0x5f9   : > { %v4857_v51 = vadd.f32 %v4856_v57, %v4855_v3 }
 0x5fb   : > { %v4858_v50 = vmul.f32 0.015625, %v4857_v51 }
 0x5fd   : > { %v4859_v61 = vadd.f32 1e-05, %v4858_v50 }
 0x5ff   : > { %6647 = vrsqrt.f32 %v4859_v61 }
 0x609   : > { %v6648_v22 = vpop.eup %6647 }
 0x60a   : > { %v4869_v35 = vmul.f32 %v6648_v22, %v4801_v18  ;;  %v4870_v60 = vmul.f32 %v6648_v22, %v4802_v8  ;;  %v4861_v12 = vmul.f32 %v6648_v22, %v8255_v39  ;;  %v4862_v43 = vmul.f32 %v6648_v22, %v8259_v6 }
 0x60b   : > { %v4863_v29 = vmul.f32 %v6648_v22, %v8263_v38  ;;  %v4864_v14 = vmul.f32 %v6648_v22, %v8267_v31  ;;  %v4865_v20 = vmul.f32 %v6648_v22, %v8269_v0  ;;  %v4866_v4 = vmul.f32 %v6648_v22, %v8271_v46  ;;  %v6652_v46 = vld [vmem:[%s8533_s5] sm:$0xf] }
 0x60c   : > { %v4901_v63 = vpack.c.bf16 %v4870_v60, %v4869_v35  ;;  %v4897_v62 = vpack.c.bf16 %v4862_v43, %v4861_v12  ;;  %v4867_v49 = vmul.f32 %v6648_v22, %v8273_v40  ;;  %v4868_v58 = vmul.f32 %v6648_v22, %v8275_v7  ;;  %v4880_v35 = vld [vmem:[%s6727_s10 + $0x58] sm:$0xff]  ;;  %v4878_v12 = vld [vmem:[%s6727_s10 + $0x48] sm:$0xff] }
 0x60d   : > { %v4898_v18 = vpack.c.bf16 %v4864_v14, %v4863_v29  ;;  %v4899_v8 = vpack.c.bf16 %v4866_v4, %v4865_v20  ;;  %v4871_v39 = vmul.f32 %v6648_v22, %v8277_v32  ;;  %v4872_v6 = vmul.f32 %v6648_v22, %v8279_v36  ;;  %v4875_v32 = vld [vmem:[%s6727_s10 + $0x30] sm:$0xff] }
 0x60e   : > { %6257 = vmatprep.mubr.msk.bf16.mxu1 %vm8879_vm12, %v4897_v62  ;;  %v4900_v38 = vpack.c.bf16 %v4868_v58, %v4867_v49  ;;  %v5158_v0 = vsub.s32 3, %v6928_v52  ;;  %v4874_v52 = vld [vmem:[%s6727_s10 + $0x28] sm:$0xff]  ;;  %vm8885_vm12 = vmmov %vm8794_vm1 }
 0x60f   : > { %6258 = vmatmul.mubr.msk.bf16.vlgmr.msra.gmra.mrb[24].mxu1 %vm8880_vm10, %v4898_v18  ;;  %v4902_v31 = vpack.c.bf16 %v4872_v6, %v4871_v39  ;;  %vm8886_vm10 = vmmov %vm8794_vm1 }
 0x610   : > { %6261 = vmatprep.mubr.msk.bf16.mxu1 %vm8881_vm8, %v4899_v8  ;;  %v8347_v40 = vrot.slane %v6652_v46, %v5158_v0  ;;  %vm8887_vm8 = vmmov %vm8794_vm1  ;;  %v4883_v46 = vld [vmem:[%s6727_s10 + $0x70] sm:$0xff] }
 0x617   : > { %6262 = vmatmul.mubr.msk.bf16.gmra.mrb[28].mxu1 %vm8794_vm1, %v4900_v38 }
 0x618   : > { %6265 = vmatprep.mubr.msk.bf16.mxu1 %vm8882_vm13, %v4901_v63  ;;  %vm8888_vm13 = vmmov %vm8794_vm1 }
 0x61f   : > { %6266 = vmatmul.mubr.msk.bf16.gmra.mrb[32].mxu1 %vm8883_vm14, %v4902_v31  ;;  %vm8884_vm14 = vmmov %vm8794_vm1 }
 0x6e2   : > { %v6259_v7 = vpop.f32.mrb[24].mxu1 }
 0x6e3   : > { %v5162_v36 = vadd.f32 %v6259_v7, %v8347_v40  ;;  %v5109_v53 = vpop.f32.mrb[25].mxu1 }
 0x6e4   : > { %v5160_v55 = vadd.f32 %v8347_v40, %v5109_v53  ;;  %v6260_v16 = vpop.f32.mrb[26].mxu1 }
 0x6e5   : > { %v5163_v5 = vadd.f32 %v6260_v16, %v8347_v40  ;;  %v5112_v10 = vpop.f32.mrb[27].mxu1  ;;  %v8356_v56 = vadd.f32 %v5162_v36, %v4875_v32  ;;  %v4881_v32 = vld [vmem:[%s6727_s10 + $0x60] sm:$0xff] }
 0x6e6   : > { %v8358_v9 = vadd.f32 %v5160_v55, %v4873_v1  ;;  %v5161_v15 = vadd.f32 %v8347_v40, %v5112_v10  ;;  %v4882_v10 = vld [vmem:[%s6727_s10 + $0x68] sm:$0xff] }
 0x6e7   : > { %v8364_v19 = vadd.f32 %v5163_v5, %v4876_v27  ;;  %v5186_v2 = vsel %vm7103_vm9, %v8356_v56, 0.0  ;;  %v4884_v5 = vld [vmem:[%s6727_s10 + $0x78] sm:$0xff]  ;;  %s6573_s10 = smul.u32 96, %s8920_s22 }
 0x6e8   : > { %v5184_v28 = vsel %vm7121_vm2, %v8358_v9, 0.0  ;;  %v8366_v17 = vadd.f32 %v5161_v15, %v4874_v52  ;;  %v5199_v22 = vsel %vm8886_vm10, %v5186_v2, 0.0  ;;  %vm8891_vm10 = vmmov %vm8794_vm1 }
 0x6e9   : > { %v5196_v44 = vsel %vm8884_vm14, %v5184_v28, 0.0  ;;  %v5187_v57 = vsel %vm7174_vm15, %v8364_v19, 0.0  ;;  %vm8889_vm14 = vmmov %vm8794_vm1  ;;  %s271_s12 = scalar_lea.vmem %s8534_s6, %s6573_s10 }
 0x6ea   : > { %v5185_v59 = vsel %vm7156_vm3, %v8366_v17, 0.0  ;;  %v6263_v23 = vpop.f32.mrb[28].mxu1  ;;  %v5201_v63 = vsel %vm8887_vm8, %v5187_v57, 0.0  ;;  %vm8892_vm8 = vnez %v8608_v33 }
 0x6eb   : > { %v5197_v37 = vsel %vm8885_vm12, %v5185_v59, 0.0  ;;  %v5166_v41 = vadd.f32 %v6263_v23, %v8347_v40  ;;  %v5125_v3 = vpop.f32.mrb[29].mxu1  ;;  %vm8890_vm12 = vmmov %vm8794_vm1 }
 0x6ec   : > { %v5198_v51 = vadd.f32 %v5197_v37, %v5196_v44  ;;  %v5164_v50 = vadd.f32 %v8347_v40, %v5125_v3  ;;  %v6264_v61 = vpop.f32.mrb[30].mxu1 }
 0x6ed   : > { %v5167_v60 = vadd.f32 %v6264_v61, %v8347_v40  ;;  %v5128_v43 = vpop.f32.mrb[31].mxu1  ;;  %v5178_v14 = vadd.f32 %v5166_v41, %v4879_v48 }
 0x6ee   : > { %v5200_v29 = vadd.f32 %v5199_v22, %v5198_v51  ;;  %v5176_v20 = vadd.f32 %v5164_v50, %v4877_v13  ;;  %v5165_v4 = vadd.f32 %v8347_v40, %v5128_v43 }
 0x6ef   : > { %v5179_v58 = vadd.f32 %v5167_v60, %v4880_v35  ;;  %v5190_v39 = vsel %vm8618_vm6, %v5178_v14, 0.0 }
 0x6f0   : > { %v5188_v62 = vsel %vm7224_vm0, %v5176_v20, 0.0  ;;  %v5202_v49 = vadd.f32 %v5201_v63, %v5200_v29  ;;  %v5177_v18 = vadd.f32 %v5165_v4, %v4878_v12  ;;  %v5207_v27 = vsel %vm8889_vm14, %v5190_v39, 0.0  ;;  %vm8894_vm14 = vmmov %vm8794_vm1 }
 0x6f1   : > { %v5203_v8 = vsel %vm8794_vm1, %v5188_v62, 0.0  ;;  %v5191_v1 = vsel %vm8860_vm7, %v5179_v58, 0.0 }
 0x6f2   : > { %v5204_v6 = vadd.f32 %v5203_v8, %v5202_v49  ;;  %v5189_v38 = vsel %vm8729_vm11, %v5177_v18, 0.0  ;;  %v6267_v31 = vpop.f32.mrb[32].mxu1  ;;  %v5209_v44 = vsel %vm8890_vm12, %v5191_v1, 0.0  ;;  %vm8895_vm12 = vmmov %vm8794_vm1 }
 0x6f3   : > { %v5205_v0 = vsel %vm8888_vm13, %v5189_v38, 0.0  ;;  %v5170_v7 = vadd.f32 %v6267_v31, %v8347_v40  ;;  %v5141_v36 = vpop.f32.mrb[33].mxu1  ;;  %vm8893_vm13 = vnez %v8612_v24 }
 0x6f4   : > { %v5206_v53 = vadd.f32 %v5205_v0, %v5204_v6  ;;  %v5168_v55 = vadd.f32 %v8347_v40, %v5141_v36  ;;  %v6268_v16 = vpop.f32.mrb[34].mxu1 }
 0x6f5   : > { %v5171_v52 = vadd.f32 %v6268_v16, %v8347_v40  ;;  %v5144_v15 = vpop.f32.mrb[35].mxu1  ;;  %v5182_v2 = vadd.f32 %v5170_v7, %v4883_v46 }
 0x6f6   : > { %v5208_v28 = vadd.f32 %v5207_v27, %v5206_v53  ;;  %v5180_v59 = vadd.f32 %v5168_v55, %v4881_v32  ;;  %v5169_v23 = vadd.f32 %v8347_v40, %v5144_v15 }
 0x6f7   : > { %v5183_v41 = vadd.f32 %v5171_v52, %v4884_v5  ;;  %v5194_v57 = vsel %vm8865_vm4, %v5182_v2, 0.0 }
 0x6f8   : > { %v5192_v37 = vsel %vm8863_vm5, %v5180_v59, 0.0  ;;  %v5210_v48 = vadd.f32 %v5209_v44, %v5208_v28  ;;  %v5181_v13 = vadd.f32 %v5169_v23, %v4882_v10  ;;  %v5215_v35 = vsel %vm8894_vm14, %v5194_v57, 0.0 }
 0x6f9   : > { %v5211_v3 = vsel %vm8891_vm10, %v5192_v37, 0.0  ;;  %v5195_v40 = vsel %vm8893_vm13, %v5183_v41, 0.0  ;;  %vm8897_vm10 = vmmov %vm8794_vm1 }
 0x6fa   : > { %v5212_v51 = vadd.f32 %v5211_v3, %v5210_v48  ;;  %v5193_v50 = vsel %vm8892_vm8, %v5181_v13, 0.0  ;;  %v5217_v12 = vsel %vm8895_vm12, %v5195_v40, 0.0 }
 0x6fb   : > { %v5213_v61 = vsel %vm8794_vm1, %v5193_v50, 0.0 }
 0x6fc   : > { %v5214_v22 = vadd.f32 %v5213_v61, %v5212_v51 }
 0x6fe   : > { %v5216_v60 = vadd.f32 %v5215_v35, %v5214_v22 }
 0x700   : > { %v5218_v43 = vadd.f32 %v5217_v12, %v5216_v60 }
 0x702   : > { %v5219_v29 = vrot.slane %v5218_v43, 4 }
 0x704   : > { %v5220_v4 = vadd.f32 %v5219_v29, %v5218_v43 }
 0x706   : > { %v5221_v63 = vrot.slane %v5220_v4, 2 }
 0x708   : > { %v5222_v62 = vadd.f32 %v5221_v63, %v5220_v4 }
 0x70a   : > { %v5223_v49 = vrot.slane %v5222_v62, 1 }
 0x70c   : > { %v5224_v8 = vadd.f32 %v5223_v49, %v5222_v62 }
 0x70e   : > { %v5225_v39 = vmul.f32 0.015625, %v5224_v8 }
 0x710   : > { %v8422_v6 = vsub.f32 %v8358_v9, %v5225_v39  ;;  %v8425_v38 = vsub.f32 %v8366_v17, %v5225_v39  ;;  %v8428_v31 = vsub.f32 %v8356_v56, %v5225_v39  ;;  %v8431_v0 = vsub.f32 %v8364_v19, %v5225_v39 }
 0x711   : > { %v8433_v46 = vsub.f32 %v5176_v20, %v5225_v39  ;;  %v8435_v7 = vsub.f32 %v5177_v18, %v5225_v39  ;;  %v8437_v32 = vsub.f32 %v5178_v14, %v5225_v39  ;;  %v8439_v36 = vsub.f32 %v5179_v58, %v5225_v39 }
 0x712   : > { %v8441_v1 = vsub.f32 %v5180_v59, %v5225_v39  ;;  %v8443_v9 = vsub.f32 %v5181_v13, %v5225_v39  ;;  %v8445_v17 = vsub.f32 %v5182_v2, %v5225_v39  ;;  %v8447_v53 = vsub.f32 %v5183_v41, %v5225_v39 }
 0x713   : > { %v5238_v56 = vsel %vm7121_vm2, %v8422_v6, 0.0  ;;  %v5239_v19 = vsel %vm7156_vm3, %v8425_v38, 0.0  ;;  %v5240_v14 = vsel %vm7103_vm9, %v8428_v31, 0.0  ;;  %v5241_v20 = vsel %vm7174_vm15, %v8431_v0, 0.0  ;;  %vm8896_vm2 = vmmov %vm8794_vm1 }
 0x714   : > { %v5250_v58 = vmul.f32 %v5238_v56, %v5238_v56  ;;  %v5251_v18 = vmul.f32 %v5239_v19, %v5239_v19  ;;  %v5252_v55 = vmul.f32 %v5240_v14, %v5240_v14  ;;  %v5242_v54 = vsel %vm7224_vm0, %v8433_v46, 0.0  ;;  %vm8898_vm9 = vmmov %vm8794_vm1 }
 0x715   : > { %v5253_v16 = vmul.f32 %v5241_v20, %v5241_v20  ;;  %v5243_v47 = vsel %vm8729_vm11, %v8435_v7, 0.0  ;;  %v5254_v52 = vmul.f32 %v5242_v54, %v5242_v54  ;;  %v5244_v10 = vsel %vm8618_vm6, %v8437_v32, 0.0  ;;  %vm8899_vm0 = vmmov %vm8794_vm1 }
 0x716   : > { %v5262_v27 = vsel %vm8896_vm2, %v5250_v58, 0.0  ;;  %v5263_v26 = vsel %vm8897_vm10, %v5251_v18, 0.0  ;;  %v5265_v11 = vsel %vm8898_vm9, %v5252_v55, 0.0  ;;  %v5255_v42 = vmul.f32 %v5243_v47, %v5243_v47  ;;  %vm8900_vm3 = vmmov %vm8899_vm0 }
 0x717   : > { %v5264_v5 = vadd.f32 %v5263_v26, %v5262_v27  ;;  %v5267_v28 = vsel %vm8899_vm0, %v5253_v16, 0.0  ;;  %v5245_v2 = vsel %vm8860_vm7, %v8439_v36, 0.0  ;;  %v5256_v23 = vmul.f32 %v5244_v10, %v5244_v10  ;;  %vm8901_vm15 = vmmov %vm8899_vm0 }
 0x718   : > { %v5269_v30 = vsel %vm8900_vm3, %v5254_v52, 0.0  ;;  %v5246_v44 = vsel %vm8863_vm5, %v8441_v1, 0.0  ;;  %v5257_v48 = vmul.f32 %v5245_v2, %v5245_v2  ;;  %v5271_v34 = vsel %vm8901_vm15, %v5255_v42, 0.0  ;;  %vm8902_vm6 = vmmov %vm8899_vm0 }
 0x719   : > { %v5266_v15 = vadd.f32 %v5265_v11, %v5264_v5  ;;  %v5247_v41 = vsel %vm8892_vm8, %v8443_v9, 0.0  ;;  %v5258_v3 = vmul.f32 %v5246_v44, %v5246_v44  ;;  %v5273_v45 = vsel %vm8902_vm6, %v5256_v23, 0.0  ;;  %vm8903_vm11 = vmmov %vm8899_vm0 }
 0x71a   : > { %v5248_v57 = vsel %vm8865_vm4, %v8445_v17, 0.0  ;;  %v5259_v50 = vmul.f32 %v5247_v41, %v5247_v41  ;;  %v5275_v21 = vsel %vm8903_vm11, %v5257_v48, 0.0  ;;  %v5249_v61 = vsel %vm8893_vm13, %v8447_v53, 0.0  ;;  %vm8904_vm7 = vmmov %vm8899_vm0 }
 0x71b   : > { %v5268_v59 = vadd.f32 %v5267_v28, %v5266_v15  ;;  %v5260_v22 = vmul.f32 %v5248_v57, %v5248_v57  ;;  %v5277_v33 = vsel %vm8904_vm7, %v5258_v3, 0.0  ;;  %v5261_v60 = vmul.f32 %v5249_v61, %v5249_v61  ;;  %vm8905_vm5 = vmmov %vm8899_vm0 }
 0x71c   : > { %v5279_v12 = vsel %vm8905_vm5, %v5259_v50, 0.0  ;;  %vm8906_vm8 = vmmov %vm8899_vm0 }
 0x71d   : > { %v5270_v37 = vadd.f32 %v5269_v30, %v5268_v59  ;;  %v5281_v25 = vsel %vm8906_vm8, %v5260_v22, 0.0  ;;  %vm8907_vm4 = vmmov %vm8899_vm0 }
 0x71e   : > { %v5283_v4 = vsel %vm8907_vm4, %v5261_v60, 0.0  ;;  %vm8908_vm1 = vmmov %vm8899_vm0 }
 0x71f   : > { %v5272_v13 = vadd.f32 %v5271_v34, %v5270_v37  ;;  %vm8909_vm13 = vmmov %vm8899_vm0 }
 0x720   : > { %vm8910_vm14 = vmmov %vm8899_vm0 }
 0x721   : > { %v5274_v51 = vadd.f32 %v5273_v45, %v5272_v13  ;;  %vm8911_vm12 = vmmov %vm8899_vm0 }
 0x722   : > { %vm8912_vm2 = vmmov %vm8899_vm0 }
 0x723   : > { %v5276_v40 = vadd.f32 %v5275_v21, %v5274_v51  ;;  %vm8913_vm10 = vmmov %vm8899_vm0 }
 0x724   : > { %vm8914_vm9 = vmmov %vm8899_vm0 }
 0x725   : > { %v5278_v35 = vadd.f32 %v5277_v33, %v5276_v40  ;;  %vm8915_vm3 = vmmov %vm8899_vm0 }
 0x726   : > { %vm8916_vm15 = vmmov %vm8899_vm0 }
 0x727   : > { %v5280_v43 = vadd.f32 %v5279_v12, %v5278_v35  ;;  %vm8917_vm6 = vmmov %vm8899_vm0 }
 0x728   : > { %vm8918_vm11 = vmmov %vm8899_vm0 }
 0x729   : > { %v5282_v29 = vadd.f32 %v5281_v25, %v5280_v43 }
 0x72b   : > { %v5284_v63 = vadd.f32 %v5283_v4, %v5282_v29 }
 0x72d   : > { %v5285_v62 = vrot.slane %v5284_v63, 4 }
 0x72f   : > { %v5286_v49 = vadd.f32 %v5285_v62, %v5284_v63 }
 0x731   : > { %v5287_v24 = vrot.slane %v5286_v49, 2 }
 0x733   : > { %v5288_v8 = vadd.f32 %v5287_v24, %v5286_v49 }
 0x735   : > { %v5289_v39 = vrot.slane %v5288_v8, 1 }
 0x737   : > { %v5290_v56 = vadd.f32 %v5289_v39, %v5288_v8 }
 0x739   : > { %v5291_v19 = vmul.f32 0.015625, %v5290_v56 }
 0x73b   : > { %v5292_v14 = vadd.f32 1e-05, %v5291_v19 }
 0x73d   : > { %6649 = vrsqrt.f32 %v5292_v14 }
 0x747   : > { %v6650_v20 = vpop.eup %6649 }
 0x748   : > { %v5294_v58 = vmul.f32 %v6650_v20, %v8422_v6  ;;  %v5295_v18 = vmul.f32 %v6650_v20, %v8425_v38  ;;  %v5296_v55 = vmul.f32 %v6650_v20, %v8428_v31  ;;  %v5297_v54 = vmul.f32 %v6650_v20, %v8431_v0 }
 0x749   : > { %v5298_v16 = vmul.f32 %v6650_v20, %v8433_v46  ;;  %v5299_v27 = vmul.f32 %v6650_v20, %v8435_v7  ;;  %v5300_v26 = vmul.f32 %v6650_v20, %v8437_v32  ;;  %v5301_v47 = vmul.f32 %v6650_v20, %v8439_v36 }
 0x74a   : > { %v5302_v5 = vmul.f32 %v6650_v20, %v8441_v1  ;;  %v5303_v52 = vmul.f32 %v6650_v20, %v8443_v9  ;;  %v5304_v6 = vmul.f32 %v6650_v20, %v8445_v17  ;;  %v5305_v38 = vmul.f32 %v6650_v20, %v8447_v53  ;;  %5306 = vst.msk [vmem:[%s271_s12] sm:$0xff] %vm8908_vm1, %v5294_v58 }
 0x74b   : > { %5307 = vst.msk [vmem:[%s271_s12 + $0x8] sm:$0xff] %vm8909_vm13, %v5295_v18 }
 0x74c   : > { %5308 = vst.msk [vmem:[%s271_s12 + $0x10] sm:$0xff] %vm8910_vm14, %v5296_v55 }
 0x74d   : > { %5309 = vst.msk [vmem:[%s271_s12 + $0x18] sm:$0xff] %vm8911_vm12, %v5297_v54 }
 0x74e   : > { %5310 = vst.msk [vmem:[%s271_s12 + $0x20] sm:$0xff] %vm8912_vm2, %v5298_v16 }
 0x74f   : > { %5311 = vst.msk [vmem:[%s271_s12 + $0x28] sm:$0xff] %vm8913_vm10, %v5299_v27 }
 0x750   : > { %5312 = vst.msk [vmem:[%s271_s12 + $0x30] sm:$0xff] %vm8914_vm9, %v5300_v26 }
 0x751   : > { %5313 = vst.msk [vmem:[%s271_s12 + $0x38] sm:$0xff] %vm8899_vm0, %v5301_v47 }
 0x752   : > { %5314 = vst.msk [vmem:[%s271_s12 + $0x40] sm:$0xff] %vm8915_vm3, %v5302_v5 }
 0x753   : > { %5315 = vst.msk [vmem:[%s271_s12 + $0x48] sm:$0xff] %vm8916_vm15, %v5303_v52 }
 0x754   : > { %5316 = vst.msk [vmem:[%s271_s12 + $0x50] sm:$0xff] %vm8917_vm6, %v5304_v6 }
 0x755   : > { %5317 = vst.msk [vmem:[%s271_s12 + $0x58] sm:$0xff] %vm8918_vm11, %v5305_v38 }
 0x756 PF: > { %s16_s21 = sadd.s32 1, %s6659_s21  }
 0x757   : > { %p13_p4 = scmp.ge.s32.totalorder %s16_s21, 6  }
 0x759   :  { %15 = sbr.rel (!%p13_p4) target bundleno = 1 (0x1), region = 103 }

</bundles_post_ra>
